<compile_context>
chip_gen: v7x
topology: tpu7x:2x2x1
jax: 0.10.0
libtpu: 0.0.40
codegen_flags: <defaults>
</compile_context>

<pallas_src>
import functools

import jax
import jax.numpy as jnp
from jax.experimental import pallas as pl
from jax.experimental.pallas import tpu as pltpu


def _round_up(x, m):
    return ((x + m - 1) // m) * m


# ---------------------------------------------------------------------------
# Kernels
# ---------------------------------------------------------------------------
def _gated_conv_kernel(p_ref, w_ref, b_ref, o_ref, *, cout):
    """Fused GatedConv2d tile: acc = P @ [Wh|Wg] + [bh|bg]; out = h * sigmoid(g)."""
    acc = jnp.dot(p_ref[...], w_ref[...], preferred_element_type=jnp.float32)
    acc = acc + b_ref[...]                 # f32 bias add on the f32 accumulator
    h = acc[:, :cout]
    g = acc[:, cout:]
    o_ref[...] = h * jax.nn.sigmoid(g)     # sigmoid on EUP, multiply on VPU (f32)


def _heads_kernel(h_ref, w_ref, b_ref, o_ref, *, nz):
    """Fused heads tile: acc = H @ [Wm|Wv] + [bm|bv]; clip (Hardtanh) the logvar half."""
    acc = jnp.dot(h_ref[...], w_ref[...], preferred_element_type=jnp.float32)
    acc = acc + b_ref[...]
    mean = acc[:, :nz]
    logvar = jnp.clip(acc[:, nz:], -6.0, 2.0)     # nn.Hardtanh(min=-6.0, max=2.0)
    o_ref[...] = jnp.concatenate([mean, logvar], axis=-1)


# ---------------------------------------------------------------------------
# Glue: im2col patch extraction (pure layout plumbing, stays in JAX/XLA)
# ---------------------------------------------------------------------------
def _im2col(x_nhwc, k, stride, pad):
    n, h, w, c = x_nhwc.shape
    xp = jnp.pad(x_nhwc, ((0, 0), (pad, pad), (pad, pad), (0, 0)))
    hout = (h + 2 * pad - k) // stride + 1
    wout = (w + 2 * pad - k) // stride + 1
    cols = []
    for dy in range(k):
        for dx in range(k):
            cols.append(xp[:, dy:dy + stride * hout:stride,
                           dx:dx + stride * wout:stride, :])
    patches = jnp.stack(cols, axis=3)            # (N, Hout, Wout, k*k, Cin)
    return patches.reshape(n * hout * wout, k * k * c), hout, wout


# ---------------------------------------------------------------------------
# Layers
# ---------------------------------------------------------------------------
_VMEM_LIMIT = 32 * 1024 * 1024   # comfortable on v5e/v6e/v7x; tiles use only a few MiB
_TILE_M = 512                    # rows per grid step; sized against v7x 64 MiB VMEM


def gated_conv2d(x_nhwc, wh, bh, wg, bg, k, stride, pad, *, tile_m=_TILE_M):
    """One GatedConv2d layer.  Weights are PyTorch OIHW (Cout, Cin, kh, kw)."""
    n, _, _, cin = x_nhwc.shape
    cout = wh.shape[0]
    kdim = k * k * cin

    patches, hout, wout = _im2col(x_nhwc, k, stride, pad)          # (M, K) f32
    m = patches.shape[0]

    # OIHW -> (kh, kw, Cin, Cout) -> (K, Cout); fuse h|g along the output axis.
    whm = jnp.transpose(wh, (2, 3, 1, 0)).reshape(kdim, cout)
    wgm = jnp.transpose(wg, (2, 3, 1, 0)).reshape(kdim, cout)
    w_fused = jnp.concatenate([whm, wgm], axis=1)                  # (K, 2*Cout)
    b_fused = jnp.concatenate([bh, bg]).reshape(1, 2 * cout)       # f32

    # Pad contraction dim to a multiple of 8 sublanes (only layer 1: 49 -> 56).
    kpad = _round_up(kdim, 8)
    if kpad != kdim:
        patches = jnp.pad(patches, ((0, 0), (0, kpad - kdim)))
        w_fused = jnp.pad(w_fused, ((0, kpad - kdim), (0, 0)))

    # Pad rows to a multiple of the tile so the grid divides evenly.
    tile_m = min(tile_m, _round_up(m, 8))
    m_pad = _round_up(m, tile_m)
    if m_pad != m:
        patches = jnp.pad(patches, ((0, m_pad - m), (0, 0)))

    out = pl.pallas_call(
        functools.partial(_gated_conv_kernel, cout=cout),
        out_shape=jax.ShapeDtypeStruct((m_pad, cout), jnp.float32),
        grid=(m_pad // tile_m,),
        in_specs=[pl.BlockSpec((tile_m, kpad), lambda i: (i, 0)),
                  pl.BlockSpec((kpad, 2 * cout), lambda i: (0, 0)),
                  pl.BlockSpec((1, 2 * cout), lambda i: (0, 0))],
        out_specs=pl.BlockSpec((tile_m, cout), lambda i: (i, 0)),
        compiler_params=pltpu.CompilerParams(
            dimension_semantics=("parallel",),
            vmem_limit_bytes=_VMEM_LIMIT),
    )(patches.astype(jnp.bfloat16), w_fused.astype(jnp.bfloat16), b_fused)

    return out[:m].reshape(n, hout, wout, cout)


def _heads(feat_nhwc_flat, w_fused, b_fused, nz, *, tile_n=256):
    """Fused p_z_mean / p_z_logvar heads on the NHWC-flattened features."""
    n, hdim = feat_nhwc_flat.shape
    tile_n = min(tile_n, _round_up(n, 8))
    n_pad = _round_up(n, tile_n)
    feat = feat_nhwc_flat
    if n_pad != n:
        feat = jnp.pad(feat, ((0, n_pad - n), (0, 0)))

    out = pl.pallas_call(
        functools.partial(_heads_kernel, nz=nz),
        out_shape=jax.ShapeDtypeStruct((n_pad, 2 * nz), jnp.float32),
        grid=(n_pad // tile_n,),
        in_specs=[pl.BlockSpec((tile_n, hdim), lambda i: (i, 0)),
                  pl.BlockSpec((hdim, 2 * nz), lambda i: (0, 0)),
                  pl.BlockSpec((1, 2 * nz), lambda i: (0, 0))],
        out_specs=pl.BlockSpec((tile_n, 2 * nz), lambda i: (i, 0)),
        compiler_params=pltpu.CompilerParams(
            dimension_semantics=("parallel",),
            vmem_limit_bytes=_VMEM_LIMIT),
    )(feat.astype(jnp.bfloat16), w_fused.astype(jnp.bfloat16), b_fused)

    return out[:n, :nz], out[:n, nz:]


# ---------------------------------------------------------------------------
# Encoder_z_prior configuration (MNIST-like: input_size=(1,28,28), h_size=294)
# ---------------------------------------------------------------------------
CONV_CFG = [
    # (cin, cout, kernel, stride, pad) — matches nn.Sequential in the module
    (1, 32, 7, 1, 3),
    (32, 32, 3, 2, 1),
    (32, 64, 5, 1, 2),
    (64, 64, 3, 2, 1),
    (64, 6, 3, 1, 1),
]
INPUT_SIZE = (1, 28, 28)
FINAL_C, FINAL_H, FINAL_W = 6, 7, 7
H_SIZE = FINAL_C * FINAL_H * FINAL_W   # 294
N_Z = 8                                # args.z_size


def init_params(key):
    params = {"convs": []}
    for (cin, cout, k, _, _) in CONV_CFG:
        key, kh, kg, kbh, kbg = jax.random.split(key, 5)
        std = (2.0 / (cin * k * k)) ** 0.5
        params["convs"].append(dict(
            wh=std * jax.random.normal(kh, (cout, cin, k, k), jnp.float32),
            bh=0.01 * jax.random.normal(kbh, (cout,), jnp.float32),
            wg=std * jax.random.normal(kg, (cout, cin, k, k), jnp.float32),
            bg=0.01 * jax.random.normal(kbg, (cout,), jnp.float32),
        ))
    key, km, kv = jax.random.split(key, 3)
    std = (2.0 / H_SIZE) ** 0.5  # he_init on nn.Linear
    params["wm"] = std * jax.random.normal(km, (N_Z, H_SIZE), jnp.float32)  # PyTorch (out, in)
    params["bm"] = jnp.zeros((N_Z,), jnp.float32)
    params["wv"] = std * jax.random.normal(kv, (N_Z, H_SIZE), jnp.float32)
    params["bv"] = jnp.zeros((N_Z,), jnp.float32)
    return params


def _reorder_head_weight(w_pt):
    """PyTorch head weight (N_Z, 294) with feature index c*49 + h*7 + w  ->
    (294, N_Z) matrix whose rows follow the NHWC flatten index (h*7+w)*6 + c."""
    wt = w_pt.T                                              # (294, N_Z), rows c*49+hw
    return wt.reshape(FINAL_C, FINAL_H * FINAL_W, N_Z) \
             .transpose(1, 0, 2).reshape(H_SIZE, N_Z)        # rows hw*6+c


def encoder_z_prior(params, x):
    # x: (N, C, H, W) — x.view(-1, *input_size) is a no-op at these shapes
    n = x.shape[0]
    h = jnp.transpose(x, (0, 2, 3, 1))                       # NCHW -> NHWC
    for (_, _, k, stride, pad), p in zip(CONV_CFG, params["convs"]):
        h = gated_conv2d(h, p["wh"], p["bh"], p["wg"], p["bg"], k, stride, pad)

    # PyTorch h.view(N, -1) flattens NCHW; instead of transposing the activations we
    # flatten NHWC directly and apply a one-time row permutation to the head weights.
    feat = h.reshape(n, H_SIZE)                              # (N, 294) NHWC order
    w_heads = jnp.concatenate([_reorder_head_weight(params["wm"]),
                               _reorder_head_weight(params["wv"])], axis=1)  # (294, 16)
    b_heads = jnp.concatenate([params["bm"], params["bv"]]).reshape(1, 2 * N_Z)

    mean, logvar = _heads(feat, w_heads, b_heads, N_Z)
    return mean, logvar


if __name__ == "__main__":
    key = jax.random.PRNGKey(0)
    kp, kx = jax.random.split(key)
    params = init_params(kp)
    x = jax.random.uniform(kx, (2,) + INPUT_SIZE, jnp.float32)   # batch=2, 1x28x28

    fwd = jax.jit(functools.partial(encoder_z_prior, params))
    mean, logvar = fwd(x)
    jax.block_until_ready((mean, logvar))

    assert mean.shape == (2, N_Z) and logvar.shape == (2, N_Z)
    assert bool(jnp.all(jnp.isfinite(mean))) and bool(jnp.all(jnp.isfinite(logvar)))
    assert bool(jnp.all(logvar >= -6.0)) and bool(jnp.all(logvar <= 2.0))
    print("KERNEL_OK")
</pallas_src>

<mosaic_0001>
module attributes {stable_mosaic.version = 11 : i64} {
  func.func @_gated_conv_kernel(%arg0: i32, %arg1: memref<512x56xbf16, #tpu.memory_space<vmem>>, %arg2: memref<56x64xbf16, #tpu.memory_space<vmem>>, %arg3: memref<1x64xf32, #tpu.memory_space<vmem>>, %arg4: memref<512x32xf32, #tpu.memory_space<vmem>>) attributes {dimension_semantics = [#tpu.dimension_semantics<parallel>], iteration_bounds = array<i64: 4>, scalar_prefetch = 0 : i64, scratch_operands = 0 : i64, tpu.core_type = #tpu.core_type<tc>, window_params = [{transform_indices = @transform_0, window_bounds = array<i64: 512, 56>}, {pipeline_mode = #tpu.pipeline_mode<synchronous>, transform_indices = @transform_1, window_bounds = array<i64: 56, 64>}, {pipeline_mode = #tpu.pipeline_mode<synchronous>, transform_indices = @transform_2, window_bounds = array<i64: 1, 64>}, {transform_indices = @transform_3, window_bounds = array<i64: 512, 32>}]} {
    %c0 = arith.constant 0 : index
    %c0_0 = arith.constant 0 : index
    %0 = vector.load %arg1[%c0, %c0_0] : memref<512x56xbf16, #tpu.memory_space<vmem>>, vector<512x56xbf16>
    %c0_1 = arith.constant 0 : index
    %c0_2 = arith.constant 0 : index
    %1 = vector.load %arg2[%c0_1, %c0_2] : memref<56x64xbf16, #tpu.memory_space<vmem>>, vector<56x64xbf16>
    %cst = arith.constant dense<0.000000e+00> : vector<512x64xf32>
    %2 = tpu.matmul %0, %1, %cst {dimension_numbers = #tpu.dot_dimension_numbers<[1], [0], [0], [1], [0, 0, 1, 1], [], []>} : vector<512x56xbf16>, vector<56x64xbf16>, vector<512x64xf32> -> vector<512x64xf32>
    %c0_3 = arith.constant 0 : index
    %c0_4 = arith.constant 0 : index
    %3 = vector.load %arg3[%c0_3, %c0_4] : memref<1x64xf32, #tpu.memory_space<vmem>>, vector<1x64xf32>
    %4 = vector.broadcast %3 : vector<1x64xf32> to vector<512x64xf32>
    %5 = arith.addf %2, %4 : vector<512x64xf32>
    %6 = vector.extract_strided_slice %5 {offsets = [0, 0], sizes = [512, 32], strides = [1, 1]} : vector<512x64xf32> to vector<512x32xf32>
    %7 = vector.extract_strided_slice %5 {offsets = [0, 32], sizes = [512, 32], strides = [1, 1]} : vector<512x64xf32> to vector<512x32xf32>
    %8 = arith.negf %7 : vector<512x32xf32>
    %9 = math.exp %8 : vector<512x32xf32>
    %cst_5 = arith.constant 1.000000e+00 : f32
    %10 = vector.broadcast %cst_5 : f32 to vector<512x32xf32>
    %11 = arith.addf %10, %9 : vector<512x32xf32>
    %12 = arith.divf %10, %11 : vector<512x32xf32>
    %13 = arith.mulf %6, %12 : vector<512x32xf32>
    %c0_6 = arith.constant 0 : index
    %c0_7 = arith.constant 0 : index
    %14 = vector.load %arg4[%c0_6, %c0_7] : memref<512x32xf32, #tpu.memory_space<vmem>>, vector<512x32xf32>
    tpu.vector_store %arg4[%c0_6, %c0_7], %13 {strides = array<i32>} : memref<512x32xf32, #tpu.memory_space<vmem>>, vector<512x32xf32>,
    return
  }
  func.func @transform_0(%arg0: i32) -> (i32, i32) {
    %c0_i32 = arith.constant 0 : i32
    %c0_i32_0 = arith.constant 0 : i32
    return %arg0, %c0_i32 : i32, i32
  }
  func.func @transform_1(%arg0: i32) -> (i32, i32) {
    %c0_i32 = arith.constant 0 : i32
    %c0_i32_0 = arith.constant 0 : i32
    %c0_i32_1 = arith.constant 0 : i32
    return %c0_i32, %c0_i32_0 : i32, i32
  }
  func.func @transform_2(%arg0: i32) -> (i32, i32) {
    %c0_i32 = arith.constant 0 : i32
    %c0_i32_0 = arith.constant 0 : i32
    %c0_i32_1 = arith.constant 0 : i32
    return %c0_i32, %c0_i32_0 : i32, i32
  }
  func.func @transform_3(%arg0: i32) -> (i32, i32) {
    %c0_i32 = arith.constant 0 : i32
    %c0_i32_0 = arith.constant 0 : i32
    return %arg0, %c0_i32 : i32, i32
  }
}

module attributes {stable_mosaic.version = 11 : i64} {
  func.func @_gated_conv_kernel(%arg0: i32, %arg1: memref<392x288xbf16, #tpu.memory_space<vmem>>, %arg2: memref<288x64xbf16, #tpu.memory_space<vmem>>, %arg3: memref<1x64xf32, #tpu.memory_space<vmem>>, %arg4: memref<392x32xf32, #tpu.memory_space<vmem>>) attributes {dimension_semantics = [#tpu.dimension_semantics<parallel>], iteration_bounds = array<i64: 1>, scalar_prefetch = 0 : i64, scratch_operands = 0 : i64, tpu.core_type = #tpu.core_type<tc>, window_params = [{transform_indices = @transform_0, window_bounds = array<i64: 392, 288>}, {pipeline_mode = #tpu.pipeline_mode<synchronous>, transform_indices = @transform_1, window_bounds = array<i64: 288, 64>}, {pipeline_mode = #tpu.pipeline_mode<synchronous>, transform_indices = @transform_2, window_bounds = array<i64: 1, 64>}, {transform_indices = @transform_3, window_bounds = array<i64: 392, 32>}]} {
    %c0 = arith.constant 0 : index
    %c0_0 = arith.constant 0 : index
    %0 = vector.load %arg1[%c0, %c0_0] : memref<392x288xbf16, #tpu.memory_space<vmem>>, vector<392x288xbf16>
    %c0_1 = arith.constant 0 : index
    %c0_2 = arith.constant 0 : index
    %1 = vector.load %arg2[%c0_1, %c0_2] : memref<288x64xbf16, #tpu.memory_space<vmem>>, vector<288x64xbf16>
    %cst = arith.constant dense<0.000000e+00> : vector<392x64xf32>
    %2 = tpu.matmul %0, %1, %cst {dimension_numbers = #tpu.dot_dimension_numbers<[1], [0], [0], [1], [0, 0, 1, 1], [], []>} : vector<392x288xbf16>, vector<288x64xbf16>, vector<392x64xf32> -> vector<392x64xf32>
    %c0_3 = arith.constant 0 : index
    %c0_4 = arith.constant 0 : index
    %3 = vector.load %arg3[%c0_3, %c0_4] : memref<1x64xf32, #tpu.memory_space<vmem>>, vector<1x64xf32>
    %4 = vector.broadcast %3 : vector<1x64xf32> to vector<392x64xf32>
    %5 = arith.addf %2, %4 : vector<392x64xf32>
    %6 = vector.extract_strided_slice %5 {offsets = [0, 0], sizes = [392, 32], strides = [1, 1]} : vector<392x64xf32> to vector<392x32xf32>
    %7 = vector.extract_strided_slice %5 {offsets = [0, 32], sizes = [392, 32], strides = [1, 1]} : vector<392x64xf32> to vector<392x32xf32>
    %8 = arith.negf %7 : vector<392x32xf32>
    %9 = math.exp %8 : vector<392x32xf32>
    %cst_5 = arith.constant 1.000000e+00 : f32
    %10 = vector.broadcast %cst_5 : f32 to vector<392x32xf32>
    %11 = arith.addf %10, %9 : vector<392x32xf32>
    %12 = arith.divf %10, %11 : vector<392x32xf32>
    %13 = arith.mulf %6, %12 : vector<392x32xf32>
    %c0_6 = arith.constant 0 : index
    %c0_7 = arith.constant 0 : index
    %14 = vector.load %arg4[%c0_6, %c0_7] : memref<392x32xf32, #tpu.memory_space<vmem>>, vector<392x32xf32>
    tpu.vector_store %arg4[%c0_6, %c0_7], %13 {strides = array<i32>} : memref<392x32xf32, #tpu.memory_space<vmem>>, vector<392x32xf32>,
    return
  }
  func.func @transform_0(%arg0: i32) -> (i32, i32) {
    %c0_i32 = arith.constant 0 : i32
    %c0_i32_0 = arith.constant 0 : i32
    return %arg0, %c0_i32 : i32, i32
  }
  func.func @transform_1(%arg0: i32) -> (i32, i32) {
    %c0_i32 = arith.constant 0 : i32
    %c0_i32_0 = arith.constant 0 : i32
    %c0_i32_1 = arith.constant 0 : i32
    return %c0_i32, %c0_i32_0 : i32, i32
  }
  func.func @transform_2(%arg0: i32) -> (i32, i32) {
    %c0_i32 = arith.constant 0 : i32
    %c0_i32_0 = arith.constant 0 : i32
    %c0_i32_1 = arith.constant 0 : i32
    return %c0_i32, %c0_i32_0 : i32, i32
  }
  func.func @transform_3(%arg0: i32) -> (i32, i32) {
    %c0_i32 = arith.constant 0 : i32
    %c0_i32_0 = arith.constant 0 : i32
    return %arg0, %c0_i32 : i32, i32
  }
}

module attributes {stable_mosaic.version = 11 : i64} {
  func.func @_gated_conv_kernel(%arg0: i32, %arg1: memref<392x800xbf16, #tpu.memory_space<vmem>>, %arg2: memref<800x128xbf16, #tpu.memory_space<vmem>>, %arg3: memref<1x128xf32, #tpu.memory_space<vmem>>, %arg4: memref<392x64xf32, #tpu.memory_space<vmem>>) attributes {dimension_semantics = [#tpu.dimension_semantics<parallel>], iteration_bounds = array<i64: 1>, scalar_prefetch = 0 : i64, scratch_operands = 0 : i64, tpu.core_type = #tpu.core_type<tc>, window_params = [{transform_indices = @transform_0, window_bounds = array<i64: 392, 800>}, {pipeline_mode = #tpu.pipeline_mode<synchronous>, transform_indices = @transform_1, window_bounds = array<i64: 800, 128>}, {pipeline_mode = #tpu.pipeline_mode<synchronous>, transform_indices = @transform_2, window_bounds = array<i64: 1, 128>}, {transform_indices = @transform_3, window_bounds = array<i64: 392, 64>}]} {
    %c0 = arith.constant 0 : index
    %c0_0 = arith.constant 0 : index
    %0 = vector.load %arg1[%c0, %c0_0] : memref<392x800xbf16, #tpu.memory_space<vmem>>, vector<392x800xbf16>
    %c0_1 = arith.constant 0 : index
    %c0_2 = arith.constant 0 : index
    %1 = vector.load %arg2[%c0_1, %c0_2] : memref<800x128xbf16, #tpu.memory_space<vmem>>, vector<800x128xbf16>
    %cst = arith.constant dense<0.000000e+00> : vector<392x128xf32>
    %2 = tpu.matmul %0, %1, %cst {dimension_numbers = #tpu.dot_dimension_numbers<[1], [0], [0], [1], [0, 0, 1, 1], [], []>} : vector<392x800xbf16>, vector<800x128xbf16>, vector<392x128xf32> -> vector<392x128xf32>
    %c0_3 = arith.constant 0 : index
    %c0_4 = arith.constant 0 : index
    %3 = vector.load %arg3[%c0_3, %c0_4] : memref<1x128xf32, #tpu.memory_space<vmem>>, vector<1x128xf32>
    %4 = vector.broadcast %3 : vector<1x128xf32> to vector<392x128xf32>
    %5 = arith.addf %2, %4 : vector<392x128xf32>
    %6 = vector.extract_strided_slice %5 {offsets = [0, 0], sizes = [392, 64], strides = [1, 1]} : vector<392x128xf32> to vector<392x64xf32>
    %7 = vector.extract_strided_slice %5 {offsets = [0, 64], sizes = [392, 64], strides = [1, 1]} : vector<392x128xf32> to vector<392x64xf32>
    %8 = arith.negf %7 : vector<392x64xf32>
    %9 = math.exp %8 : vector<392x64xf32>
    %cst_5 = arith.constant 1.000000e+00 : f32
    %10 = vector.broadcast %cst_5 : f32 to vector<392x64xf32>
    %11 = arith.addf %10, %9 : vector<392x64xf32>
    %12 = arith.divf %10, %11 : vector<392x64xf32>
    %13 = arith.mulf %6, %12 : vector<392x64xf32>
    %c0_6 = arith.constant 0 : index
    %c0_7 = arith.constant 0 : index
    %14 = vector.load %arg4[%c0_6, %c0_7] : memref<392x64xf32, #tpu.memory_space<vmem>>, vector<392x64xf32>
    tpu.vector_store %arg4[%c0_6, %c0_7], %13 {strides = array<i32>} : memref<392x64xf32, #tpu.memory_space<vmem>>, vector<392x64xf32>,
    return
  }
  func.func @transform_0(%arg0: i32) -> (i32, i32) {
    %c0_i32 = arith.constant 0 : i32
    %c0_i32_0 = arith.constant 0 : i32
    return %arg0, %c0_i32 : i32, i32
  }
  func.func @transform_1(%arg0: i32) -> (i32, i32) {
    %c0_i32 = arith.constant 0 : i32
    %c0_i32_0 = arith.constant 0 : i32
    %c0_i32_1 = arith.constant 0 : i32
    return %c0_i32, %c0_i32_0 : i32, i32
  }
  func.func @transform_2(%arg0: i32) -> (i32, i32) {
    %c0_i32 = arith.constant 0 : i32
    %c0_i32_0 = arith.constant 0 : i32
    %c0_i32_1 = arith.constant 0 : i32
    return %c0_i32, %c0_i32_0 : i32, i32
  }
  func.func @transform_3(%arg0: i32) -> (i32, i32) {
    %c0_i32 = arith.constant 0 : i32
    %c0_i32_0 = arith.constant 0 : i32
    return %arg0, %c0_i32 : i32, i32
  }
}

module attributes {stable_mosaic.version = 11 : i64} {
  func.func @_gated_conv_kernel(%arg0: i32, %arg1: memref<104x576xbf16, #tpu.memory_space<vmem>>, %arg2: memref<576x128xbf16, #tpu.memory_space<vmem>>, %arg3: memref<1x128xf32, #tpu.memory_space<vmem>>, %arg4: memref<104x64xf32, #tpu.memory_space<vmem>>) attributes {dimension_semantics = [#tpu.dimension_semantics<parallel>], iteration_bounds = array<i64: 1>, scalar_prefetch = 0 : i64, scratch_operands = 0 : i64, tpu.core_type = #tpu.core_type<tc>, window_params = [{transform_indices = @transform_0, window_bounds = array<i64: 104, 576>}, {pipeline_mode = #tpu.pipeline_mode<synchronous>, transform_indices = @transform_1, window_bounds = array<i64: 576, 128>}, {pipeline_mode = #tpu.pipeline_mode<synchronous>, transform_indices = @transform_2, window_bounds = array<i64: 1, 128>}, {transform_indices = @transform_3, window_bounds = array<i64: 104, 64>}]} {
    %c0 = arith.constant 0 : index
    %c0_0 = arith.constant 0 : index
    %0 = vector.load %arg1[%c0, %c0_0] : memref<104x576xbf16, #tpu.memory_space<vmem>>, vector<104x576xbf16>
    %c0_1 = arith.constant 0 : index
    %c0_2 = arith.constant 0 : index
    %1 = vector.load %arg2[%c0_1, %c0_2] : memref<576x128xbf16, #tpu.memory_space<vmem>>, vector<576x128xbf16>
    %cst = arith.constant dense<0.000000e+00> : vector<104x128xf32>
    %2 = tpu.matmul %0, %1, %cst {dimension_numbers = #tpu.dot_dimension_numbers<[1], [0], [0], [1], [0, 0, 1, 1], [], []>} : vector<104x576xbf16>, vector<576x128xbf16>, vector<104x128xf32> -> vector<104x128xf32>
    %c0_3 = arith.constant 0 : index
    %c0_4 = arith.constant 0 : index
    %3 = vector.load %arg3[%c0_3, %c0_4] : memref<1x128xf32, #tpu.memory_space<vmem>>, vector<1x128xf32>
    %4 = vector.broadcast %3 : vector<1x128xf32> to vector<104x128xf32>
    %5 = arith.addf %2, %4 : vector<104x128xf32>
    %6 = vector.extract_strided_slice %5 {offsets = [0, 0], sizes = [104, 64], strides = [1, 1]} : vector<104x128xf32> to vector<104x64xf32>
    %7 = vector.extract_strided_slice %5 {offsets = [0, 64], sizes = [104, 64], strides = [1, 1]} : vector<104x128xf32> to vector<104x64xf32>
    %8 = arith.negf %7 : vector<104x64xf32>
    %9 = math.exp %8 : vector<104x64xf32>
    %cst_5 = arith.constant 1.000000e+00 : f32
    %10 = vector.broadcast %cst_5 : f32 to vector<104x64xf32>
    %11 = arith.addf %10, %9 : vector<104x64xf32>
    %12 = arith.divf %10, %11 : vector<104x64xf32>
    %13 = arith.mulf %6, %12 : vector<104x64xf32>
    %c0_6 = arith.constant 0 : index
    %c0_7 = arith.constant 0 : index
    %14 = vector.load %arg4[%c0_6, %c0_7] : memref<104x64xf32, #tpu.memory_space<vmem>>, vector<104x64xf32>
    tpu.vector_store %arg4[%c0_6, %c0_7], %13 {strides = array<i32>} : memref<104x64xf32, #tpu.memory_space<vmem>>, vector<104x64xf32>,
    return
  }
  func.func @transform_0(%arg0: i32) -> (i32, i32) {
    %c0_i32 = arith.constant 0 : i32
    %c0_i32_0 = arith.constant 0 : i32
    return %arg0, %c0_i32 : i32, i32
  }
  func.func @transform_1(%arg0: i32) -> (i32, i32) {
    %c0_i32 = arith.constant 0 : i32
    %c0_i32_0 = arith.constant 0 : i32
    %c0_i32_1 = arith.constant 0 : i32
    return %c0_i32, %c0_i32_0 : i32, i32
  }
  func.func @transform_2(%arg0: i32) -> (i32, i32) {
    %c0_i32 = arith.constant 0 : i32
    %c0_i32_0 = arith.constant 0 : i32
    %c0_i32_1 = arith.constant 0 : i32
    return %c0_i32, %c0_i32_0 : i32, i32
  }
  func.func @transform_3(%arg0: i32) -> (i32, i32) {
    %c0_i32 = arith.constant 0 : i32
    %c0_i32_0 = arith.constant 0 : i32
    return %arg0, %c0_i32 : i32, i32
  }
}

module attributes {stable_mosaic.version = 11 : i64} {
  func.func @_gated_conv_kernel(%arg0: i32, %arg1: memref<104x576xbf16, #tpu.memory_space<vmem>>, %arg2: memref<576x12xbf16, #tpu.memory_space<vmem>>, %arg3: memref<1x12xf32, #tpu.memory_space<vmem>>, %arg4: memref<104x6xf32, #tpu.memory_space<vmem>>) attributes {dimension_semantics = [#tpu.dimension_semantics<parallel>], iteration_bounds = array<i64: 1>, scalar_prefetch = 0 : i64, scratch_operands = 0 : i64, tpu.core_type = #tpu.core_type<tc>, window_params = [{transform_indices = @transform_0, window_bounds = array<i64: 104, 576>}, {pipeline_mode = #tpu.pipeline_mode<synchronous>, transform_indices = @transform_1, window_bounds = array<i64: 576, 12>}, {pipeline_mode = #tpu.pipeline_mode<synchronous>, transform_indices = @transform_2, window_bounds = array<i64: 1, 12>}, {transform_indices = @transform_3, window_bounds = array<i64: 104, 6>}]} {
    %c0 = arith.constant 0 : index
    %c0_0 = arith.constant 0 : index
    %0 = vector.load %arg1[%c0, %c0_0] : memref<104x576xbf16, #tpu.memory_space<vmem>>, vector<104x576xbf16>
    %c0_1 = arith.constant 0 : index
    %c0_2 = arith.constant 0 : index
    %1 = vector.load %arg2[%c0_1, %c0_2] : memref<576x12xbf16, #tpu.memory_space<vmem>>, vector<576x12xbf16>
    %cst = arith.constant dense<0.000000e+00> : vector<104x12xf32>
    %2 = tpu.matmul %0, %1, %cst {dimension_numbers = #tpu.dot_dimension_numbers<[1], [0], [0], [1], [0, 0, 1, 1], [], []>} : vector<104x576xbf16>, vector<576x12xbf16>, vector<104x12xf32> -> vector<104x12xf32>
    %c0_3 = arith.constant 0 : index
    %c0_4 = arith.constant 0 : index
    %3 = vector.load %arg3[%c0_3, %c0_4] : memref<1x12xf32, #tpu.memory_space<vmem>>, vector<1x12xf32>
    %4 = vector.broadcast %3 : vector<1x12xf32> to vector<104x12xf32>
    %5 = arith.addf %2, %4 : vector<104x12xf32>
    %6 = vector.extract_strided_slice %5 {offsets = [0, 0], sizes = [104, 6], strides = [1, 1]} : vector<104x12xf32> to vector<104x6xf32>
    %7 = vector.extract_strided_slice %5 {offsets = [0, 6], sizes = [104, 6], strides = [1, 1]} : vector<104x12xf32> to vector<104x6xf32>
    %8 = arith.negf %7 : vector<104x6xf32>
    %9 = math.exp %8 : vector<104x6xf32>
    %cst_5 = arith.constant 1.000000e+00 : f32
    %10 = vector.broadcast %cst_5 : f32 to vector<104x6xf32>
    %11 = arith.addf %10, %9 : vector<104x6xf32>
    %12 = arith.divf %10, %11 : vector<104x6xf32>
    %13 = arith.mulf %6, %12 : vector<104x6xf32>
    %c0_6 = arith.constant 0 : index
    %c0_7 = arith.constant 0 : index
    %14 = vector.load %arg4[%c0_6, %c0_7] : memref<104x6xf32, #tpu.memory_space<vmem>>, vector<104x6xf32>
    tpu.vector_store %arg4[%c0_6, %c0_7], %13 {strides = array<i32>} : memref<104x6xf32, #tpu.memory_space<vmem>>, vector<104x6xf32>,
    return
  }
  func.func @transform_0(%arg0: i32) -> (i32, i32) {
    %c0_i32 = arith.constant 0 : i32
    %c0_i32_0 = arith.constant 0 : i32
    return %arg0, %c0_i32 : i32, i32
  }
  func.func @transform_1(%arg0: i32) -> (i32, i32) {
    %c0_i32 = arith.constant 0 : i32
    %c0_i32_0 = arith.constant 0 : i32
    %c0_i32_1 = arith.constant 0 : i32
    return %c0_i32, %c0_i32_0 : i32, i32
  }
  func.func @transform_2(%arg0: i32) -> (i32, i32) {
    %c0_i32 = arith.constant 0 : i32
    %c0_i32_0 = arith.constant 0 : i32
    %c0_i32_1 = arith.constant 0 : i32
    return %c0_i32, %c0_i32_0 : i32, i32
  }
  func.func @transform_3(%arg0: i32) -> (i32, i32) {
    %c0_i32 = arith.constant 0 : i32
    %c0_i32_0 = arith.constant 0 : i32
    return %arg0, %c0_i32 : i32, i32
  }
}

module attributes {stable_mosaic.version = 11 : i64} {
  func.func @_heads_kernel(%arg0: i32, %arg1: memref<8x294xbf16, #tpu.memory_space<vmem>>, %arg2: memref<294x16xbf16, #tpu.memory_space<vmem>>, %arg3: memref<1x16xf32, #tpu.memory_space<vmem>>, %arg4: memref<8x16xf32, #tpu.memory_space<vmem>>) attributes {dimension_semantics = [#tpu.dimension_semantics<parallel>], iteration_bounds = array<i64: 1>, scalar_prefetch = 0 : i64, scratch_operands = 0 : i64, tpu.core_type = #tpu.core_type<tc>, window_params = [{transform_indices = @transform_0, window_bounds = array<i64: 8, 294>}, {pipeline_mode = #tpu.pipeline_mode<synchronous>, transform_indices = @transform_1, window_bounds = array<i64: 294, 16>}, {pipeline_mode = #tpu.pipeline_mode<synchronous>, transform_indices = @transform_2, window_bounds = array<i64: 1, 16>}, {transform_indices = @transform_3, window_bounds = array<i64: 8, 16>}]} {
    %c0 = arith.constant 0 : index
    %c0_0 = arith.constant 0 : index
    %0 = vector.load %arg1[%c0, %c0_0] : memref<8x294xbf16, #tpu.memory_space<vmem>>, vector<8x294xbf16>
    %c0_1 = arith.constant 0 : index
    %c0_2 = arith.constant 0 : index
    %1 = vector.load %arg2[%c0_1, %c0_2] : memref<294x16xbf16, #tpu.memory_space<vmem>>, vector<294x16xbf16>
    %cst = arith.constant dense<0.000000e+00> : vector<8x16xf32>
    %2 = tpu.matmul %0, %1, %cst {dimension_numbers = #tpu.dot_dimension_numbers<[1], [0], [0], [1], [0, 0, 1, 1], [], []>} : vector<8x294xbf16>, vector<294x16xbf16>, vector<8x16xf32> -> vector<8x16xf32>
    %c0_3 = arith.constant 0 : index
    %c0_4 = arith.constant 0 : index
    %3 = vector.load %arg3[%c0_3, %c0_4] : memref<1x16xf32, #tpu.memory_space<vmem>>, vector<1x16xf32>
    %4 = vector.broadcast %3 : vector<1x16xf32> to vector<8x16xf32>
    %5 = arith.addf %2, %4 : vector<8x16xf32>
    %6 = vector.extract_strided_slice %5 {offsets = [0, 0], sizes = [8, 8], strides = [1, 1]} : vector<8x16xf32> to vector<8x8xf32>
    %7 = vector.extract_strided_slice %5 {offsets = [0, 8], sizes = [8, 8], strides = [1, 1]} : vector<8x16xf32> to vector<8x8xf32>
    %cst_5 = arith.constant -6.000000e+00 : f32
    %cst_6 = arith.constant 2.000000e+00 : f32
    %8 = vector.broadcast %cst_5 : f32 to vector<8x8xf32>
    %9 = arith.maximumf %8, %7 : vector<8x8xf32>
    %10 = vector.broadcast %cst_6 : f32 to vector<8x8xf32>
    %11 = arith.minimumf %10, %9 : vector<8x8xf32>
    %12 = tpu.concatenate %6, %11 in 1 : vector<8x8xf32>, vector<8x8xf32> -> vector<8x16xf32>
    %c0_7 = arith.constant 0 : index
    %c0_8 = arith.constant 0 : index
    %13 = vector.load %arg4[%c0_7, %c0_8] : memref<8x16xf32, #tpu.memory_space<vmem>>, vector<8x16xf32>
    tpu.vector_store %arg4[%c0_7, %c0_8], %12 {strides = array<i32>} : memref<8x16xf32, #tpu.memory_space<vmem>>, vector<8x16xf32>,
    return
  }
  func.func @transform_0(%arg0: i32) -> (i32, i32) {
    %c0_i32 = arith.constant 0 : i32
    %c0_i32_0 = arith.constant 0 : i32
    return %arg0, %c0_i32 : i32, i32
  }
  func.func @transform_1(%arg0: i32) -> (i32, i32) {
    %c0_i32 = arith.constant 0 : i32
    %c0_i32_0 = arith.constant 0 : i32
    %c0_i32_1 = arith.constant 0 : i32
    return %c0_i32, %c0_i32_0 : i32, i32
  }
  func.func @transform_2(%arg0: i32) -> (i32, i32) {
    %c0_i32 = arith.constant 0 : i32
    %c0_i32_0 = arith.constant 0 : i32
    %c0_i32_1 = arith.constant 0 : i32
    return %c0_i32, %c0_i32_0 : i32, i32
  }
  func.func @transform_3(%arg0: i32) -> (i32, i32) {
    %c0_i32 = arith.constant 0 : i32
    %c0_i32_0 = arith.constant 0 : i32
    return %arg0, %c0_i32 : i32, i32
  }
}

</mosaic_0001>

<bundles_post_ra>
// kernel: encoder_z_prior.6
= control target key start
LH: loop header
LB: loop body
LE: loop exit
PB: predicated region body
PF: predicated region fallthrough
CT: control target
= control target key end

     0   :  { %s2241_s12 = smov 0   ;;  %s2889_s0 = inlined_call_operand.vmem [shape: bf16[2048,56], index: 0, kind: input, shape index: {}]   ;;  %s2890_s1 = inlined_call_operand.vmem [shape: bf16[56,64], index: 1, kind: input, shape index: {}]   ;;  %s2891_s2 = inlined_call_operand.vmem [shape: f32[1,64], index: 2, kind: input, shape index: {}]   ;;  %s2892_s3 = inlined_call_operand.vmem [shape: f32[2048,32], index: 3, kind: output, shape index: {}]  }
   0x1 LB: > { %s1649_s13 = sadd.s32 4294967295, %s2218_s12   ;;  %p1653_p0 = scmp.ge.s32.totalorder %s2218_s12, 1  ;;  %s2218_s12 = sphi %s2241_s12, %s13_s12  }
   0x2   : > { %p138_p1 = scmp.lt.s32.totalorder %s2218_s12, 5 }
   0x4   : > { %p139_p2 = pnand %p1653_p0, %p138_p1 }
   0x6   : > { %142 = sbr.rel (%p139_p2) target bundleno = 521 (0x209), region = 32 }
   0xd   : > { %v1920_v0 = vld [vmem:[%s2890_s1] sm:$0xff]   ;;  %v1921_v1 = vld [vmem:[%s2890_s1 + $0x8] sm:$0xff]   ;;  %s1654_s18 = sshll.u32 %s1649_s13, 6  ;;  %v1922_v2 = vld [vmem:[%s2890_s1 + $0x10] sm:$0xff]   ;;  %vm434_vm0 = vcmask 457728   ;;  %vm531_vm1 = vcmask 1043456  }
   0xe   : > { %1829 = vmatprep.subr.bf16.mxu0 %v1920_v0  ;;  %1901 = vmatprep.subr.bf16.mxu1 %v1920_v0  ;;  %p163_p3 = scmp.lt.s32.totalorder %s1654_s18, 255  ;;  %v1923_v3 = vld [vmem:[%s2890_s1 + $0x18] ss:$0 sps:$4 sm:$0xff]   ;;  %v2336_v37 = vld [vmem:[%s2891_s2] ss:$0 sm:$0xff]  ;;  %s2220_s29 = smov 96  }
   0xf   : > { %1830 = vmatpush3.bf16.msra.mxu0 %v1920_v0  ;;  %1905 = vmatpush3.bf16.msra.mxu1 %v1920_v0  ;;  %v533_v6 = vsel %vm531_vm1, %v1923_v3, 0  ;;  %vm1528_vm2 = vcmask 261120  }
  0x10   : > { %1831 = vmatprep.subr.bf16.mxu0 %v1921_v1  ;;  %1902 = vmatprep.subr.bf16.mxu1 %v1921_v1  ;;  %s2951_s18 = smov (!%p163_p3, %s1654_s18), 255 }
  0x11   : > { %s1655_s21 = sshll.u32 %s2951_s18, 2  ;;  %s1657_s30 = sshll.u32 %s2951_s18, 3 }
  0x12   : > { %s2267_s26 = scalar_lea.vmem %s2889_s0, %s1655_s21  ;;  %s2683_s6 = scalar_lea.vmem %s2892_s3, %s1657_s30 }
  0x13   : > { %1832 = vmatpush3.bf16.msra.mxu0 %v1921_v1  ;;  %1906 = vmatpush3.bf16.msra.mxu1 %v1921_v1  ;;  %v1924_v4 = vld [vmem:[%s2267_s26] sm:$0xff]   ;;  %v1926_v7 = vld [vmem:[%s2267_s26 + $0x8] sm:$0xff]   ;;  %v1928_v9 = vld [vmem:[%s2267_s26 + $0x10] sm:$0xff]  }
  0x14   : > { %1833 = vmatprep.subr.bf16.mxu0 %v1922_v2  ;;  %1903 = vmatprep.subr.bf16.mxu1 %v1922_v2  ;;  %v1925_v5 = vld [vmem:[%s2267_s26 + $0x80] sm:$0xff]   ;;  %v1927_v8 = vld [vmem:[%s2267_s26 + $0x88] sm:$0xff]   ;;  %v1930_v10 = vld [vmem:[%s2267_s26 + $0x90] sm:$0xff]  }
  0x15   : > { %1837 = vmatprep.mubr.msk.bf16.mxu0 %vm434_vm0, %v1924_v4  ;;  %1869 = vmatprep.mubr.msk.bf16.mxu1 %vm434_vm0, %v1925_v5  ;;  %v1929_v11 = vld [vmem:[%s2267_s26 + $0x18] sm:$0xff]   ;;  %v1932_v13 = vld [vmem:[%s2267_s26 + $0x20] sm:$0xff]   ;;  %v1933_v15 = vld [vmem:[%s2267_s26 + $0x28] sm:$0xff]  }
  0x16   : > { %v1931_v12 = vld [vmem:[%s2267_s26 + $0x98] sm:$0xff]   ;;  %v1934_v14 = vld [vmem:[%s2267_s26 + $0xa0] sm:$0xff]   ;;  %v1935_v16 = vld [vmem:[%s2267_s26 + $0xa8] sm:$0xff]  }
  0x17   : > { %1834 = vmatpush3.bf16.msra.mxu0 %v1922_v2  ;;  %1907 = vmatpush3.bf16.msra.mxu1 %v1922_v2  ;;  %v1936_v17 = vld [vmem:[%s2267_s26 + $0x30] sm:$0xff]   ;;  %v1937_v19 = vld [vmem:[%s2267_s26 + $0x38] sm:$0xff]   ;;  %v1940_v21 = vld [vmem:[%s2267_s26 + $0x40] sm:$0xff]  }
  0x18   : > { %1909 = vmatprep.subr.msk.bf16.mxu0 %vm531_vm1, %v1923_v3  ;;  %1910 = vmatprep.subr.msk.bf16.mxu1 %vm531_vm1, %v1923_v3  ;;  %v1938_v18 = vld [vmem:[%s2267_s26 + $0xb0] sm:$0xff]   ;;  %v1939_v20 = vld [vmem:[%s2267_s26 + $0xb8] sm:$0xff]   ;;  %v1942_v22 = vld [vmem:[%s2267_s26 + $0xc0] sm:$0xff]  }
  0x19   : > { %v1941_v23 = vld [vmem:[%s2267_s26 + $0x48] sm:$0xff]   ;;  %v1944_v25 = vld [vmem:[%s2267_s26 + $0x50] sm:$0xff]   ;;  %v1945_v27 = vld [vmem:[%s2267_s26 + $0x58] sm:$0xff]  }
  0x1a   : > { %v1943_v24 = vld [vmem:[%s2267_s26 + $0xc8] sm:$0xff]   ;;  %v1946_v26 = vld [vmem:[%s2267_s26 + $0xd0] sm:$0xff]   ;;  %v1947_v28 = vld [vmem:[%s2267_s26 + $0xd8] sm:$0xff]  }
  0x1b   : > { %1836 = vmatpush3.bf16.msra.mxu0 %v533_v6  ;;  %1908 = vmatpush3.bf16.msra.mxu1 %v533_v6  ;;  %v1948_v29 = vld [vmem:[%s2267_s26 + $0x60] sm:$0xff]   ;;  %v1949_v31 = vld [vmem:[%s2267_s26 + $0x68] sm:$0xff]   ;;  %v1952_v33 = vld [vmem:[%s2267_s26 + $0x70] sm:$0xff]  }
  0x1c   : > { %v1950_v30 = vld [vmem:[%s2267_s26 + $0xe0] sm:$0xff]   ;;  %v1951_v32 = vld [vmem:[%s2267_s26 + $0xe8] sm:$0xff]   ;;  %v1954_v34 = vld [vmem:[%s2267_s26 + $0xf0] sm:$0xff]  }
  0x1d   : > { %v1953_v35 = vld [vmem:[%s2267_s26 + $0x78] sm:$0xff]  }
  0x1e   : > { %1838 = vmatmul.mubr.msk.bf16.vlgmr.msra.gmra.mrb[0].mxu0 %vm434_vm0, %v1926_v7  ;;  %1870 = vmatmul.mubr.msk.bf16.vlgmr.msra.gmra.mrb[0].mxu1 %vm434_vm0, %v1927_v8  ;;  %v1955_v36 = vld [vmem:[%s2267_s26 + $0xf8] sm:$0xff]  }
  0x1f   : > { %1841 = vmatprep.mubr.msk.bf16.mxu0 %vm434_vm0, %v1928_v9  ;;  %1873 = vmatprep.mubr.msk.bf16.mxu1 %vm434_vm0, %v1930_v10 }
  0x26   : > { %1842 = vmatmul.mubr.msk.bf16.gmra.mrb[4].mxu0 %vm434_vm0, %v1929_v11  ;;  %1874 = vmatmul.mubr.msk.bf16.gmra.mrb[4].mxu1 %vm434_vm0, %v1931_v12 }
  0x27   : > { %1845 = vmatprep.mubr.msk.bf16.mxu0 %vm434_vm0, %v1932_v13  ;;  %1877 = vmatprep.mubr.msk.bf16.mxu1 %vm434_vm0, %v1934_v14 }
  0x2e   : > { %1846 = vmatmul.mubr.msk.bf16.gmra.mrb[8].mxu0 %vm434_vm0, %v1933_v15  ;;  %1878 = vmatmul.mubr.msk.bf16.gmra.mrb[8].mxu1 %vm434_vm0, %v1935_v16 }
  0x2f   : > { %1849 = vmatprep.mubr.msk.bf16.mxu0 %vm434_vm0, %v1936_v17  ;;  %1881 = vmatprep.mubr.msk.bf16.mxu1 %vm434_vm0, %v1938_v18 }
  0x36   : > { %1850 = vmatmul.mubr.msk.bf16.gmra.mrb[12].mxu0 %vm434_vm0, %v1937_v19  ;;  %1882 = vmatmul.mubr.msk.bf16.gmra.mrb[12].mxu1 %vm434_vm0, %v1939_v20 }
  0x37   : > { %1853 = vmatprep.mubr.msk.bf16.mxu0 %vm434_vm0, %v1940_v21  ;;  %1885 = vmatprep.mubr.msk.bf16.mxu1 %vm434_vm0, %v1942_v22 }
  0x3e   : > { %1854 = vmatmul.mubr.msk.bf16.gmra.mrb[16].mxu0 %vm434_vm0, %v1941_v23  ;;  %1886 = vmatmul.mubr.msk.bf16.gmra.mrb[16].mxu1 %vm434_vm0, %v1943_v24 }
  0x3f   : > { %1857 = vmatprep.mubr.msk.bf16.mxu0 %vm434_vm0, %v1944_v25  ;;  %1889 = vmatprep.mubr.msk.bf16.mxu1 %vm434_vm0, %v1946_v26 }
  0x46   : > { %1858 = vmatmul.mubr.msk.bf16.gmra.mrb[20].mxu0 %vm434_vm0, %v1945_v27  ;;  %1890 = vmatmul.mubr.msk.bf16.gmra.mrb[20].mxu1 %vm434_vm0, %v1947_v28 }
  0x47   : > { %1861 = vmatprep.mubr.msk.bf16.mxu0 %vm434_vm0, %v1948_v29  ;;  %1893 = vmatprep.mubr.msk.bf16.mxu1 %vm434_vm0, %v1950_v30 }
  0x4e   : > { %1862 = vmatmul.mubr.msk.bf16.gmra.mrb[24].mxu0 %vm434_vm0, %v1949_v31  ;;  %1894 = vmatmul.mubr.msk.bf16.gmra.mrb[24].mxu1 %vm434_vm0, %v1951_v32 }
  0x4f   : > { %1865 = vmatprep.mubr.msk.bf16.mxu0 %vm434_vm0, %v1952_v33  ;;  %1897 = vmatprep.mubr.msk.bf16.mxu1 %vm434_vm0, %v1954_v34 }
  0x56   : > { %1866 = vmatmul.mubr.msk.bf16.gmra.mrb[28].mxu0 %vm434_vm0, %v1953_v35  ;;  %1898 = vmatmul.mubr.msk.bf16.gmra.mrb[28].mxu1 %vm434_vm0, %v1955_v36 }
  0xf1   : > { %v1839_v38 = vpop.f32.mrb[0].mxu0  ;;  %v1871_v39 = vpop.f32.mrb[0].mxu1 }
  0xf2   : > { %v2339_v40 = vadd.f32 %v1839_v38, %v2336_v37  ;;  %v2342_v41 = vadd.f32 %v1871_v39, %v2336_v37  ;;  %v569_v42 = vpop.f32.mrb[1].mxu0  ;;  %v697_v43 = vpop.f32.mrb[1].mxu1 }
  0xf3   : > { %v2345_v44 = vadd.f32 %v2336_v37, %v569_v42  ;;  %v2348_v45 = vadd.f32 %v2336_v37, %v697_v43  ;;  %v1840_v46 = vpop.f32.mrb[2].mxu0  ;;  %v1872_v47 = vpop.f32.mrb[2].mxu1 }
  0xf4   : > { %v1729_v48 = vmul.f32 -1.442695, %v2339_v40  ;;  %v1761_v49 = vmul.f32 -1.442695, %v2342_v41  ;;  %v2353_v50 = vadd.f32 %v1840_v46, %v2336_v37  ;;  %v2356_v51 = vadd.f32 %v1872_v47, %v2336_v37  ;;  %v572_v52 = vpop.f32.mrb[3].mxu0  ;;  %v700_v53 = vpop.f32.mrb[3].mxu1 }
  0xf5   : > { %v1727_v54 = vmul.f32 -1.442695, %v2345_v44  ;;  %v1759_v55 = vmul.f32 -1.442695, %v2348_v45  ;;  %v2361_v56 = vadd.f32 %v2336_v37, %v572_v52  ;;  %v2364_v57 = vadd.f32 %v2336_v37, %v700_v53 }
  0xf6   : > { %1956 = vpow2.f32 %v1729_v48  ;;  %v1730_v58 = vmul.f32 -1.442695, %v2353_v50  ;;  %v1762_v59 = vmul.f32 -1.442695, %v2356_v51 }
  0xf7   : > { %1958 = vpow2.f32 %v1761_v49  ;;  %v1728_v60 = vmul.f32 -1.442695, %v2361_v56  ;;  %v1760_v61 = vmul.f32 -1.442695, %v2364_v57 }
  0xf8   : > { %1960 = vpow2.f32 %v1727_v54 }
  0xf9   : > { %1962 = vpow2.f32 %v1759_v55  ;;  %v1843_v62 = vpop.f32.mrb[4].mxu0  ;;  %v1875_v63 = vpop.f32.mrb[4].mxu1 }
  0xfa   : > { %1964 = vpow2.f32 %v1730_v58  ;;  %v2371_v0 = vadd.f32 %v1843_v62, %v2336_v37  ;;  %v585_v1 = vpop.f32.mrb[5].mxu0  ;;  %v2374_v2 = vadd.f32 %v1875_v63, %v2336_v37  ;;  %v713_v3 = vpop.f32.mrb[5].mxu1 }
  0xfb   : > { %1966 = vpow2.f32 %v1762_v59  ;;  %v1844_v4 = vpop.f32.mrb[6].mxu0  ;;  %v1876_v5 = vpop.f32.mrb[6].mxu1  ;;  %v2381_v10 = vadd.f32 %v2336_v37, %v585_v1  ;;  %v2397_v43 = vadd.f32 %v2336_v37, %v713_v3 }
  0xfc   : > { %1968 = vpow2.f32 %v1728_v60  ;;  %v1733_v6 = vmul.f32 -1.442695, %v2371_v0  ;;  %v2378_v7 = vadd.f32 %v1844_v4, %v2336_v37  ;;  %v588_v8 = vpop.f32.mrb[7].mxu0  ;;  %v716_v9 = vpop.f32.mrb[7].mxu1  ;;  %v1765_v12 = vmul.f32 -1.442695, %v2374_v2 }
  0xfd   : > { %1970 = vpow2.f32 %v1760_v61  ;;  %v2386_v16 = vadd.f32 %v2336_v37, %v588_v8  ;;  %v1731_v21 = vmul.f32 -1.442695, %v2381_v10  ;;  %v2400_v47 = vadd.f32 %v1876_v5, %v2336_v37 }
  0xfe   : > { %1972 = vpow2.f32 %v1733_v6  ;;  %v1734_v11 = vmul.f32 -1.442695, %v2378_v7  ;;  %v1763_v62 = vmul.f32 -1.442695, %v2397_v43  ;;  %v2417_v63 = vadd.f32 %v2336_v37, %v716_v9 }
  0xff   : > { %2912 = vst [vmem:[#allocation2_spill] sm:$0xff] %v2386_v16  ;;  %v1732_v33 = vmul.f32 -1.442695, %v2386_v16  ;;  %v1766_v5 = vmul.f32 -1.442695, %v2400_v47 }
 0x100   : > { %v1957_v13 = vpop.eup %1956  ;;  %1974 = vpow2.f32 %v1734_v11  ;;  %2914 = vst [vmem:[#allocation4_spill] sm:$0xff] %v2417_v63 }
 0x101   : > { %v1959_v14 = vpop.eup %1958  ;;  %v1018_v15 = vadd.f32 1.0, %v1957_v13  ;;  %v1847_v17 = vpop.f32.mrb[8].mxu0  ;;  %1976 = vpow2.f32 %v1765_v12 }
 0x102   : > { %v1879_v18 = vpop.f32.mrb[8].mxu1  ;;  %v1961_v19 = vpop.eup %1960  ;;  %v1050_v20 = vadd.f32 1.0, %v1959_v14  ;;  %v2409_v58 = vadd.f32 %v1847_v17, %v2336_v37 }
 0x103   : > { %v601_v22 = vpop.f32.mrb[9].mxu0  ;;  %v2389_v23 = vpop.f32.mrb[9].mxu1  ;;  %1978 = vrcp.f32 %v1018_v15  ;;  %v1016_v28 = vadd.f32 1.0, %v1961_v19  ;;  %v2432_v13 = vadd.f32 %v1879_v18, %v2336_v37 }
 0x104   : > { %v1963_v24 = vpop.eup %1962  ;;  %v1848_v25 = vpop.f32.mrb[10].mxu0  ;;  %1980 = vrcp.f32 %v1050_v20  ;;  %2913 = vst [vmem:[#allocation3_spill] sm:$0xff] %v2409_v58  ;;  %v2425_v6 = vadd.f32 %v2336_v37, %v601_v22  ;;  %v1737_v14 = vmul.f32 -1.442695, %v2409_v58  ;;  %v1764_v20 = vmul.f32 -1.442695, %v2417_v63 }
 0x105   : > { %v2391_v26 = vpop.f32.mrb[10].mxu1  ;;  %v1965_v27 = vpop.eup %1964  ;;  %v1048_v35 = vadd.f32 1.0, %v1963_v24  ;;  %1982 = vpow2.f32 %v1731_v21  ;;  %v2429_v9 = vadd.f32 %v1848_v25, %v2336_v37  ;;  %2917 = vst [vmem:[#allocation7_spill] sm:$0xff] %v2432_v13  ;;  %v1769_v25 = vmul.f32 -1.442695, %v2432_v13 }
 0x106   : > { %v604_v29 = vpop.f32.mrb[11].mxu0  ;;  %v2393_v30 = vpop.f32.mrb[11].mxu1  ;;  %v1019_v32 = vadd.f32 1.0, %v1965_v27  ;;  %2915 = vst [vmem:[#allocation5_spill] sm:$0xff] %v2425_v6  ;;  %v1735_v18 = vmul.f32 -1.442695, %v2425_v6  ;;  %v2448_v27 = vadd.f32 %v2336_v37, %v2389_v23 }
 0x107   : > { %v1967_v31 = vpop.eup %1966  ;;  %2916 = vst [vmem:[#allocation6_spill] sm:$0xff] %v2429_v9  ;;  %v2437_v15 = vadd.f32 %v2336_v37, %v604_v29  ;;  %v1738_v24 = vmul.f32 -1.442695, %v2429_v9 }
 0x108   : > { %v1969_v34 = vpop.eup %1968  ;;  %1984 = vrcp.f32 %v1019_v32  ;;  %v1051_v38 = vadd.f32 1.0, %v1967_v31  ;;  %2920 = vst [vmem:[#allocation10_spill] sm:$0xff] %v2448_v27 }
 0x109   : > { %v1971_v36 = vpop.eup %1970  ;;  %1986 = vrcp.f32 %v1016_v28  ;;  %v1017_v42 = vadd.f32 1.0, %v1969_v34  ;;  %v2402_v48 = vpop.f32.mrb[12].mxu0  ;;  %2918 = vst [vmem:[#allocation8_spill] sm:$0xff] %v2437_v15  ;;  %v1736_v32 = vmul.f32 -1.442695, %v2437_v15 }
 0x10a   : > { %v1973_v39 = vpop.eup %1972  ;;  %v1049_v46 = vadd.f32 1.0, %v1971_v36  ;;  %1988 = vpow2.f32 %v1732_v33  ;;  %v2404_v49 = vpop.f32.mrb[12].mxu1 }
 0x10b   : > { %v1975_v52 = vpop.eup %1974  ;;  %1990 = vrcp.f32 %v1048_v35  ;;  %v1022_v53 = vadd.f32 1.0, %v1973_v39  ;;  %v2406_v54 = vpop.f32.mrb[13].mxu0 }
 0x10c   : > { %1992 = vrcp.f32 %v1051_v38  ;;  %v1023_v55 = vadd.f32 1.0, %v1975_v52  ;;  %v2411_v59 = vpop.f32.mrb[14].mxu0  ;;  %v2413_v60 = vpop.f32.mrb[13].mxu1  ;;  %v2461_v38 = vadd.f32 %v2391_v26, %v2336_v37  ;;  %v1767_v26 = vmul.f32 -1.442695, %v2448_v27 }
 0x10d   : > { %v1977_v61 = vpop.eup %1976  ;;  %1994 = vrcp.f32 %v1017_v42  ;;  %v2419_v1 = vpop.f32.mrb[15].mxu0 }
 0x10e   : > { %v2421_v3 = vpop.f32.mrb[14].mxu1  ;;  %v1979_v4 = vpop.eup %1978  ;;  %1996 = vrcp.f32 %v1049_v46  ;;  %v1054_v12 = vadd.f32 1.0, %v1977_v61  ;;  %2921 = vst [vmem:[#allocation11_spill] sm:$0xff] %v2461_v38 }
 0x10f   : > { %v748_v8 = vpop.f32.mrb[15].mxu1  ;;  %v1981_v11 = vpop.eup %1980  ;;  %1998 = vrcp.f32 %v1022_v53  ;;  %1276 = vrot.lane.b32.xlu1 %v1979_v4, %s2220_s29 }
 0x110   : > { %2000 = vrcp.f32 %v1023_v55  ;;  %1340 = vrot.lane.b32.xlu0 %v1981_v11, %s2220_s29  ;;  %v2440_v17 = vadd.f32 %v2336_v37, %v748_v8  ;;  %v1983_v19 = vpop.eup %1982 }
 0x111   : > { %2002 = vpow2.f32 %v1763_v62  ;;  %v1855_v28 = vpop.f32.mrb[16].mxu0  ;;  %v1887_v29 = vpop.f32.mrb[16].mxu1  ;;  %v1020_v11 = vadd.f32 1.0, %v1983_v19  ;;  %v2491_v19 = vadd.f32 %v2402_v48, %v2336_v37 }
 0x112   : > { %2919 = vst [vmem:[#allocation9_spill] sm:$0xff] %v2440_v17  ;;  %v1985_v21 = vpop.eup %1984  ;;  %2004 = vpow2.f32 %v1766_v5  ;;  %v2454_v33 = vadd.f32 %v1855_v28, %v2336_v37  ;;  %v633_v34 = vpop.f32.mrb[17].mxu0  ;;  %v2457_v35 = vadd.f32 %v1887_v29, %v2336_v37  ;;  %v2496_v29 = vadd.f32 %v2336_v37, %v2406_v54 }
 0x113   : > { %v1987_v22 = vpop.eup %1986  ;;  %2006 = vrcp.f32 %v1054_v12  ;;  %1278 = vrot.lane.b32.xlu1 %v1985_v21, %s2220_s29  ;;  %v761_v36 = vpop.f32.mrb[17].mxu1  ;;  %v2464_v39 = vadd.f32 %v2336_v37, %v633_v34  ;;  %v1770_v21 = vmul.f32 -1.442695, %v2461_v38  ;;  %2924 = vst [vmem:[#allocation14_spill] sm:$0xff] %v2491_v19 }
 0x114   : > { %v1989_v31 = vpop.eup %1988  ;;  %2008 = vpow2.f32 %v1737_v14  ;;  %1272 = vrot.lane.b32.xlu0 %v1987_v22, %s2220_s29  ;;  %v1856_v42 = vpop.f32.mrb[18].mxu0  ;;  %v2467_v46 = vadd.f32 %v2336_v37, %v761_v36  ;;  %v2487_v22 = vadd.f32 %v2336_v37, %v2393_v30  ;;  %2925 = vst [vmem:[#allocation15_spill] sm:$0xff] %v2496_v29 }
 0x115   : > { %v1991_v23 = vpop.eup %1990  ;;  %2010 = vpow2.f32 %v1764_v20  ;;  %v1888_v52 = vpop.f32.mrb[18].mxu1  ;;  %v2470_v55 = vadd.f32 %v1856_v42, %v2336_v37 }
 0x116   : > { %v1993_v53 = vpop.eup %1992  ;;  %2012 = vpow2.f32 %v1735_v18  ;;  %v636_v61 = vpop.f32.mrb[19].mxu0  ;;  %v2479_v12 = vadd.f32 %v1888_v52, %v2336_v37  ;;  %2923 = vst [vmem:[#allocation13_spill] sm:$0xff] %v2487_v22 }
 0x117   : > { %v764_v62 = vpop.f32.mrb[19].mxu1  ;;  %v1995_v4 = vpop.eup %1994  ;;  %2014 = vpow2.f32 %v1738_v24  ;;  %1342 = vrot.lane.b32.xlu1 %v1993_v53, %s2220_s29  ;;  %v2475_v5 = vadd.f32 %v2336_v37, %v636_v61 }
 0x118   : > { %v1997_v8 = vpop.eup %1996  ;;  %2016 = vpow2.f32 %v1769_v25  ;;  %1336 = vrot.lane.b32.xlu0 %v1991_v23, %s2220_s29  ;;  %v2482_v14 = vadd.f32 %v2336_v37, %v764_v62  ;;  %v1021_v23 = vadd.f32 1.0, %v1989_v31 }
 0x119   : > { %2922 = vst [vmem:[#allocation12_spill] sm:$0xff] %v2475_v5  ;;  %v1999_v20 = vpop.eup %1998  ;;  %2018 = vpow2.f32 %v1736_v32  ;;  %v1859_v24 = vpop.f32.mrb[20].mxu0 }
 0x11a   : > { %v2001_v18 = vpop.eup %2000  ;;  %v1891_v25 = vpop.f32.mrb[20].mxu1  ;;  %2020 = vpow2.f32 %v1767_v26  ;;  %v2499_v32 = vadd.f32 %v1859_v24, %v2336_v37 }
 0x11b   : > { %v2003_v28 = vpop.eup %2002  ;;  %1338 = vrot.lane.b32.xlu1 %v1997_v8, %s2220_s29  ;;  %v649_v34 = vpop.f32.mrb[21].mxu0  ;;  %v2502_v30 = vadd.f32 %v1891_v25, %v2336_v37  ;;  %2022 = vrcp.f32 %v1020_v11 }
 0x11c   : > { %v777_v36 = vpop.f32.mrb[21].mxu1  ;;  %v2005_v48 = vpop.eup %2004  ;;  %1274 = vrot.lane.b32.xlu0 %v1995_v4, %s2220_s29  ;;  %v2506_v42 = vadd.f32 %v2336_v37, %v649_v34  ;;  %v1052_v62 = vadd.f32 1.0, %v2003_v28  ;;  %2024 = vpow2.f32 %v1770_v21  ;;  %v1768_v4 = vmul.f32 -1.442695, %v2487_v22 }
 0x11d   : > { %v1860_v52 = vpop.f32.mrb[22].mxu0  ;;  %v2509_v54 = vadd.f32 %v2336_v37, %v777_v36  ;;  %v1892_v53 = vpop.f32.mrb[22].mxu1  ;;  %v1055_v26 = vadd.f32 1.0, %v2005_v48  ;;  %v1741_v36 = vmul.f32 -1.442695, %v2491_v19 }
 0x11e   : > { %v2007_v61 = vpop.eup %2006  ;;  %v2512_v8 = vadd.f32 %v1860_v52, %v2336_v37  ;;  %v652_v24 = vpop.f32.mrb[23].mxu0  ;;  %v1739_v21 = vmul.f32 -1.442695, %v2496_v29  ;;  %v2523_v22 = vadd.f32 %v1892_v53, %v2336_v37 }
 0x11f   : > { %v780_v11 = vpop.f32.mrb[23].mxu1  ;;  %v2009_v31 = vpop.eup %2008  ;;  %v2516_v25 = vadd.f32 %v2336_v37, %v652_v24  ;;  %2026 = vrcp.f32 %v1055_v26  ;;  %1286 = vrot.lane.b32.xlu1 %v2001_v18, %s2220_s29  ;;  %v2530_v18 = vadd.f32 %v2411_v59, %v2336_v37 }
 0x120   : > { %v2011_v34 = vpop.eup %2010  ;;  %2028 = vrcp.f32 %v1021_v23  ;;  %1284 = vrot.lane.b32.xlu0 %v1999_v20, %s2220_s29  ;;  %v1026_v52 = vadd.f32 1.0, %v2009_v31  ;;  %v2526_v24 = vadd.f32 %v2336_v37, %v780_v11 }
 0x121   : > { %v2013_v28 = vpop.eup %2012  ;;  %2030 = vrcp.f32 %v1052_v62  ;;  %v1053_v15 = vadd.f32 1.0, %v2011_v34  ;;  %2926 = vst [vmem:[#allocation16_spill] sm:$0xff] %v2530_v18  ;;  %v1863_v23 = vpop.f32.mrb[24].mxu0  ;;  %v2534_v62 = vadd.f32 %v2404_v49, %v2336_v37  ;;  %v1742_v38 = vmul.f32 -1.442695, %v2530_v18 }
 0x122   : > { %v2015_v48 = vpop.eup %2014  ;;  %2032 = vpow2.f32 %v1768_v4  ;;  %v1895_v29 = vpop.f32.mrb[24].mxu1  ;;  %v1024_v20 = vadd.f32 1.0, %v2013_v28  ;;  %v2538_v11 = vadd.f32 %v1863_v23, %v2336_v37 }
 0x123   : > { %v2017_v26 = vpop.eup %2016  ;;  %2034 = vpow2.f32 %v1741_v36  ;;  %2927 = vst [vmem:[#allocation17_spill] sm:$0xff] %v2534_v62  ;;  %v665_v53 = vpop.f32.mrb[25].mxu0  ;;  %v1027_v31 = vadd.f32 1.0, %v2015_v48  ;;  %v2547_v48 = vadd.f32 %v1895_v29, %v2336_v37 }
 0x124   : > { %v2019_v19 = vpop.eup %2018  ;;  %2036 = vpow2.f32 %v1739_v21  ;;  %1348 = vrot.lane.b32.xlu0 %v2007_v61, %s2220_s29  ;;  %v2541_v59 = vadd.f32 %v2336_v37, %v665_v53  ;;  %v1864_v4 = vpop.f32.mrb[26].mxu0  ;;  %v1058_v36 = vadd.f32 1.0, %v2017_v26  ;;  %v2556_v26 = vadd.f32 %v2421_v3, %v2336_v37 }
 0x125   : > { %v793_v34 = vpop.f32.mrb[25].mxu1  ;;  %v2021_v27 = vpop.eup %2020  ;;  %2038 = vrcp.f32 %v1026_v52  ;;  %v2544_v28 = vadd.f32 %v1864_v4, %v2336_v37  ;;  %v1025_v23 = vadd.f32 1.0, %v2019_v19  ;;  %v2552_v52 = vadd.f32 %v2336_v37, %v2419_v1 }
 0x126   : > { %v668_v49 = vpop.f32.mrb[27].mxu0  ;;  %v1896_v21 = vpop.f32.mrb[26].mxu1  ;;  %2040 = vrcp.f32 %v1053_v15  ;;  %2929 = vst [vmem:[#allocation19_spill] sm:$0xff] %v2556_v26  ;;  %v1056_v4 = vadd.f32 1.0, %v2021_v27  ;;  %v1773_v15 = vmul.f32 -1.442695, %v2534_v62  ;;  %v2564_v19 = vadd.f32 %v2336_v37, %v793_v34 }
 0x127   : > { %v2023_v61 = vpop.eup %2022  ;;  %v796_v53 = vpop.f32.mrb[27].mxu1  ;;  %2042 = vrcp.f32 %v1024_v20  ;;  %2928 = vst [vmem:[#allocation18_spill] sm:$0xff] %v2552_v52  ;;  %v2559_v29 = vadd.f32 %v2336_v37, %v668_v49  ;;  %v2568_v1 = vadd.f32 %v2336_v37, %v2413_v60  ;;  %v2571_v3 = vadd.f32 %v1896_v21, %v2336_v37 }
 0x128   : > { %v2025_v6 = vpop.eup %2024  ;;  %2044 = vrcp.f32 %v1027_v31  ;;  %1280 = vrot.lane.b32.xlu0 %v2023_v61, %s2220_s29  ;;  %v2574_v49 = vadd.f32 %v2336_v37, %v796_v53  ;;  %v1774_v60 = vmul.f32 -1.442695, %v2556_v26 }
 0x129   : > { %v2027_v20 = vpop.eup %2026  ;;  %2046 = vrcp.f32 %v1058_v36  ;;  %2930 = vst [vmem:[#allocation20_spill] sm:$0xff] %v2568_v1  ;;  %v1059_v31 = vadd.f32 1.0, %v2025_v6  ;;  %v1867_v61 = vpop.f32.mrb[28].mxu0  ;;  %v1740_v36 = vmul.f32 -1.442695, %v2552_v52 }
 0x12a   : > { %v2029_v27 = vpop.eup %2028  ;;  %2048 = vrcp.f32 %v1025_v23  ;;  %1350 = vrot.lane.b32.xlu1 %v2027_v20, %s2220_s29  ;;  %v1899_v34 = vpop.f32.mrb[28].mxu1  ;;  %v2580_v62 = vadd.f32 %v1867_v61, %v2336_v37  ;;  %v1771_v61 = vmul.f32 -1.442695, %v2568_v1  ;;  %v1745_v1 = vmul.f32 -1.442695, %v2454_v33 }
 0x12b   : > { %v2031_v18 = vpop.eup %2030  ;;  %2050 = vpow2.f32 %v1742_v38  ;;  %v681_v21 = vpop.f32.mrb[29].mxu0  ;;  %v2587_v20 = vadd.f32 %v1899_v34, %v2336_v37  ;;  %v1772_v34 = vmul.f32 -1.442695, %v2440_v17 }
 0x12c   : > { %v809_v9 = vpop.f32.mrb[29].mxu1  ;;  %v2033_v53 = vpop.eup %2032  ;;  %2052 = vrcp.f32 %v1056_v4  ;;  %1344 = vrot.lane.b32.xlu0 %v2031_v18, %s2220_s29  ;;  %v2584_v6 = vadd.f32 %v2336_v37, %v681_v21 }
 0x12d   : > { %v1868_v23 = vpop.f32.mrb[30].mxu0  ;;  %v2590_v38 = vadd.f32 %v2336_v37, %v809_v9  ;;  %v1900_v52 = vpop.f32.mrb[30].mxu1  ;;  %2054 = vpow2.f32 %v1773_v15  ;;  %v1057_v58 = vadd.f32 1.0, %v2033_v53 }
 0x12e   : > { %v2035_v26 = vpop.eup %2034  ;;  %v2594_v13 = vadd.f32 %v1868_v23, %v2336_v37  ;;  %v684_v4 = vpop.f32.mrb[31].mxu0  ;;  %v2597_v18 = vadd.f32 %v1900_v52, %v2336_v37  ;;  %2056 = vrcp.f32 %v1059_v31  ;;  %1282 = vrot.lane.b32.xlu1 %v2029_v27, %s2220_s29  ;;  %v1743_v27 = vmul.f32 -1.442695, %v2464_v39 }
 0x12f   : > { %v812_v21 = vpop.f32.mrb[31].mxu1  ;;  %v2037_v63 = vpop.eup %2036  ;;  %v2602_v9 = vadd.f32 %v2336_v37, %v684_v4  ;;  %2058 = vpow2.f32 %v1774_v60  ;;  %v1030_v16 = vadd.f32 1.0, %v2035_v26  ;;  %v1777_v4 = vmul.f32 -1.442695, %v2457_v35 }
 0x130   : > { %v2039_v15 = vpop.eup %2038  ;;  %2060 = vpow2.f32 %v1740_v36  ;;  %v2607_v52 = vadd.f32 %v2336_v37, %v812_v21  ;;  %v1746_v37 = vmul.f32 -1.442695, %v2470_v55 }
 0x131   : > { %v2041_v23 = vpop.eup %2040  ;;  %1292 = vrot.lane.b32.xlu0 %v2039_v15, %s2220_s29  ;;  %2062 = vpow2.f32 %v1771_v61  ;;  %v1028_v15 = vadd.f32 1.0, %v2037_v63  ;;  %v1775_v63 = vmul.f32 -1.442695, %v2467_v46 }
 0x132   : > { %v2043_v31 = vpop.eup %2042  ;;  %2064 = vpow2.f32 %v1772_v34  ;;  %1346 = vrot.lane.b32.xlu1 %v2041_v23, %s2220_s29 }
 0x133   : > { %v2045_v17 = vpop.eup %2044  ;;  %2066 = vpow2.f32 %v1745_v1 }
 0x134   : > { %v2047_v60 = vpop.eup %2046  ;;  %2068 = vrcp.f32 %v1057_v58  ;;  %v1778_v58 = vmul.f32 -1.442695, %v2479_v12 }
 0x135   : > { %v2049_v53 = vpop.eup %2048  ;;  %1356 = vrot.lane.b32.xlu0 %v2047_v60, %s2220_s29  ;;  %2070 = vrcp.f32 %v1030_v16  ;;  %v1744_v16 = vmul.f32 -1.442695, %v2475_v5 }
 0x136   : > { %v2051_v36 = vpop.eup %2050  ;;  %2072 = vpow2.f32 %v1743_v27  ;;  %1294 = vrot.lane.b32.xlu1 %v2045_v17, %s2220_s29 }
 0x137   : > { %v2053_v26 = vpop.eup %2052  ;;  %v1031_v21 = vadd.f32 1.0, %v2051_v36  ;;  %2074 = vpow2.f32 %v1777_v4 }
 0x138   : > { %v2055_v61 = vpop.eup %2054  ;;  %2076 = vpow2.f32 %v1746_v37 }
 0x139   : > { %v2057_v34 = vpop.eup %2056  ;;  %v1062_v1 = vadd.f32 1.0, %v2055_v61  ;;  %1288 = vrot.lane.b32.xlu0 %v2043_v31, %s2220_s29 }
 0x13a   : > { %v2059_v23 = vpop.eup %2058  ;;  %1358 = vrot.lane.b32.xlu1 %v2057_v34, %s2220_s29 }
 0x13b   : > { %v2061_v60 = vpop.eup %2060  ;;  %2078 = vrcp.f32 %v1062_v1  ;;  %v1063_v17 = vadd.f32 1.0, %v2059_v23  ;;  %v1749_v23 = vmul.f32 -1.442695, %v2499_v32 }
 0x13c   : > { %v2063_v27 = vpop.eup %2062  ;;  %2080 = vrcp.f32 %v1031_v21  ;;  %v1029_v4 = vadd.f32 1.0, %v2061_v60 }
 0x13d   : > { %v2065_v36 = vpop.eup %2064  ;;  %2082 = vrcp.f32 %v1028_v15  ;;  %1352 = vrot.lane.b32.xlu0 %v2053_v26, %s2220_s29  ;;  %v1060_v61 = vadd.f32 1.0, %v2063_v27  ;;  %v1776_v26 = vmul.f32 -1.442695, %v2482_v14 }
 0x13e   : > { %v2067_v31 = vpop.eup %2066  ;;  %2084 = vpow2.f32 %v1778_v58  ;;  %1290 = vrot.lane.b32.xlu1 %v2049_v53, %s2220_s29  ;;  %v1061_v34 = vadd.f32 1.0, %v2065_v36 }
 0x13f   : > { %v2069_v37 = vpop.eup %2068  ;;  %2086 = vpow2.f32 %v1744_v16  ;;  %v1034_v21 = vadd.f32 1.0, %v2067_v31 }
 0x140   : > { %v2071_v1 = vpop.eup %2070  ;;  %2088 = vrcp.f32 %v1063_v17  ;;  %v1750_v17 = vmul.f32 -1.442695, %v2512_v8 }
 0x141   : > { %v2073_v5 = vpop.eup %2072  ;;  %2090 = vpow2.f32 %v1775_v63  ;;  %1300 = vrot.lane.b32.xlu0 %v2071_v1, %s2220_s29  ;;  %v1781_v63 = vmul.f32 -1.442695, %v2502_v30  ;;  %v1782_v1 = vmul.f32 -1.442695, %v2523_v22 }
 0x142   : > { %v2075_v15 = vpop.eup %2074  ;;  %2092 = vrcp.f32 %v1029_v4  ;;  %1354 = vrot.lane.b32.xlu1 %v2069_v37, %s2220_s29  ;;  %v1032_v53 = vadd.f32 1.0, %v2073_v5  ;;  %v1747_v5 = vmul.f32 -1.442695, %v2506_v42 }
 0x143   : > { %2094 = vrcp.f32 %v1060_v61  ;;  %v2077_v58 = vpop.eup %2076  ;;  %v1066_v16 = vadd.f32 1.0, %v2075_v15 }
 0x144   : > { %2096 = vrcp.f32 %v1061_v34  ;;  %v1035_v4 = vadd.f32 1.0, %v2077_v58 }
 0x145   : > { %v2079_v60 = vpop.eup %2078  ;;  %2098 = vrcp.f32 %v1034_v21 }
 0x146   : > { %v2081_v27 = vpop.eup %2080  ;;  %2100 = vpow2.f32 %v1776_v26  ;;  %1364 = vrot.lane.b32.xlu0 %v2079_v60, %s2220_s29  ;;  %v1748_v26 = vmul.f32 -1.442695, %v2516_v25  ;;  %v1779_v60 = vmul.f32 -1.442695, %v2509_v54 }
 0x147   : > { %v2083_v36 = vpop.eup %2082  ;;  %2102 = vpow2.f32 %v1749_v23  ;;  %1302 = vrot.lane.b32.xlu1 %v2081_v27, %s2220_s29 }
 0x148   : > { %v2085_v31 = vpop.eup %2084  ;;  %2104 = vrcp.f32 %v1032_v53 }
 0x149   : > { %v2087_v37 = vpop.eup %2086  ;;  %2106 = vrcp.f32 %v1066_v16  ;;  %v1067_v21 = vadd.f32 1.0, %v2085_v31  ;;  %v1753_v31 = vmul.f32 -1.442695, %v2538_v11 }
 0x14a   : > { %v2089_v61 = vpop.eup %2088  ;;  %2108 = vpow2.f32 %v1750_v17  ;;  %1296 = vrot.lane.b32.xlu0 %v2083_v36, %s2220_s29  ;;  %v1033_v58 = vadd.f32 1.0, %v2087_v37  ;;  %v1780_v36 = vmul.f32 -1.442695, %v2526_v24 }
 0x14b   : > { %v2091_v34 = vpop.eup %2090  ;;  %2110 = vpow2.f32 %v1781_v63  ;;  %1366 = vrot.lane.b32.xlu1 %v2089_v61, %s2220_s29 }
 0x14c   : > { %v2093_v15 = vpop.eup %2092  ;;  %2112 = vrcp.f32 %v1035_v4  ;;  %v1064_v27 = vadd.f32 1.0, %v2091_v34 }
 0x14d   : > { %v2095_v23 = vpop.eup %2094  ;;  %2114 = vpow2.f32 %v1747_v5 }
 0x14e   : > { %v2097_v53 = vpop.eup %2096  ;;  %2116 = vpow2.f32 %v1782_v1  ;;  %1360 = vrot.lane.b32.xlu0 %v2095_v23, %s2220_s29 }
 0x14f   : > { %v2099_v16 = vpop.eup %2098  ;;  %2118 = vrcp.f32 %v1067_v21  ;;  %1298 = vrot.lane.b32.xlu1 %v2093_v15, %s2220_s29  ;;  %v1754_v21 = vmul.f32 -1.442695, %v2544_v28 }
 0x150   : > { %v2101_v17 = vpop.eup %2100  ;;  %2120 = vpow2.f32 %v1748_v26  ;;  %v1751_v26 = vmul.f32 -1.442695, %v2541_v59 }
 0x151   : > { %v2103_v63 = vpop.eup %2102  ;;  %2122 = vrcp.f32 %v1033_v58  ;;  %v1065_v1 = vadd.f32 1.0, %v2101_v17 }
 0x152   : > { %v2105_v4 = vpop.eup %2104  ;;  %2124 = vpow2.f32 %v1779_v60  ;;  %1308 = vrot.lane.b32.xlu0 %v2099_v16, %s2220_s29  ;;  %v1038_v5 = vadd.f32 1.0, %v2103_v63 }
 0x153   : > { %v2107_v37 = vpop.eup %2106  ;;  %2126 = vrcp.f32 %v1064_v27  ;;  %1362 = vrot.lane.b32.xlu1 %v2097_v53, %s2220_s29  ;;  %v1752_v27 = vmul.f32 -1.442695, %v2559_v29 }
 0x154   : > { %v2109_v61 = vpop.eup %2108  ;;  %2128 = vpow2.f32 %v1780_v36 }
 0x155   : > { %v2111_v34 = vpop.eup %2110  ;;  %2130 = vpow2.f32 %v1753_v31  ;;  %v1039_v53 = vadd.f32 1.0, %v2109_v61 }
 0x156   : > { %v2113_v15 = vpop.eup %2112  ;;  %1372 = vrot.lane.b32.xlu0 %v2107_v37, %s2220_s29  ;;  %2132 = vrcp.f32 %v1038_v5  ;;  %v1070_v58 = vadd.f32 1.0, %v2111_v34  ;;  %v1785_v5 = vmul.f32 -1.442695, %v2547_v48 }
 0x157   : > { %v2115_v23 = vpop.eup %2114  ;;  %1310 = vrot.lane.b32.xlu1 %v2113_v15, %s2220_s29  ;;  %2134 = vrcp.f32 %v1065_v1 }
 0x158   : > { %v2117_v60 = vpop.eup %2116  ;;  %2136 = vpow2.f32 %v1754_v21  ;;  %v1036_v36 = vadd.f32 1.0, %v2115_v23  ;;  %v1786_v21 = vmul.f32 -1.442695, %v2571_v3 }
 0x159   : > { %v2119_v16 = vpop.eup %2118  ;;  %2138 = vpow2.f32 %v1751_v26  ;;  %v1071_v31 = vadd.f32 1.0, %v2117_v60  ;;  %v1783_v26 = vmul.f32 -1.442695, %v2564_v19 }
 0x15a   : > { %v2121_v17 = vpop.eup %2120  ;;  %1304 = vrot.lane.b32.xlu0 %v2105_v4, %s2220_s29  ;;  %2140 = vrcp.f32 %v1070_v58 }
 0x15b   : > { %v2123_v63 = vpop.eup %2122  ;;  %1374 = vrot.lane.b32.xlu1 %v2119_v16, %s2220_s29  ;;  %2142 = vrcp.f32 %v1039_v53  ;;  %v1037_v61 = vadd.f32 1.0, %v2121_v17 }
 0x15c   : > { %v2125_v37 = vpop.eup %2124  ;;  %2144 = vpow2.f32 %v1752_v27  ;;  %v1784_v27 = vmul.f32 -1.442695, %v2574_v49 }
 0x15d   : > { %v2127_v1 = vpop.eup %2126  ;;  %2146 = vrcp.f32 %v1036_v36  ;;  %v1068_v4 = vadd.f32 1.0, %v2125_v37  ;;  %v1757_v36 = vmul.f32 -1.442695, %v2580_v62 }
 0x15e   : > { %v2129_v34 = vpop.eup %2128  ;;  %1368 = vrot.lane.b32.xlu0 %v2127_v1, %s2220_s29  ;;  %2148 = vrcp.f32 %v1071_v31  ;;  %v1758_v1 = vmul.f32 -1.442695, %v2594_v13 }
 0x15f   : > { %v2131_v15 = vpop.eup %2130  ;;  %1306 = vrot.lane.b32.xlu1 %v2123_v63, %s2220_s29  ;;  %2150 = vpow2.f32 %v1785_v5  ;;  %v1069_v58 = vadd.f32 1.0, %v2129_v34  ;;  %v1755_v34 = vmul.f32 -1.442695, %v2584_v6 }
 0x160   : > { %v2133_v23 = vpop.eup %2132  ;;  %2152 = vrcp.f32 %v1037_v61  ;;  %v1042_v53 = vadd.f32 1.0, %v2131_v15 }
 0x161   : > { %v2135_v60 = vpop.eup %2134  ;;  %2154 = vpow2.f32 %v1786_v21 }
 0x162   : > { %1316 = vrot.lane.b32.xlu0 %v2133_v23, %s2220_s29  ;;  %v2137_v16 = vpop.eup %2136  ;;  %2156 = vrcp.f32 %v1068_v4  ;;  %v1756_v4 = vmul.f32 -1.442695, %v2602_v9 }
 0x163   : > { %1370 = vrot.lane.b32.xlu1 %v2135_v60, %s2220_s29  ;;  %v2139_v17 = vpop.eup %2138  ;;  %2158 = vpow2.f32 %v1783_v26  ;;  %v1043_v37 = vadd.f32 1.0, %v2137_v16 }
 0x164   : > { %v2141_v63 = vpop.eup %2140  ;;  %2160 = vrcp.f32 %v1069_v58  ;;  %v1787_v58 = vmul.f32 -1.442695, %v2590_v38  ;;  %v1040_v16 = vadd.f32 1.0, %v2139_v17 }
 0x165   : > { %v2143_v31 = vpop.eup %2142  ;;  %2162 = vrcp.f32 %v1042_v53 }
 0x166   : > { %1380 = vrot.lane.b32.xlu0 %v2141_v63, %s2220_s29  ;;  %v2145_v5 = vpop.eup %2144  ;;  %2164 = vpow2.f32 %v1784_v27 }
 0x167   : > { %1318 = vrot.lane.b32.xlu1 %v2143_v31, %s2220_s29  ;;  %v2147_v61 = vpop.eup %2146  ;;  %2166 = vpow2.f32 %v1757_v36  ;;  %v1041_v63 = vadd.f32 1.0, %v2145_v5  ;;  %v1790_v5 = vmul.f32 -1.442695, %v2597_v18 }
 0x168   : > { %v2149_v21 = vpop.eup %2148  ;;  %2168 = vrcp.f32 %v1043_v37  ;;  %v1788_v37 = vmul.f32 -1.442695, %v2607_v52 }
 0x169   : > { %v2151_v15 = vpop.eup %2150  ;;  %2170 = vpow2.f32 %v1758_v1 }
 0x16a   : > { %1312 = vrot.lane.b32.xlu0 %v2147_v61, %s2220_s29  ;;  %v2153_v26 = vpop.eup %2152  ;;  %v1074_v23 = vadd.f32 1.0, %v2151_v15  ;;  %2172 = vpow2.f32 %v1755_v34  ;;  %v1789_v61 = vmul.f32 -1.442695, %v2587_v20 }
 0x16b   : > { %1382 = vrot.lane.b32.xlu1 %v2149_v21, %s2220_s29  ;;  %v2155_v60 = vpop.eup %2154 }
 0x16c   : > { %v2157_v53 = vpop.eup %2156  ;;  %2174 = vrcp.f32 %v1074_v23  ;;  %v1075_v27 = vadd.f32 1.0, %v2155_v60 }
 0x16d   : > { %v2159_v36 = vpop.eup %2158  ;;  %2176 = vpow2.f32 %v1756_v4 }
 0x16e   : > { %1376 = vrot.lane.b32.xlu0 %v2157_v53, %s2220_s29  ;;  %v2161_v31 = vpop.eup %2160  ;;  %2178 = vpow2.f32 %v1787_v58  ;;  %v1072_v17 = vadd.f32 1.0, %v2159_v36 }
 0x16f   : > { %1314 = vrot.lane.b32.xlu1 %v2153_v26, %s2220_s29  ;;  %v2163_v1 = vpop.eup %2162  ;;  %2180 = vrcp.f32 %v1075_v27 }
 0x170   : > { %v2165_v34 = vpop.eup %2164  ;;  %2182 = vrcp.f32 %v1040_v16 }
 0x171   : > { %v2167_v21 = vpop.eup %2166  ;;  %2184 = vrcp.f32 %v1041_v63  ;;  %v1073_v4 = vadd.f32 1.0, %v2165_v34 }
 0x172   : > { %1324 = vrot.lane.b32.xlu0 %v2163_v1, %s2220_s29  ;;  %2186 = vpow2.f32 %v1788_v37  ;;  %v2169_v15 = vpop.eup %2168  ;;  %v1046_v23 = vadd.f32 1.0, %v2167_v21 }
 0x173   : > { %1378 = vrot.lane.b32.xlu1 %v2161_v31, %s2220_s29  ;;  %2188 = vpow2.f32 %v1789_v61  ;;  %v2171_v26 = vpop.eup %2170 }
 0x174   : > { %2190 = vrcp.f32 %v1072_v17  ;;  %v2173_v58 = vpop.eup %2172  ;;  %v1047_v16 = vadd.f32 1.0, %v2171_v26 }
 0x175   : > { %2192 = vpow2.f32 %v1790_v5  ;;  %v1044_v36 = vadd.f32 1.0, %v2173_v58 }
 0x176   : > { %v2175_v60 = vpop.eup %2174  ;;  %2194 = vrcp.f32 %v1073_v4 }
 0x177   : > { %1326 = vrot.lane.b32.xlu1 %v2169_v15, %s2220_s29  ;;  %v2177_v53 = vpop.eup %2176  ;;  %1388 = vrot.lane.b32.xlu0 %v2175_v60, %s2220_s29  ;;  %2196 = vrcp.f32 %v1046_v23 }
 0x178   : > { %v2179_v27 = vpop.eup %2178  ;;  %2198 = vrcp.f32 %v1047_v16  ;;  %v1045_v1 = vadd.f32 1.0, %v2177_v53 }
 0x179   : > { %v2181_v63 = vpop.eup %2180  ;;  %2200 = vrcp.f32 %v1044_v36  ;;  %v1076_v34 = vadd.f32 1.0, %v2179_v27 }
 0x17a   : > { %v2183_v31 = vpop.eup %2182  ;;  %2202 = vrcp.f32 %v1045_v1 }
 0x17b   : > { %1390 = vrot.lane.b32.xlu1 %v2181_v63, %s2220_s29  ;;  %v2185_v37 = vpop.eup %2184  ;;  %1320 = vrot.lane.b32.xlu0 %v2183_v31, %s2220_s29  ;;  %2204 = vrcp.f32 %v1076_v34 }
 0x17c   : > { %v2187_v61 = vpop.eup %2186 }
 0x17d   : > { %v2189_v17 = vpop.eup %2188  ;;  %v1077_v5 = vadd.f32 1.0, %v2187_v61 }
 0x17e   : > { %v2191_v21 = vpop.eup %2190  ;;  %v1078_v4 = vadd.f32 1.0, %v2189_v17 }
 0x17f   : > { %1322 = vrot.lane.b32.xlu1 %v2185_v37, %s2220_s29  ;;  %1384 = vrot.lane.b32.xlu0 %v2191_v21, %s2220_s29  ;;  %v2193_v15 = vpop.eup %2192  ;;  %2206 = vrcp.f32 %v1077_v5 }
 0x180   : > { %v2195_v26 = vpop.eup %2194  ;;  %v1079_v16 = vadd.f32 1.0, %v2193_v15  ;;  %2208 = vrcp.f32 %v1078_v4 }
 0x181   : > { %v1277_v23 = vpop.permute.xlu1 %1276  ;;  %v2197_v58 = vpop.eup %2196 }
 0x182   : > { %v1341_v60 = vpop.permute.xlu0 %1340  ;;  %v1466_v53 = vmul.f32 %v1277_v23, %v2339_v40  ;;  %v2199_v36 = vpop.eup %2198  ;;  %2210 = vrcp.f32 %v1079_v16 }
 0x183   : > { %1386 = vrot.lane.b32.xlu1 %v2195_v26, %s2220_s29  ;;  %1332 = vrot.lane.b32.xlu0 %v2197_v58, %s2220_s29  ;;  %v1498_v27 = vmul.f32 %v1341_v60, %v2342_v41  ;;  %v2201_v31 = vpop.eup %2200 }
 0x184   : > { %1531 = vst.msk [vmem:[%s2683_s6 + $0x10] sm:$0xff] %vm1528_vm2, %v1466_v53  ;;  %v2203_v1 = vpop.eup %2202 }
 0x185   : > { %1563 = vst.msk [vmem:[%s2683_s6 + $0x110] sm:$0xff] %vm1528_vm2, %v1498_v27  ;;  %v1279_v63 = vpop.permute.xlu1 %1278  ;;  %v2205_v34 = vpop.eup %2204 }
 0x186   : > { %v1467_v40 = vmul.f32 %v1279_v63, %v2353_v50  ;;  %v1273_v37 = vpop.permute.xlu0 %1272 }
 0x187   : > { %1334 = vrot.lane.b32.xlu1 %v2199_v36, %s2220_s29  ;;  %1328 = vrot.lane.b32.xlu0 %v2201_v31, %s2220_s29  ;;  %v1464_v41 = vmul.f32 %v1273_v37, %v2345_v44 }
 0x188   : > { %1532 = vst.msk [vmem:[%s2683_s6 + $0x18] sm:$0xff] %vm1528_vm2, %v1467_v40 }
 0x189   : > { %1529 = vst.msk [vmem:[%s2683_s6] sm:$0xff] %vm1528_vm2, %v1464_v41  ;;  %v1343_v61 = vpop.permute.xlu1 %1342  ;;  %v2207_v44 = vpop.eup %2206 }
 0x18a   : > { %v1499_v17 = vmul.f32 %v1343_v61, %v2356_v51  ;;  %v1337_v50 = vpop.permute.xlu0 %1336  ;;  %v2209_v15 = vpop.eup %2208 }
 0x18b   : > { %1330 = vrot.lane.b32.xlu1 %v2203_v1, %s2220_s29  ;;  %1392 = vrot.lane.b32.xlu0 %v2205_v34, %s2220_s29  ;;  %v1496_v21 = vmul.f32 %v1337_v50, %v2348_v45  ;;  %v2933_v1 = vld [vmem:[#allocation4_spill] sm:$0xff] }
 0x18c   : > { %1564 = vst.msk [vmem:[%s2683_s6 + $0x118] sm:$0xff] %vm1528_vm2, %v1499_v17  ;;  %v2211_v45 = vpop.eup %2210 }
 0x18d   : > { %1561 = vst.msk [vmem:[%s2683_s6 + $0x100] sm:$0xff] %vm1528_vm2, %v1496_v21  ;;  %v1339_v5 = vpop.permute.xlu1 %1338  ;;  %v2935_v21 = vld [vmem:[#allocation6_spill] sm:$0xff] }
 0x18e   : > { %v1497_v4 = vmul.f32 %v1339_v5, %v2364_v57  ;;  %v1275_v51 = vpop.permute.xlu0 %1274 }
 0x18f   : > { %1394 = vrot.lane.b32.xlu1 %v2207_v44, %s2220_s29  ;;  %1396 = vrot.lane.b32.xlu0 %v2209_v15, %s2220_s29  ;;  %v1465_v26 = vmul.f32 %v1275_v51, %v2361_v56  ;;  %v2936_v15 = vld [vmem:[#allocation5_spill] sm:$0xff] }
 0x190   : > { %1562 = vst.msk [vmem:[%s2683_s6 + $0x108] sm:$0xff] %vm1528_vm2, %v1497_v4 }
 0x191   : > { %1530 = vst.msk [vmem:[%s2683_s6 + $0x8] sm:$0xff] %vm1528_vm2, %v1465_v26  ;;  %v1287_v23 = vpop.permute.xlu1 %1286  ;;  %v2937_v26 = vld [vmem:[#allocation11_spill] sm:$0xff] }
 0x192   : > { %v1471_v58 = vmul.f32 %v1287_v23, %v2378_v7  ;;  %v1285_v60 = vpop.permute.xlu0 %1284 }
 0x193   : > { %1398 = vrot.lane.b32.xlu1 %v2211_v45, %s2220_s29  ;;  %v1470_v57 = vmul.f32 %v1285_v60, %v2371_v0 }
 0x194   : > { %1536 = vst.msk [vmem:[%s2683_s6 + $0x38] sm:$0xff] %vm1528_vm2, %v1471_v58  ;;  %v2938_v58 = vld [vmem:[#allocation10_spill] sm:$0xff] }
 0x195   : > { %1535 = vst.msk [vmem:[%s2683_s6 + $0x30] sm:$0xff] %vm1528_vm2, %v1470_v57 }
 0x196   : > { %v1349_v56 = vpop.permute.xlu0 %1348 }
 0x197   : > { %v1502_v53 = vmul.f32 %v1349_v56, %v2374_v2  ;;  %v2931_v2 = vld [vmem:[#allocation2_spill] sm:$0xff]  ;;  %v2939_v56 = vld [vmem:[#allocation8_spill] sm:$0xff] }
 0x199   : > { %1567 = vst.msk [vmem:[%s2683_s6 + $0x130] sm:$0xff] %vm1528_vm2, %v1502_v53 }
 0x19a   : > { %v1281_v16 = vpop.permute.xlu0 %1280 }
 0x19b   : > { %v1468_v27 = vmul.f32 %v1281_v16, %v2381_v10  ;;  %v2932_v10 = vld [vmem:[#allocation3_spill] sm:$0xff] }
 0x19c   : > { %v1351_v36 = vpop.permute.xlu1 %1350 }
 0x19d   : > { %v1503_v7 = vmul.f32 %v1351_v36, %v2400_v47  ;;  %1533 = vst.msk [vmem:[%s2683_s6 + $0x20] sm:$0xff] %vm1528_vm2, %v1468_v27  ;;  %v2940_v27 = vld [vmem:[#allocation14_spill] sm:$0xff] }
 0x19e   : > { %v1345_v0 = vpop.permute.xlu0 %1344 }
 0x19f   : > { %1568 = vst.msk [vmem:[%s2683_s6 + $0x138] sm:$0xff] %vm1528_vm2, %v1503_v7  ;;  %v1500_v63 = vmul.f32 %v1345_v0, %v2397_v43  ;;  %v2934_v43 = vld [vmem:[#allocation7_spill] sm:$0xff]  ;;  %v2941_v0 = vld [vmem:[#allocation13_spill] sm:$0xff] }
 0x1a0   : > { %v1283_v31 = vpop.permute.xlu1 %1282 }
 0x1a1   : > { %v1469_v40 = vmul.f32 %v1283_v31, %v2931_v2  ;;  %1565 = vst.msk [vmem:[%s2683_s6 + $0x120] sm:$0xff] %vm1528_vm2, %v1500_v63 }
 0x1a3   : > { %v1293_v37 = vpop.permute.xlu0 %1292  ;;  %1534 = vst.msk [vmem:[%s2683_s6 + $0x28] sm:$0xff] %vm1528_vm2, %v1469_v40  ;;  %v2942_v40 = vld [vmem:[#allocation17_spill] sm:$0xff] }
 0x1a4   : > { %v1474_v47 = vmul.f32 %v1293_v37, %v2932_v10  ;;  %v1347_v41 = vpop.permute.xlu1 %1346  ;;  %v2943_v10 = vld [vmem:[#allocation16_spill] sm:$0xff] }
 0x1a5   : > { %v1501_v61 = vmul.f32 %v1347_v41, %v2933_v1 }
 0x1a6   : > { %1539 = vst.msk [vmem:[%s2683_s6 + $0x50] sm:$0xff] %vm1528_vm2, %v1474_v47 }
 0x1a7   : > { %v1357_v34 = vpop.permute.xlu0 %1356  ;;  %1566 = vst.msk [vmem:[%s2683_s6 + $0x128] sm:$0xff] %vm1528_vm2, %v1501_v61  ;;  %v2944_v61 = vld [vmem:[#allocation15_spill] sm:$0xff] }
 0x1a8   : > { %v1506_v17 = vmul.f32 %v1357_v34, %v2934_v43  ;;  %v1295_v50 = vpop.permute.xlu1 %1294  ;;  %v2945_v43 = vld [vmem:[#allocation19_spill] sm:$0xff] }
 0x1a9   : > { %v1475_v44 = vmul.f32 %v1295_v50, %v2935_v21 }
 0x1aa   : > { %1571 = vst.msk [vmem:[%s2683_s6 + $0x150] sm:$0xff] %vm1528_vm2, %v1506_v17 }
 0x1ab   : > { %v1289_v5 = vpop.permute.xlu0 %1288  ;;  %1540 = vst.msk [vmem:[%s2683_s6 + $0x58] sm:$0xff] %vm1528_vm2, %v1475_v44  ;;  %v2946_v44 = vld [vmem:[#allocation20_spill] sm:$0xff] }
 0x1ac   : > { %v1472_v4 = vmul.f32 %v1289_v5, %v2936_v15  ;;  %v1359_v51 = vpop.permute.xlu1 %1358  ;;  %v2947_v15 = vld [vmem:[#allocation18_spill] sm:$0xff] }
 0x1ad   : > { %v1507_v45 = vmul.f32 %v1359_v51, %v2937_v26 }
 0x1ae   : > { %1537 = vst.msk [vmem:[%s2683_s6 + $0x40] sm:$0xff] %vm1528_vm2, %v1472_v4 }
 0x1af   : > { %v1353_v23 = vpop.permute.xlu0 %1352  ;;  %1572 = vst.msk [vmem:[%s2683_s6 + $0x158] sm:$0xff] %vm1528_vm2, %v1507_v45 }
 0x1b0   : > { %v1504_v60 = vmul.f32 %v1353_v23, %v2938_v58  ;;  %v1291_v57 = vpop.permute.xlu1 %1290  ;;  %v2948_v23 = vld [vmem:[#allocation9_spill] sm:$0xff] }
 0x1b1   : > { %v1473_v53 = vmul.f32 %v1291_v57, %v2939_v56 }
 0x1b2   : > { %1569 = vst.msk [vmem:[%s2683_s6 + $0x140] sm:$0xff] %vm1528_vm2, %v1504_v60 }
 0x1b3   : > { %v1301_v16 = vpop.permute.xlu0 %1300  ;;  %1538 = vst.msk [vmem:[%s2683_s6 + $0x48] sm:$0xff] %vm1528_vm2, %v1473_v53 }
 0x1b4   : > { %v1478_v36 = vmul.f32 %v1301_v16, %v2940_v27  ;;  %v1355_v7 = vpop.permute.xlu1 %1354 }
 0x1b5   : > { %v1505_v63 = vmul.f32 %v1355_v7, %v2941_v0  ;;  %v2949_v0 = vld [vmem:[#allocation12_spill] sm:$0xff] }
 0x1b6   : > { %1543 = vst.msk [vmem:[%s2683_s6 + $0x70] sm:$0xff] %vm1528_vm2, %v1478_v36 }
 0x1b7   : > { %1570 = vst.msk [vmem:[%s2683_s6 + $0x148] sm:$0xff] %vm1528_vm2, %v1505_v63 }
 0x1b8   : > { %v1365_v31 = vpop.permute.xlu0 %1364 }
 0x1b9   : > { %v1303_v2 = vpop.permute.xlu1 %1302  ;;  %v1510_v37 = vmul.f32 %v1365_v31, %v2942_v40 }
 0x1ba   : > { %v1479_v47 = vmul.f32 %v1303_v2, %v2943_v10 }
 0x1bb   : > { %1575 = vst.msk [vmem:[%s2683_s6 + $0x170] sm:$0xff] %vm1528_vm2, %v1510_v37 }
 0x1bc   : > { %1544 = vst.msk [vmem:[%s2683_s6 + $0x78] sm:$0xff] %vm1528_vm2, %v1479_v47  ;;  %v1297_v41 = vpop.permute.xlu0 %1296 }
 0x1bd   : > { %v1367_v1 = vpop.permute.xlu1 %1366  ;;  %v1476_v34 = vmul.f32 %v1297_v41, %v2944_v61 }
 0x1be   : > { %v1511_v17 = vmul.f32 %v1367_v1, %v2945_v43 }
 0x1bf   : > { %1541 = vst.msk [vmem:[%s2683_s6 + $0x60] sm:$0xff] %vm1528_vm2, %v1476_v34 }
 0x1c0   : > { %1576 = vst.msk [vmem:[%s2683_s6 + $0x178] sm:$0xff] %vm1528_vm2, %v1511_v17  ;;  %v1361_v50 = vpop.permute.xlu0 %1360 }
 0x1c1   : > { %v1299_v21 = vpop.permute.xlu1 %1298  ;;  %v1508_v5 = vmul.f32 %v1361_v50, %v2946_v44 }
 0x1c2   : > { %v1477_v4 = vmul.f32 %v1299_v21, %v2947_v15 }
 0x1c3   : > { %1573 = vst.msk [vmem:[%s2683_s6 + $0x160] sm:$0xff] %vm1528_vm2, %v1508_v5 }
 0x1c4   : > { %1542 = vst.msk [vmem:[%s2683_s6 + $0x68] sm:$0xff] %vm1528_vm2, %v1477_v4  ;;  %v1309_v51 = vpop.permute.xlu0 %1308 }
 0x1c5   : > { %v1363_v26 = vpop.permute.xlu1 %1362  ;;  %v1482_v45 = vmul.f32 %v1309_v51, %v2454_v33 }
 0x1c6   : > { %v1509_v58 = vmul.f32 %v1363_v26, %v2948_v23 }
 0x1c7   : > { %1547 = vst.msk [vmem:[%s2683_s6 + $0x90] sm:$0xff] %vm1528_vm2, %v1482_v45 }
 0x1c8   : > { %1574 = vst.msk [vmem:[%s2683_s6 + $0x168] sm:$0xff] %vm1528_vm2, %v1509_v58  ;;  %v1373_v60 = vpop.permute.xlu0 %1372 }
 0x1c9   : > { %v1311_v57 = vpop.permute.xlu1 %1310  ;;  %v1514_v56 = vmul.f32 %v1373_v60, %v2457_v35 }
 0x1ca   : > { %v1483_v53 = vmul.f32 %v1311_v57, %v2470_v55 }
 0x1cb   : > { %1579 = vst.msk [vmem:[%s2683_s6 + $0x190] sm:$0xff] %vm1528_vm2, %v1514_v56 }
 0x1cc   : > { %1548 = vst.msk [vmem:[%s2683_s6 + $0x98] sm:$0xff] %vm1528_vm2, %v1483_v53  ;;  %v1305_v16 = vpop.permute.xlu0 %1304 }
 0x1cd   : > { %v1375_v33 = vpop.permute.xlu1 %1374  ;;  %v1480_v27 = vmul.f32 %v1305_v16, %v2464_v39 }
 0x1ce   : > { %v1515_v36 = vmul.f32 %v1375_v33, %v2479_v12 }
 0x1cf   : > { %1545 = vst.msk [vmem:[%s2683_s6 + $0x80] sm:$0xff] %vm1528_vm2, %v1480_v27 }
 0x1d0   : > { %1580 = vst.msk [vmem:[%s2683_s6 + $0x198] sm:$0xff] %vm1528_vm2, %v1515_v36  ;;  %v1369_v7 = vpop.permute.xlu0 %1368 }
 0x1d1   : > { %v1307_v35 = vpop.permute.xlu1 %1306  ;;  %v1512_v55 = vmul.f32 %v1369_v7, %v2467_v46 }
 0x1d2   : > { %v1481_v63 = vmul.f32 %v1307_v35, %v2949_v0 }
 0x1d3   : > { %1577 = vst.msk [vmem:[%s2683_s6 + $0x180] sm:$0xff] %vm1528_vm2, %v1512_v55 }
 0x1d4   : > { %1546 = vst.msk [vmem:[%s2683_s6 + $0x88] sm:$0xff] %vm1528_vm2, %v1481_v63  ;;  %v1317_v31 = vpop.permute.xlu0 %1316 }
 0x1d5   : > { %v1371_v39 = vpop.permute.xlu1 %1370  ;;  %v1486_v12 = vmul.f32 %v1317_v31, %v2499_v32 }
 0x1d6   : > { %v1513_v2 = vmul.f32 %v1371_v39, %v2482_v14 }
 0x1d7   : > { %1551 = vst.msk [vmem:[%s2683_s6 + $0xb0] sm:$0xff] %vm1528_vm2, %v1486_v12 }
 0x1d8   : > { %1578 = vst.msk [vmem:[%s2683_s6 + $0x188] sm:$0xff] %vm1528_vm2, %v1513_v2  ;;  %v1381_v40 = vpop.permute.xlu0 %1380 }
 0x1d9   : > { %v1319_v46 = vpop.permute.xlu1 %1318  ;;  %v1518_v37 = vmul.f32 %v1381_v40, %v2502_v30 }
 0x1da   : > { %v1487_v10 = vmul.f32 %v1319_v46, %v2512_v8 }
 0x1db   : > { %1583 = vst.msk [vmem:[%s2683_s6 + $0x1b0] sm:$0xff] %vm1528_vm2, %v1518_v37 }
 0x1dc   : > { %1552 = vst.msk [vmem:[%s2683_s6 + $0xb8] sm:$0xff] %vm1528_vm2, %v1487_v10  ;;  %v1313_v47 = vpop.permute.xlu0 %1312 }
 0x1dd   : > { %v1383_v32 = vpop.permute.xlu1 %1382  ;;  %v1484_v14 = vmul.f32 %v1313_v47, %v2506_v42 }
 0x1de   : > { %v1519_v41 = vmul.f32 %v1383_v32, %v2523_v22 }
 0x1df   : > { %1549 = vst.msk [vmem:[%s2683_s6 + $0xa0] sm:$0xff] %vm1528_vm2, %v1484_v14 }
 0x1e0   : > { %1584 = vst.msk [vmem:[%s2683_s6 + $0x1b8] sm:$0xff] %vm1528_vm2, %v1519_v41  ;;  %v1377_v1 = vpop.permute.xlu0 %1376 }
 0x1e1   : > { %v1315_v30 = vpop.permute.xlu1 %1314  ;;  %v1516_v8 = vmul.f32 %v1377_v1, %v2509_v54 }
 0x1e2   : > { %v1485_v61 = vmul.f32 %v1315_v30, %v2516_v25 }
 0x1e3   : > { %1581 = vst.msk [vmem:[%s2683_s6 + $0x1a0] sm:$0xff] %vm1528_vm2, %v1516_v8 }
 0x1e4   : > { %1550 = vst.msk [vmem:[%s2683_s6 + $0xa8] sm:$0xff] %vm1528_vm2, %v1485_v61  ;;  %v1325_v34 = vpop.permute.xlu0 %1324 }
 0x1e5   : > { %v1379_v42 = vpop.permute.xlu1 %1378  ;;  %v1490_v22 = vmul.f32 %v1325_v34, %v2538_v11 }
 0x1e6   : > { %v1517_v43 = vmul.f32 %v1379_v42, %v2526_v24 }
 0x1e7   : > { %1555 = vst.msk [vmem:[%s2683_s6 + $0xd0] sm:$0xff] %vm1528_vm2, %v1490_v22 }
 0x1e8   : > { %1582 = vst.msk [vmem:[%s2683_s6 + $0x1a8] sm:$0xff] %vm1528_vm2, %v1517_v43 }
 0x1e9   : > { %v1327_v54 = vpop.permute.xlu1 %1326  ;;  %v1389_v17 = vpop.permute.xlu0 %1388 }
 0x1ea   : > { %v1491_v25 = vmul.f32 %v1327_v54, %v2544_v28  ;;  %v1522_v50 = vmul.f32 %v1389_v17, %v2547_v48 }
 0x1ec   : > { %1556 = vst.msk [vmem:[%s2683_s6 + $0xd8] sm:$0xff] %vm1528_vm2, %v1491_v25  ;;  %1587 = vst.msk [vmem:[%s2683_s6 + $0x1d0] sm:$0xff] %vm1528_vm2, %v1522_v50 }
 0x1ed   : > { %v1391_v21 = vpop.permute.xlu1 %1390  ;;  %v1321_v11 = vpop.permute.xlu0 %1320 }
 0x1ee   : > { %v1523_v24 = vmul.f32 %v1391_v21, %v2571_v3  ;;  %v1488_v44 = vmul.f32 %v1321_v11, %v2541_v59 }
 0x1f0   : > { %1588 = vst.msk [vmem:[%s2683_s6 + $0x1d8] sm:$0xff] %vm1528_vm2, %v1523_v24  ;;  %1553 = vst.msk [vmem:[%s2683_s6 + $0xc0] sm:$0xff] %vm1528_vm2, %v1488_v44 }
 0x1f1   : > { %v1323_v5 = vpop.permute.xlu1 %1322  ;;  %v1385_v48 = vpop.permute.xlu0 %1384 }
 0x1f2   : > { %v1489_v28 = vmul.f32 %v1323_v5, %v2559_v29  ;;  %v1520_v15 = vmul.f32 %v1385_v48, %v2564_v19 }
 0x1f4   : > { %1554 = vst.msk [vmem:[%s2683_s6 + $0xc8] sm:$0xff] %vm1528_vm2, %v1489_v28  ;;  %1585 = vst.msk [vmem:[%s2683_s6 + $0x1c0] sm:$0xff] %vm1528_vm2, %v1520_v15 }
 0x1f5   : > { %v1387_v4 = vpop.permute.xlu1 %1386  ;;  %v1333_v3 = vpop.permute.xlu0 %1332 }
 0x1f6   : > { %v1521_v59 = vmul.f32 %v1387_v4, %v2574_v49  ;;  %v1494_v51 = vmul.f32 %v1333_v3, %v2580_v62 }
 0x1f8   : > { %1586 = vst.msk [vmem:[%s2683_s6 + $0x1c8] sm:$0xff] %vm1528_vm2, %v1521_v59  ;;  %1559 = vst.msk [vmem:[%s2683_s6 + $0xf0] sm:$0xff] %vm1528_vm2, %v1494_v51 }
 0x1f9   : > { %v1335_v26 = vpop.permute.xlu1 %1334  ;;  %v1329_v19 = vpop.permute.xlu0 %1328 }
 0x1fa   : > { %v1495_v29 = vmul.f32 %v1335_v26, %v2594_v13  ;;  %v1492_v45 = vmul.f32 %v1329_v19, %v2584_v6 }
 0x1fc   : > { %1560 = vst.msk [vmem:[%s2683_s6 + $0xf8] sm:$0xff] %vm1528_vm2, %v1495_v29  ;;  %1557 = vst.msk [vmem:[%s2683_s6 + $0xe0] sm:$0xff] %vm1528_vm2, %v1492_v45 }
 0x1fd   : > { %v1331_v49 = vpop.permute.xlu1 %1330  ;;  %v1393_v23 = vpop.permute.xlu0 %1392 }
 0x1fe   : > { %v1493_v62 = vmul.f32 %v1331_v49, %v2602_v9  ;;  %v1524_v58 = vmul.f32 %v1393_v23, %v2590_v38 }
 0x200   : > { %1558 = vst.msk [vmem:[%s2683_s6 + $0xe8] sm:$0xff] %vm1528_vm2, %v1493_v62  ;;  %1589 = vst.msk [vmem:[%s2683_s6 + $0x1e0] sm:$0xff] %vm1528_vm2, %v1524_v58 }
 0x201   : > { %v1395_v60 = vpop.permute.xlu1 %1394  ;;  %v1397_v57 = vpop.permute.xlu0 %1396 }
 0x202   : > { %v1525_v13 = vmul.f32 %v1395_v60, %v2607_v52  ;;  %v1526_v6 = vmul.f32 %v1397_v57, %v2587_v20 }
 0x204   : > { %1590 = vst.msk [vmem:[%s2683_s6 + $0x1e8] sm:$0xff] %vm1528_vm2, %v1525_v13  ;;  %1591 = vst.msk [vmem:[%s2683_s6 + $0x1f0] sm:$0xff] %vm1528_vm2, %v1526_v6 }
 0x205   : > { %v1399_v56 = vpop.permute.xlu1 %1398 }
 0x206   : > { %v1527_v9 = vmul.f32 %v1399_v56, %v2597_v18 }
 0x208   : > { %1592 = vst.msk [vmem:[%s2683_s6 + $0x1f8] sm:$0xff] %vm1528_vm2, %v1527_v9 }
 0x209 PF: > { %s13_s12 = sadd.s32 1, %s2218_s12  }
 0x20a   : > { %p10_p4 = scmp.ge.s32.totalorder %s13_s12, 6  }
 0x20c   :  { %12 = sbr.rel (!%p10_p4) target bundleno = 1 (0x1), region = 62 }

// kernel: encoder_z_prior.7
= control target key start
LH: loop header
LB: loop body
LE: loop exit
PB: predicated region body
PF: predicated region fallthrough
CT: control target
= control target key end

     0   :  { %v2481_v0 = vmov 0   ;;  %v2482_v2 = vmov 0.0   ;;  %vm2483_vm0 = vmmov 0   ;;  %vm634_vm1 = vcmask 261120   ;;  %s2484_s30 = smov 96   ;;  %s3506_s1 = inlined_call_operand.vmem [shape: bf16[288,64], index: 1, kind: input, shape index: {}]   ;;  %s3507_s0 = inlined_call_operand.vmem [shape: bf16[392,288], index: 0, kind: input, shape index: {}]   ;;  %s3508_s2 = inlined_call_operand.vmem [shape: f32[1,64], index: 2, kind: input, shape index: {}]   ;;  %s3509_s3 = inlined_call_operand.vmem [shape: f32[392,32], index: 3, kind: output, shape index: {}]  }
   0x1   :  { %710 = vmatprep.subr.bf16.mxu1 %v2481_v0  ;;  %v2167_v1 = vld [vmem:[%s3506_s1] sm:$0xff]   ;;  %1961 = vmatprep.subr.bf16.mxu0 %v2482_v2  ;;  %v2168_v3 = vld [vmem:[%s3506_s1 + $0x8] sm:$0xff]   ;;  %v2169_v4 = vld [vmem:[%s3506_s1 + $0x10] sm:$0xff]  }
   0x2   :  { %1965 = vmatprep.mubr.msk.bf16.mxu0 %vm2483_vm0, %v2482_v2  ;;  %711 = vmatpush1.bf16.msra.mxu1 %v2167_v1  ;;  %v2170_v5 = vld [vmem:[%s3506_s1 + $0x18] sm:$0xff]   ;;  %v2171_v6 = vld [vmem:[%s3506_s1 + $0x20] sm:$0xff]   ;;  %v2183_v8 = vld [vmem:[%s3506_s1 + $0x88] sm:$0xff]  }
   0x3   :  { %712 = vmatprep.subr.bf16.mxu1 %v2481_v0  ;;  %v2181_v7 = vld [vmem:[%s3506_s1 + $0x80] sm:$0xff]   ;;  %v2172_v9 = vld [vmem:[%s3506_s1 + $0x28] sm:$0xff]   ;;  %v2173_v12 = vld [vmem:[%s3506_s1 + $0x30] sm:$0xff]  }
   0x4   :  { %1962 = vmatpush3.bf16.msra.mxu0 %v2181_v7  ;;  %v2187_v10 = vld [vmem:[%s3507_s0 + $0x4] ss:$12 sps:$4 sm:$0xff]   ;;  %v2188_v11 = vld [vmem:[%s3507_s0 + $0x8] ss:$12 sps:$4 sm:$0xff]   ;;  %v2174_v13 = vld [vmem:[%s3506_s1 + $0x38] sm:$0xff]  }
   0x5   :  { %1963 = vmatprep.subr.bf16.mxu0 %v2482_v2  ;;  %742 = vmatprep.mubr.bf16.mxu1 %v2187_v10  ;;  %v2191_v14 = vld [vmem:[%s3507_s0 + $0x20] ss:$12 sps:$4 sm:$0xff]   ;;  %v2195_v17 = vld [vmem:[%s3507_s0 + $0x38] ss:$12 sps:$4 sm:$0xff]   ;;  %v2177_v18 = vld [vmem:[%s3506_s1 + $0x50] sm:$0xff]  }
   0x6   :  { %713 = vmatpush1.bf16.msra.mxu1 %v2168_v3  ;;  %v2175_v15 = vld [vmem:[%s3506_s1 + $0x40] sm:$0xff]   ;;  %v2176_v16 = vld [vmem:[%s3506_s1 + $0x48] sm:$0xff]   ;;  %v2178_v19 = vld [vmem:[%s3506_s1 + $0x58] sm:$0xff]  }
   0x7   :  { %714 = vmatprep.subr.bf16.mxu1 %v2481_v0  ;;  %v2199_v20 = vld [vmem:[%s3507_s0 + $0x50] ss:$12 sps:$4 sm:$0xff]   ;;  %v2179_v21 = vld [vmem:[%s3506_s1 + $0x60] sm:$0xff]   ;;  %v2180_v22 = vld [vmem:[%s3506_s1 + $0x68] sm:$0xff]  }
   0x8   :  { %1964 = vmatpush3.bf16.msra.mxu0 %v2183_v8  ;;  %v2203_v23 = vld [vmem:[%s3507_s0 + $0x68] ss:$12 sps:$4 sm:$0xff]   ;;  %v2184_v25 = vld [vmem:[%s3506_s1 + $0x78] sm:$0xff]   ;;  %v2207_v26 = vld [vmem:[%s3507_s0 + $0x80] ss:$12 sps:$4 sm:$0xff]  }
   0x9   :  { %v2182_v24 = vld [vmem:[%s3506_s1 + $0x70] sm:$0xff]   ;;  %v2185_v27 = vld [vmem:[%s3507_s0] ss:$12 sps:$4 sm:$0xff]   ;;  %v2189_v28 = vld [vmem:[%s3507_s0 + $0x1c] ss:$12 sps:$4 sm:$0xff]  }
   0xa   :  { %715 = vmatpush1.bf16.msra.mxu1 %v2169_v4  ;;  %v2211_v29 = vld [vmem:[%s3507_s0 + $0x98] ss:$12 sps:$4 sm:$0xff]   ;;  %v2193_v31 = vld [vmem:[%s3507_s0 + $0x34] ss:$12 sps:$4 sm:$0xff]   ;;  %v2215_v32 = vld [vmem:[%s3507_s0 + $0xb0] ss:$12 sps:$4 sm:$0xff]  }
   0xb   :  { %716 = vmatprep.subr.bf16.mxu1 %v2481_v0  ;;  %1966 = vmatmul.mubr.msk.bf16.vlgmr.msra.gmra.mrb[0].mxu0 %vm634_vm1, %v2188_v11  ;;  %v2192_v30 = vld [vmem:[%s3507_s0 + $0x18] ss:$12 sps:$4 sm:$0xff]   ;;  %v2196_v33 = vld [vmem:[%s3507_s0 + $0x30] ss:$12 sps:$4 sm:$0xff]   ;;  %v2219_v35 = vld [vmem:[%s3507_s0 + $0xc8] ss:$12 sps:$4 sm:$0xff]  }
   0xc   :  { %1969 = vmatprep.mubr.msk.bf16.mxu0 %vm2483_vm0, %v2482_v2  ;;  %v2197_v34 = vld [vmem:[%s3507_s0 + $0x4c] ss:$12 sps:$4 sm:$0xff]   ;;  %v2200_v36 = vld [vmem:[%s3507_s0 + $0x48] ss:$12 sps:$4 sm:$0xff]   ;;  %v2201_v37 = vld [vmem:[%s3507_s0 + $0x64] ss:$12 sps:$4 sm:$0xff]  }
   0xd   :  { %v2223_v38 = vld [vmem:[%s3507_s0 + $0xe0] ss:$12 sps:$4 sm:$0xff]   ;;  %v2205_v40 = vld [vmem:[%s3507_s0 + $0x7c] ss:$12 sps:$4 sm:$0xff]   ;;  %v2227_v41 = vld [vmem:[%s3507_s0 + $0xf8] ss:$12 sps:$4 sm:$0xff]  }
   0xe   :  { %717 = vmatpush1.bf16.msra.mxu1 %v2170_v5  ;;  %v2204_v39 = vld [vmem:[%s3507_s0 + $0x60] ss:$12 sps:$4 sm:$0xff]   ;;  %v2208_v42 = vld [vmem:[%s3507_s0 + $0x78] ss:$12 sps:$4 sm:$0xff]   ;;  %v2231_v44 = vld [vmem:[%s3507_s0 + $0x110] ss:$12 sps:$4 sm:$0xff]  }
   0xf   :  { %718 = vmatprep.subr.bf16.mxu1 %v2481_v0  ;;  %v2209_v43 = vld [vmem:[%s3507_s0 + $0x94] ss:$12 sps:$4 sm:$0xff]   ;;  %v2212_v45 = vld [vmem:[%s3507_s0 + $0x90] ss:$12 sps:$4 sm:$0xff]   ;;  %v2213_v46 = vld [vmem:[%s3507_s0 + $0xac] ss:$12 sps:$4 sm:$0xff]  }
  0x10   :  { %v2235_v47 = vld [vmem:[%s3507_s0 + $0x128] ss:$12 sps:$4 sm:$0xff]   ;;  %v2217_v49 = vld [vmem:[%s3507_s0 + $0xc4] ss:$12 sps:$4 sm:$0xff]   ;;  %v2239_v50 = vld [vmem:[%s3507_s0 + $0x140] ss:$12 sps:$4 sm:$0xff]  }
  0x11   :  { %v2216_v48 = vld [vmem:[%s3507_s0 + $0xa8] ss:$12 sps:$4 sm:$0xff]   ;;  %v2220_v51 = vld [vmem:[%s3507_s0 + $0xc0] ss:$12 sps:$4 sm:$0xff]   ;;  %v2243_v53 = vld [vmem:[%s3507_s0 + $0x158] ss:$12 sps:$4 sm:$0xff]  }
  0x12   :  { %719 = vmatpush1.bf16.msra.mxu1 %v2171_v6  ;;  %v2221_v52 = vld [vmem:[%s3507_s0 + $0xdc] ss:$12 sps:$4 sm:$0xff]   ;;  %v2224_v54 = vld [vmem:[%s3507_s0 + $0xd8] ss:$12 sps:$4 sm:$0xff]   ;;  %v2225_v55 = vld [vmem:[%s3507_s0 + $0xf4] ss:$12 sps:$4 sm:$0xff]  }
  0x13   :  { %720 = vmatprep.subr.bf16.mxu1 %v2481_v0  ;;  %1970 = vmatmul.mubr.msk.bf16.gmra.mrb[4].mxu0 %vm634_vm1, %v2191_v14  ;;  %v2247_v56 = vld [vmem:[%s3507_s0 + $0x170] ss:$12 sps:$4 sm:$0xff]   ;;  %v2229_v58 = vld [vmem:[%s3507_s0 + $0x10c] ss:$12 sps:$4 sm:$0xff]   ;;  %v2251_v59 = vld [vmem:[%s3507_s0 + $0x188] ss:$12 sps:$4 sm:$0xff]  }
  0x14   :  { %1973 = vmatprep.mubr.msk.bf16.mxu0 %vm2483_vm0, %v2482_v2  ;;  %v2228_v57 = vld [vmem:[%s3507_s0 + $0xf0] ss:$12 sps:$4 sm:$0xff]   ;;  %v2232_v60 = vld [vmem:[%s3507_s0 + $0x108] ss:$12 sps:$4 sm:$0xff]   ;;  %v2255_v62 = vld [vmem:[%s3507_s0 + $0x1a0] ss:$12 sps:$4 sm:$0xff]  }
  0x15   :  { %v2233_v61 = vld [vmem:[%s3507_s0 + $0x124] ss:$12 sps:$4 sm:$0xff]   ;;  %v2236_v63 = vld [vmem:[%s3507_s0 + $0x120] ss:$12 sps:$4 sm:$0xff]   ;;  %v2267_v8 = vld [vmem:[%s3507_s0 + $0x1e8] ss:$12 sps:$4 sm:$0xff]  }
  0x16   :  { %721 = vmatpush1.bf16.msra.mxu1 %v2172_v9  ;;  %v2259_v1 = vld [vmem:[%s3507_s0 + $0x1b8] ss:$12 sps:$4 sm:$0xff]   ;;  %v2241_v4 = vld [vmem:[%s3507_s0 + $0x154] ss:$12 sps:$4 sm:$0xff]   ;;  %v2263_v5 = vld [vmem:[%s3507_s0 + $0x1d0] ss:$12 sps:$4 sm:$0xff]  }
  0x17   :  { %722 = vmatprep.subr.bf16.mxu1 %v2481_v0  ;;  %v2240_v3 = vld [vmem:[%s3507_s0 + $0x138] ss:$12 sps:$4 sm:$0xff]   ;;  %v2244_v6 = vld [vmem:[%s3507_s0 + $0x150] ss:$12 sps:$4 sm:$0xff]   ;;  %v2248_v9 = vld [vmem:[%s3507_s0 + $0x168] ss:$12 sps:$4 sm:$0xff]  }
  0x18   :  { %v2245_v7 = vld [vmem:[%s3507_s0 + $0x16c] ss:$12 sps:$4 sm:$0xff]   ;;  %v2249_v10 = vld [vmem:[%s3507_s0 + $0x184] ss:$12 sps:$4 sm:$0xff]  }
  0x19   :  { %v2271_v11 = vld [vmem:[%s3507_s0 + $0x200] ss:$12 sps:$4 sm:$0xff]   ;;  %v2275_v14 = vld [vmem:[%s3507_s0 + $0x218] ss:$12 sps:$4 sm:$0xff]  }
  0x1a   :  { %723 = vmatpush1.bf16.msra.mxu1 %v2173_v12  ;;  %v2252_v12 = vld [vmem:[%s3507_s0 + $0x180] ss:$12 sps:$4 sm:$0xff]  }
  0x1b   :  { %724 = vmatprep.subr.bf16.mxu1 %v2481_v0  ;;  %1974 = vmatmul.mubr.msk.bf16.gmra.mrb[8].mxu0 %vm634_vm1, %v2195_v17  ;;  %v2279_v17 = vld [vmem:[%s3507_s0 + $0x230] ss:$12 sps:$4 sm:$0xff]  }
  0x1c   :  { %1977 = vmatprep.mubr.msk.bf16.mxu0 %vm2483_vm0, %v2482_v2 }
  0x1e   :  { %725 = vmatpush1.bf16.msra.mxu1 %v2174_v13  ;;  %v2253_v13 = vld [vmem:[%s3507_s0 + $0x19c] ss:$12 sps:$4 sm:$0xff]  }
  0x1f   :  { %726 = vmatprep.subr.bf16.mxu1 %v2481_v0 }
  0x22   :  { %727 = vmatpush1.bf16.msra.mxu1 %v2175_v15  ;;  %v2256_v15 = vld [vmem:[%s3507_s0 + $0x198] ss:$12 sps:$4 sm:$0xff]  }
  0x23   :  { %728 = vmatprep.subr.bf16.mxu1 %v2481_v0  ;;  %1978 = vmatmul.mubr.msk.bf16.gmra.mrb[12].mxu0 %vm634_vm1, %v2199_v20  ;;  %v2282_v20 = vld [vmem:[%s3507_s0 + $0x248] ss:$0 sps:$4 sm:$0xff]  }
  0x24   :  { %1981 = vmatprep.mubr.msk.bf16.mxu0 %vm2483_vm0, %v2482_v2 }
  0x26   :  { %729 = vmatpush1.bf16.msra.mxu1 %v2176_v16  ;;  %v2257_v16 = vld [vmem:[%s3507_s0 + $0x1b4] ss:$12 sps:$4 sm:$0xff]  }
  0x27   :  { %730 = vmatprep.subr.bf16.mxu1 %v2481_v0 }
  0x2a   :  { %731 = vmatpush1.bf16.msra.mxu1 %v2177_v18  ;;  %v2260_v18 = vld [vmem:[%s3507_s0 + $0x1b0] ss:$12 sps:$4 sm:$0xff]  }
  0x2b   :  { %732 = vmatprep.subr.bf16.mxu1 %v2481_v0  ;;  %1982 = vmatmul.mubr.msk.bf16.gmra.mrb[16].mxu0 %vm634_vm1, %v2203_v23  ;;  %v2269_v23 = vld [vmem:[%s3507_s0 + $0x1fc] ss:$12 sps:$4 sm:$0xff]  }
  0x2c   :  { %1985 = vmatprep.mubr.msk.bf16.mxu0 %vm2483_vm0, %v2482_v2 }
  0x2e   :  { %733 = vmatpush1.bf16.msra.mxu1 %v2178_v19  ;;  %v2261_v19 = vld [vmem:[%s3507_s0 + $0x1cc] ss:$12 sps:$4 sm:$0xff]  }
  0x2f   :  { %734 = vmatprep.subr.bf16.mxu1 %v2481_v0 }
  0x32   :  { %735 = vmatpush1.bf16.msra.mxu1 %v2179_v21  ;;  %v2264_v21 = vld [vmem:[%s3507_s0 + $0x1c8] ss:$12 sps:$4 sm:$0xff]  }
  0x33   :  { %736 = vmatprep.subr.bf16.mxu1 %v2481_v0  ;;  %1986 = vmatmul.mubr.msk.bf16.gmra.mrb[20].mxu0 %vm634_vm1, %v2207_v26 }
  0x34   :  { %1989 = vmatprep.mubr.msk.bf16.mxu0 %vm2483_vm0, %v2482_v2 }
  0x36   :  { %737 = vmatpush1.bf16.msra.mxu1 %v2180_v22  ;;  %v2265_v22 = vld [vmem:[%s3507_s0 + $0x1e4] ss:$12 sps:$4 sm:$0xff]  }
  0x37   :  { %738 = vmatprep.subr.bf16.mxu1 %v2481_v0 }
  0x3a   :  { %739 = vmatpush1.bf16.msra.mxu1 %v2182_v24  ;;  %v2272_v24 = vld [vmem:[%s3507_s0 + $0x1f8] ss:$12 sps:$4 sm:$0xff]  }
  0x3b   :  { %740 = vmatprep.subr.bf16.mxu1 %v2481_v0  ;;  %1990 = vmatmul.mubr.msk.bf16.gmra.mrb[24].mxu0 %vm634_vm1, %v2211_v29  ;;  %v2237_v0 = vld [vmem:[%s3507_s0 + $0x13c] ss:$12 sps:$4 sm:$0xff]  }
  0x3c   :  { %1993 = vmatprep.mubr.msk.bf16.mxu0 %vm2483_vm0, %v2482_v2  ;;  %v2276_v29 = vld [vmem:[%s3507_s0 + $0x210] ss:$12 sps:$4 sm:$0xff]  }
  0x3e   :  { %741 = vmatpush1.bf16.msra.mxu1 %v2184_v25  ;;  %v2273_v25 = vld [vmem:[%s3507_s0 + $0x214] ss:$12 sps:$4 sm:$0xff]  }
  0x41   :  { %743 = vmatmul.mubr.bf16.vlgmr.msra.gmra.mrb[0].mxu1 %v2185_v27 }
  0x42   :  { %750 = vmatprep.mubr.bf16.mxu1 %v2189_v28 }
  0x43   :  { %1994 = vmatmul.mubr.msk.bf16.gmra.mrb[28].mxu0 %vm634_vm1, %v2215_v32 }
  0x44   :  { %1997 = vmatprep.mubr.msk.bf16.mxu0 %vm2483_vm0, %v2482_v2 }
  0x49   :  { %751 = vmatmul.mubr.bf16.gmra.mrb[4].mxu1 %v2192_v30 }
  0x4a   :  { %758 = vmatprep.mubr.bf16.mxu1 %v2193_v31  ;;  %v2277_v31 = vld [vmem:[%s3507_s0 + $0x22c] ss:$12 sps:$4 sm:$0xff]  }
  0x4b   :  { %1998 = vmatmul.mubr.msk.bf16.gmra.mrb[32].mxu0 %vm634_vm1, %v2219_v35 }
  0x4c   :  { %2001 = vmatprep.mubr.msk.bf16.mxu0 %vm2483_vm0, %v2482_v2 }
  0x51   :  { %759 = vmatmul.mubr.bf16.gmra.mrb[8].mxu1 %v2196_v33  ;;  %v111_v33 = vld [vmem:[%s3507_s0 + $0x240] sm:$0xff] }
  0x52   :  { %766 = vmatprep.mubr.bf16.mxu1 %v2197_v34 }
  0x53   :  { %2002 = vmatmul.mubr.msk.bf16.gmra.mrb[36].mxu0 %vm634_vm1, %v2223_v38  ;;  %v1840_v38 = vcombine.high %v111_v33, %v111_v33 }
  0x54   :  { %2005 = vmatprep.mubr.msk.bf16.mxu0 %vm2483_vm0, %v2482_v2 }
  0x59   :  { %767 = vmatmul.mubr.bf16.gmra.mrb[12].mxu1 %v2200_v36  ;;  %v2280_v36 = vld [vmem:[%s3507_s0 + $0x228] ss:$12 sps:$4 sm:$0xff]  }
  0x5a   :  { %774 = vmatprep.mubr.bf16.mxu1 %v2201_v37 }
  0x5b   :  { %2006 = vmatmul.mubr.msk.bf16.gmra.mrb[40].mxu0 %vm634_vm1, %v2227_v41 }
  0x5c   :  { %2009 = vmatprep.mubr.msk.bf16.mxu0 %vm2483_vm0, %v2482_v2 }
  0x61   :  { %775 = vmatmul.mubr.bf16.gmra.mrb[16].mxu1 %v2204_v39 }
  0x62   :  { %782 = vmatprep.mubr.bf16.mxu1 %v2205_v40 }
  0x63   :  { %2010 = vmatmul.mubr.msk.bf16.gmra.mrb[44].mxu0 %vm634_vm1, %v2231_v44 }
  0x64   :  { %2013 = vmatprep.mubr.msk.bf16.mxu0 %vm2483_vm0, %v2482_v2 }
  0x69   :  { %783 = vmatmul.mubr.bf16.gmra.mrb[20].mxu1 %v2208_v42  ;;  %v1839_v42 = vcombine.low %v111_v33, %v111_v33 }
  0x6a   :  { %790 = vmatprep.mubr.bf16.mxu1 %v2209_v43 }
  0x6b   :  { %2014 = vmatmul.mubr.msk.bf16.gmra.mrb[48].mxu0 %vm634_vm1, %v2235_v47 }
  0x6c   :  { %2017 = vmatprep.mubr.msk.bf16.mxu0 %vm2483_vm0, %v2482_v2 }
  0x71   :  { %791 = vmatmul.mubr.bf16.gmra.mrb[24].mxu1 %v2212_v45 }
  0x72   :  { %798 = vmatprep.mubr.bf16.mxu1 %v2213_v46 }
  0x73   :  { %2018 = vmatmul.mubr.msk.bf16.gmra.mrb[52].mxu0 %vm634_vm1, %v2239_v50 }
  0x74   :  { %2021 = vmatprep.mubr.msk.bf16.mxu0 %vm2483_vm0, %v2482_v2 }
  0x79   :  { %799 = vmatmul.mubr.bf16.gmra.mrb[28].mxu1 %v2216_v48 }
  0x7a   :  { %806 = vmatprep.mubr.bf16.mxu1 %v2217_v49 }
  0x7b   :  { %2022 = vmatmul.mubr.msk.bf16.gmra.mrb[56].mxu0 %vm634_vm1, %v2243_v53 }
  0x7c   :  { %2025 = vmatprep.mubr.msk.bf16.mxu0 %vm2483_vm0, %v2482_v2 }
  0x81   :  { %807 = vmatmul.mubr.bf16.gmra.mrb[32].mxu1 %v2220_v51 }
  0x82   :  { %814 = vmatprep.mubr.bf16.mxu1 %v2221_v52  ;;  %v2887_v52 = vld [vmem:[%s3508_s2] ss:$0 sm:$0xff] }
  0x83   :  { %2026 = vmatmul.mubr.msk.bf16.gmra.mrb[60].mxu0 %vm634_vm1, %v2247_v56 }
  0x84   :  { %2029 = vmatprep.mubr.msk.bf16.mxu0 %vm2483_vm0, %v2482_v2 }
  0x89   :  { %815 = vmatmul.mubr.bf16.gmra.mrb[36].mxu1 %v2224_v54 }
  0x8a   :  { %822 = vmatprep.mubr.bf16.mxu1 %v2225_v55 }
  0x8b   :  { %2030 = vmatmul.mubr.msk.bf16.gmra.mrb[64].mxu0 %vm634_vm1, %v2251_v59 }
  0x8c   :  { %2033 = vmatprep.mubr.msk.bf16.mxu0 %vm2483_vm0, %v2482_v2 }
  0x91   :  { %823 = vmatmul.mubr.bf16.gmra.mrb[40].mxu1 %v2228_v57 }
  0x92   :  { %830 = vmatprep.mubr.bf16.mxu1 %v2229_v58 }
  0x93   :  { %2034 = vmatmul.mubr.msk.bf16.gmra.mrb[68].mxu0 %vm634_vm1, %v2255_v62 }
  0x94   :  { %2037 = vmatprep.mubr.msk.bf16.mxu0 %vm2483_vm0, %v2482_v2 }
  0x99   :  { %831 = vmatmul.mubr.bf16.gmra.mrb[44].mxu1 %v2232_v60 }
  0x9a   :  { %838 = vmatprep.mubr.bf16.mxu1 %v2233_v61 }
  0x9b   :  { %2038 = vmatmul.mubr.msk.bf16.gmra.mrb[72].mxu0 %vm634_vm1, %v2259_v1 }
  0x9c   :  { %2041 = vmatprep.mubr.msk.bf16.mxu0 %vm2483_vm0, %v2482_v2 }
  0xa1   :  { %839 = vmatmul.mubr.bf16.gmra.mrb[48].mxu1 %v2236_v63 }
  0xa2   :  { %846 = vmatprep.mubr.bf16.mxu1 %v2237_v0 }
  0xa3   :  { %2042 = vmatmul.mubr.msk.bf16.gmra.mrb[76].mxu0 %vm634_vm1, %v2263_v5 }
  0xa4   :  { %2045 = vmatprep.mubr.msk.bf16.mxu0 %vm2483_vm0, %v2482_v2 }
  0xa9   :  { %847 = vmatmul.mubr.bf16.gmra.mrb[52].mxu1 %v2240_v3 }
  0xaa   :  { %854 = vmatprep.mubr.bf16.mxu1 %v2241_v4 }
  0xab   :  { %2046 = vmatmul.mubr.msk.bf16.gmra.mrb[80].mxu0 %vm634_vm1, %v2267_v8 }
  0xac   :  { %2049 = vmatprep.mubr.msk.bf16.mxu0 %vm2483_vm0, %v2482_v2 }
  0xb1   :  { %855 = vmatmul.mubr.bf16.gmra.mrb[56].mxu1 %v2244_v6 }
  0xb2   :  { %862 = vmatprep.mubr.bf16.mxu1 %v2245_v7 }
  0xb3   :  { %2050 = vmatmul.mubr.msk.bf16.gmra.mrb[84].mxu0 %vm634_vm1, %v2271_v11 }
  0xb4   :  { %2053 = vmatprep.mubr.msk.bf16.mxu0 %vm2483_vm0, %v2482_v2 }
  0xb9   :  { %863 = vmatmul.mubr.bf16.gmra.mrb[60].mxu1 %v2248_v9 }
  0xba   :  { %870 = vmatprep.mubr.bf16.mxu1 %v2249_v10 }
  0xbb   :  { %2054 = vmatmul.mubr.msk.bf16.gmra.mrb[88].mxu0 %vm634_vm1, %v2275_v14 }
  0xbc   :  { %2057 = vmatprep.mubr.msk.bf16.mxu0 %vm2483_vm0, %v2482_v2 }
  0xc1   :  { %871 = vmatmul.mubr.bf16.gmra.mrb[64].mxu1 %v2252_v12 }
  0xc2   :  { %878 = vmatprep.mubr.bf16.mxu1 %v2253_v13 }
  0xc3   :  { %2058 = vmatmul.mubr.msk.bf16.gmra.mrb[92].mxu0 %vm634_vm1, %v2279_v17 }
  0xc4   :  { %2061 = vmatprep.mubr.msk.bf16.mxu0 %vm2483_vm0, %v2482_v2  ;;  %v2268_v2 = vld [vmem:[%s3507_s0 + $0x1e0] ss:$12 sps:$4 sm:$0xff]  }
  0xc9   :  { %879 = vmatmul.mubr.bf16.gmra.mrb[68].mxu1 %v2256_v15 }
  0xca   :  { %886 = vmatprep.mubr.bf16.mxu1 %v2257_v16 }
  0xcb   :  { %2062 = vmatmul.mubr.msk.bf16.gmra.mrb[96].mxu0 %vm634_vm1, %v2282_v20 }
  0xd1   :  { %887 = vmatmul.mubr.bf16.gmra.mrb[72].mxu1 %v2260_v18 }
  0xd2   :  { %894 = vmatprep.mubr.bf16.mxu1 %v2261_v19 }
  0xd9   :  { %895 = vmatmul.mubr.bf16.gmra.mrb[76].mxu1 %v2264_v21 }
  0xda   :  { %902 = vmatprep.mubr.bf16.mxu1 %v2265_v22 }
  0xde   :  { %v976_v26 = vpop.f32.mrb[0].mxu0 }
  0xdf   :  { %v1967_v27 = vpop.f32.mrb[1].mxu0 }
  0xe0   :  { %v979_v28 = vpop.f32.mrb[2].mxu0 }
  0xe1   :  { %903 = vmatmul.mubr.bf16.gmra.mrb[80].mxu1 %v2268_v2  ;;  %v1968_v30 = vpop.f32.mrb[3].mxu0 }
  0xe2   :  { %910 = vmatprep.mubr.bf16.mxu1 %v2269_v23 }
  0xe6   :  { %v984_v32 = vpop.f32.mrb[4].mxu0 }
  0xe7   :  { %v1971_v34 = vpop.f32.mrb[5].mxu0 }
  0xe8   :  { %v987_v35 = vpop.f32.mrb[6].mxu0 }
  0xe9   :  { %911 = vmatmul.mubr.bf16.gmra.mrb[84].mxu1 %v2272_v24  ;;  %v1972_v37 = vpop.f32.mrb[7].mxu0 }
  0xea   :  { %918 = vmatprep.mubr.bf16.mxu1 %v2273_v25 }
  0xee   :  { %v992_v39 = vpop.f32.mrb[8].mxu0 }
  0xef   :  { %v1975_v40 = vpop.f32.mrb[9].mxu0 }
  0xf0   :  { %v2874_v41 = vpop.f32.mrb[10].mxu0 }
  0xf1   :  { %919 = vmatmul.mubr.bf16.gmra.mrb[88].mxu1 %v2276_v29  ;;  %v1976_v43 = vpop.f32.mrb[11].mxu0 }
  0xf2   :  { %926 = vmatprep.mubr.bf16.mxu1 %v2277_v31 }
  0xf6   :  { %v2876_v44 = vpop.f32.mrb[12].mxu0 }
  0xf7   :  { %v1979_v45 = vpop.f32.mrb[13].mxu0 }
  0xf8   :  { %v2878_v46 = vpop.f32.mrb[14].mxu0 }
  0xf9   :  { %927 = vmatmul.mubr.bf16.gmra.mrb[92].mxu1 %v2280_v36  ;;  %v1980_v47 = vpop.f32.mrb[15].mxu0 }
  0xfa   :  { %934 = vmatprep.mubr.bf16.mxu1 %v1840_v38 }
  0xfe   :  { %v2880_v48 = vpop.f32.mrb[16].mxu0 }
  0xff   :  { %v1983_v49 = vpop.f32.mrb[17].mxu0 }
 0x100   :  { %v2882_v50 = vpop.f32.mrb[18].mxu0 }
 0x101   :  { %935 = vmatmul.mubr.bf16.gmra.mrb[96].mxu1 %v1839_v42  ;;  %v1984_v51 = vpop.f32.mrb[19].mxu0 }
 0x106   :  { %v2889_v53 = vpop.f32.mrb[20].mxu0 }
 0x107   :  { %v1987_v54 = vpop.f32.mrb[21].mxu0 }
 0x108   :  { %v2891_v56 = vpop.f32.mrb[22].mxu0 }
 0x109   :  { %v1988_v59 = vpop.f32.mrb[23].mxu0 }
 0x10e   :  { %v2900_v3 = vpop.f32.mrb[24].mxu0 }
 0x10f   :  { %v1991_v5 = vpop.f32.mrb[25].mxu0 }
 0x110   :  { %v2903_v7 = vpop.f32.mrb[26].mxu0 }
 0x111   :  { %v1992_v10 = vpop.f32.mrb[27].mxu0 }
 0x114   :  { %v744_v55 = vpop.f32.mrb[0].mxu1 }
 0x115   :  { %v745_v57 = vadd.f32 %v2887_v52, %v744_v55  ;;  %v746_v58 = vpop.f32.mrb[1].mxu1 }
 0x116   :  { %v747_v60 = vpop.f32.mrb[2].mxu1  ;;  %v2912_v17 = vpop.f32.mrb[28].mxu0 }
 0x117   :  { %v2894_v61 = vadd.f32 %v976_v26, %v745_v57  ;;  %v748_v62 = vadd.f32 %v2887_v52, %v747_v60  ;;  %v749_v63 = vpop.f32.mrb[3].mxu1  ;;  %v1995_v19 = vpop.f32.mrb[29].mxu0 }
 0x118   :  { %v2915_v21 = vpop.f32.mrb[30].mxu0 }
 0x119   :  { %v1885_v0 = vmul.f32 -1.442695, %v2894_v61  ;;  %v2898_v1 = vadd.f32 %v979_v28, %v748_v62  ;;  %v1996_v24 = vpop.f32.mrb[31].mxu0 }
 0x11b   :  { %2284 = vpow2.f32 %v1885_v0  ;;  %v1886_v4 = vmul.f32 -1.442695, %v2898_v1 }
 0x11c   :  { %v752_v6 = vpop.f32.mrb[4].mxu1 }
 0x11d   :  { %2286 = vpow2.f32 %v1886_v4  ;;  %v753_v8 = vadd.f32 %v2887_v52, %v752_v6  ;;  %v754_v9 = vpop.f32.mrb[5].mxu1 }
 0x11e   :  { %v755_v11 = vpop.f32.mrb[6].mxu1  ;;  %v2925_v34 = vpop.f32.mrb[32].mxu0 }
 0x11f   :  { %v2906_v12 = vadd.f32 %v984_v32, %v753_v8  ;;  %v756_v13 = vadd.f32 %v2887_v52, %v755_v11  ;;  %v757_v14 = vpop.f32.mrb[7].mxu1  ;;  %v1999_v36 = vpop.f32.mrb[33].mxu0 }
 0x120   :  { %v2928_v38 = vpop.f32.mrb[34].mxu0 }
 0x121   :  { %v1887_v15 = vmul.f32 -1.442695, %v2906_v12  ;;  %v2910_v16 = vadd.f32 %v987_v35, %v756_v13  ;;  %v2000_v43 = vpop.f32.mrb[35].mxu0 }
 0x123   :  { %2288 = vpow2.f32 %v1887_v15  ;;  %v1888_v18 = vmul.f32 -1.442695, %v2910_v16 }
 0x124   :  { %v760_v20 = vpop.f32.mrb[8].mxu1 }
 0x125   :  { %v2285_v22 = vpop.eup %2284  ;;  %2290 = vpow2.f32 %v1888_v18  ;;  %v761_v2 = vadd.f32 %v2887_v52, %v760_v20  ;;  %v762_v23 = vpop.f32.mrb[9].mxu1 }
 0x126   :  { %v1321_v25 = vadd.f32 1.0, %v2285_v22  ;;  %v763_v26 = vpop.f32.mrb[10].mxu1  ;;  %v2939_v60 = vpop.f32.mrb[36].mxu0 }
 0x127   :  { %v2287_v27 = vpop.eup %2286  ;;  %v2918_v28 = vadd.f32 %v992_v39, %v761_v2  ;;  %v764_v29 = vadd.f32 %v2887_v52, %v763_v26  ;;  %v765_v30 = vpop.f32.mrb[11].mxu1 }
 0x128   :  { %2292 = vrcp.f32 %v1321_v25  ;;  %v1322_v31 = vadd.f32 1.0, %v2287_v27 }
 0x129   :  { %v1889_v32 = vmul.f32 -1.442695, %v2918_v28  ;;  %v2923_v33 = vadd.f32 %v2874_v41, %v764_v29 }
 0x12b   :  { %2294 = vpow2.f32 %v1889_v32  ;;  %v1890_v35 = vmul.f32 -1.442695, %v2923_v33 }
 0x12c   :  { %2296 = vrcp.f32 %v1322_v31  ;;  %v768_v37 = vpop.f32.mrb[12].mxu1 }
 0x12d   :  { %v2289_v39 = vpop.eup %2288  ;;  %2298 = vpow2.f32 %v1890_v35  ;;  %v769_v40 = vadd.f32 %v2887_v52, %v768_v37  ;;  %v770_v42 = vpop.f32.mrb[13].mxu1 }
 0x12e   :  { %v1323_v45 = vadd.f32 1.0, %v2289_v39  ;;  %v771_v47 = vpop.f32.mrb[14].mxu1 }
 0x12f   :  { %v2291_v41 = vpop.eup %2290  ;;  %v2932_v49 = vadd.f32 %v2876_v44, %v769_v40  ;;  %v772_v51 = vadd.f32 %v2887_v52, %v771_v47  ;;  %v773_v54 = vpop.f32.mrb[15].mxu1 }
 0x130   :  { %2300 = vrcp.f32 %v1323_v45  ;;  %v1324_v55 = vadd.f32 1.0, %v2291_v41  ;;  %v2003_v44 = vpop.f32.mrb[37].mxu0 }
 0x131   :  { %v1891_v57 = vmul.f32 -1.442695, %v2932_v49  ;;  %v2937_v58 = vadd.f32 %v2878_v46, %v772_v51  ;;  %v2943_v0 = vpop.f32.mrb[38].mxu0 }
 0x132   :  { %v2293_v59 = vpop.eup %2292  ;;  %v2004_v6 = vpop.f32.mrb[39].mxu0 }
 0x133   :  { %2302 = vpow2.f32 %v1891_v57  ;;  %v1892_v62 = vmul.f32 -1.442695, %v2937_v58  ;;  %1517 = vrot.lane.b32.xlu0 %v2293_v59, %s2484_s30  ;;  %v2955_v2 = vpop.f32.mrb[40].mxu0 }
 0x134   :  { %2304 = vrcp.f32 %v1324_v55  ;;  %v776_v63 = vpop.f32.mrb[16].mxu1  ;;  %v2007_v23 = vpop.f32.mrb[41].mxu0 }
 0x135   :  { %v2295_v4 = vpop.eup %2294  ;;  %2306 = vpow2.f32 %v1892_v62  ;;  %v777_v5 = vadd.f32 %v2887_v52, %v776_v63  ;;  %v778_v46 = vpop.f32.mrb[17].mxu1 }
 0x136   :  { %v2297_v8 = vpop.eup %2296  ;;  %v1325_v9 = vadd.f32 1.0, %v2295_v4  ;;  %v779_v10 = vpop.f32.mrb[18].mxu1 }
 0x137   :  { %v2299_v11 = vpop.eup %2298  ;;  %v2947_v13 = vadd.f32 %v2880_v48, %v777_v5  ;;  %v780_v14 = vadd.f32 %v2887_v52, %v779_v10  ;;  %v781_v15 = vpop.f32.mrb[19].mxu1  ;;  %1519 = vrot.lane.b32.xlu0 %v2297_v8, %s2484_s30 }
 0x138   :  { %2308 = vrcp.f32 %v1325_v9  ;;  %v1326_v18 = vadd.f32 1.0, %v2299_v11  ;;  %v2959_v25 = vpop.f32.mrb[42].mxu0 }
 0x139   :  { %v1893_v19 = vmul.f32 -1.442695, %v2947_v13  ;;  %v2953_v20 = vadd.f32 %v2882_v50, %v780_v14  ;;  %v2008_v50 = vpop.f32.mrb[43].mxu0 }
 0x13a   :  { %v2301_v22 = vpop.eup %2300  ;;  %2310 = vrcp.f32 %v1326_v18  ;;  %v2971_v47 = vpop.f32.mrb[44].mxu0 }
 0x13b   :  { %2312 = vpow2.f32 %v1893_v19  ;;  %v1894_v48 = vmul.f32 -1.442695, %v2953_v20  ;;  %1521 = vrot.lane.b32.xlu1 %v2301_v22, %s2484_s30  ;;  %v2011_v41 = vpop.f32.mrb[45].mxu0 }
 0x13c   :  { %v784_v24 = vpop.f32.mrb[20].mxu1  ;;  %v2975_v55 = vpop.f32.mrb[46].mxu0 }
 0x13d   :  { %v2303_v26 = vpop.eup %2302  ;;  %2314 = vpow2.f32 %v1894_v48  ;;  %v785_v27 = vadd.f32 %v2887_v52, %v784_v24  ;;  %v786_v29 = vpop.f32.mrb[21].mxu1 }
 0x13e   :  { %v2305_v30 = vpop.eup %2304  ;;  %v1327_v31 = vadd.f32 1.0, %v2303_v26  ;;  %v787_v32 = vpop.f32.mrb[22].mxu1 }
 0x13f   :  { %v2307_v35 = vpop.eup %2306  ;;  %v2963_v36 = vadd.f32 %v2889_v53, %v785_v27  ;;  %v788_v37 = vadd.f32 %v2887_v52, %v787_v32  ;;  %v789_v39 = vpop.f32.mrb[23].mxu1  ;;  %1523 = vrot.lane.b32.xlu1 %v2305_v30, %s2484_s30 }
 0x140   :  { %2316 = vrcp.f32 %v1327_v31  ;;  %v1328_v40 = vadd.f32 1.0, %v2307_v35  ;;  %v2012_v62 = vpop.f32.mrb[47].mxu0 }
 0x141   :  { %v1895_v42 = vmul.f32 -1.442695, %v2963_v36  ;;  %v2969_v43 = vadd.f32 %v2891_v56, %v788_v37  ;;  %v2987_v14 = vpop.f32.mrb[48].mxu0 }
 0x142   :  { %v2309_v45 = vpop.eup %2308  ;;  %2318 = vrcp.f32 %v1328_v40 }
 0x143   :  { %2320 = vpow2.f32 %v1895_v42  ;;  %v1896_v53 = vmul.f32 -1.442695, %v2969_v43  ;;  %1525 = vrot.lane.b32.xlu0 %v2309_v45, %s2484_s30 }
 0x144   :  { %v2311_v51 = vpop.eup %2310  ;;  %v792_v54 = vpop.f32.mrb[24].mxu1 }
 0x145   :  { %v2313_v57 = vpop.eup %2312  ;;  %2322 = vpow2.f32 %v1896_v53  ;;  %v793_v59 = vadd.f32 %v2887_v52, %v792_v54  ;;  %v794_v56 = vpop.f32.mrb[25].mxu1  ;;  %1527 = vrot.lane.b32.xlu1 %v2311_v51, %s2484_s30 }
 0x146   :  { %v1329_v44 = vadd.f32 1.0, %v2313_v57  ;;  %v795_v63 = vpop.f32.mrb[26].mxu1 }
 0x147   :  { %v2315_v4 = vpop.eup %2314  ;;  %v2980_v5 = vadd.f32 %v2900_v3, %v793_v59  ;;  %v796_v46 = vadd.f32 %v2887_v52, %v795_v63  ;;  %v797_v6 = vpop.f32.mrb[27].mxu1 }
 0x148   :  { %2324 = vrcp.f32 %v1329_v44  ;;  %v1330_v8 = vadd.f32 1.0, %v2315_v4  ;;  %v2015_v3 = vpop.f32.mrb[49].mxu0 }
 0x149   :  { %v1897_v9 = vmul.f32 -1.442695, %v2980_v5  ;;  %v2985_v10 = vadd.f32 %v2903_v7, %v796_v46  ;;  %v2991_v22 = vpop.f32.mrb[50].mxu0 }
 0x14a   :  { %v2317_v11 = vpop.eup %2316  ;;  %2326 = vrcp.f32 %v1330_v8  ;;  %v2016_v24 = vpop.f32.mrb[51].mxu0 }
 0x14b   :  { %2328 = vpow2.f32 %v1897_v9  ;;  %v1898_v15 = vmul.f32 -1.442695, %v2985_v10  ;;  %1529 = vrot.lane.b32.xlu0 %v2317_v11, %s2484_s30  ;;  %v3003_v40 = vpop.f32.mrb[52].mxu0 }
 0x14c   :  { %v2319_v18 = vpop.eup %2318  ;;  %v800_v19 = vpop.f32.mrb[28].mxu1 }
 0x14d   :  { %v2321_v48 = vpop.eup %2320  ;;  %2330 = vpow2.f32 %v1898_v15  ;;  %v801_v23 = vadd.f32 %v2887_v52, %v800_v19  ;;  %v802_v7 = vpop.f32.mrb[29].mxu1  ;;  %1531 = vrot.lane.b32.xlu1 %v2319_v18, %s2484_s30 }
 0x14e   :  { %v1331_v26 = vadd.f32 1.0, %v2321_v48  ;;  %v803_v27 = vpop.f32.mrb[30].mxu1 }
 0x14f   :  { %v2323_v29 = vpop.eup %2322  ;;  %v2996_v50 = vadd.f32 %v2912_v17, %v801_v23  ;;  %v804_v30 = vadd.f32 %v2887_v52, %v803_v27  ;;  %v805_v31 = vpop.f32.mrb[31].mxu1 }
 0x150   :  { %2332 = vrcp.f32 %v1331_v26  ;;  %v1332_v32 = vadd.f32 1.0, %v2323_v29  ;;  %v2019_v17 = vpop.f32.mrb[53].mxu0 }
 0x151   :  { %v1899_v35 = vmul.f32 -1.442695, %v2996_v50  ;;  %v3001_v37 = vadd.f32 %v2915_v21, %v804_v30  ;;  %v3007_v41 = vpop.f32.mrb[54].mxu0 }
 0x152   :  { %v2325_v39 = vpop.eup %2324  ;;  %2334 = vrcp.f32 %v1332_v32  ;;  %v2020_v57 = vpop.f32.mrb[55].mxu0 }
 0x153   :  { %2336 = vpow2.f32 %v1899_v35  ;;  %v1900_v42 = vmul.f32 -1.442695, %v3001_v37  ;;  %1533 = vrot.lane.b32.xlu0 %v2325_v39, %s2484_s30  ;;  %v3019_v11 = vpop.f32.mrb[56].mxu0 }
 0x154   :  { %v2327_v45 = vpop.eup %2326  ;;  %v808_v53 = vpop.f32.mrb[32].mxu1 }
 0x155   :  { %v2329_v51 = vpop.eup %2328  ;;  %2338 = vpow2.f32 %v1900_v42  ;;  %v809_v54 = vadd.f32 %v2887_v52, %v808_v53  ;;  %v810_v21 = vpop.f32.mrb[33].mxu1  ;;  %1535 = vrot.lane.b32.xlu1 %v2327_v45, %s2484_s30 }
 0x156   :  { %v1333_v59 = vadd.f32 1.0, %v2329_v51  ;;  %v811_v56 = vpop.f32.mrb[34].mxu1 }
 0x157   :  { %v2331_v62 = vpop.eup %2330  ;;  %v3012_v44 = vadd.f32 %v2925_v34, %v809_v54  ;;  %v812_v63 = vadd.f32 %v2887_v52, %v811_v56  ;;  %v813_v4 = vpop.f32.mrb[35].mxu1 }
 0x158   :  { %2340 = vrcp.f32 %v1333_v59  ;;  %v1334_v46 = vadd.f32 1.0, %v2331_v62  ;;  %v2023_v34 = vpop.f32.mrb[57].mxu0 }
 0x159   :  { %v1901_v6 = vmul.f32 -1.442695, %v3012_v44  ;;  %v3017_v8 = vadd.f32 %v2928_v38, %v812_v63  ;;  %v3023_v19 = vpop.f32.mrb[58].mxu0 }
 0x15a   :  { %v2333_v9 = vpop.eup %2332  ;;  %2342 = vrcp.f32 %v1334_v46  ;;  %v2024_v7 = vpop.f32.mrb[59].mxu0 }
 0x15b   :  { %2344 = vpow2.f32 %v1901_v6  ;;  %v1902_v15 = vmul.f32 -1.442695, %v3017_v8  ;;  %1537 = vrot.lane.b32.xlu0 %v2333_v9, %s2484_s30  ;;  %v3035_v17 = vpop.f32.mrb[60].mxu0 }
 0x15c   :  { %v2335_v3 = vpop.eup %2334  ;;  %v816_v18 = vpop.f32.mrb[36].mxu1 }
 0x15d   :  { %v2337_v48 = vpop.eup %2336  ;;  %2346 = vpow2.f32 %v1902_v15  ;;  %v817_v23 = vadd.f32 %v2887_v52, %v816_v18  ;;  %v818_v38 = vpop.f32.mrb[37].mxu1  ;;  %1539 = vrot.lane.b32.xlu1 %v2335_v3, %s2484_s30 }
 0x15e   :  { %v1335_v24 = vadd.f32 1.0, %v2337_v48  ;;  %v819_v26 = vpop.f32.mrb[38].mxu1 }
 0x15f   :  { %v2339_v27 = vpop.eup %2338  ;;  %v3028_v29 = vadd.f32 %v2939_v60, %v817_v23  ;;  %v820_v30 = vadd.f32 %v2887_v52, %v819_v26  ;;  %v821_v31 = vpop.f32.mrb[39].mxu1 }
 0x160   :  { %2348 = vrcp.f32 %v1335_v24  ;;  %v1336_v32 = vadd.f32 1.0, %v2339_v27  ;;  %v2027_v60 = vpop.f32.mrb[61].mxu0 }
 0x161   :  { %v1903_v35 = vmul.f32 -1.442695, %v3028_v29  ;;  %v3033_v39 = vadd.f32 %v2943_v0, %v820_v30  ;;  %v3039_v54 = vpop.f32.mrb[62].mxu0 }
 0x162   :  { %v2341_v42 = vpop.eup %2340  ;;  %2350 = vrcp.f32 %v1336_v32  ;;  %v2028_v59 = vpop.f32.mrb[63].mxu0 }
 0x163   :  { %2352 = vpow2.f32 %v1903_v35  ;;  %v1904_v45 = vmul.f32 -1.442695, %v3033_v39  ;;  %1541 = vrot.lane.b32.xlu0 %v2341_v42, %s2484_s30  ;;  %v3051_v18 = vpop.f32.mrb[64].mxu0 }
 0x164   :  { %v2343_v53 = vpop.eup %2342  ;;  %v824_v51 = vpop.f32.mrb[40].mxu1 }
 0x165   :  { %v2345_v21 = vpop.eup %2344  ;;  %2354 = vpow2.f32 %v1904_v45  ;;  %v825_v57 = vadd.f32 %v2887_v52, %v824_v51  ;;  %v826_v0 = vpop.f32.mrb[41].mxu1  ;;  %1543 = vrot.lane.b32.xlu1 %v2343_v53, %s2484_s30 }
 0x166   :  { %v1337_v56 = vadd.f32 1.0, %v2345_v21  ;;  %v827_v62 = vpop.f32.mrb[42].mxu1 }
 0x167   :  { %v2347_v63 = vpop.eup %2346  ;;  %v3044_v4 = vadd.f32 %v2955_v2, %v825_v57  ;;  %v828_v46 = vadd.f32 %v2887_v52, %v827_v62  ;;  %v829_v6 = vpop.f32.mrb[43].mxu1 }
 0x168   :  { %2356 = vrcp.f32 %v1337_v56  ;;  %v1338_v9 = vadd.f32 1.0, %v2347_v63  ;;  %v2031_v2 = vpop.f32.mrb[65].mxu0 }
 0x169   :  { %v1905_v15 = vmul.f32 -1.442695, %v3044_v4  ;;  %v3049_v34 = vadd.f32 %v2959_v25, %v828_v46  ;;  %v3055_v7 = vpop.f32.mrb[66].mxu0 }
 0x16a   :  { %v2349_v3 = vpop.eup %2348  ;;  %2358 = vrcp.f32 %v1338_v9  ;;  %v2032_v27 = vpop.f32.mrb[67].mxu0 }
 0x16b   :  { %2360 = vpow2.f32 %v1905_v15  ;;  %v1906_v48 = vmul.f32 -1.442695, %v3049_v34  ;;  %1545 = vrot.lane.b32.xlu0 %v2349_v3, %s2484_s30  ;;  %v3067_v57 = vpop.f32.mrb[68].mxu0 }
 0x16c   :  { %v2351_v23 = vpop.eup %2350  ;;  %v832_v38 = vpop.f32.mrb[44].mxu1 }
 0x16d   :  { %v2353_v24 = vpop.eup %2352  ;;  %2362 = vpow2.f32 %v1906_v48  ;;  %v833_v26 = vadd.f32 %v2887_v52, %v832_v38  ;;  %v834_v25 = vpop.f32.mrb[45].mxu1  ;;  %1547 = vrot.lane.b32.xlu1 %v2351_v23, %s2484_s30 }
 0x16e   :  { %v1339_v30 = vadd.f32 1.0, %v2353_v24  ;;  %v835_v31 = vpop.f32.mrb[46].mxu1 }
 0x16f   :  { %v2355_v32 = vpop.eup %2354  ;;  %v3060_v35 = vadd.f32 %v2971_v47, %v833_v26  ;;  %v836_v42 = vadd.f32 %v2887_v52, %v835_v31  ;;  %v837_v45 = vpop.f32.mrb[47].mxu1 }
 0x170   :  { %2364 = vrcp.f32 %v1339_v30  ;;  %v1340_v60 = vadd.f32 1.0, %v2355_v32  ;;  %v2035_v47 = vpop.f32.mrb[69].mxu0 }
 0x171   :  { %v1907_v53 = vmul.f32 -1.442695, %v3060_v35  ;;  %v3065_v51 = vadd.f32 %v2975_v55, %v836_v42  ;;  %v3071_v62 = vpop.f32.mrb[70].mxu0 }
 0x172   :  { %v2357_v21 = vpop.eup %2356  ;;  %2366 = vrcp.f32 %v1340_v60  ;;  %v2036_v6 = vpop.f32.mrb[71].mxu0 }
 0x173   :  { %2368 = vpow2.f32 %v1907_v53  ;;  %v1908_v0 = vmul.f32 -1.442695, %v3065_v51  ;;  %1549 = vrot.lane.b32.xlu0 %v2357_v21, %s2484_s30  ;;  %v3083_v27 = vpop.f32.mrb[72].mxu0 }
 0x174   :  { %v2359_v59 = vpop.eup %2358  ;;  %v840_v56 = vpop.f32.mrb[48].mxu1 }
 0x175   :  { %v2361_v63 = vpop.eup %2360  ;;  %2370 = vpow2.f32 %v1908_v0  ;;  %v841_v46 = vadd.f32 %v2887_v52, %v840_v56  ;;  %v842_v55 = vpop.f32.mrb[49].mxu1  ;;  %1551 = vrot.lane.b32.xlu1 %v2359_v59, %s2484_s30 }
 0x176   :  { %v1341_v9 = vadd.f32 1.0, %v2361_v63  ;;  %v843_v15 = vpop.f32.mrb[50].mxu1 }
 0x177   :  { %v2363_v3 = vpop.eup %2362  ;;  %v3076_v48 = vadd.f32 %v2987_v14, %v841_v46  ;;  %v844_v2 = vadd.f32 %v2887_v52, %v843_v15  ;;  %v845_v23 = vpop.f32.mrb[51].mxu1 }
 0x178   :  { %2372 = vrcp.f32 %v1341_v9  ;;  %v1342_v38 = vadd.f32 1.0, %v2363_v3  ;;  %v2039_v14 = vpop.f32.mrb[73].mxu0 }
 0x179   :  { %v1909_v24 = vmul.f32 -1.442695, %v3076_v48  ;;  %v3081_v26 = vadd.f32 %v2991_v22, %v844_v2  ;;  %v3087_v42 = vpop.f32.mrb[74].mxu0 }
 0x17a   :  { %v2365_v25 = vpop.eup %2364  ;;  %2374 = vrcp.f32 %v1342_v38  ;;  %v2040_v53 = vpop.f32.mrb[75].mxu0 }
 0x17b   :  { %2376 = vpow2.f32 %v1909_v24  ;;  %v1910_v30 = vmul.f32 -1.442695, %v3081_v26  ;;  %1553 = vrot.lane.b32.xlu0 %v2365_v25, %s2484_s30  ;;  %v3099_v15 = vpop.f32.mrb[76].mxu0 }
 0x17c   :  { %v2367_v31 = vpop.eup %2366  ;;  %v848_v32 = vpop.f32.mrb[52].mxu1 }
 0x17d   :  { %v2369_v45 = vpop.eup %2368  ;;  %2378 = vpow2.f32 %v1910_v30  ;;  %v849_v60 = vadd.f32 %v2887_v52, %v848_v32  ;;  %v850_v22 = vpop.f32.mrb[53].mxu1  ;;  %1555 = vrot.lane.b32.xlu1 %v2367_v31, %s2484_s30 }
 0x17e   :  { %v1343_v21 = vadd.f32 1.0, %v2369_v45  ;;  %v851_v0 = vpop.f32.mrb[54].mxu1 }
 0x17f   :  { %v2371_v47 = vpop.eup %2370  ;;  %v3092_v59 = vadd.f32 %v3003_v40, %v849_v60  ;;  %v852_v56 = vadd.f32 %v2887_v52, %v851_v0  ;;  %v853_v63 = vpop.f32.mrb[55].mxu1 }
 0x180   :  { %2380 = vrcp.f32 %v1343_v21  ;;  %v1344_v46 = vadd.f32 1.0, %v2371_v47  ;;  %v2043_v40 = vpop.f32.mrb[77].mxu0 }
 0x181   :  { %v1911_v55 = vmul.f32 -1.442695, %v3092_v59  ;;  %v3097_v6 = vadd.f32 %v3007_v41, %v852_v56  ;;  %v3103_v38 = vpop.f32.mrb[78].mxu0 }
 0x182   :  { %v2373_v9 = vpop.eup %2372  ;;  %2382 = vrcp.f32 %v1344_v46  ;;  %v2044_v30 = vpop.f32.mrb[79].mxu0 }
 0x183   :  { %2384 = vpow2.f32 %v1911_v55  ;;  %v1912_v3 = vmul.f32 -1.442695, %v3097_v6  ;;  %1557 = vrot.lane.b32.xlu0 %v2373_v9, %s2484_s30  ;;  %v3115_v56 = vpop.f32.mrb[80].mxu0 }
 0x184   :  { %v2375_v2 = vpop.eup %2374  ;;  %v856_v23 = vpop.f32.mrb[56].mxu1 }
 0x185   :  { %v2377_v24 = vpop.eup %2376  ;;  %2386 = vpow2.f32 %v1912_v3  ;;  %v857_v25 = vadd.f32 %v2887_v52, %v856_v23  ;;  %v858_v41 = vpop.f32.mrb[57].mxu1  ;;  %1559 = vrot.lane.b32.xlu1 %v2375_v2, %s2484_s30 }
 0x186   :  { %v1345_v14 = vadd.f32 1.0, %v2377_v24  ;;  %v859_v31 = vpop.f32.mrb[58].mxu1 }
 0x187   :  { %v2379_v32 = vpop.eup %2378  ;;  %v3108_v45 = vadd.f32 %v3019_v11, %v857_v25  ;;  %v860_v60 = vadd.f32 %v2887_v52, %v859_v31  ;;  %v861_v22 = vpop.f32.mrb[59].mxu1 }
 0x188   :  { %2388 = vrcp.f32 %v1345_v14  ;;  %v1346_v53 = vadd.f32 1.0, %v2379_v32  ;;  %v2047_v11 = vpop.f32.mrb[81].mxu0 }
 0x189   :  { %v1913_v21 = vmul.f32 -1.442695, %v3108_v45  ;;  %v3113_v0 = vadd.f32 %v3023_v19, %v860_v60  ;;  %v3119_v9 = vpop.f32.mrb[82].mxu0 }
 0x18a   :  { %v2381_v47 = vpop.eup %2380  ;;  %2390 = vrcp.f32 %v1346_v53  ;;  %v2048_v2 = vpop.f32.mrb[83].mxu0 }
 0x18b   :  { %2392 = vpow2.f32 %v1913_v21  ;;  %v1914_v63 = vmul.f32 -1.442695, %v3113_v0  ;;  %1561 = vrot.lane.b32.xlu0 %v2381_v47, %s2484_s30  ;;  %v3131_v53 = vpop.f32.mrb[84].mxu0 }
 0x18c   :  { %v2383_v46 = vpop.eup %2382  ;;  %v864_v55 = vpop.f32.mrb[60].mxu1 }
 0x18d   :  { %v2385_v3 = vpop.eup %2384  ;;  %2394 = vpow2.f32 %v1914_v63  ;;  %v865_v40 = vadd.f32 %v2887_v52, %v864_v55  ;;  %v866_v19 = vpop.f32.mrb[61].mxu1  ;;  %1563 = vrot.lane.b32.xlu1 %v2383_v46, %s2484_s30 }
 0x18e   :  { %v1347_v23 = vadd.f32 1.0, %v2385_v3  ;;  %v867_v24 = vpop.f32.mrb[62].mxu1 }
 0x18f   :  { %v2387_v25 = vpop.eup %2386  ;;  %v3124_v41 = vadd.f32 %v3035_v17, %v865_v40  ;;  %v868_v30 = vadd.f32 %v2887_v52, %v867_v24  ;;  %v869_v14 = vpop.f32.mrb[63].mxu1 }
 0x190   :  { %2396 = vrcp.f32 %v1347_v23  ;;  %v1348_v31 = vadd.f32 1.0, %v2387_v25  ;;  %v2051_v17 = vpop.f32.mrb[85].mxu0 }
 0x191   :  { %v1915_v32 = vmul.f32 -1.442695, %v3124_v41  ;;  %v3129_v60 = vadd.f32 %v3039_v54, %v868_v30  ;;  %v3135_v11 = vpop.f32.mrb[86].mxu0 }
 0x192   :  { %v2389_v22 = vpop.eup %2388  ;;  %2398 = vrcp.f32 %v1348_v31  ;;  %v2052_v3 = vpop.f32.mrb[87].mxu0 }
 0x193   :  { %2400 = vpow2.f32 %v1915_v32  ;;  %v1916_v21 = vmul.f32 -1.442695, %v3129_v60  ;;  %1565 = vrot.lane.b32.xlu0 %v2389_v22, %s2484_s30  ;;  %v3147_v22 = vpop.f32.mrb[88].mxu0 }
 0x194   :  { %v2391_v47 = vpop.eup %2390  ;;  %v872_v63 = vpop.f32.mrb[64].mxu1 }
 0x195   :  { %v2393_v46 = vpop.eup %2392  ;;  %2402 = vpow2.f32 %v1916_v21  ;;  %v873_v55 = vadd.f32 %v2887_v52, %v872_v63  ;;  %v874_v54 = vpop.f32.mrb[65].mxu1  ;;  %1567 = vrot.lane.b32.xlu1 %v2391_v47, %s2484_s30 }
 0x196   :  { %v1349_v40 = vadd.f32 1.0, %v2393_v46  ;;  %v875_v19 = vpop.f32.mrb[66].mxu1 }
 0x197   :  { %v2395_v2 = vpop.eup %2394  ;;  %v3140_v23 = vadd.f32 %v3051_v18, %v873_v55  ;;  %v876_v24 = vadd.f32 %v2887_v52, %v875_v19  ;;  %v877_v25 = vpop.f32.mrb[67].mxu1 }
 0x198   :  { %2404 = vrcp.f32 %v1349_v40  ;;  %v1350_v30 = vadd.f32 1.0, %v2395_v2  ;;  %v2055_v18 = vpop.f32.mrb[89].mxu0 }
 0x199   :  { %v1917_v14 = vmul.f32 -1.442695, %v3140_v23  ;;  %v3145_v31 = vadd.f32 %v3055_v7, %v876_v24  ;;  %v3151_v63 = vpop.f32.mrb[90].mxu0 }
 0x19a   :  { %v2397_v32 = vpop.eup %2396  ;;  %2406 = vrcp.f32 %v1350_v30  ;;  %v2056_v54 = vpop.f32.mrb[91].mxu0 }
 0x19b   :  { %2408 = vpow2.f32 %v1917_v14  ;;  %v1918_v21 = vmul.f32 -1.442695, %v3145_v31  ;;  %1569 = vrot.lane.b32.xlu0 %v2397_v32, %s2484_s30  ;;  %v3163_v18 = vpop.f32.mrb[92].mxu0 }
 0x19c   :  { %v2399_v17 = vpop.eup %2398  ;;  %v880_v47 = vpop.f32.mrb[68].mxu1 }
 0x19d   :  { %v2401_v46 = vpop.eup %2400  ;;  %2410 = vpow2.f32 %v1918_v21  ;;  %v881_v55 = vadd.f32 %v2887_v52, %v880_v47  ;;  %v882_v7 = vpop.f32.mrb[69].mxu1  ;;  %1571 = vrot.lane.b32.xlu1 %v2399_v17, %s2484_s30 }
 0x19e   :  { %v1351_v3 = vadd.f32 1.0, %v2401_v46  ;;  %v883_v40 = vpop.f32.mrb[70].mxu1 }
 0x19f   :  { %v2403_v19 = vpop.eup %2402  ;;  %v3156_v2 = vadd.f32 %v3067_v57, %v881_v55  ;;  %v884_v24 = vadd.f32 %v2887_v52, %v883_v40  ;;  %v885_v25 = vpop.f32.mrb[71].mxu1 }
 0x1a0   :  { %2412 = vrcp.f32 %v1351_v3  ;;  %v1352_v30 = vadd.f32 1.0, %v2403_v19  ;;  %v2059_v57 = vpop.f32.mrb[93].mxu0 }
 0x1a1   :  { %v1919_v14 = vmul.f32 -1.442695, %v3156_v2  ;;  %v3161_v32 = vadd.f32 %v3071_v62, %v884_v24  ;;  %v3167_v55 = vpop.f32.mrb[94].mxu0 }
 0x1a2   :  { %v2405_v21 = vpop.eup %2404  ;;  %2414 = vrcp.f32 %v1352_v30  ;;  %v2060_v25 = vpop.f32.mrb[95].mxu0 }
 0x1a3   :  { %2416 = vpow2.f32 %v1919_v14  ;;  %v1920_v17 = vmul.f32 -1.442695, %v3161_v32  ;;  %1573 = vrot.lane.b32.xlu0 %v2405_v21, %s2484_s30 }
 0x1a4   :  { %v2407_v47 = vpop.eup %2406  ;;  %v888_v46 = vpop.f32.mrb[72].mxu1 }
 0x1a5   :  { %v2409_v7 = vpop.eup %2408  ;;  %2418 = vpow2.f32 %v1920_v17  ;;  %v889_v54 = vadd.f32 %v2887_v52, %v888_v46  ;;  %v890_v62 = vpop.f32.mrb[73].mxu1  ;;  %1575 = vrot.lane.b32.xlu1 %v2407_v47, %s2484_s30 }
 0x1a6   :  { %v1518_v3 = vpop.permute.xlu0 %1517  ;;  %v1353_v40 = vadd.f32 1.0, %v2409_v7  ;;  %v891_v24 = vpop.f32.mrb[74].mxu1 }
 0x1a7   :  { %v1664_v19 = vmul.f32 %v1518_v3, %v2894_v61  ;;  %v2411_v30 = vpop.eup %2410  ;;  %v3173_v14 = vadd.f32 %v3083_v27, %v889_v54  ;;  %v892_v21 = vadd.f32 %v2887_v52, %v891_v24  ;;  %v893_v57 = vpop.f32.mrb[75].mxu1 }
 0x1a8   :  { %2420 = vrcp.f32 %v1353_v40  ;;  %v1354_v17 = vadd.f32 1.0, %v2411_v30  ;;  %v3185_v54 = vpop.f32.mrb[96].mxu0 }
 0x1a9   :  { %1713 = vst.msk [vmem:[%s3509_s3] sm:$0xff] %vm634_vm1, %v1664_v19  ;;  %v1921_v47 = vmul.f32 -1.442695, %v3173_v14  ;;  %v3182_v61 = vadd.f32 %v3087_v42, %v892_v21  ;;  %v2063_v3 = vpop.f32.mrb[97].mxu0 }
 0x1aa   :  { %v1520_v46 = vpop.permute.xlu0 %1519  ;;  %v2413_v7 = vpop.eup %2412  ;;  %2422 = vrcp.f32 %v1354_v17 }
 0x1ab   :  { %v1665_v27 = vmul.f32 %v1520_v46, %v2898_v1  ;;  %2424 = vpow2.f32 %v1921_v47  ;;  %v1922_v62 = vmul.f32 -1.442695, %v3182_v61  ;;  %1577 = vrot.lane.b32.xlu0 %v2413_v7, %s2484_s30  ;;  %v1171_v19 = vpop.f32.mrb[98].mxu0 }
 0x1ac   :  { %v2415_v40 = vpop.eup %2414  ;;  %v896_v42 = vpop.f32.mrb[76].mxu1 }
 0x1ad   :  { %1714 = vst.msk [vmem:[%s3509_s3 + $0x8] sm:$0xff] %vm634_vm1, %v1665_v27  ;;  %v2417_v24 = vpop.eup %2416  ;;  %2426 = vpow2.f32 %v1922_v62  ;;  %v897_v1 = vadd.f32 %v2887_v52, %v896_v42  ;;  %v898_v25 = vpop.f32.mrb[77].mxu1  ;;  %1579 = vrot.lane.b32.xlu1 %v2415_v40, %s2484_s30 }
 0x1ae   :  { %v1522_v30 = vpop.permute.xlu1 %1521  ;;  %v1355_v21 = vadd.f32 1.0, %v2417_v24  ;;  %v899_v17 = vpop.f32.mrb[78].mxu1 }
 0x1af   :  { %v1666_v57 = vmul.f32 %v1522_v30, %v2906_v12  ;;  %v2064_v47 = vpop.f32.mrb[99].mxu0  ;;  %v2419_v46 = vpop.eup %2418  ;;  %v3197_v7 = vadd.f32 %v3099_v15, %v897_v1  ;;  %v900_v27 = vadd.f32 %v2887_v52, %v899_v17 }
 0x1b0   :  { %v901_v3 = vpop.f32.mrb[79].mxu1  ;;  %2428 = vrcp.f32 %v1355_v21  ;;  %v1356_v62 = vadd.f32 1.0, %v2419_v46 }
 0x1b1   :  { %1715 = vst.msk [vmem:[%s3509_s3 + $0x10] sm:$0xff] %vm634_vm1, %v1666_v57  ;;  %v1923_v40 = vmul.f32 -1.442695, %v3197_v7  ;;  %v3206_v12 = vadd.f32 %v3103_v38, %v900_v27  ;;  %v3218_v38 = vld [vmem:[%s3508_s2] ss:$0 sm:$0xff] }
 0x1b2   :  { %v1524_v42 = vpop.permute.xlu1 %1523  ;;  %v2421_v19 = vpop.eup %2420  ;;  %2430 = vrcp.f32 %v1356_v62 }
 0x1b3   :  { %v1667_v15 = vmul.f32 %v1524_v42, %v2910_v16  ;;  %2432 = vpow2.f32 %v1923_v40  ;;  %v1924_v52 = vmul.f32 -1.442695, %v3206_v12  ;;  %1581 = vrot.lane.b32.xlu0 %v2421_v19, %s2484_s30 }
 0x1b4   :  { %v2423_v24 = vpop.eup %2422  ;;  %v904_v1 = vpop.f32.mrb[80].mxu1 }
 0x1b5   :  { %1716 = vst.msk [vmem:[%s3509_s3 + $0x18] sm:$0xff] %vm634_vm1, %v1667_v15  ;;  %v2425_v25 = vpop.eup %2424  ;;  %2434 = vpow2.f32 %v1924_v52  ;;  %v905_v16 = vadd.f32 %v3218_v38, %v904_v1  ;;  %v906_v30 = vpop.f32.mrb[81].mxu1  ;;  %1583 = vrot.lane.b32.xlu1 %v2423_v24, %s2484_s30 }
 0x1b6   :  { %v1526_v21 = vpop.permute.xlu0 %1525  ;;  %v1357_v57 = vadd.f32 1.0, %v2425_v25  ;;  %v907_v47 = vpop.f32.mrb[82].mxu1 }
 0x1b7   :  { %v1668_v17 = vmul.f32 %v1526_v21, %v2918_v28  ;;  %v2427_v46 = vpop.eup %2426  ;;  %v3224_v27 = vadd.f32 %v3115_v56, %v905_v16  ;;  %v908_v3 = vadd.f32 %v3218_v38, %v907_v47  ;;  %v909_v62 = vpop.f32.mrb[83].mxu1 }
 0x1b8   :  { %v1528_v40 = vpop.permute.xlu1 %1527  ;;  %2436 = vrcp.f32 %v1357_v57  ;;  %v1358_v42 = vadd.f32 1.0, %v2427_v46 }
 0x1b9   :  { %1717 = vst.msk [vmem:[%s3509_s3 + $0x20] sm:$0xff] %vm634_vm1, %v1668_v17  ;;  %v1669_v19 = vmul.f32 %v1528_v40, %v2923_v33  ;;  %v1925_v28 = vmul.f32 -1.442695, %v3224_v27  ;;  %v3234_v15 = vadd.f32 %v3119_v9, %v908_v3 }
 0x1ba   :  { %v2429_v56 = vpop.eup %2428  ;;  %2438 = vrcp.f32 %v1358_v42 }
 0x1bb   :  { %1718 = vst.msk [vmem:[%s3509_s3 + $0x28] sm:$0xff] %vm634_vm1, %v1669_v19  ;;  %2440 = vpow2.f32 %v1925_v28  ;;  %v1926_v52 = vmul.f32 -1.442695, %v3234_v15  ;;  %1585 = vrot.lane.b32.xlu0 %v2429_v56, %s2484_s30 }
 0x1bc   :  { %v2431_v24 = vpop.eup %2430  ;;  %v912_v1 = vpop.f32.mrb[84].mxu1 }
 0x1bd   :  { %v2433_v33 = vpop.eup %2432  ;;  %2442 = vpow2.f32 %v1926_v52  ;;  %v913_v25 = vadd.f32 %v3218_v38, %v912_v1  ;;  %v914_v9 = vpop.f32.mrb[85].mxu1  ;;  %1587 = vrot.lane.b32.xlu1 %v2431_v24, %s2484_s30 }
 0x1be   :  { %v1530_v16 = vpop.permute.xlu0 %1529  ;;  %v1359_v30 = vadd.f32 1.0, %v2433_v33  ;;  %v915_v57 = vpop.f32.mrb[86].mxu1 }
 0x1bf   :  { %v1670_v21 = vmul.f32 %v1530_v16, %v2932_v49  ;;  %v2435_v17 = vpop.eup %2434  ;;  %v3246_v47 = vadd.f32 %v3131_v53, %v913_v25  ;;  %v916_v46 = vadd.f32 %v3218_v38, %v915_v57  ;;  %v917_v3 = vpop.f32.mrb[87].mxu1 }
 0x1c0   :  { %v1532_v62 = vpop.permute.xlu1 %1531  ;;  %2444 = vrcp.f32 %v1359_v30  ;;  %v1360_v40 = vadd.f32 1.0, %v2435_v17 }
 0x1c1   :  { %1719 = vst.msk [vmem:[%s3509_s3 + $0x30] sm:$0xff] %vm634_vm1, %v1670_v21  ;;  %v1671_v42 = vmul.f32 %v1532_v62, %v2937_v58  ;;  %v1927_v49 = vmul.f32 -1.442695, %v3246_v47  ;;  %v3256_v19 = vadd.f32 %v3135_v11, %v916_v46 }
 0x1c2   :  { %v2437_v53 = vpop.eup %2436  ;;  %2446 = vrcp.f32 %v1360_v40 }
 0x1c3   :  { %1720 = vst.msk [vmem:[%s3509_s3 + $0x38] sm:$0xff] %vm634_vm1, %v1671_v42  ;;  %2448 = vpow2.f32 %v1927_v49  ;;  %v1928_v28 = vmul.f32 -1.442695, %v3256_v19  ;;  %1589 = vrot.lane.b32.xlu0 %v2437_v53, %s2484_s30 }
 0x1c4   :  { %v2439_v56 = vpop.eup %2438  ;;  %v920_v52 = vpop.f32.mrb[88].mxu1 }
 0x1c5   :  { %v2441_v58 = vpop.eup %2440  ;;  %2450 = vpow2.f32 %v1928_v28  ;;  %v921_v24 = vadd.f32 %v3218_v38, %v920_v52  ;;  %v922_v11 = vpop.f32.mrb[89].mxu1  ;;  %1591 = vrot.lane.b32.xlu1 %v2439_v56, %s2484_s30 }
 0x1c6   :  { %v1534_v1 = vpop.permute.xlu0 %1533  ;;  %v1361_v33 = vadd.f32 1.0, %v2441_v58  ;;  %v923_v9 = vpop.f32.mrb[90].mxu1 }
 0x1c7   :  { %v1672_v25 = vmul.f32 %v1534_v1, %v2947_v13  ;;  %v2443_v16 = vpop.eup %2442  ;;  %v3268_v30 = vadd.f32 %v3147_v22, %v921_v24  ;;  %v924_v21 = vadd.f32 %v3218_v38, %v923_v9  ;;  %v925_v57 = vpop.f32.mrb[91].mxu1 }
 0x1c8   :  { %v1536_v17 = vpop.permute.xlu1 %1535  ;;  %2452 = vrcp.f32 %v1361_v33  ;;  %v1362_v46 = vadd.f32 1.0, %v2443_v16 }
 0x1c9   :  { %1721 = vst.msk [vmem:[%s3509_s3 + $0x40] sm:$0xff] %vm634_vm1, %v1672_v25  ;;  %v1673_v3 = vmul.f32 %v1536_v17, %v2953_v20  ;;  %v1929_v13 = vmul.f32 -1.442695, %v3268_v30  ;;  %v3278_v62 = vadd.f32 %v3151_v63, %v924_v21 }
 0x1ca   :  { %v2445_v22 = vpop.eup %2444  ;;  %2454 = vrcp.f32 %v1362_v46 }
 0x1cb   :  { %1722 = vst.msk [vmem:[%s3509_s3 + $0x48] sm:$0xff] %vm634_vm1, %v1673_v3  ;;  %2456 = vpow2.f32 %v1929_v13  ;;  %v1930_v40 = vmul.f32 -1.442695, %v3278_v62  ;;  %1593 = vrot.lane.b32.xlu0 %v2445_v22, %s2484_s30 }
 0x1cc   :  { %v2447_v42 = vpop.eup %2446  ;;  %v928_v49 = vpop.f32.mrb[92].mxu1 }
 0x1cd   :  { %v2449_v20 = vpop.eup %2448  ;;  %2458 = vpow2.f32 %v1930_v40  ;;  %v929_v53 = vadd.f32 %v3218_v38, %v928_v49  ;;  %v930_v63 = vpop.f32.mrb[93].mxu1  ;;  %1595 = vrot.lane.b32.xlu1 %v2447_v42, %s2484_s30 }
 0x1ce   :  { %v1538_v28 = vpop.permute.xlu0 %1537  ;;  %v1363_v56 = vadd.f32 1.0, %v2449_v20  ;;  %v931_v58 = vpop.f32.mrb[94].mxu1 }
 0x1cf   :  { %v1674_v52 = vmul.f32 %v1538_v28, %v2963_v36  ;;  %v2451_v24 = vpop.eup %2450  ;;  %v3290_v11 = vadd.f32 %v3163_v18, %v929_v53  ;;  %v932_v1 = vadd.f32 %v3218_v38, %v931_v58  ;;  %v933_v33 = vpop.f32.mrb[95].mxu1 }
 0x1d0   :  { %v1540_v25 = vpop.permute.xlu1 %1539  ;;  %2460 = vrcp.f32 %v1363_v56  ;;  %v1364_v9 = vadd.f32 1.0, %v2451_v24 }
 0x1d1   :  { %1723 = vst.msk [vmem:[%s3509_s3 + $0x50] sm:$0xff] %vm634_vm1, %v1674_v52  ;;  %v1675_v16 = vmul.f32 %v1540_v25, %v2969_v43  ;;  %v1931_v36 = vmul.f32 -1.442695, %v3290_v11  ;;  %v3300_v21 = vadd.f32 %v3167_v55, %v932_v1 }
 0x1d2   :  { %v2453_v18 = vpop.eup %2452  ;;  %2462 = vrcp.f32 %v1364_v9 }
 0x1d3   :  { %1724 = vst.msk [vmem:[%s3509_s3 + $0x58] sm:$0xff] %vm634_vm1, %v1675_v16  ;;  %2464 = vpow2.f32 %v1931_v36  ;;  %v1932_v57 = vmul.f32 -1.442695, %v3300_v21  ;;  %1597 = vrot.lane.b32.xlu0 %v2453_v18, %s2484_s30 }
 0x1d4   :  { %v2455_v17 = vpop.eup %2454  ;;  %v936_v46 = vpop.f32.mrb[96].mxu1 }
 0x1d5   :  { %v2457_v43 = vpop.eup %2456  ;;  %2466 = vpow2.f32 %v1932_v57  ;;  %v937_v3 = vadd.f32 %v3218_v38, %v936_v46  ;;  %v938_v55 = vpop.f32.mrb[97].mxu1  ;;  %1599 = vrot.lane.b32.xlu1 %v2455_v17, %s2484_s30 }
 0x1d6   :  { %v1542_v13 = vpop.permute.xlu0 %1541  ;;  %v1365_v22 = vadd.f32 1.0, %v2457_v43  ;;  %v939_v42 = vpop.f32.mrb[98].mxu1 }
 0x1d7   :  { %v1676_v40 = vmul.f32 %v1542_v13, %v2980_v5  ;;  %v2459_v49 = vpop.eup %2458  ;;  %v3312_v20 = vadd.f32 %v3185_v54, %v937_v3  ;;  %v940_v53 = vpop.f32.mrb[99].mxu1 }
 0x1d8   :  { %v1544_v63 = vpop.permute.xlu1 %1543  ;;  %2468 = vrcp.f32 %v1365_v22  ;;  %v1366_v28 = vadd.f32 1.0, %v2459_v49 }
 0x1d9   :  { %1725 = vst.msk [vmem:[%s3509_s3 + $0x60] sm:$0xff] %vm634_vm1, %v1676_v40  ;;  %v1677_v38 = vmul.f32 %v1544_v63, %v2985_v10  ;;  %v1933_v56 = vmul.f32 -1.442695, %v3312_v20 }
 0x1da   :  { %v2461_v52 = vpop.eup %2460  ;;  %2470 = vrcp.f32 %v1366_v28 }
 0x1db   :  { %1726 = vst.msk [vmem:[%s3509_s3 + $0x68] sm:$0xff] %vm634_vm1, %v1677_v38  ;;  %2472 = vpow2.f32 %v1933_v56  ;;  %1601 = vrot.lane.b32.xlu0 %v2461_v52, %s2484_s30 }
 0x1dc   :  { %v2463_v5 = vpop.eup %2462 }
 0x1dd   :  { %v2465_v54 = vpop.eup %2464  ;;  %1603 = vrot.lane.b32.xlu1 %v2463_v5, %s2484_s30  ;;  %v1546_v58 = vpop.permute.xlu0 %1545 }
 0x1de   :  { %v1367_v24 = vadd.f32 1.0, %v2465_v54  ;;  %v1678_v10 = vmul.f32 %v1546_v58, %v2996_v50 }
 0x1df   :  { %v2467_v1 = vpop.eup %2466  ;;  %v1548_v33 = vpop.permute.xlu1 %1547 }
 0x1e0   :  { %2474 = vrcp.f32 %v1367_v24  ;;  %v1368_v25 = vadd.f32 1.0, %v2467_v1  ;;  %1727 = vst.msk [vmem:[%s3509_s3 + $0x70] sm:$0xff] %vm634_vm1, %v1678_v10  ;;  %v1679_v9 = vmul.f32 %v1548_v33, %v3001_v37 }
 0x1e2   :  { %v2469_v16 = vpop.eup %2468  ;;  %2476 = vrcp.f32 %v1368_v25  ;;  %1728 = vst.msk [vmem:[%s3509_s3 + $0x78] sm:$0xff] %vm634_vm1, %v1679_v9 }
 0x1e3   :  { %1605 = vrot.lane.b32.xlu0 %v2469_v16, %s2484_s30 }
 0x1e4   :  { %v2471_v50 = vpop.eup %2470 }
 0x1e5   :  { %v2473_v36 = vpop.eup %2472  ;;  %1607 = vrot.lane.b32.xlu1 %v2471_v50, %s2484_s30  ;;  %v1550_v18 = vpop.permute.xlu0 %1549 }
 0x1e6   :  { %v1369_v57 = vadd.f32 1.0, %v2473_v36  ;;  %v1680_v17 = vmul.f32 %v1550_v18, %v3012_v44 }
 0x1e7   :  { %v1552_v46 = vpop.permute.xlu1 %1551 }
 0x1e8   :  { %2478 = vrcp.f32 %v1369_v57  ;;  %1729 = vst.msk [vmem:[%s3509_s3 + $0x80] sm:$0xff] %vm634_vm1, %v1680_v17  ;;  %v1681_v37 = vmul.f32 %v1552_v46, %v3017_v8 }
 0x1ea   :  { %v2475_v43 = vpop.eup %2474  ;;  %1730 = vst.msk [vmem:[%s3509_s3 + $0x88] sm:$0xff] %vm634_vm1, %v1681_v37 }
 0x1eb   :  { %1609 = vrot.lane.b32.xlu0 %v2475_v43, %s2484_s30 }
 0x1ec   :  { %v2477_v3 = vpop.eup %2476 }
 0x1ed   :  { %1611 = vrot.lane.b32.xlu1 %v2477_v3, %s2484_s30  ;;  %v1554_v44 = vpop.permute.xlu0 %1553 }
 0x1ee   :  { %v1682_v55 = vmul.f32 %v1554_v44, %v3028_v29 }
 0x1ef   :  { %v1556_v13 = vpop.permute.xlu1 %1555 }
 0x1f0   :  { %1731 = vst.msk [vmem:[%s3509_s3 + $0x90] sm:$0xff] %vm634_vm1, %v1682_v55  ;;  %v1683_v8 = vmul.f32 %v1556_v13, %v3033_v39 }
 0x1f2   :  { %v2479_v22 = vpop.eup %2478  ;;  %1732 = vst.msk [vmem:[%s3509_s3 + $0x98] sm:$0xff] %vm634_vm1, %v1683_v8 }
 0x1f3   :  { %1613 = vrot.lane.b32.xlu0 %v2479_v22, %s2484_s30 }
 0x1f5   :  { %v1558_v40 = vpop.permute.xlu0 %1557 }
 0x1f6   :  { %v1684_v42 = vmul.f32 %v1558_v40, %v3044_v4 }
 0x1f7   :  { %v1560_v29 = vpop.permute.xlu1 %1559 }
 0x1f8   :  { %1733 = vst.msk [vmem:[%s3509_s3 + $0xa0] sm:$0xff] %vm634_vm1, %v1684_v42  ;;  %v1685_v49 = vmul.f32 %v1560_v29, %v3049_v34 }
 0x1fa   :  { %1734 = vst.msk [vmem:[%s3509_s3 + $0xa8] sm:$0xff] %vm634_vm1, %v1685_v49 }
 0x1fd   :  { %v1562_v39 = vpop.permute.xlu0 %1561 }
 0x1fe   :  { %v1686_v53 = vmul.f32 %v1562_v39, %v3060_v35 }
 0x1ff   :  { %v1564_v63 = vpop.permute.xlu1 %1563 }
 0x200   :  { %1735 = vst.msk [vmem:[%s3509_s3 + $0xb0] sm:$0xff] %vm634_vm1, %v1686_v53  ;;  %v1687_v4 = vmul.f32 %v1564_v63, %v3065_v51 }
 0x202   :  { %1736 = vst.msk [vmem:[%s3509_s3 + $0xb8] sm:$0xff] %vm634_vm1, %v1687_v4 }
 0x205   :  { %v1566_v34 = vpop.permute.xlu0 %1565 }
 0x206   :  { %v1688_v28 = vmul.f32 %v1566_v34, %v3076_v48 }
 0x207   :  { %v1568_v38 = vpop.permute.xlu1 %1567 }
 0x208   :  { %1737 = vst.msk [vmem:[%s3509_s3 + $0xc0] sm:$0xff] %vm634_vm1, %v1688_v28  ;;  %v1689_v35 = vmul.f32 %v1568_v38, %v3081_v26 }
 0x20a   :  { %1738 = vst.msk [vmem:[%s3509_s3 + $0xc8] sm:$0xff] %vm634_vm1, %v1689_v35 }
 0x20d   :  { %v1570_v51 = vpop.permute.xlu0 %1569 }
 0x20e   :  { %v1690_v56 = vmul.f32 %v1570_v51, %v3092_v59 }
 0x20f   :  { %v1572_v52 = vpop.permute.xlu1 %1571 }
 0x210   :  { %1739 = vst.msk [vmem:[%s3509_s3 + $0xd0] sm:$0xff] %vm634_vm1, %v1690_v56  ;;  %v1691_v48 = vmul.f32 %v1572_v52, %v3097_v6 }
 0x212   :  { %1740 = vst.msk [vmem:[%s3509_s3 + $0xd8] sm:$0xff] %vm634_vm1, %v1691_v48 }
 0x215   :  { %v1574_v26 = vpop.permute.xlu0 %1573 }
 0x216   :  { %v1692_v5 = vmul.f32 %v1574_v26, %v3108_v45 }
 0x217   :  { %v1576_v54 = vpop.permute.xlu1 %1575 }
 0x218   :  { %1741 = vst.msk [vmem:[%s3509_s3 + $0xe0] sm:$0xff] %vm634_vm1, %v1692_v5  ;;  %v1693_v59 = vmul.f32 %v1576_v54, %v3113_v0 }
 0x21a   :  { %1742 = vst.msk [vmem:[%s3509_s3 + $0xe8] sm:$0xff] %vm634_vm1, %v1693_v59 }
 0x21d   :  { %v1578_v6 = vpop.permute.xlu0 %1577 }
 0x21e   :  { %v1694_v58 = vmul.f32 %v1578_v6, %v3124_v41 }
 0x21f   :  { %v1580_v24 = vpop.permute.xlu1 %1579 }
 0x220   :  { %1743 = vst.msk [vmem:[%s3509_s3 + $0xf0] sm:$0xff] %vm634_vm1, %v1694_v58  ;;  %v1695_v45 = vmul.f32 %v1580_v24, %v3129_v60 }
 0x222   :  { %1744 = vst.msk [vmem:[%s3509_s3 + $0xf8] sm:$0xff] %vm634_vm1, %v1695_v45 }
 0x225   :  { %v1582_v0 = vpop.permute.xlu0 %1581 }
 0x226   :  { %v1696_v10 = vmul.f32 %v1582_v0, %v3140_v23 }
 0x227   :  { %v1584_v1 = vpop.permute.xlu1 %1583 }
 0x228   :  { %1745 = vst.msk [vmem:[%s3509_s3 + $0x100] sm:$0xff] %vm634_vm1, %v1696_v10  ;;  %v1697_v41 = vmul.f32 %v1584_v1, %v3145_v31 }
 0x22a   :  { %1746 = vst.msk [vmem:[%s3509_s3 + $0x108] sm:$0xff] %vm634_vm1, %v1697_v41 }
 0x22d   :  { %v1586_v60 = vpop.permute.xlu0 %1585 }
 0x22e   :  { %v1698_v33 = vmul.f32 %v1586_v60, %v3156_v2 }
 0x22f   :  { %v1588_v25 = vpop.permute.xlu1 %1587 }
 0x230   :  { %1747 = vst.msk [vmem:[%s3509_s3 + $0x110] sm:$0xff] %vm634_vm1, %v1698_v33  ;;  %v1699_v23 = vmul.f32 %v1588_v25, %v3161_v32 }
 0x232   :  { %1748 = vst.msk [vmem:[%s3509_s3 + $0x118] sm:$0xff] %vm634_vm1, %v1699_v23 }
 0x235   :  { %v1590_v31 = vpop.permute.xlu0 %1589 }
 0x236   :  { %v1700_v9 = vmul.f32 %v1590_v31, %v3173_v14 }
 0x237   :  { %v1592_v16 = vpop.permute.xlu1 %1591 }
 0x238   :  { %1749 = vst.msk [vmem:[%s3509_s3 + $0x120] sm:$0xff] %vm634_vm1, %v1700_v9  ;;  %v1701_v2 = vmul.f32 %v1592_v16, %v3182_v61 }
 0x23a   :  { %1750 = vst.msk [vmem:[%s3509_s3 + $0x128] sm:$0xff] %vm634_vm1, %v1701_v2 }
 0x23d   :  { %v1594_v32 = vpop.permute.xlu0 %1593 }
 0x23e   :  { %v1702_v50 = vmul.f32 %v1594_v32, %v3197_v7 }
 0x23f   :  { %v1596_v36 = vpop.permute.xlu1 %1595 }
 0x240   :  { %1751 = vst.msk [vmem:[%s3509_s3 + $0x130] sm:$0xff] %vm634_vm1, %v1702_v50  ;;  %v1703_v14 = vmul.f32 %v1596_v36, %v3206_v12 }
 0x242   :  { %1752 = vst.msk [vmem:[%s3509_s3 + $0x138] sm:$0xff] %vm634_vm1, %v1703_v14 }
 0x245   :  { %v1598_v61 = vpop.permute.xlu0 %1597 }
 0x246   :  { %v1704_v18 = vmul.f32 %v1598_v61, %v3224_v27 }
 0x247   :  { %v1600_v57 = vpop.permute.xlu1 %1599 }
 0x248   :  { %1753 = vst.msk [vmem:[%s3509_s3 + $0x140] sm:$0xff] %vm634_vm1, %v1704_v18  ;;  %v1705_v7 = vmul.f32 %v1600_v57, %v3234_v15 }
 0x24a   :  { %1754 = vst.msk [vmem:[%s3509_s3 + $0x148] sm:$0xff] %vm634_vm1, %v1705_v7 }
 0x24d   :  { %v1602_v12 = vpop.permute.xlu0 %1601 }
 0x24e   :  { %v1706_v17 = vmul.f32 %v1602_v12, %v3246_v47 }
 0x24f   :  { %v1604_v46 = vpop.permute.xlu1 %1603 }
 0x250   :  { %1755 = vst.msk [vmem:[%s3509_s3 + $0x150] sm:$0xff] %vm634_vm1, %v1706_v17  ;;  %v1707_v27 = vmul.f32 %v1604_v46, %v3256_v19 }
 0x252   :  { %1756 = vst.msk [vmem:[%s3509_s3 + $0x158] sm:$0xff] %vm634_vm1, %v1707_v27 }
 0x255   :  { %v1606_v15 = vpop.permute.xlu0 %1605 }
 0x256   :  { %v1708_v37 = vmul.f32 %v1606_v15, %v3268_v30 }
 0x257   :  { %v1608_v43 = vpop.permute.xlu1 %1607 }
 0x258   :  { %1757 = vst.msk [vmem:[%s3509_s3 + $0x160] sm:$0xff] %vm634_vm1, %v1708_v37  ;;  %v1709_v47 = vmul.f32 %v1608_v43, %v3278_v62 }
 0x25a   :  { %1758 = vst.msk [vmem:[%s3509_s3 + $0x168] sm:$0xff] %vm634_vm1, %v1709_v47 }
 0x25d   :  { %v1610_v19 = vpop.permute.xlu0 %1609 }
 0x25e   :  { %v1710_v3 = vmul.f32 %v1610_v19, %v3290_v11 }
 0x25f   :  { %v1612_v44 = vpop.permute.xlu1 %1611 }
 0x260   :  { %1759 = vst.msk [vmem:[%s3509_s3 + $0x170] sm:$0xff] %vm634_vm1, %v1710_v3  ;;  %v1711_v30 = vmul.f32 %v1612_v44, %v3300_v21 }
 0x262   :  { %1760 = vst.msk [vmem:[%s3509_s3 + $0x178] sm:$0xff] %vm634_vm1, %v1711_v30 }
 0x265   :  { %v1614_v62 = vpop.permute.xlu0 %1613 }
 0x266   :  { %v1712_v55 = vmul.f32 %v1614_v62, %v3312_v20 }
 0x268   :  { %1761 = vst.msk [vmem:[%s3509_s3 + $0x180] sm:$0xff] %vm634_vm1, %v1712_v55 }

// kernel: encoder_z_prior.8
= control target key start
LH: loop header
LB: loop body
LE: loop exit
PB: predicated region body
PF: predicated region fallthrough
CT: control target
= control target key end

     0   :  { %v4306_v0 = vmov 0   ;;  %v4307_v40 = vmov 0.0   ;;  %vm4308_vm0 = vmmov 0   ;;  %vm1482_vm1 = vcmask 261120   ;;  %s5621_s1 = inlined_call_operand.vmem [shape: bf16[800,128], index: 1, kind: input, shape index: {}]   ;;  %s5622_s0 = inlined_call_operand.vmem [shape: bf16[392,800], index: 0, kind: input, shape index: {}]   ;;  %s5623_s2 = inlined_call_operand.vmem [shape: f32[1,128], index: 2, kind: input, shape index: {}]   ;;  %s5624_s3 = inlined_call_operand.vmem [shape: f32[392,64], index: 3, kind: output, shape index: {}]  }
   0x1   :  { %1558 = vmatprep.subr.bf16.mxu1 %v4306_v0  ;;  %2022 = vmatprep.subr.bf16.mxu0 %v4306_v0  ;;  %v3812_v1 = vld [vmem:[%s5621_s1] sm:$0xff]   ;;  %v3814_v3 = vld [vmem:[%s5621_s1 + $0x8] sm:$0xff]   ;;  %v3816_v5 = vld [vmem:[%s5621_s1 + $0x10] sm:$0xff]   ;;  %vm3025_vm2 = vcmask 523264  }
   0x2   :  { %v3813_v2 = vld [vmem:[%s5621_s1 + $0x100] sm:$0xff]   ;;  %1559 = vmatpush1.bf16.msra.mxu1 %v3812_v1  ;;  %v3815_v4 = vld [vmem:[%s5621_s1 + $0x108] sm:$0xff]   ;;  %v3817_v6 = vld [vmem:[%s5621_s1 + $0x110] sm:$0xff]  }
   0x3   :  { %2023 = vmatpush1.bf16.msra.mxu0 %v3813_v2  ;;  %1560 = vmatprep.subr.bf16.mxu1 %v4306_v0  ;;  %v3818_v7 = vld [vmem:[%s5621_s1 + $0x18] sm:$0xff]   ;;  %v3820_v9 = vld [vmem:[%s5621_s1 + $0x20] sm:$0xff]   ;;  %v3822_v11 = vld [vmem:[%s5621_s1 + $0x28] sm:$0xff]  }
   0x4   :  { %2024 = vmatprep.subr.bf16.mxu0 %v4306_v0  ;;  %v3819_v8 = vld [vmem:[%s5621_s1 + $0x118] sm:$0xff]   ;;  %v3821_v10 = vld [vmem:[%s5621_s1 + $0x120] sm:$0xff]   ;;  %v3823_v12 = vld [vmem:[%s5621_s1 + $0x128] sm:$0xff]  }
   0x5   :  { %v3824_v13 = vld [vmem:[%s5621_s1 + $0x30] sm:$0xff]   ;;  %v3826_v15 = vld [vmem:[%s5621_s1 + $0x38] sm:$0xff]   ;;  %v3828_v17 = vld [vmem:[%s5621_s1 + $0x40] sm:$0xff]  }
   0x6   :  { %1561 = vmatpush1.bf16.msra.mxu1 %v3814_v3  ;;  %v3825_v14 = vld [vmem:[%s5621_s1 + $0x130] sm:$0xff]   ;;  %v3827_v16 = vld [vmem:[%s5621_s1 + $0x138] sm:$0xff]   ;;  %v3829_v18 = vld [vmem:[%s5621_s1 + $0x140] sm:$0xff]  }
   0x7   :  { %2025 = vmatpush1.bf16.msra.mxu0 %v3815_v4  ;;  %1562 = vmatprep.subr.bf16.mxu1 %v4306_v0  ;;  %v3846_v19 = vld [vmem:[%s5622_s0 + $0x4] ss:$28 sps:$4 sm:$0xff]   ;;  %v3830_v20 = vld [vmem:[%s5621_s1 + $0x48] sm:$0xff]   ;;  %v3849_v21 = vld [vmem:[%s5622_s0 + $0x14] ss:$28 sps:$4 sm:$0xff]  }
   0x8   :  { %2026 = vmatprep.subr.bf16.mxu0 %v4306_v0  ;;  %v3831_v22 = vld [vmem:[%s5621_s1 + $0x148] sm:$0xff]   ;;  %1590 = vmatprep.mubr.bf16.mxu1 %v3846_v19  ;;  %v3832_v23 = vld [vmem:[%s5621_s1 + $0x50] sm:$0xff]   ;;  %v3834_v25 = vld [vmem:[%s5621_s1 + $0x58] sm:$0xff]  }
   0x9   :  { %2054 = vmatprep.mubr.bf16.mxu0 %v3849_v21  ;;  %v3833_v24 = vld [vmem:[%s5621_s1 + $0x150] sm:$0xff]   ;;  %v3835_v26 = vld [vmem:[%s5621_s1 + $0x158] sm:$0xff]   ;;  %v3836_v27 = vld [vmem:[%s5621_s1 + $0x60] sm:$0xff]  }
   0xa   :  { %1563 = vmatpush1.bf16.msra.mxu1 %v3816_v5  ;;  %v3837_v28 = vld [vmem:[%s5621_s1 + $0x160] sm:$0xff]   ;;  %v3838_v29 = vld [vmem:[%s5621_s1 + $0x68] sm:$0xff]   ;;  %v3840_v31 = vld [vmem:[%s5621_s1 + $0x70] sm:$0xff]  }
   0xb   :  { %2027 = vmatpush1.bf16.msra.mxu0 %v3817_v6  ;;  %1564 = vmatprep.subr.bf16.mxu1 %v4306_v0  ;;  %v3839_v30 = vld [vmem:[%s5621_s1 + $0x168] sm:$0xff]   ;;  %v3841_v32 = vld [vmem:[%s5621_s1 + $0x170] sm:$0xff]   ;;  %v3842_v33 = vld [vmem:[%s5621_s1 + $0x78] sm:$0xff]  }
   0xc   :  { %2028 = vmatprep.subr.bf16.mxu0 %v4306_v0  ;;  %v3843_v34 = vld [vmem:[%s5621_s1 + $0x178] sm:$0xff]   ;;  %v3847_v36 = vld [vmem:[%s5622_s0 + $0x10] ss:$28 sps:$4 sm:$0xff]   ;;  %v3850_v37 = vld [vmem:[%s5621_s1 + $0x80] sm:$0xff]  }
   0xd   :  { %v3844_v35 = vld [vmem:[%s5622_s0] ss:$28 sps:$4 sm:$0xff]   ;;  %v3854_v41 = vld [vmem:[%s5622_s0 + $0x4c] ss:$28 sps:$4 sm:$0xff]   ;;  %v3856_v43 = vld [vmem:[%s5622_s0 + $0x38] ss:$28 sps:$4 sm:$0xff]  }
   0xe   :  { %1565 = vmatpush1.bf16.msra.mxu1 %v3818_v7  ;;  %v3851_v38 = vld [vmem:[%s5621_s1 + $0x180] sm:$0xff]   ;;  %v3852_v39 = vld [vmem:[%s5622_s0 + $0x3c] ss:$28 sps:$4 sm:$0xff]   ;;  %v3858_v42 = vld [vmem:[%s5621_s1 + $0x88] sm:$0xff]  }
   0xf   :  { %2029 = vmatpush1.bf16.msra.mxu0 %v3819_v8  ;;  %1566 = vmatprep.subr.bf16.mxu1 %v4306_v0  ;;  %v3857_v44 = vld [vmem:[%s5622_s0 + $0x48] ss:$28 sps:$4 sm:$0xff]   ;;  %v3859_v45 = vld [vmem:[%s5622_s0 + $0x74] ss:$28 sps:$4 sm:$0xff]   ;;  %v3880_v49 = vld [vmem:[%s5621_s1 + $0x98] sm:$0xff]  }
  0x10   :  { %2030 = vmatprep.subr.bf16.mxu0 %v4306_v0  ;;  %v3861_v46 = vld [vmem:[%s5622_s0 + $0x84] ss:$28 sps:$4 sm:$0xff]   ;;  %v3871_v47 = vld [vmem:[%s5621_s1 + $0x90] sm:$0xff]   ;;  %v3865_v51 = vld [vmem:[%s5622_s0 + $0xac] ss:$28 sps:$4 sm:$0xff]  }
  0x11   :  { %v3863_v48 = vld [vmem:[%s5622_s0 + $0x70] ss:$28 sps:$4 sm:$0xff]   ;;  %v3864_v50 = vld [vmem:[%s5622_s0 + $0x80] ss:$28 sps:$4 sm:$0xff]   ;;  %v3869_v56 = vld [vmem:[%s5622_s0 + $0xa8] ss:$28 sps:$4 sm:$0xff]  }
  0x12   :  { %1567 = vmatpush1.bf16.msra.mxu1 %v3820_v9  ;;  %v3867_v52 = vld [vmem:[%s5622_s0 + $0xbc] ss:$28 sps:$4 sm:$0xff]   ;;  %v3891_v53 = vld [vmem:[%s5621_s1 + $0xa0] sm:$0xff]   ;;  %v3936_v54 = vld [vmem:[%s5621_s1 + $0x188] sm:$0xff]  }
  0x13   :  { %2031 = vmatpush1.bf16.msra.mxu0 %v3821_v10  ;;  %1568 = vmatprep.subr.bf16.mxu1 %v4306_v0  ;;  %v3903_v55 = vld [vmem:[%s5621_s1 + $0xa8] sm:$0xff]   ;;  %v3870_v57 = vld [vmem:[%s5622_s0 + $0xb8] ss:$28 sps:$4 sm:$0xff]   ;;  %v3872_v58 = vld [vmem:[%s5622_s0 + $0xe4] ss:$28 sps:$4 sm:$0xff]  }
  0x14   :  { %2032 = vmatprep.subr.bf16.mxu0 %v4306_v0  ;;  %v3874_v59 = vld [vmem:[%s5622_s0 + $0xf4] ss:$28 sps:$4 sm:$0xff]   ;;  %v3924_v61 = vld [vmem:[%s5621_s1 + $0xb8] sm:$0xff]   ;;  %v3881_v2 = vld [vmem:[%s5622_s0 + $0x12c] ss:$28 sps:$4 sm:$0xff]  }
  0x15   :  { %v3911_v60 = vld [vmem:[%s5621_s1 + $0xb0] sm:$0xff]   ;;  %v3876_v62 = vld [vmem:[%s5622_s0 + $0xe0] ss:$28 sps:$4 sm:$0xff]   ;;  %v3945_v4 = vld [vmem:[%s5621_s1 + $0xc8] sm:$0xff]  }
  0x16   :  { %1569 = vmatpush1.bf16.msra.mxu1 %v3822_v11  ;;  %v3877_v63 = vld [vmem:[%s5622_s0 + $0xf0] ss:$28 sps:$4 sm:$0xff]   ;;  %v3878_v1 = vld [vmem:[%s5622_s0 + $0x11c] ss:$28 sps:$4 sm:$0xff]   ;;  %v3931_v3 = vld [vmem:[%s5621_s1 + $0xc0] sm:$0xff]  }
  0x17   :  { %2033 = vmatpush1.bf16.msra.mxu0 %v3823_v12  ;;  %1570 = vmatprep.subr.bf16.mxu1 %v4306_v0  ;;  %v3883_v5 = vld [vmem:[%s5622_s0 + $0x118] ss:$28 sps:$4 sm:$0xff]   ;;  %v3884_v6 = vld [vmem:[%s5622_s0 + $0x128] ss:$28 sps:$4 sm:$0xff]   ;;  %v3889_v10 = vld [vmem:[%s5622_s0 + $0x150] ss:$28 sps:$4 sm:$0xff]  }
  0x18   :  { %2034 = vmatprep.subr.bf16.mxu0 %v4306_v0  ;;  %v3885_v7 = vld [vmem:[%s5622_s0 + $0x154] ss:$28 sps:$4 sm:$0xff]   ;;  %v3887_v8 = vld [vmem:[%s5622_s0 + $0x164] ss:$28 sps:$4 sm:$0xff]   ;;  %v3965_v11 = vld [vmem:[%s5621_s1 + $0xd8] sm:$0xff]  }
  0x19   :  { %v3952_v9 = vld [vmem:[%s5621_s1 + $0xd0] sm:$0xff]   ;;  %v3890_v12 = vld [vmem:[%s5622_s0 + $0x160] ss:$28 sps:$4 sm:$0xff]  }
  0x1a   :  { %1571 = vmatpush1.bf16.msra.mxu1 %v3824_v13  ;;  %v3892_v13 = vld [vmem:[%s5622_s0 + $0x18c] ss:$28 sps:$4 sm:$0xff]   ;;  %v3898_v19 = vld [vmem:[%s5622_s0 + $0x1c4] ss:$28 sps:$4 sm:$0xff]   ;;  %v3997_v21 = vld [vmem:[%s5621_s1 + $0xf0] sm:$0xff]  }
  0x1b   :  { %2035 = vmatpush1.bf16.msra.mxu0 %v3825_v14  ;;  %1572 = vmatprep.subr.bf16.mxu1 %v4306_v0  ;;  %v3894_v14 = vld [vmem:[%s5622_s0 + $0x19c] ss:$28 sps:$4 sm:$0xff]  }
  0x1c   :  { %2036 = vmatprep.subr.bf16.mxu0 %v4306_v0 }
  0x1e   :  { %1573 = vmatpush1.bf16.msra.mxu1 %v3826_v15  ;;  %v3974_v15 = vld [vmem:[%s5621_s1 + $0xe0] sm:$0xff]  }
  0x1f   :  { %2037 = vmatpush1.bf16.msra.mxu0 %v3827_v16  ;;  %1574 = vmatprep.subr.bf16.mxu1 %v4306_v0  ;;  %v3896_v16 = vld [vmem:[%s5622_s0 + $0x188] ss:$28 sps:$4 sm:$0xff]  }
  0x20   :  { %2038 = vmatprep.subr.bf16.mxu0 %v4306_v0 }
  0x22   :  { %1575 = vmatpush1.bf16.msra.mxu1 %v3828_v17  ;;  %v3985_v17 = vld [vmem:[%s5621_s1 + $0xe8] sm:$0xff]  }
  0x23   :  { %2039 = vmatpush1.bf16.msra.mxu0 %v3829_v18  ;;  %1576 = vmatprep.subr.bf16.mxu1 %v4306_v0  ;;  %v3897_v18 = vld [vmem:[%s5622_s0 + $0x198] ss:$28 sps:$4 sm:$0xff]  }
  0x24   :  { %2040 = vmatprep.subr.bf16.mxu0 %v4306_v0 }
  0x26   :  { %1577 = vmatpush1.bf16.msra.mxu1 %v3830_v20  ;;  %v3900_v20 = vld [vmem:[%s5622_s0 + $0x1d4] ss:$28 sps:$4 sm:$0xff]  }
  0x27   :  { %2041 = vmatpush1.bf16.msra.mxu0 %v3831_v22  ;;  %1578 = vmatprep.subr.bf16.mxu1 %v4306_v0  ;;  %v4005_v22 = vld [vmem:[%s5621_s1 + $0xf8] sm:$0xff]  }
  0x28   :  { %2042 = vmatprep.subr.bf16.mxu0 %v4306_v0 }
  0x2a   :  { %1579 = vmatpush1.bf16.msra.mxu1 %v3832_v23  ;;  %v3902_v23 = vld [vmem:[%s5622_s0 + $0x1c0] ss:$28 sps:$4 sm:$0xff]  }
  0x2b   :  { %2043 = vmatpush1.bf16.msra.mxu0 %v3833_v24  ;;  %1580 = vmatprep.subr.bf16.mxu1 %v4306_v0  ;;  %v3904_v24 = vld [vmem:[%s5622_s0 + $0x1d0] ss:$28 sps:$4 sm:$0xff]  }
  0x2c   :  { %2044 = vmatprep.subr.bf16.mxu0 %v4306_v0 }
  0x2e   :  { %1581 = vmatpush1.bf16.msra.mxu1 %v3834_v25  ;;  %v3905_v25 = vld [vmem:[%s5622_s0 + $0x1fc] ss:$28 sps:$4 sm:$0xff]  }
  0x2f   :  { %2045 = vmatpush1.bf16.msra.mxu0 %v3835_v26  ;;  %1582 = vmatprep.subr.bf16.mxu1 %v4306_v0  ;;  %v3907_v26 = vld [vmem:[%s5622_s0 + $0x20c] ss:$28 sps:$4 sm:$0xff]  }
  0x30   :  { %2046 = vmatprep.subr.bf16.mxu0 %v4306_v0 }
  0x32   :  { %1583 = vmatpush1.bf16.msra.mxu1 %v3836_v27  ;;  %v3909_v27 = vld [vmem:[%s5622_s0 + $0x1f8] ss:$28 sps:$4 sm:$0xff]  }
  0x33   :  { %2047 = vmatpush1.bf16.msra.mxu0 %v3837_v28  ;;  %1584 = vmatprep.subr.bf16.mxu1 %v4306_v0  ;;  %v3910_v28 = vld [vmem:[%s5622_s0 + $0x208] ss:$28 sps:$4 sm:$0xff]  }
  0x34   :  { %2048 = vmatprep.subr.bf16.mxu0 %v4306_v0 }
  0x36   :  { %1585 = vmatpush1.bf16.msra.mxu1 %v3838_v29  ;;  %v3914_v29 = vld [vmem:[%s5622_s0 + $0x244] ss:$28 sps:$4 sm:$0xff]  }
  0x37   :  { %2049 = vmatpush1.bf16.msra.mxu0 %v3839_v30  ;;  %1586 = vmatprep.subr.bf16.mxu1 %v4306_v0  ;;  %v3916_v30 = vld [vmem:[%s5622_s0 + $0x230] ss:$28 sps:$4 sm:$0xff]  }
  0x38   :  { %2050 = vmatprep.subr.bf16.mxu0 %v4306_v0 }
  0x3a   :  { %1587 = vmatpush1.bf16.msra.mxu1 %v3840_v31  ;;  %v3917_v31 = vld [vmem:[%s5622_s0 + $0x240] ss:$28 sps:$4 sm:$0xff]  }
  0x3b   :  { %2051 = vmatpush1.bf16.msra.mxu0 %v3841_v32  ;;  %1588 = vmatprep.subr.bf16.mxu1 %v4306_v0  ;;  %v3918_v32 = vld [vmem:[%s5622_s0 + $0x26c] ss:$28 sps:$4 sm:$0xff]  }
  0x3c   :  { %2052 = vmatprep.subr.bf16.mxu0 %v4306_v0 }
  0x3e   :  { %1589 = vmatpush1.bf16.msra.mxu1 %v3842_v33  ;;  %v3920_v33 = vld [vmem:[%s5622_s0 + $0x27c] ss:$28 sps:$4 sm:$0xff]  }
  0x3f   :  { %2053 = vmatpush1.bf16.msra.mxu0 %v3843_v34  ;;  %1790 = vmatprep.subr.bf16.mxu1 %v4306_v0  ;;  %v3922_v34 = vld [vmem:[%s5622_s0 + $0x268] ss:$28 sps:$4 sm:$0xff]  }
  0x40   :  { %3406 = vmatprep.subr.bf16.mxu0 %v4307_v40 }
  0x41   :  { %1591 = vmatmul.mubr.bf16.vlgmr.msra.gmra.mrb[0].mxu1 %v3844_v35  ;;  %v3923_v35 = vld [vmem:[%s5622_s0 + $0x278] ss:$28 sps:$4 sm:$0xff]  }
  0x42   :  { %2055 = vmatmul.mubr.bf16.vlgmr.msra.gmra.mrb[0].mxu0 %v3847_v36  ;;  %1791 = vmatpush1.bf16.msra.mxu1 %v3850_v37  ;;  %v3925_v36 = vld [vmem:[%s5622_s0 + $0x2a4] ss:$28 sps:$4 sm:$0xff]   ;;  %v3927_v37 = vld [vmem:[%s5622_s0 + $0x2b4] ss:$28 sps:$4 sm:$0xff]  }
  0x43   :  { %3407 = vmatpush3.bf16.msra.mxu0 %v3851_v38  ;;  %1598 = vmatprep.mubr.bf16.mxu1 %v3852_v39  ;;  %v3929_v38 = vld [vmem:[%s5622_s0 + $0x2a0] ss:$28 sps:$4 sm:$0xff]   ;;  %v3930_v39 = vld [vmem:[%s5622_s0 + $0x2b0] ss:$28 sps:$4 sm:$0xff]  }
  0x44   :  { %2062 = vmatprep.mubr.bf16.mxu0 %v3854_v41  ;;  %1792 = vmatprep.subr.bf16.mxu1 %v4306_v0  ;;  %v3932_v41 = vld [vmem:[%s5622_s0 + $0x2dc] ss:$28 sps:$4 sm:$0xff]  }
  0x45   :  { %3408 = vmatprep.subr.bf16.mxu0 %v4307_v40 }
  0x46   :  { %1793 = vmatpush1.bf16.msra.mxu1 %v3858_v42  ;;  %v3934_v42 = vld [vmem:[%s5622_s0 + $0x2ec] ss:$28 sps:$4 sm:$0xff]  }
  0x47   :  { %1794 = vmatprep.subr.bf16.mxu1 %v4306_v0  ;;  %3409 = vmatpush3.bf16.msra.mxu0 %v3936_v54  ;;  %v3955_v54 = vld [vmem:[%s5622_s0 + $0x394] ss:$28 sps:$4 sm:$0xff]  }
  0x49   :  { %1599 = vmatmul.mubr.bf16.gmra.mrb[4].mxu1 %v3856_v43  ;;  %v3937_v43 = vld [vmem:[%s5622_s0 + $0x2d8] ss:$28 sps:$4 sm:$0xff]  }
  0x4a   :  { %2063 = vmatmul.mubr.bf16.gmra.mrb[4].mxu0 %v3857_v44  ;;  %1606 = vmatprep.mubr.bf16.mxu1 %v3859_v45  ;;  %v3938_v44 = vld [vmem:[%s5622_s0 + $0x2e8] ss:$28 sps:$4 sm:$0xff]   ;;  %v3939_v45 = vld [vmem:[%s5622_s0 + $0x314] ss:$28 sps:$4 sm:$0xff]  }
  0x4b   :  { %2070 = vmatprep.mubr.bf16.mxu0 %v3861_v46  ;;  %1795 = vmatpush1.bf16.msra.mxu1 %v3871_v47  ;;  %v3941_v46 = vld [vmem:[%s5622_s0 + $0x324] ss:$28 sps:$4 sm:$0xff]   ;;  %v3943_v47 = vld [vmem:[%s5622_s0 + $0x310] ss:$28 sps:$4 sm:$0xff]  }
  0x4c   :  { %1796 = vmatprep.subr.bf16.mxu1 %v4306_v0 }
  0x4f   :  { %1797 = vmatpush1.bf16.msra.mxu1 %v3880_v49  ;;  %v3946_v49 = vld [vmem:[%s5622_s0 + $0x34c] ss:$28 sps:$4 sm:$0xff]  }
  0x50   :  { %1798 = vmatprep.subr.bf16.mxu1 %v4306_v0 }
  0x51   :  { %1607 = vmatmul.mubr.bf16.gmra.mrb[8].mxu1 %v3863_v48  ;;  %v3944_v48 = vld [vmem:[%s5622_s0 + $0x320] ss:$28 sps:$4 sm:$0xff]  }
  0x52   :  { %2071 = vmatmul.mubr.bf16.gmra.mrb[8].mxu0 %v3864_v50  ;;  %1614 = vmatprep.mubr.bf16.mxu1 %v3865_v51  ;;  %v3948_v50 = vld [vmem:[%s5622_s0 + $0x35c] ss:$28 sps:$4 sm:$0xff]   ;;  %v3950_v51 = vld [vmem:[%s5622_s0 + $0x348] ss:$28 sps:$4 sm:$0xff]  }
  0x53   :  { %2078 = vmatprep.mubr.bf16.mxu0 %v3867_v52  ;;  %1799 = vmatpush1.bf16.msra.mxu1 %v3891_v53  ;;  %v3951_v52 = vld [vmem:[%s5622_s0 + $0x358] ss:$28 sps:$4 sm:$0xff]   ;;  %v3953_v53 = vld [vmem:[%s5622_s0 + $0x384] ss:$28 sps:$4 sm:$0xff]  }
  0x54   :  { %1800 = vmatprep.subr.bf16.mxu1 %v4306_v0 }
  0x57   :  { %1801 = vmatpush1.bf16.msra.mxu1 %v3903_v55  ;;  %v3957_v55 = vld [vmem:[%s5622_s0 + $0x380] ss:$28 sps:$4 sm:$0xff]  }
  0x58   :  { %1802 = vmatprep.subr.bf16.mxu1 %v4306_v0 }
  0x59   :  { %1615 = vmatmul.mubr.bf16.gmra.mrb[12].mxu1 %v3869_v56  ;;  %v3958_v56 = vld [vmem:[%s5622_s0 + $0x390] ss:$28 sps:$4 sm:$0xff]  }
  0x5a   :  { %2079 = vmatmul.mubr.bf16.gmra.mrb[12].mxu0 %v3870_v57  ;;  %1622 = vmatprep.mubr.bf16.mxu1 %v3872_v58  ;;  %v3959_v57 = vld [vmem:[%s5622_s0 + $0x3bc] ss:$28 sps:$4 sm:$0xff]   ;;  %v3961_v58 = vld [vmem:[%s5622_s0 + $0x3cc] ss:$28 sps:$4 sm:$0xff]  }
  0x5b   :  { %2086 = vmatprep.mubr.bf16.mxu0 %v3874_v59  ;;  %1803 = vmatpush1.bf16.msra.mxu1 %v3911_v60  ;;  %v3963_v59 = vld [vmem:[%s5622_s0 + $0x3b8] ss:$28 sps:$4 sm:$0xff]   ;;  %v3964_v60 = vld [vmem:[%s5622_s0 + $0x3c8] ss:$28 sps:$4 sm:$0xff]  }
  0x5c   :  { %1804 = vmatprep.subr.bf16.mxu1 %v4306_v0 }
  0x5f   :  { %1805 = vmatpush1.bf16.msra.mxu1 %v3924_v61  ;;  %v3966_v61 = vld [vmem:[%s5622_s0 + $0x3f4] ss:$28 sps:$4 sm:$0xff]  }
  0x60   :  { %1806 = vmatprep.subr.bf16.mxu1 %v4306_v0 }
  0x61   :  { %1623 = vmatmul.mubr.bf16.gmra.mrb[16].mxu1 %v3876_v62  ;;  %v3968_v62 = vld [vmem:[%s5622_s0 + $0x404] ss:$28 sps:$4 sm:$0xff]  }
  0x62   :  { %2087 = vmatmul.mubr.bf16.gmra.mrb[16].mxu0 %v3877_v63  ;;  %1630 = vmatprep.mubr.bf16.mxu1 %v3878_v1  ;;  %v3970_v63 = vld [vmem:[%s5622_s0 + $0x3f0] ss:$28 sps:$4 sm:$0xff]   ;;  %v3971_v1 = vld [vmem:[%s5622_s0 + $0x400] ss:$28 sps:$4 sm:$0xff]  }
  0x63   :  { %2094 = vmatprep.mubr.bf16.mxu0 %v3881_v2  ;;  %1807 = vmatpush1.bf16.msra.mxu1 %v3931_v3  ;;  %v3972_v2 = vld [vmem:[%s5622_s0 + $0x42c] ss:$28 sps:$4 sm:$0xff]   ;;  %v3975_v3 = vld [vmem:[%s5622_s0 + $0x43c] ss:$28 sps:$4 sm:$0xff]  }
  0x64   :  { %1808 = vmatprep.subr.bf16.mxu1 %v4306_v0 }
  0x67   :  { %1809 = vmatpush1.bf16.msra.mxu1 %v3945_v4  ;;  %v3977_v4 = vld [vmem:[%s5622_s0 + $0x428] ss:$28 sps:$4 sm:$0xff]  }
  0x68   :  { %1810 = vmatprep.subr.bf16.mxu1 %v4306_v0 }
  0x69   :  { %1631 = vmatmul.mubr.bf16.gmra.mrb[20].mxu1 %v3883_v5  ;;  %v3978_v5 = vld [vmem:[%s5622_s0 + $0x438] ss:$28 sps:$4 sm:$0xff]  }
  0x6a   :  { %2095 = vmatmul.mubr.bf16.gmra.mrb[20].mxu0 %v3884_v6  ;;  %1638 = vmatprep.mubr.bf16.mxu1 %v3885_v7  ;;  %v3979_v6 = vld [vmem:[%s5622_s0 + $0x464] ss:$28 sps:$4 sm:$0xff]   ;;  %v3981_v7 = vld [vmem:[%s5622_s0 + $0x474] ss:$28 sps:$4 sm:$0xff]  }
  0x6b   :  { %2102 = vmatprep.mubr.bf16.mxu0 %v3887_v8  ;;  %1811 = vmatpush1.bf16.msra.mxu1 %v3952_v9  ;;  %v3983_v8 = vld [vmem:[%s5622_s0 + $0x460] ss:$28 sps:$4 sm:$0xff]   ;;  %v3984_v9 = vld [vmem:[%s5622_s0 + $0x470] ss:$28 sps:$4 sm:$0xff]  }
  0x6c   :  { %1812 = vmatprep.subr.bf16.mxu1 %v4306_v0 }
  0x6f   :  { %1813 = vmatpush1.bf16.msra.mxu1 %v3965_v11  ;;  %v3988_v11 = vld [vmem:[%s5622_s0 + $0x4ac] ss:$28 sps:$4 sm:$0xff]  }
  0x70   :  { %1814 = vmatprep.subr.bf16.mxu1 %v4306_v0 }
  0x71   :  { %1639 = vmatmul.mubr.bf16.gmra.mrb[24].mxu1 %v3889_v10  ;;  %v3986_v10 = vld [vmem:[%s5622_s0 + $0x49c] ss:$28 sps:$4 sm:$0xff]  }
  0x72   :  { %2103 = vmatmul.mubr.bf16.gmra.mrb[24].mxu0 %v3890_v12  ;;  %1646 = vmatprep.mubr.bf16.mxu1 %v3892_v13  ;;  %v3990_v12 = vld [vmem:[%s5622_s0 + $0x498] ss:$28 sps:$4 sm:$0xff]   ;;  %v3991_v13 = vld [vmem:[%s5622_s0 + $0x4a8] ss:$28 sps:$4 sm:$0xff]  }
  0x73   :  { %2110 = vmatprep.mubr.bf16.mxu0 %v3894_v14  ;;  %1815 = vmatpush1.bf16.msra.mxu1 %v3974_v15  ;;  %v3992_v14 = vld [vmem:[%s5622_s0 + $0x4d4] ss:$28 sps:$4 sm:$0xff]   ;;  %v3994_v15 = vld [vmem:[%s5622_s0 + $0x4e4] ss:$28 sps:$4 sm:$0xff]  }
  0x74   :  { %1816 = vmatprep.subr.bf16.mxu1 %v4306_v0 }
  0x77   :  { %1817 = vmatpush1.bf16.msra.mxu1 %v3985_v17  ;;  %v3998_v17 = vld [vmem:[%s5622_s0 + $0x4e0] ss:$28 sps:$4 sm:$0xff]  }
  0x78   :  { %1818 = vmatprep.subr.bf16.mxu1 %v4306_v0 }
  0x79   :  { %1647 = vmatmul.mubr.bf16.gmra.mrb[28].mxu1 %v3896_v16  ;;  %v3996_v16 = vld [vmem:[%s5622_s0 + $0x4d0] ss:$28 sps:$4 sm:$0xff]  }
  0x7a   :  { %2111 = vmatmul.mubr.bf16.gmra.mrb[28].mxu0 %v3897_v18  ;;  %1654 = vmatprep.mubr.bf16.mxu1 %v3898_v19  ;;  %v3999_v18 = vld [vmem:[%s5622_s0 + $0x50c] ss:$28 sps:$4 sm:$0xff]   ;;  %v4001_v19 = vld [vmem:[%s5622_s0 + $0x51c] ss:$28 sps:$4 sm:$0xff]  }
  0x7b   :  { %2118 = vmatprep.mubr.bf16.mxu0 %v3900_v20  ;;  %1819 = vmatpush1.bf16.msra.mxu1 %v3997_v21  ;;  %v207_v20 = vld [vmem:[%s5622_s0 + $0x540] sm:$0xff]  ;;  %v209_v21 = vld [vmem:[%s5622_s0 + $0x550] sm:$0xff] }
  0x7c   :  { %1820 = vmatprep.subr.bf16.mxu1 %v4306_v0  ;;  %v3912_v0 = vld [vmem:[%s5622_s0 + $0x234] ss:$28 sps:$4 sm:$0xff]  }
  0x7f   :  { %1821 = vmatpush1.bf16.msra.mxu1 %v4005_v22  ;;  %v4003_v22 = vld [vmem:[%s5622_s0 + $0x508] ss:$28 sps:$4 sm:$0xff]  }
  0x81   :  { %1655 = vmatmul.mubr.bf16.gmra.mrb[32].mxu1 %v3902_v23  ;;  %v4004_v23 = vld [vmem:[%s5622_s0 + $0x518] ss:$28 sps:$4 sm:$0xff]  }
  0x82   :  { %2119 = vmatmul.mubr.bf16.gmra.mrb[32].mxu0 %v3904_v24  ;;  %1662 = vmatprep.mubr.bf16.mxu1 %v3905_v25  ;;  %v3249_v24 = vcombine.high %v207_v20, %v207_v20  ;;  %v3253_v25 = vcombine.high %v209_v21, %v209_v21 }
  0x83   :  { %2126 = vmatprep.mubr.bf16.mxu0 %v3907_v26  ;;  %v3248_v26 = vcombine.low %v207_v20, %v207_v20  ;;  %v4084_v20 = vld [vmem:[%s5622_s0 + $0x3f8] ss:$28 sps:$4 sm:$0xff]  }
  0x89   :  { %1663 = vmatmul.mubr.bf16.gmra.mrb[36].mxu1 %v3909_v27  ;;  %v3252_v27 = vcombine.low %v209_v21, %v209_v21  ;;  %v4085_v21 = vld [vmem:[%s5622_s0 + $0x408] ss:$28 sps:$4 sm:$0xff]  }
  0x8a   :  { %2127 = vmatmul.mubr.bf16.gmra.mrb[36].mxu0 %v3910_v28  ;;  %1670 = vmatprep.mubr.bf16.mxu1 %v3912_v0  ;;  %v4012_v28 = vld [vmem:[%s5622_s0 + $0xc] ss:$28 sps:$4 sm:$0xff]  }
  0x8b   :  { %2134 = vmatprep.mubr.bf16.mxu0 %v3914_v29  ;;  %v4010_v0 = vld [vmem:[%s5622_s0 + $0x8] ss:$28 sps:$4 sm:$0xff]   ;;  %v4013_v29 = vld [vmem:[%s5622_s0 + $0x18] ss:$28 sps:$4 sm:$0xff]  }
  0x91   :  { %1671 = vmatmul.mubr.bf16.gmra.mrb[40].mxu1 %v3916_v30  ;;  %v4014_v30 = vld [vmem:[%s5622_s0 + $0x44] ss:$28 sps:$4 sm:$0xff]  }
  0x92   :  { %2135 = vmatmul.mubr.bf16.gmra.mrb[40].mxu0 %v3917_v31  ;;  %1678 = vmatprep.mubr.bf16.mxu1 %v3918_v32  ;;  %v4016_v31 = vld [vmem:[%s5622_s0 + $0x40] ss:$28 sps:$4 sm:$0xff]   ;;  %v4017_v32 = vld [vmem:[%s5622_s0 + $0x50] ss:$28 sps:$4 sm:$0xff]  }
  0x93   :  { %2142 = vmatprep.mubr.bf16.mxu0 %v3920_v33  ;;  %v4018_v33 = vld [vmem:[%s5622_s0 + $0x7c] ss:$28 sps:$4 sm:$0xff]  }
  0x99   :  { %1679 = vmatmul.mubr.bf16.gmra.mrb[44].mxu1 %v3922_v34  ;;  %v4020_v34 = vld [vmem:[%s5622_s0 + $0x78] ss:$28 sps:$4 sm:$0xff]  }
  0x9a   :  { %2143 = vmatmul.mubr.bf16.gmra.mrb[44].mxu0 %v3923_v35  ;;  %1686 = vmatprep.mubr.bf16.mxu1 %v3925_v36  ;;  %v4021_v35 = vld [vmem:[%s5622_s0 + $0x88] ss:$28 sps:$4 sm:$0xff]   ;;  %v4022_v36 = vld [vmem:[%s5622_s0 + $0xb4] ss:$28 sps:$4 sm:$0xff]  }
  0x9b   :  { %2150 = vmatprep.mubr.bf16.mxu0 %v3927_v37  ;;  %v4024_v37 = vld [vmem:[%s5622_s0 + $0xb0] ss:$28 sps:$4 sm:$0xff]  }
  0xa1   :  { %1687 = vmatmul.mubr.bf16.gmra.mrb[48].mxu1 %v3929_v38  ;;  %v4025_v38 = vld [vmem:[%s5622_s0 + $0xc0] ss:$28 sps:$4 sm:$0xff]  }
  0xa2   :  { %2151 = vmatmul.mubr.bf16.gmra.mrb[48].mxu0 %v3930_v39  ;;  %1694 = vmatprep.mubr.bf16.mxu1 %v3932_v41  ;;  %v4026_v39 = vld [vmem:[%s5622_s0 + $0xec] ss:$28 sps:$4 sm:$0xff]  }
  0xa3   :  { %2158 = vmatprep.mubr.bf16.mxu0 %v3934_v42  ;;  %v4028_v41 = vld [vmem:[%s5622_s0 + $0xe8] ss:$28 sps:$4 sm:$0xff]   ;;  %v4029_v42 = vld [vmem:[%s5622_s0 + $0xf8] ss:$28 sps:$4 sm:$0xff]  }
  0xa9   :  { %1695 = vmatmul.mubr.bf16.gmra.mrb[52].mxu1 %v3937_v43  ;;  %v4030_v43 = vld [vmem:[%s5622_s0 + $0x124] ss:$28 sps:$4 sm:$0xff]  }
  0xaa   :  { %2159 = vmatmul.mubr.bf16.gmra.mrb[52].mxu0 %v3938_v44  ;;  %1702 = vmatprep.mubr.bf16.mxu1 %v3939_v45  ;;  %v4032_v44 = vld [vmem:[%s5622_s0 + $0x120] ss:$28 sps:$4 sm:$0xff]   ;;  %v4033_v45 = vld [vmem:[%s5622_s0 + $0x130] ss:$28 sps:$4 sm:$0xff]  }
  0xab   :  { %2166 = vmatprep.mubr.bf16.mxu0 %v3941_v46  ;;  %v4034_v46 = vld [vmem:[%s5622_s0 + $0x15c] ss:$28 sps:$4 sm:$0xff]  }
  0xb1   :  { %1703 = vmatmul.mubr.bf16.gmra.mrb[56].mxu1 %v3943_v47  ;;  %v4036_v47 = vld [vmem:[%s5622_s0 + $0x158] ss:$28 sps:$4 sm:$0xff]  }
  0xb2   :  { %2167 = vmatmul.mubr.bf16.gmra.mrb[56].mxu0 %v3944_v48  ;;  %1710 = vmatprep.mubr.bf16.mxu1 %v3946_v49  ;;  %v4037_v48 = vld [vmem:[%s5622_s0 + $0x168] ss:$28 sps:$4 sm:$0xff]   ;;  %v4038_v49 = vld [vmem:[%s5622_s0 + $0x194] ss:$28 sps:$4 sm:$0xff]  }
  0xb3   :  { %2174 = vmatprep.mubr.bf16.mxu0 %v3948_v50  ;;  %v4040_v50 = vld [vmem:[%s5622_s0 + $0x190] ss:$28 sps:$4 sm:$0xff]  }
  0xb9   :  { %1711 = vmatmul.mubr.bf16.gmra.mrb[60].mxu1 %v3950_v51  ;;  %v4041_v51 = vld [vmem:[%s5622_s0 + $0x1a0] ss:$28 sps:$4 sm:$0xff]  }
  0xba   :  { %2175 = vmatmul.mubr.bf16.gmra.mrb[60].mxu0 %v3951_v52  ;;  %1718 = vmatprep.mubr.bf16.mxu1 %v3953_v53  ;;  %v4042_v52 = vld [vmem:[%s5622_s0 + $0x1cc] ss:$28 sps:$4 sm:$0xff]  }
  0xbb   :  { %2182 = vmatprep.mubr.bf16.mxu0 %v3955_v54  ;;  %v4044_v53 = vld [vmem:[%s5622_s0 + $0x1c8] ss:$28 sps:$4 sm:$0xff]   ;;  %v4045_v54 = vld [vmem:[%s5622_s0 + $0x1d8] ss:$28 sps:$4 sm:$0xff]  }
  0xc1   :  { %1719 = vmatmul.mubr.bf16.gmra.mrb[64].mxu1 %v3957_v55  ;;  %v4046_v55 = vld [vmem:[%s5622_s0 + $0x204] ss:$28 sps:$4 sm:$0xff]  }
  0xc2   :  { %2183 = vmatmul.mubr.bf16.gmra.mrb[64].mxu0 %v3958_v56  ;;  %1726 = vmatprep.mubr.bf16.mxu1 %v3959_v57  ;;  %v4048_v56 = vld [vmem:[%s5622_s0 + $0x200] ss:$28 sps:$4 sm:$0xff]   ;;  %v4049_v57 = vld [vmem:[%s5622_s0 + $0x210] ss:$28 sps:$4 sm:$0xff]  }
  0xc3   :  { %2190 = vmatprep.mubr.bf16.mxu0 %v3961_v58  ;;  %v4050_v58 = vld [vmem:[%s5622_s0 + $0x23c] ss:$28 sps:$4 sm:$0xff]  }
  0xc9   :  { %1727 = vmatmul.mubr.bf16.gmra.mrb[68].mxu1 %v3963_v59  ;;  %v4052_v59 = vld [vmem:[%s5622_s0 + $0x238] ss:$28 sps:$4 sm:$0xff]  }
  0xca   :  { %2191 = vmatmul.mubr.bf16.gmra.mrb[68].mxu0 %v3964_v60  ;;  %1734 = vmatprep.mubr.bf16.mxu1 %v3966_v61  ;;  %v4053_v60 = vld [vmem:[%s5622_s0 + $0x248] ss:$28 sps:$4 sm:$0xff]   ;;  %v4054_v61 = vld [vmem:[%s5622_s0 + $0x274] ss:$28 sps:$4 sm:$0xff]  }
  0xcb   :  { %2198 = vmatprep.mubr.bf16.mxu0 %v3968_v62  ;;  %v4056_v62 = vld [vmem:[%s5622_s0 + $0x270] ss:$28 sps:$4 sm:$0xff]  }
  0xd1   :  { %1735 = vmatmul.mubr.bf16.gmra.mrb[72].mxu1 %v3970_v63  ;;  %v4057_v63 = vld [vmem:[%s5622_s0 + $0x280] ss:$28 sps:$4 sm:$0xff]  }
  0xd2   :  { %2199 = vmatmul.mubr.bf16.gmra.mrb[72].mxu0 %v3971_v1  ;;  %1742 = vmatprep.mubr.bf16.mxu1 %v3972_v2  ;;  %v4058_v1 = vld [vmem:[%s5622_s0 + $0x2ac] ss:$28 sps:$4 sm:$0xff]  }
  0xd3   :  { %2206 = vmatprep.mubr.bf16.mxu0 %v3975_v3  ;;  %v4060_v2 = vld [vmem:[%s5622_s0 + $0x2a8] ss:$28 sps:$4 sm:$0xff]   ;;  %v4061_v3 = vld [vmem:[%s5622_s0 + $0x2b8] ss:$28 sps:$4 sm:$0xff]  }
  0xd9   :  { %1743 = vmatmul.mubr.bf16.gmra.mrb[76].mxu1 %v3977_v4  ;;  %v4062_v4 = vld [vmem:[%s5622_s0 + $0x2e4] ss:$28 sps:$4 sm:$0xff]  }
  0xda   :  { %2207 = vmatmul.mubr.bf16.gmra.mrb[76].mxu0 %v3978_v5  ;;  %1750 = vmatprep.mubr.bf16.mxu1 %v3979_v6  ;;  %v4064_v5 = vld [vmem:[%s5622_s0 + $0x2e0] ss:$28 sps:$4 sm:$0xff]   ;;  %v4065_v6 = vld [vmem:[%s5622_s0 + $0x2f0] ss:$28 sps:$4 sm:$0xff]  }
  0xdb   :  { %2214 = vmatprep.mubr.bf16.mxu0 %v3981_v7  ;;  %v4066_v7 = vld [vmem:[%s5622_s0 + $0x31c] ss:$28 sps:$4 sm:$0xff]  }
  0xe1   :  { %1751 = vmatmul.mubr.bf16.gmra.mrb[80].mxu1 %v3983_v8  ;;  %v4068_v8 = vld [vmem:[%s5622_s0 + $0x318] ss:$28 sps:$4 sm:$0xff]  }
  0xe2   :  { %2215 = vmatmul.mubr.bf16.gmra.mrb[80].mxu0 %v3984_v9  ;;  %1758 = vmatprep.mubr.bf16.mxu1 %v3986_v10  ;;  %v4069_v9 = vld [vmem:[%s5622_s0 + $0x328] ss:$28 sps:$4 sm:$0xff]   ;;  %v4070_v10 = vld [vmem:[%s5622_s0 + $0x354] ss:$28 sps:$4 sm:$0xff]  }
  0xe3   :  { %2222 = vmatprep.mubr.bf16.mxu0 %v3988_v11  ;;  %v4072_v11 = vld [vmem:[%s5622_s0 + $0x350] ss:$28 sps:$4 sm:$0xff]  }
  0xe9   :  { %1759 = vmatmul.mubr.bf16.gmra.mrb[84].mxu1 %v3990_v12  ;;  %v4073_v12 = vld [vmem:[%s5622_s0 + $0x360] ss:$28 sps:$4 sm:$0xff]  }
  0xea   :  { %2223 = vmatmul.mubr.bf16.gmra.mrb[84].mxu0 %v3991_v13  ;;  %1766 = vmatprep.mubr.bf16.mxu1 %v3992_v14  ;;  %v4074_v13 = vld [vmem:[%s5622_s0 + $0x38c] ss:$28 sps:$4 sm:$0xff]  }
  0xeb   :  { %2230 = vmatprep.mubr.bf16.mxu0 %v3994_v15  ;;  %v4076_v14 = vld [vmem:[%s5622_s0 + $0x388] ss:$28 sps:$4 sm:$0xff]   ;;  %v4077_v15 = vld [vmem:[%s5622_s0 + $0x398] ss:$28 sps:$4 sm:$0xff]  }
  0xf1   :  { %1767 = vmatmul.mubr.bf16.gmra.mrb[88].mxu1 %v3996_v16  ;;  %v4078_v16 = vld [vmem:[%s5622_s0 + $0x3c4] ss:$28 sps:$4 sm:$0xff]  }
  0xf2   :  { %2231 = vmatmul.mubr.bf16.gmra.mrb[88].mxu0 %v3998_v17  ;;  %1774 = vmatprep.mubr.bf16.mxu1 %v3999_v18  ;;  %v4080_v17 = vld [vmem:[%s5622_s0 + $0x3c0] ss:$28 sps:$4 sm:$0xff]   ;;  %v4081_v18 = vld [vmem:[%s5622_s0 + $0x3d0] ss:$28 sps:$4 sm:$0xff]  }
  0xf3   :  { %2238 = vmatprep.mubr.bf16.mxu0 %v4001_v19  ;;  %v4082_v19 = vld [vmem:[%s5622_s0 + $0x3fc] ss:$28 sps:$4 sm:$0xff]  }
  0xf9   :  { %1775 = vmatmul.mubr.bf16.gmra.mrb[92].mxu1 %v4003_v22  ;;  %v4086_v22 = vld [vmem:[%s5622_s0 + $0x434] ss:$28 sps:$4 sm:$0xff]  }
  0xfa   :  { %2239 = vmatmul.mubr.bf16.gmra.mrb[92].mxu0 %v4004_v23  ;;  %1782 = vmatprep.mubr.bf16.mxu1 %v3249_v24  ;;  %v4088_v23 = vld [vmem:[%s5622_s0 + $0x430] ss:$28 sps:$4 sm:$0xff]   ;;  %v4089_v24 = vld [vmem:[%s5622_s0 + $0x440] ss:$28 sps:$4 sm:$0xff]  }
  0xfb   :  { %2246 = vmatprep.mubr.bf16.mxu0 %v3253_v25  ;;  %v4090_v25 = vld [vmem:[%s5622_s0 + $0x46c] ss:$28 sps:$4 sm:$0xff]  }
 0x101   :  { %1783 = vmatmul.mubr.bf16.gmra.mrb[96].mxu1 %v3248_v26  ;;  %v4092_v26 = vld [vmem:[%s5622_s0 + $0x468] ss:$28 sps:$4 sm:$0xff]  }
 0x102   :  { %2247 = vmatmul.mubr.bf16.gmra.mrb[96].mxu0 %v3252_v27  ;;  %1822 = vmatprep.mubr.bf16.mxu1 %v4012_v28  ;;  %v4093_v27 = vld [vmem:[%s5622_s0 + $0x478] ss:$28 sps:$4 sm:$0xff]   ;;  %v4094_v28 = vld [vmem:[%s5622_s0 + $0x4a4] ss:$28 sps:$4 sm:$0xff]  }
 0x103   :  { %3410 = vmatprep.mubr.msk.bf16.mxu0 %vm4308_vm0, %v4307_v40 }
 0x109   :  { %1823 = vmatmul.mubr.bf16.vlgmr.msra.gmra.mrb[0].mxu1 %v4010_v0  ;;  %v4096_v0 = vld [vmem:[%s5622_s0 + $0x4a0] ss:$28 sps:$4 sm:$0xff]  }
 0x10a   :  { %3411 = vmatmul.mubr.msk.bf16.vlgmr.msra.gmra.mrb[0].mxu0 %vm1482_vm1, %v4013_v29  ;;  %1830 = vmatprep.mubr.bf16.mxu1 %v4014_v30  ;;  %v4097_v29 = vld [vmem:[%s5622_s0 + $0x4b0] ss:$28 sps:$4 sm:$0xff]   ;;  %v4098_v30 = vld [vmem:[%s5622_s0 + $0x4dc] ss:$28 sps:$4 sm:$0xff]  }
 0x10b   :  { %3414 = vmatprep.mubr.msk.bf16.mxu0 %vm4308_vm0, %v4307_v40 }
 0x111   :  { %1831 = vmatmul.mubr.bf16.gmra.mrb[4].mxu1 %v4016_v31  ;;  %v4100_v31 = vld [vmem:[%s5622_s0 + $0x4d8] ss:$28 sps:$4 sm:$0xff]  }
 0x112   :  { %3415 = vmatmul.mubr.msk.bf16.gmra.mrb[4].mxu0 %vm1482_vm1, %v4017_v32  ;;  %1838 = vmatprep.mubr.bf16.mxu1 %v4018_v33  ;;  %v4101_v32 = vld [vmem:[%s5622_s0 + $0x4e8] ss:$28 sps:$4 sm:$0xff]   ;;  %v4102_v33 = vld [vmem:[%s5622_s0 + $0x514] ss:$28 sps:$4 sm:$0xff]  }
 0x113   :  { %3418 = vmatprep.mubr.msk.bf16.mxu0 %vm4308_vm0, %v4307_v40 }
 0x119   :  { %1839 = vmatmul.mubr.bf16.gmra.mrb[8].mxu1 %v4020_v34  ;;  %v208_v34 = vld [vmem:[%s5622_s0 + $0x548] sm:$0xff] }
 0x11a   :  { %3419 = vmatmul.mubr.msk.bf16.gmra.mrb[8].mxu0 %vm1482_vm1, %v4021_v35  ;;  %1846 = vmatprep.mubr.bf16.mxu1 %v4022_v36  ;;  %v4104_v35 = vld [vmem:[%s5622_s0 + $0x510] ss:$28 sps:$4 sm:$0xff]   ;;  %v4105_v36 = vld [vmem:[%s5622_s0 + $0x520] ss:$28 sps:$4 sm:$0xff]  }
 0x11b   :  { %3422 = vmatprep.mubr.msk.bf16.mxu0 %vm4308_vm0, %v4307_v40 }
 0x121   :  { %1847 = vmatmul.mubr.bf16.gmra.mrb[12].mxu1 %v4024_v37  ;;  %v3251_v37 = vcombine.high %v208_v34, %v208_v34 }
 0x122   :  { %3423 = vmatmul.mubr.msk.bf16.gmra.mrb[12].mxu0 %vm1482_vm1, %v4025_v38  ;;  %1854 = vmatprep.mubr.bf16.mxu1 %v4026_v39  ;;  %v3250_v38 = vcombine.low %v208_v34, %v208_v34  ;;  %v4108_v39 = vld [vmem:[%s5622_s0 + $0x558] ss:$0 sps:$4 sm:$0xff]   ;;  %s4309_s0 = smov 64  }
 0x123   :  { %3426 = vmatprep.mubr.msk.bf16.mxu0 %vm4308_vm0, %v4307_v40 }
 0x129   :  { %1855 = vmatmul.mubr.bf16.gmra.mrb[16].mxu1 %v4028_v41  ;;  %v5124_v41 = vld [vmem:[%s5623_s2] ss:$0 sm:$0xff] }
 0x12a   :  { %3427 = vmatmul.mubr.msk.bf16.gmra.mrb[16].mxu0 %vm1482_vm1, %v4029_v42  ;;  %1862 = vmatprep.mubr.bf16.mxu1 %v4030_v43 }
 0x12b   :  { %3430 = vmatprep.mubr.msk.bf16.mxu0 %vm4308_vm0, %v4307_v40 }
 0x131   :  { %1863 = vmatmul.mubr.bf16.gmra.mrb[20].mxu1 %v4032_v44 }
 0x132   :  { %3431 = vmatmul.mubr.msk.bf16.gmra.mrb[20].mxu0 %vm1482_vm1, %v4033_v45  ;;  %1870 = vmatprep.mubr.bf16.mxu1 %v4034_v46 }
 0x133   :  { %3434 = vmatprep.mubr.msk.bf16.mxu0 %vm4308_vm0, %v4307_v40 }
 0x139   :  { %1871 = vmatmul.mubr.bf16.gmra.mrb[24].mxu1 %v4036_v47 }
 0x13a   :  { %3435 = vmatmul.mubr.msk.bf16.gmra.mrb[24].mxu0 %vm1482_vm1, %v4037_v48  ;;  %1878 = vmatprep.mubr.bf16.mxu1 %v4038_v49 }
 0x13b   :  { %3438 = vmatprep.mubr.msk.bf16.mxu0 %vm4308_vm0, %v4307_v40 }
 0x141   :  { %1879 = vmatmul.mubr.bf16.gmra.mrb[28].mxu1 %v4040_v50 }
 0x142   :  { %3439 = vmatmul.mubr.msk.bf16.gmra.mrb[28].mxu0 %vm1482_vm1, %v4041_v51  ;;  %1886 = vmatprep.mubr.bf16.mxu1 %v4042_v52 }
 0x143   :  { %3442 = vmatprep.mubr.msk.bf16.mxu0 %vm4308_vm0, %v4307_v40 }
 0x149   :  { %1887 = vmatmul.mubr.bf16.gmra.mrb[32].mxu1 %v4044_v53 }
 0x14a   :  { %3443 = vmatmul.mubr.msk.bf16.gmra.mrb[32].mxu0 %vm1482_vm1, %v4045_v54  ;;  %1894 = vmatprep.mubr.bf16.mxu1 %v4046_v55 }
 0x14b   :  { %3446 = vmatprep.mubr.msk.bf16.mxu0 %vm4308_vm0, %v4307_v40 }
 0x151   :  { %1895 = vmatmul.mubr.bf16.gmra.mrb[36].mxu1 %v4048_v56 }
 0x152   :  { %3447 = vmatmul.mubr.msk.bf16.gmra.mrb[36].mxu0 %vm1482_vm1, %v4049_v57  ;;  %1902 = vmatprep.mubr.bf16.mxu1 %v4050_v58 }
 0x153   :  { %3450 = vmatprep.mubr.msk.bf16.mxu0 %vm4308_vm0, %v4307_v40 }
 0x159   :  { %1903 = vmatmul.mubr.bf16.gmra.mrb[40].mxu1 %v4052_v59 }
 0x15a   :  { %3451 = vmatmul.mubr.msk.bf16.gmra.mrb[40].mxu0 %vm1482_vm1, %v4053_v60  ;;  %1910 = vmatprep.mubr.bf16.mxu1 %v4054_v61 }
 0x15b   :  { %3454 = vmatprep.mubr.msk.bf16.mxu0 %vm4308_vm0, %v4307_v40 }
 0x161   :  { %1911 = vmatmul.mubr.bf16.gmra.mrb[44].mxu1 %v4056_v62 }
 0x162   :  { %3455 = vmatmul.mubr.msk.bf16.gmra.mrb[44].mxu0 %vm1482_vm1, %v4057_v63  ;;  %1918 = vmatprep.mubr.bf16.mxu1 %v4058_v1 }
 0x163   :  { %3458 = vmatprep.mubr.msk.bf16.mxu0 %vm4308_vm0, %v4307_v40 }
 0x169   :  { %1919 = vmatmul.mubr.bf16.gmra.mrb[48].mxu1 %v4060_v2 }
 0x16a   :  { %3459 = vmatmul.mubr.msk.bf16.gmra.mrb[48].mxu0 %vm1482_vm1, %v4061_v3  ;;  %1926 = vmatprep.mubr.bf16.mxu1 %v4062_v4 }
 0x16b   :  { %3462 = vmatprep.mubr.msk.bf16.mxu0 %vm4308_vm0, %v4307_v40 }
 0x171   :  { %1927 = vmatmul.mubr.bf16.gmra.mrb[52].mxu1 %v4064_v5 }
 0x172   :  { %3463 = vmatmul.mubr.msk.bf16.gmra.mrb[52].mxu0 %vm1482_vm1, %v4065_v6  ;;  %1934 = vmatprep.mubr.bf16.mxu1 %v4066_v7 }
 0x173   :  { %3466 = vmatprep.mubr.msk.bf16.mxu0 %vm4308_vm0, %v4307_v40 }
 0x179   :  { %1935 = vmatmul.mubr.bf16.gmra.mrb[56].mxu1 %v4068_v8 }
 0x17a   :  { %3467 = vmatmul.mubr.msk.bf16.gmra.mrb[56].mxu0 %vm1482_vm1, %v4069_v9  ;;  %1942 = vmatprep.mubr.bf16.mxu1 %v4070_v10 }
 0x17b   :  { %3470 = vmatprep.mubr.msk.bf16.mxu0 %vm4308_vm0, %v4307_v40 }
 0x181   :  { %1943 = vmatmul.mubr.bf16.gmra.mrb[60].mxu1 %v4072_v11 }
 0x182   :  { %3471 = vmatmul.mubr.msk.bf16.gmra.mrb[60].mxu0 %vm1482_vm1, %v4073_v12  ;;  %1950 = vmatprep.mubr.bf16.mxu1 %v4074_v13 }
 0x183   :  { %3474 = vmatprep.mubr.msk.bf16.mxu0 %vm4308_vm0, %v4307_v40 }
 0x189   :  { %1951 = vmatmul.mubr.bf16.gmra.mrb[64].mxu1 %v4076_v14 }
 0x18a   :  { %3475 = vmatmul.mubr.msk.bf16.gmra.mrb[64].mxu0 %vm1482_vm1, %v4077_v15  ;;  %1958 = vmatprep.mubr.bf16.mxu1 %v4078_v16 }
 0x18b   :  { %3478 = vmatprep.mubr.msk.bf16.mxu0 %vm4308_vm0, %v4307_v40 }
 0x191   :  { %1959 = vmatmul.mubr.bf16.gmra.mrb[68].mxu1 %v4080_v17 }
 0x192   :  { %3479 = vmatmul.mubr.msk.bf16.gmra.mrb[68].mxu0 %vm1482_vm1, %v4081_v18  ;;  %1966 = vmatprep.mubr.bf16.mxu1 %v4082_v19 }
 0x193   :  { %3482 = vmatprep.mubr.msk.bf16.mxu0 %vm4308_vm0, %v4307_v40 }
 0x199   :  { %1967 = vmatmul.mubr.bf16.gmra.mrb[72].mxu1 %v4084_v20 }
 0x19a   :  { %3483 = vmatmul.mubr.msk.bf16.gmra.mrb[72].mxu0 %vm1482_vm1, %v4085_v21  ;;  %1974 = vmatprep.mubr.bf16.mxu1 %v4086_v22 }
 0x19b   :  { %3486 = vmatprep.mubr.msk.bf16.mxu0 %vm4308_vm0, %v4307_v40 }
 0x1a1   :  { %1975 = vmatmul.mubr.bf16.gmra.mrb[76].mxu1 %v4088_v23 }
 0x1a2   :  { %3487 = vmatmul.mubr.msk.bf16.gmra.mrb[76].mxu0 %vm1482_vm1, %v4089_v24  ;;  %1982 = vmatprep.mubr.bf16.mxu1 %v4090_v25 }
 0x1a3   :  { %3490 = vmatprep.mubr.msk.bf16.mxu0 %vm4308_vm0, %v4307_v40 }
 0x1a9   :  { %1983 = vmatmul.mubr.bf16.gmra.mrb[80].mxu1 %v4092_v26 }
 0x1aa   :  { %3491 = vmatmul.mubr.msk.bf16.gmra.mrb[80].mxu0 %vm1482_vm1, %v4093_v27  ;;  %1990 = vmatprep.mubr.bf16.mxu1 %v4094_v28 }
 0x1ab   :  { %3494 = vmatprep.mubr.msk.bf16.mxu0 %vm4308_vm0, %v4307_v40 }
 0x1b1   :  { %1991 = vmatmul.mubr.bf16.gmra.mrb[84].mxu1 %v4096_v0 }
 0x1b2   :  { %3495 = vmatmul.mubr.msk.bf16.gmra.mrb[84].mxu0 %vm1482_vm1, %v4097_v29  ;;  %1998 = vmatprep.mubr.bf16.mxu1 %v4098_v30 }
 0x1b3   :  { %3498 = vmatprep.mubr.msk.bf16.mxu0 %vm4308_vm0, %v4307_v40 }
 0x1b9   :  { %1999 = vmatmul.mubr.bf16.gmra.mrb[88].mxu1 %v4100_v31 }
 0x1ba   :  { %3499 = vmatmul.mubr.msk.bf16.gmra.mrb[88].mxu0 %vm1482_vm1, %v4101_v32  ;;  %2006 = vmatprep.mubr.bf16.mxu1 %v4102_v33 }
 0x1bb   :  { %3502 = vmatprep.mubr.msk.bf16.mxu0 %vm4308_vm0, %v4307_v40 }
 0x1c1   :  { %2007 = vmatmul.mubr.bf16.gmra.mrb[92].mxu1 %v4104_v35 }
 0x1c2   :  { %3503 = vmatmul.mubr.msk.bf16.gmra.mrb[92].mxu0 %vm1482_vm1, %v4105_v36  ;;  %2014 = vmatprep.mubr.bf16.mxu1 %v3251_v37 }
 0x1c3   :  { %3506 = vmatprep.mubr.msk.bf16.mxu0 %vm4308_vm0, %v4307_v40 }
 0x1c9   :  { %2015 = vmatmul.mubr.bf16.gmra.mrb[96].mxu1 %v3250_v38 }
 0x1ca   :  { %3507 = vmatmul.mubr.msk.bf16.gmra.mrb[96].mxu0 %vm1482_vm1, %v4108_v39 }
 0x1dc   :  { %v1824_v42 = vpop.f32.mrb[0].mxu1 }
 0x1dd   :  { %v3510_v43 = vadd.f32 %v5124_v41, %v1824_v42  ;;  %v2288_v44 = vpop.f32.mrb[0].mxu0  ;;  %v1826_v45 = vpop.f32.mrb[1].mxu1 }
 0x1de   :  { %v3412_v46 = vpop.f32.mrb[1].mxu0  ;;  %v1827_v40 = vpop.f32.mrb[2].mxu1 }
 0x1df   :  { %v5127_v47 = vadd.f32 %v3510_v43, %v2288_v44  ;;  %v3512_v48 = vadd.f32 %v5124_v41, %v1827_v40  ;;  %v2291_v49 = vpop.f32.mrb[2].mxu0  ;;  %v1829_v50 = vpop.f32.mrb[3].mxu1 }
 0x1e0   :  { %v3413_v51 = vpop.f32.mrb[3].mxu0 }
 0x1e1   :  { %v3330_v52 = vmul.f32 -1.442695, %v5127_v47  ;;  %v5131_v53 = vadd.f32 %v3512_v48, %v2291_v49 }
 0x1e3   :  { %4109 = vpow2.f32 %v3330_v52  ;;  %v3331_v54 = vmul.f32 -1.442695, %v5131_v53 }
 0x1e4   :  { %v1832_v55 = vpop.f32.mrb[4].mxu1 }
 0x1e5   :  { %4111 = vpow2.f32 %v3331_v54  ;;  %v3514_v56 = vadd.f32 %v5124_v41, %v1832_v55  ;;  %v2296_v57 = vpop.f32.mrb[4].mxu0  ;;  %v1834_v58 = vpop.f32.mrb[5].mxu1 }
 0x1e6   :  { %v3416_v59 = vpop.f32.mrb[5].mxu0  ;;  %v1835_v60 = vpop.f32.mrb[6].mxu1 }
 0x1e7   :  { %v5135_v61 = vadd.f32 %v3514_v56, %v2296_v57  ;;  %v3516_v62 = vadd.f32 %v5124_v41, %v1835_v60  ;;  %v2299_v63 = vpop.f32.mrb[6].mxu0  ;;  %v1837_v1 = vpop.f32.mrb[7].mxu1 }
 0x1e8   :  { %v3417_v2 = vpop.f32.mrb[7].mxu0 }
 0x1e9   :  { %v3332_v3 = vmul.f32 -1.442695, %v5135_v61  ;;  %v5139_v4 = vadd.f32 %v3516_v62, %v2299_v63 }
 0x1eb   :  { %4113 = vpow2.f32 %v3332_v3  ;;  %v3333_v5 = vmul.f32 -1.442695, %v5139_v4 }
 0x1ec   :  { %v1840_v6 = vpop.f32.mrb[8].mxu1 }
 0x1ed   :  { %v4110_v7 = vpop.eup %4109  ;;  %4115 = vpow2.f32 %v3333_v5  ;;  %v3518_v8 = vadd.f32 %v5124_v41, %v1840_v6  ;;  %v2304_v9 = vpop.f32.mrb[8].mxu0 }
 0x1ee   :  { %v1842_v10 = vpop.f32.mrb[9].mxu1  ;;  %v2633_v11 = vadd.f32 1.0, %v4110_v7  ;;  %v3420_v12 = vpop.f32.mrb[9].mxu0 }
 0x1ef   :  { %v1843_v13 = vpop.f32.mrb[10].mxu1  ;;  %v4112_v14 = vpop.eup %4111  ;;  %v5143_v15 = vadd.f32 %v3518_v8, %v2304_v9 }
 0x1f0   :  { %v3520_v16 = vadd.f32 %v5124_v41, %v1843_v13  ;;  %v2307_v17 = vpop.f32.mrb[10].mxu0  ;;  %v1845_v18 = vpop.f32.mrb[11].mxu1  ;;  %4117 = vrcp.f32 %v2633_v11  ;;  %v2634_v19 = vadd.f32 1.0, %v4112_v14 }
 0x1f1   :  { %v3421_v20 = vpop.f32.mrb[11].mxu0  ;;  %v3334_v21 = vmul.f32 -1.442695, %v5143_v15 }
 0x1f2   :  { %v5147_v22 = vadd.f32 %v3520_v16, %v2307_v17 }
 0x1f3   :  { %4119 = vpow2.f32 %v3334_v21 }
 0x1f4   :  { %v3335_v23 = vmul.f32 -1.442695, %v5147_v22  ;;  %4121 = vrcp.f32 %v2634_v19  ;;  %v1848_v24 = vpop.f32.mrb[12].mxu1 }
 0x1f5   :  { %v4114_v25 = vpop.eup %4113  ;;  %v3522_v26 = vadd.f32 %v5124_v41, %v1848_v24  ;;  %v2312_v27 = vpop.f32.mrb[12].mxu0 }
 0x1f6   :  { %4123 = vpow2.f32 %v3335_v23  ;;  %v1850_v28 = vpop.f32.mrb[13].mxu1  ;;  %v2635_v0 = vadd.f32 1.0, %v4114_v25  ;;  %v3424_v29 = vpop.f32.mrb[13].mxu0 }
 0x1f7   :  { %v1851_v30 = vpop.f32.mrb[14].mxu1  ;;  %v4116_v31 = vpop.eup %4115  ;;  %v5151_v32 = vadd.f32 %v3522_v26, %v2312_v27 }
 0x1f8   :  { %v3524_v33 = vadd.f32 %v5124_v41, %v1851_v30  ;;  %v2315_v34 = vpop.f32.mrb[14].mxu0  ;;  %v1853_v35 = vpop.f32.mrb[15].mxu1  ;;  %4125 = vrcp.f32 %v2635_v0  ;;  %v2636_v36 = vadd.f32 1.0, %v4116_v31 }
 0x1f9   :  { %v3425_v37 = vpop.f32.mrb[15].mxu0  ;;  %v3336_v38 = vmul.f32 -1.442695, %v5151_v32 }
 0x1fa   :  { %v5155_v39 = vadd.f32 %v3524_v33, %v2315_v34  ;;  %v4118_v42 = vpop.eup %4117 }
 0x1fb   :  { %4127 = vpow2.f32 %v3336_v38  ;;  %2829 = vrot.lane.b32.xlu0 %v4118_v42, %s4309_s0 }
 0x1fc   :  { %v3337_v43 = vmul.f32 -1.442695, %v5155_v39  ;;  %4129 = vrcp.f32 %v2636_v36  ;;  %v1856_v44 = vpop.f32.mrb[16].mxu1 }
 0x1fd   :  { %v4120_v45 = vpop.eup %4119  ;;  %v3526_v46 = vadd.f32 %v5124_v41, %v1856_v44  ;;  %v2320_v40 = vpop.f32.mrb[16].mxu0 }
 0x1fe   :  { %4131 = vpow2.f32 %v3337_v43  ;;  %v1858_v48 = vpop.f32.mrb[17].mxu1  ;;  %v4122_v49 = vpop.eup %4121  ;;  %v2637_v50 = vadd.f32 1.0, %v4120_v45 }
 0x1ff   :  { %v3428_v51 = vpop.f32.mrb[17].mxu0  ;;  %v1859_v52 = vpop.f32.mrb[18].mxu1  ;;  %v5160_v55 = vadd.f32 %v3526_v46, %v2320_v40  ;;  %2831 = vrot.lane.b32.xlu0 %v4122_v49, %s4309_s0 }
 0x200   :  { %v4124_v54 = vpop.eup %4123  ;;  %v3528_v56 = vadd.f32 %v5124_v41, %v1859_v52  ;;  %v2323_v57 = vpop.f32.mrb[18].mxu0  ;;  %4133 = vrcp.f32 %v2637_v50 }
 0x201   :  { %v1861_v58 = vpop.f32.mrb[19].mxu1  ;;  %v2638_v59 = vadd.f32 1.0, %v4124_v54  ;;  %v3429_v60 = vpop.f32.mrb[19].mxu0  ;;  %v3338_v62 = vmul.f32 -1.442695, %v5160_v55 }
 0x202   :  { %v5165_v63 = vadd.f32 %v3528_v56, %v2323_v57  ;;  %v4126_v1 = vpop.eup %4125 }
 0x203   :  { %4135 = vrcp.f32 %v2638_v59  ;;  %2833 = vrot.lane.b32.xlu1 %v4126_v1, %s4309_s0 }
 0x204   :  { %4137 = vpow2.f32 %v3338_v62  ;;  %v3339_v2 = vmul.f32 -1.442695, %v5165_v63  ;;  %v1864_v3 = vpop.f32.mrb[20].mxu1 }
 0x205   :  { %v4128_v5 = vpop.eup %4127  ;;  %v3530_v6 = vadd.f32 %v5124_v41, %v1864_v3  ;;  %v2328_v7 = vpop.f32.mrb[20].mxu0 }
 0x206   :  { %4139 = vpow2.f32 %v3339_v2  ;;  %v1866_v8 = vpop.f32.mrb[21].mxu1  ;;  %v4130_v9 = vpop.eup %4129  ;;  %v2639_v10 = vadd.f32 1.0, %v4128_v5 }
 0x207   :  { %v3432_v11 = vpop.f32.mrb[21].mxu0  ;;  %v1867_v12 = vpop.f32.mrb[22].mxu1  ;;  %v5170_v14 = vadd.f32 %v3530_v6, %v2328_v7  ;;  %2835 = vrot.lane.b32.xlu1 %v4130_v9, %s4309_s0 }
 0x208   :  { %v4132_v13 = vpop.eup %4131  ;;  %v3532_v16 = vadd.f32 %v5124_v41, %v1867_v12  ;;  %v2331_v17 = vpop.f32.mrb[22].mxu0  ;;  %4141 = vrcp.f32 %v2639_v10 }
 0x209   :  { %v1869_v18 = vpop.f32.mrb[23].mxu1  ;;  %v2640_v19 = vadd.f32 1.0, %v4132_v13  ;;  %v3433_v20 = vpop.f32.mrb[23].mxu0  ;;  %v3340_v21 = vmul.f32 -1.442695, %v5170_v14 }
 0x20a   :  { %v5175_v23 = vadd.f32 %v3532_v16, %v2331_v17  ;;  %v4134_v24 = vpop.eup %4133 }
 0x20b   :  { %4143 = vrcp.f32 %v2640_v19  ;;  %2837 = vrot.lane.b32.xlu0 %v4134_v24, %s4309_s0 }
 0x20c   :  { %4145 = vpow2.f32 %v3340_v21  ;;  %v3341_v25 = vmul.f32 -1.442695, %v5175_v23  ;;  %v1872_v27 = vpop.f32.mrb[24].mxu1 }
 0x20d   :  { %v4136_v26 = vpop.eup %4135  ;;  %v3534_v0 = vadd.f32 %v5124_v41, %v1872_v27  ;;  %v2336_v29 = vpop.f32.mrb[24].mxu0 }
 0x20e   :  { %v4138_v28 = vpop.eup %4137  ;;  %4147 = vpow2.f32 %v3341_v25  ;;  %2839 = vrot.lane.b32.xlu1 %v4136_v26, %s4309_s0  ;;  %v1874_v30 = vpop.f32.mrb[25].mxu1 }
 0x20f   :  { %v2641_v31 = vadd.f32 1.0, %v4138_v28  ;;  %v3436_v33 = vpop.f32.mrb[25].mxu0  ;;  %v1875_v34 = vpop.f32.mrb[26].mxu1  ;;  %v5181_v36 = vadd.f32 %v3534_v0, %v2336_v29 }
 0x210   :  { %v4140_v35 = vpop.eup %4139  ;;  %v3536_v37 = vadd.f32 %v5124_v41, %v1875_v34  ;;  %v2339_v38 = vpop.f32.mrb[26].mxu0 }
 0x211   :  { %v1877_v42 = vpop.f32.mrb[27].mxu1  ;;  %4149 = vrcp.f32 %v2641_v31  ;;  %v2642_v43 = vadd.f32 1.0, %v4140_v35  ;;  %v3437_v44 = vpop.f32.mrb[27].mxu0  ;;  %v3342_v45 = vmul.f32 -1.442695, %v5181_v36 }
 0x212   :  { %v5185_v46 = vadd.f32 %v3536_v37, %v2339_v38  ;;  %v4142_v40 = vpop.eup %4141 }
 0x213   :  { %4151 = vrcp.f32 %v2642_v43  ;;  %2841 = vrot.lane.b32.xlu0 %v4142_v40, %s4309_s0 }
 0x214   :  { %4153 = vpow2.f32 %v3342_v45  ;;  %v3343_v48 = vmul.f32 -1.442695, %v5185_v46  ;;  %v1880_v50 = vpop.f32.mrb[28].mxu1 }
 0x215   :  { %v4144_v49 = vpop.eup %4143  ;;  %v3538_v52 = vadd.f32 %v5124_v41, %v1880_v50  ;;  %v2344_v54 = vpop.f32.mrb[28].mxu0 }
 0x216   :  { %v4146_v51 = vpop.eup %4145  ;;  %4155 = vpow2.f32 %v3343_v48  ;;  %2843 = vrot.lane.b32.xlu1 %v4144_v49, %s4309_s0  ;;  %v1882_v56 = vpop.f32.mrb[29].mxu1 }
 0x217   :  { %v2643_v57 = vadd.f32 1.0, %v4146_v51  ;;  %v3440_v58 = vpop.f32.mrb[29].mxu0  ;;  %v1883_v59 = vpop.f32.mrb[30].mxu1  ;;  %v5191_v62 = vadd.f32 %v3538_v52, %v2344_v54 }
 0x218   :  { %v4148_v60 = vpop.eup %4147  ;;  %v3540_v1 = vadd.f32 %v5124_v41, %v1883_v59  ;;  %v2347_v2 = vpop.f32.mrb[30].mxu0 }
 0x219   :  { %v1885_v3 = vpop.f32.mrb[31].mxu1  ;;  %4157 = vrcp.f32 %v2643_v57  ;;  %v2644_v5 = vadd.f32 1.0, %v4148_v60  ;;  %v3441_v6 = vpop.f32.mrb[31].mxu0  ;;  %v3344_v7 = vmul.f32 -1.442695, %v5191_v62 }
 0x21a   :  { %v5195_v8 = vadd.f32 %v3540_v1, %v2347_v2 }
 0x21b   :  { %v4150_v9 = vpop.eup %4149  ;;  %4159 = vrcp.f32 %v2644_v5 }
 0x21c   :  { %4161 = vpow2.f32 %v3344_v7  ;;  %v3345_v10 = vmul.f32 -1.442695, %v5195_v8  ;;  %2845 = vrot.lane.b32.xlu0 %v4150_v9, %s4309_s0  ;;  %v1888_v12 = vpop.f32.mrb[32].mxu1 }
 0x21d   :  { %v4152_v11 = vpop.eup %4151  ;;  %v3542_v16 = vadd.f32 %v5124_v41, %v1888_v12  ;;  %v2352_v17 = vpop.f32.mrb[32].mxu0 }
 0x21e   :  { %v4154_v13 = vpop.eup %4153  ;;  %4163 = vpow2.f32 %v3345_v10  ;;  %2847 = vrot.lane.b32.xlu1 %v4152_v11, %s4309_s0  ;;  %v1890_v18 = vpop.f32.mrb[33].mxu1 }
 0x21f   :  { %v2645_v19 = vadd.f32 1.0, %v4154_v13  ;;  %v3444_v20 = vpop.f32.mrb[33].mxu0  ;;  %v1891_v21 = vpop.f32.mrb[34].mxu1  ;;  %v5201_v25 = vadd.f32 %v3542_v16, %v2352_v17 }
 0x220   :  { %v4156_v24 = vpop.eup %4155  ;;  %v3544_v26 = vadd.f32 %v5124_v41, %v1891_v21  ;;  %v2355_v27 = vpop.f32.mrb[34].mxu0 }
 0x221   :  { %v1893_v28 = vpop.f32.mrb[35].mxu1  ;;  %4165 = vrcp.f32 %v2645_v19  ;;  %v2646_v0 = vadd.f32 1.0, %v4156_v24  ;;  %v3445_v29 = vpop.f32.mrb[35].mxu0  ;;  %v3346_v30 = vmul.f32 -1.442695, %v5201_v25 }
 0x222   :  { %v5205_v31 = vadd.f32 %v3544_v26, %v2355_v27 }
 0x223   :  { %v4158_v33 = vpop.eup %4157  ;;  %4167 = vrcp.f32 %v2646_v0 }
 0x224   :  { %4169 = vpow2.f32 %v3346_v30  ;;  %v3347_v34 = vmul.f32 -1.442695, %v5205_v31  ;;  %2849 = vrot.lane.b32.xlu0 %v4158_v33, %s4309_s0  ;;  %v1896_v37 = vpop.f32.mrb[36].mxu1 }
 0x225   :  { %v4160_v35 = vpop.eup %4159  ;;  %v3546_v42 = vadd.f32 %v5124_v41, %v1896_v37  ;;  %v2360_v43 = vpop.f32.mrb[36].mxu0 }
 0x226   :  { %v4162_v38 = vpop.eup %4161  ;;  %4171 = vpow2.f32 %v3347_v34  ;;  %2851 = vrot.lane.b32.xlu1 %v4160_v35, %s4309_s0  ;;  %v1898_v44 = vpop.f32.mrb[37].mxu1 }
 0x227   :  { %v2647_v45 = vadd.f32 1.0, %v4162_v38  ;;  %v3448_v40 = vpop.f32.mrb[37].mxu0  ;;  %v1899_v48 = vpop.f32.mrb[38].mxu1  ;;  %v5211_v50 = vadd.f32 %v3546_v42, %v2360_v43 }
 0x228   :  { %v4164_v49 = vpop.eup %4163  ;;  %v3548_v51 = vadd.f32 %v5124_v41, %v1899_v48  ;;  %v2363_v52 = vpop.f32.mrb[38].mxu0 }
 0x229   :  { %v1901_v54 = vpop.f32.mrb[39].mxu1  ;;  %4173 = vrcp.f32 %v2647_v45  ;;  %v2648_v56 = vadd.f32 1.0, %v4164_v49  ;;  %v3449_v57 = vpop.f32.mrb[39].mxu0  ;;  %v3348_v58 = vmul.f32 -1.442695, %v5211_v50 }
 0x22a   :  { %v5215_v59 = vadd.f32 %v3548_v51, %v2363_v52 }
 0x22b   :  { %v4166_v60 = vpop.eup %4165  ;;  %4175 = vrcp.f32 %v2648_v56 }
 0x22c   :  { %4177 = vpow2.f32 %v3348_v58  ;;  %v3349_v1 = vmul.f32 -1.442695, %v5215_v59  ;;  %2853 = vrot.lane.b32.xlu0 %v4166_v60, %s4309_s0  ;;  %v1904_v3 = vpop.f32.mrb[40].mxu1 }
 0x22d   :  { %v4168_v2 = vpop.eup %4167  ;;  %v3550_v6 = vadd.f32 %v5124_v41, %v1904_v3  ;;  %v2368_v7 = vpop.f32.mrb[40].mxu0 }
 0x22e   :  { %v4170_v5 = vpop.eup %4169  ;;  %4179 = vpow2.f32 %v3349_v1  ;;  %2855 = vrot.lane.b32.xlu1 %v4168_v2, %s4309_s0  ;;  %v1906_v9 = vpop.f32.mrb[41].mxu1 }
 0x22f   :  { %v2649_v10 = vadd.f32 1.0, %v4170_v5  ;;  %v3452_v11 = vpop.f32.mrb[41].mxu0  ;;  %v1907_v12 = vpop.f32.mrb[42].mxu1  ;;  %v5221_v16 = vadd.f32 %v3550_v6, %v2368_v7 }
 0x230   :  { %v4172_v13 = vpop.eup %4171  ;;  %v3552_v17 = vadd.f32 %v5124_v41, %v1907_v12  ;;  %v2371_v18 = vpop.f32.mrb[42].mxu0 }
 0x231   :  { %v1909_v19 = vpop.f32.mrb[43].mxu1  ;;  %4181 = vrcp.f32 %v2649_v10  ;;  %v2650_v20 = vadd.f32 1.0, %v4172_v13  ;;  %v3453_v21 = vpop.f32.mrb[43].mxu0  ;;  %v3350_v24 = vmul.f32 -1.442695, %v5221_v16 }
 0x232   :  { %v5225_v26 = vadd.f32 %v3552_v17, %v2371_v18 }
 0x233   :  { %v4174_v27 = vpop.eup %4173  ;;  %4183 = vrcp.f32 %v2650_v20 }
 0x234   :  { %4185 = vpow2.f32 %v3350_v24  ;;  %v3351_v28 = vmul.f32 -1.442695, %v5225_v26  ;;  %2857 = vrot.lane.b32.xlu0 %v4174_v27, %s4309_s0  ;;  %v1912_v29 = vpop.f32.mrb[44].mxu1 }
 0x235   :  { %v4176_v0 = vpop.eup %4175  ;;  %v3554_v33 = vadd.f32 %v5124_v41, %v1912_v29  ;;  %v2376_v34 = vpop.f32.mrb[44].mxu0 }
 0x236   :  { %v4178_v30 = vpop.eup %4177  ;;  %4187 = vpow2.f32 %v3351_v28  ;;  %2859 = vrot.lane.b32.xlu1 %v4176_v0, %s4309_s0  ;;  %v1914_v35 = vpop.f32.mrb[45].mxu1 }
 0x237   :  { %v2651_v37 = vadd.f32 1.0, %v4178_v30  ;;  %v3456_v38 = vpop.f32.mrb[45].mxu0  ;;  %v1915_v42 = vpop.f32.mrb[46].mxu1  ;;  %v5231_v44 = vadd.f32 %v3554_v33, %v2376_v34 }
 0x238   :  { %v4180_v43 = vpop.eup %4179  ;;  %v3556_v45 = vadd.f32 %v5124_v41, %v1915_v42  ;;  %v2379_v40 = vpop.f32.mrb[46].mxu0 }
 0x239   :  { %v1917_v48 = vpop.f32.mrb[47].mxu1  ;;  %4189 = vrcp.f32 %v2651_v37  ;;  %v2652_v49 = vadd.f32 1.0, %v4180_v43  ;;  %v3457_v51 = vpop.f32.mrb[47].mxu0  ;;  %v3352_v52 = vmul.f32 -1.442695, %v5231_v44 }
 0x23a   :  { %v5235_v54 = vadd.f32 %v3556_v45, %v2379_v40 }
 0x23b   :  { %v4182_v56 = vpop.eup %4181  ;;  %4191 = vrcp.f32 %v2652_v49 }
 0x23c   :  { %4193 = vpow2.f32 %v3352_v52  ;;  %v3353_v57 = vmul.f32 -1.442695, %v5235_v54  ;;  %2861 = vrot.lane.b32.xlu0 %v4182_v56, %s4309_s0  ;;  %v1920_v60 = vpop.f32.mrb[48].mxu1 }
 0x23d   :  { %v4184_v58 = vpop.eup %4183  ;;  %v3558_v2 = vadd.f32 %v5124_v41, %v1920_v60  ;;  %v2384_v3 = vpop.f32.mrb[48].mxu0 }
 0x23e   :  { %v4186_v1 = vpop.eup %4185  ;;  %4195 = vpow2.f32 %v3353_v57  ;;  %2863 = vrot.lane.b32.xlu1 %v4184_v58, %s4309_s0  ;;  %v1922_v5 = vpop.f32.mrb[49].mxu1 }
 0x23f   :  { %v2653_v6 = vadd.f32 1.0, %v4186_v1  ;;  %v3460_v7 = vpop.f32.mrb[49].mxu0  ;;  %v1923_v9 = vpop.f32.mrb[50].mxu1  ;;  %v5241_v11 = vadd.f32 %v3558_v2, %v2384_v3 }
 0x240   :  { %v4188_v10 = vpop.eup %4187  ;;  %v3560_v12 = vadd.f32 %v5124_v41, %v1923_v9  ;;  %v2387_v13 = vpop.f32.mrb[50].mxu0 }
 0x241   :  { %v1925_v17 = vpop.f32.mrb[51].mxu1  ;;  %4197 = vrcp.f32 %v2653_v6  ;;  %v2654_v18 = vadd.f32 1.0, %v4188_v10  ;;  %v3461_v19 = vpop.f32.mrb[51].mxu0  ;;  %v3354_v20 = vmul.f32 -1.442695, %v5241_v11 }
 0x242   :  { %v5245_v21 = vadd.f32 %v3560_v12, %v2387_v13 }
 0x243   :  { %v4190_v24 = vpop.eup %4189  ;;  %4199 = vrcp.f32 %v2654_v18 }
 0x244   :  { %4201 = vpow2.f32 %v3354_v20  ;;  %v3355_v27 = vmul.f32 -1.442695, %v5245_v21  ;;  %2865 = vrot.lane.b32.xlu0 %v4190_v24, %s4309_s0  ;;  %v1928_v0 = vpop.f32.mrb[52].mxu1 }
 0x245   :  { %v4192_v28 = vpop.eup %4191  ;;  %v3562_v30 = vadd.f32 %v5124_v41, %v1928_v0  ;;  %v2392_v33 = vpop.f32.mrb[52].mxu0 }
 0x246   :  { %v4194_v29 = vpop.eup %4193  ;;  %4203 = vpow2.f32 %v3355_v27  ;;  %2867 = vrot.lane.b32.xlu1 %v4192_v28, %s4309_s0  ;;  %v1930_v34 = vpop.f32.mrb[53].mxu1 }
 0x247   :  { %v2655_v35 = vadd.f32 1.0, %v4194_v29  ;;  %v3464_v37 = vpop.f32.mrb[53].mxu0  ;;  %v1931_v38 = vpop.f32.mrb[54].mxu1  ;;  %v5251_v43 = vadd.f32 %v3562_v30, %v2392_v33 }
 0x248   :  { %v4196_v42 = vpop.eup %4195  ;;  %v3564_v45 = vadd.f32 %v5124_v41, %v1931_v38  ;;  %v2395_v40 = vpop.f32.mrb[54].mxu0 }
 0x249   :  { %v1933_v48 = vpop.f32.mrb[55].mxu1  ;;  %4205 = vrcp.f32 %v2655_v35  ;;  %v2656_v49 = vadd.f32 1.0, %v4196_v42  ;;  %v3465_v51 = vpop.f32.mrb[55].mxu0  ;;  %v3356_v52 = vmul.f32 -1.442695, %v5251_v43 }
 0x24a   :  { %v5255_v56 = vadd.f32 %v3564_v45, %v2395_v40 }
 0x24b   :  { %v4198_v57 = vpop.eup %4197  ;;  %4207 = vrcp.f32 %v2656_v49 }
 0x24c   :  { %4209 = vpow2.f32 %v3356_v52  ;;  %v3357_v58 = vmul.f32 -1.442695, %v5255_v56  ;;  %2869 = vrot.lane.b32.xlu0 %v4198_v57, %s4309_s0  ;;  %v1936_v1 = vpop.f32.mrb[56].mxu1 }
 0x24d   :  { %v4200_v60 = vpop.eup %4199  ;;  %v3566_v3 = vadd.f32 %v5124_v41, %v1936_v1  ;;  %v2400_v5 = vpop.f32.mrb[56].mxu0 }
 0x24e   :  { %v4202_v2 = vpop.eup %4201  ;;  %4211 = vpow2.f32 %v3357_v58  ;;  %2871 = vrot.lane.b32.xlu1 %v4200_v60, %s4309_s0  ;;  %v1938_v6 = vpop.f32.mrb[57].mxu1 }
 0x24f   :  { %v2657_v7 = vadd.f32 1.0, %v4202_v2  ;;  %v3468_v9 = vpop.f32.mrb[57].mxu0  ;;  %v1939_v10 = vpop.f32.mrb[58].mxu1  ;;  %v5261_v13 = vadd.f32 %v3566_v3, %v2400_v5 }
 0x250   :  { %v4204_v12 = vpop.eup %4203  ;;  %v3568_v17 = vadd.f32 %v5124_v41, %v1939_v10  ;;  %v2403_v18 = vpop.f32.mrb[58].mxu0 }
 0x251   :  { %v1941_v19 = vpop.f32.mrb[59].mxu1  ;;  %4213 = vrcp.f32 %v2657_v7  ;;  %v2658_v20 = vadd.f32 1.0, %v4204_v12  ;;  %v3469_v24 = vpop.f32.mrb[59].mxu0  ;;  %v3358_v27 = vmul.f32 -1.442695, %v5261_v13 }
 0x252   :  { %v5265_v28 = vadd.f32 %v3568_v17, %v2403_v18 }
 0x253   :  { %v4206_v0 = vpop.eup %4205  ;;  %4215 = vrcp.f32 %v2658_v20 }
 0x254   :  { %4217 = vpow2.f32 %v3358_v27  ;;  %v3359_v29 = vmul.f32 -1.442695, %v5265_v28  ;;  %2873 = vrot.lane.b32.xlu0 %v4206_v0, %s4309_s0  ;;  %v1944_v33 = vpop.f32.mrb[60].mxu1 }
 0x255   :  { %v4208_v30 = vpop.eup %4207  ;;  %v3570_v35 = vadd.f32 %v5124_v41, %v1944_v33  ;;  %v2408_v37 = vpop.f32.mrb[60].mxu0 }
 0x256   :  { %v4210_v34 = vpop.eup %4209  ;;  %4219 = vpow2.f32 %v3359_v29  ;;  %2875 = vrot.lane.b32.xlu1 %v4208_v30, %s4309_s0  ;;  %v1946_v38 = vpop.f32.mrb[61].mxu1 }
 0x257   :  { %v2659_v42 = vadd.f32 1.0, %v4210_v34  ;;  %v3472_v45 = vpop.f32.mrb[61].mxu0  ;;  %v1947_v40 = vpop.f32.mrb[62].mxu1  ;;  %v5271_v49 = vadd.f32 %v3570_v35, %v2408_v37 }
 0x258   :  { %v4212_v48 = vpop.eup %4211  ;;  %v3572_v51 = vadd.f32 %v5124_v41, %v1947_v40  ;;  %v2411_v52 = vpop.f32.mrb[62].mxu0 }
 0x259   :  { %v1949_v57 = vpop.f32.mrb[63].mxu1  ;;  %4221 = vrcp.f32 %v2659_v42  ;;  %v2660_v58 = vadd.f32 1.0, %v4212_v48  ;;  %v3473_v60 = vpop.f32.mrb[63].mxu0  ;;  %v3360_v1 = vmul.f32 -1.442695, %v5271_v49 }
 0x25a   :  { %v5275_v2 = vadd.f32 %v3572_v51, %v2411_v52 }
 0x25b   :  { %v4214_v3 = vpop.eup %4213  ;;  %4223 = vrcp.f32 %v2660_v58 }
 0x25c   :  { %4225 = vpow2.f32 %v3360_v1  ;;  %v3361_v5 = vmul.f32 -1.442695, %v5275_v2  ;;  %2877 = vrot.lane.b32.xlu0 %v4214_v3, %s4309_s0  ;;  %v1952_v7 = vpop.f32.mrb[64].mxu1 }
 0x25d   :  { %v4216_v6 = vpop.eup %4215  ;;  %v3574_v10 = vadd.f32 %v5124_v41, %v1952_v7  ;;  %v2416_v12 = vpop.f32.mrb[64].mxu0 }
 0x25e   :  { %v4218_v9 = vpop.eup %4217  ;;  %4227 = vpow2.f32 %v3361_v5  ;;  %2879 = vrot.lane.b32.xlu1 %v4216_v6, %s4309_s0  ;;  %v1954_v17 = vpop.f32.mrb[65].mxu1 }
 0x25f   :  { %v2661_v18 = vadd.f32 1.0, %v4218_v9  ;;  %v3476_v19 = vpop.f32.mrb[65].mxu0  ;;  %v1955_v20 = vpop.f32.mrb[66].mxu1  ;;  %v5281_v27 = vadd.f32 %v3574_v10, %v2416_v12 }
 0x260   :  { %v4220_v24 = vpop.eup %4219  ;;  %v3576_v0 = vadd.f32 %v5124_v41, %v1955_v20  ;;  %v2419_v29 = vpop.f32.mrb[66].mxu0 }
 0x261   :  { %v1957_v30 = vpop.f32.mrb[67].mxu1  ;;  %4229 = vrcp.f32 %v2661_v18  ;;  %v2662_v33 = vadd.f32 1.0, %v4220_v24  ;;  %v3477_v34 = vpop.f32.mrb[67].mxu0  ;;  %v3362_v35 = vmul.f32 -1.442695, %v5281_v27 }
 0x262   :  { %v5285_v37 = vadd.f32 %v3576_v0, %v2419_v29 }
 0x263   :  { %v4222_v38 = vpop.eup %4221  ;;  %4231 = vrcp.f32 %v2662_v33 }
 0x264   :  { %4233 = vpow2.f32 %v3362_v35  ;;  %v3363_v42 = vmul.f32 -1.442695, %v5285_v37  ;;  %2881 = vrot.lane.b32.xlu0 %v4222_v38, %s4309_s0  ;;  %v1960_v40 = vpop.f32.mrb[68].mxu1 }
 0x265   :  { %v4224_v45 = vpop.eup %4223  ;;  %v3578_v51 = vadd.f32 %v5124_v41, %v1960_v40  ;;  %v2424_v52 = vpop.f32.mrb[68].mxu0 }
 0x266   :  { %v4226_v48 = vpop.eup %4225  ;;  %4235 = vpow2.f32 %v3363_v42  ;;  %2883 = vrot.lane.b32.xlu1 %v4224_v45, %s4309_s0  ;;  %v1962_v57 = vpop.f32.mrb[69].mxu1 }
 0x267   :  { %v2663_v58 = vadd.f32 1.0, %v4226_v48  ;;  %v3480_v60 = vpop.f32.mrb[69].mxu0  ;;  %v1963_v1 = vpop.f32.mrb[70].mxu1  ;;  %v5291_v5 = vadd.f32 %v3578_v51, %v2424_v52 }
 0x268   :  { %v4228_v3 = vpop.eup %4227  ;;  %v3580_v6 = vadd.f32 %v5124_v41, %v1963_v1  ;;  %v2427_v7 = vpop.f32.mrb[70].mxu0 }
 0x269   :  { %v1965_v9 = vpop.f32.mrb[71].mxu1  ;;  %4237 = vrcp.f32 %v2663_v58  ;;  %v2664_v10 = vadd.f32 1.0, %v4228_v3  ;;  %v3481_v12 = vpop.f32.mrb[71].mxu0  ;;  %v3364_v17 = vmul.f32 -1.442695, %v5291_v5 }
 0x26a   :  { %v5295_v18 = vadd.f32 %v3580_v6, %v2427_v7 }
 0x26b   :  { %v4230_v19 = vpop.eup %4229  ;;  %4239 = vrcp.f32 %v2664_v10 }
 0x26c   :  { %4241 = vpow2.f32 %v3364_v17  ;;  %v3365_v20 = vmul.f32 -1.442695, %v5295_v18  ;;  %2885 = vrot.lane.b32.xlu0 %v4230_v19, %s4309_s0  ;;  %v1968_v0 = vpop.f32.mrb[72].mxu1 }
 0x26d   :  { %v4232_v24 = vpop.eup %4231  ;;  %v3582_v30 = vadd.f32 %v5124_v41, %v1968_v0  ;;  %v2432_v33 = vpop.f32.mrb[72].mxu0 }
 0x26e   :  { %v4234_v29 = vpop.eup %4233  ;;  %4243 = vpow2.f32 %v3365_v20  ;;  %v2830_v34 = vpop.permute.xlu0 %2829  ;;  %2887 = vrot.lane.b32.xlu1 %v4232_v24, %s4309_s0 }
 0x26f   :  { %v2665_v35 = vadd.f32 1.0, %v4234_v29  ;;  %v3484_v38 = vpop.f32.mrb[73].mxu0  ;;  %v2976_v42 = vmul.f32 %v5127_v47, %v2830_v34  ;;  %v1970_v45 = vpop.f32.mrb[73].mxu1  ;;  %v5302_v48 = vadd.f32 %v3582_v30, %v2432_v33 }
 0x270   :  { %v4236_v40 = vpop.eup %4235  ;;  %v1971_v51 = vpop.f32.mrb[74].mxu1 }
 0x271   :  { %v2435_v52 = vpop.f32.mrb[74].mxu0  ;;  %4245 = vrcp.f32 %v2665_v35  ;;  %v2666_v57 = vadd.f32 1.0, %v4236_v40  ;;  %3026 = vst.msk [vmem:[%s5624_s3] sm:$0xff] %vm3025_vm2, %v2976_v42  ;;  %v3584_v58 = vadd.f32 %v5124_v41, %v1971_v51  ;;  %v1973_v60 = vpop.f32.mrb[75].mxu1  ;;  %v3366_v3 = vmul.f32 -1.442695, %v5302_v48 }
 0x272   :  { %v3485_v1 = vpop.f32.mrb[75].mxu0  ;;  %v2832_v47 = vpop.permute.xlu0 %2831 }
 0x273   :  { %v4238_v6 = vpop.eup %4237  ;;  %4247 = vrcp.f32 %v2666_v57  ;;  %v5310_v7 = vadd.f32 %v3584_v58, %v2435_v52  ;;  %v2977_v9 = vmul.f32 %v5131_v53, %v2832_v47 }
 0x274   :  { %4249 = vpow2.f32 %v3366_v3  ;;  %2889 = vrot.lane.b32.xlu0 %v4238_v6, %s4309_s0  ;;  %v1976_v17 = vpop.f32.mrb[76].mxu1 }
 0x275   :  { %v4240_v10 = vpop.eup %4239  ;;  %v3367_v12 = vmul.f32 -1.442695, %v5310_v7  ;;  %3027 = vst.msk [vmem:[%s5624_s3 + $0x8] sm:$0xff] %vm3025_vm2, %v2977_v9  ;;  %v3586_v20 = vadd.f32 %v5124_v41, %v1976_v17  ;;  %v2440_v24 = vpop.f32.mrb[76].mxu0  ;;  %v5342_v9 = vld [vmem:[%s5623_s2] ss:$0 sm:$0xff] }
 0x276   :  { %v4242_v19 = vpop.eup %4241  ;;  %v2834_v0 = vpop.permute.xlu1 %2833  ;;  %2891 = vrot.lane.b32.xlu1 %v4240_v10, %s4309_s0 }
 0x277   :  { %v2667_v53 = vadd.f32 1.0, %v4242_v19  ;;  %4251 = vpow2.f32 %v3367_v12  ;;  %v3488_v29 = vpop.f32.mrb[77].mxu0  ;;  %v2978_v30 = vmul.f32 %v5135_v61, %v2834_v0  ;;  %v1978_v33 = vpop.f32.mrb[77].mxu1  ;;  %v5322_v35 = vadd.f32 %v3586_v20, %v2440_v24 }
 0x278   :  { %v4244_v34 = vpop.eup %4243  ;;  %v1979_v38 = vpop.f32.mrb[78].mxu1 }
 0x279   :  { %v2443_v42 = vpop.f32.mrb[78].mxu0  ;;  %4253 = vrcp.f32 %v2667_v53  ;;  %v2668_v45 = vadd.f32 1.0, %v4244_v34  ;;  %3028 = vst.msk [vmem:[%s5624_s3 + $0x10] sm:$0xff] %vm3025_vm2, %v2978_v30  ;;  %v3588_v40 = vadd.f32 %v5124_v41, %v1979_v38  ;;  %v1981_v51 = vpop.f32.mrb[79].mxu1  ;;  %v3368_v57 = vmul.f32 -1.442695, %v5322_v35 }
 0x27a   :  { %v3489_v52 = vpop.f32.mrb[79].mxu0  ;;  %v2836_v61 = vpop.permute.xlu1 %2835 }
 0x27b   :  { %v4246_v58 = vpop.eup %4245  ;;  %4255 = vrcp.f32 %v2668_v45  ;;  %v5330_v60 = vadd.f32 %v3588_v40, %v2443_v42  ;;  %v2979_v1 = vmul.f32 %v5139_v4, %v2836_v61 }
 0x27c   :  { %4257 = vpow2.f32 %v3368_v57  ;;  %2893 = vrot.lane.b32.xlu0 %v4246_v58, %s4309_s0  ;;  %v1984_v41 = vpop.f32.mrb[80].mxu1 }
 0x27d   :  { %v4248_v3 = vpop.eup %4247  ;;  %v3369_v47 = vmul.f32 -1.442695, %v5330_v60  ;;  %3029 = vst.msk [vmem:[%s5624_s3 + $0x18] sm:$0xff] %vm3025_vm2, %v2979_v1  ;;  %v3590_v4 = vadd.f32 %v5342_v9, %v1984_v41  ;;  %v2448_v10 = vpop.f32.mrb[80].mxu0 }
 0x27e   :  { %v4250_v6 = vpop.eup %4249  ;;  %v2838_v12 = vpop.permute.xlu0 %2837  ;;  %2895 = vrot.lane.b32.xlu1 %v4248_v3, %s4309_s0 }
 0x27f   :  { %v2669_v17 = vadd.f32 1.0, %v4250_v6  ;;  %4259 = vpow2.f32 %v3369_v47  ;;  %v3492_v19 = vpop.f32.mrb[81].mxu0  ;;  %v2980_v20 = vmul.f32 %v5143_v15, %v2838_v12  ;;  %v1986_v24 = vpop.f32.mrb[81].mxu1  ;;  %v5347_v0 = vadd.f32 %v3590_v4, %v2448_v10 }
 0x280   :  { %v1987_v53 = vpop.f32.mrb[82].mxu1  ;;  %v2451_v29 = vpop.f32.mrb[82].mxu0 }
 0x281   :  { %v4252_v30 = vpop.eup %4251  ;;  %4261 = vrcp.f32 %v2669_v17  ;;  %3030 = vst.msk [vmem:[%s5624_s3 + $0x20] sm:$0xff] %vm3025_vm2, %v2980_v20  ;;  %v3592_v33 = vadd.f32 %v5342_v9, %v1987_v53  ;;  %v3493_v34 = vpop.f32.mrb[83].mxu0  ;;  %v3370_v45 = vmul.f32 -1.442695, %v5347_v0 }
 0x282   :  { %v2840_v38 = vpop.permute.xlu1 %2839  ;;  %v2670_v42 = vadd.f32 1.0, %v4252_v30  ;;  %v1989_v40 = vpop.f32.mrb[83].mxu1 }
 0x283   :  { %v2981_v15 = vmul.f32 %v5147_v22, %v2840_v38  ;;  %v4254_v51 = vpop.eup %4253  ;;  %v5356_v52 = vadd.f32 %v3592_v33, %v2451_v29 }
 0x284   :  { %4263 = vrcp.f32 %v2670_v42  ;;  %2897 = vrot.lane.b32.xlu0 %v4254_v51, %s4309_s0  ;;  %v1992_v58 = vpop.f32.mrb[84].mxu1 }
 0x285   :  { %3031 = vst.msk [vmem:[%s5624_s3 + $0x28] sm:$0xff] %vm3025_vm2, %v2981_v15  ;;  %v4256_v57 = vpop.eup %4255  ;;  %4265 = vpow2.f32 %v3370_v45  ;;  %v3371_v61 = vmul.f32 -1.442695, %v5356_v52  ;;  %v3594_v22 = vadd.f32 %v5342_v9, %v1992_v58  ;;  %v2456_v3 = vpop.f32.mrb[84].mxu0 }
 0x286   :  { %v4258_v1 = vpop.eup %4257  ;;  %v2842_v47 = vpop.permute.xlu0 %2841  ;;  %2899 = vrot.lane.b32.xlu1 %v4256_v57, %s4309_s0 }
 0x287   :  { %v2671_v41 = vadd.f32 1.0, %v4258_v1  ;;  %4267 = vpow2.f32 %v3371_v61  ;;  %v3496_v6 = vpop.f32.mrb[85].mxu0  ;;  %v2982_v4 = vmul.f32 %v5151_v32, %v2842_v47  ;;  %v1994_v10 = vpop.f32.mrb[85].mxu1  ;;  %v5367_v12 = vadd.f32 %v3594_v22, %v2456_v3 }
 0x288   :  { %v1995_v17 = vpop.f32.mrb[86].mxu1  ;;  %v2459_v19 = vpop.f32.mrb[86].mxu0 }
 0x289   :  { %v4260_v20 = vpop.eup %4259  ;;  %4269 = vrcp.f32 %v2671_v41  ;;  %3032 = vst.msk [vmem:[%s5624_s3 + $0x30] sm:$0xff] %vm3025_vm2, %v2982_v4  ;;  %v3596_v24 = vadd.f32 %v5342_v9, %v1995_v17  ;;  %v3497_v53 = vpop.f32.mrb[87].mxu0  ;;  %v3372_v33 = vmul.f32 -1.442695, %v5367_v12 }
 0x28a   :  { %v2844_v29 = vpop.permute.xlu1 %2843  ;;  %v2672_v30 = vadd.f32 1.0, %v4260_v20  ;;  %v1997_v34 = vpop.f32.mrb[87].mxu1 }
 0x28b   :  { %v2983_v32 = vmul.f32 %v5155_v39, %v2844_v29  ;;  %v4262_v38 = vpop.eup %4261  ;;  %v5376_v42 = vadd.f32 %v3596_v24, %v2459_v19 }
 0x28c   :  { %4271 = vrcp.f32 %v2672_v30  ;;  %2901 = vrot.lane.b32.xlu0 %v4262_v38, %s4309_s0  ;;  %v2000_v15 = vpop.f32.mrb[88].mxu1 }
 0x28d   :  { %3033 = vst.msk [vmem:[%s5624_s3 + $0x38] sm:$0xff] %vm3025_vm2, %v2983_v32  ;;  %4273 = vpow2.f32 %v3372_v33  ;;  %v3373_v45 = vmul.f32 -1.442695, %v5376_v42  ;;  %v3598_v51 = vadd.f32 %v5342_v9, %v2000_v15  ;;  %v2464_v39 = vpop.f32.mrb[88].mxu0  ;;  %v2002_v22 = vpop.f32.mrb[89].mxu1 }
 0x28e   :  { %v4264_v40 = vpop.eup %4263  ;;  %v2846_v57 = vpop.permute.xlu0 %2845 }
 0x28f   :  { %v4266_v61 = vpop.eup %4265  ;;  %4275 = vpow2.f32 %v3373_v45  ;;  %v3500_v58 = vpop.f32.mrb[89].mxu0  ;;  %v2984_v1 = vmul.f32 %v5160_v55, %v2846_v57  ;;  %2903 = vrot.lane.b32.xlu1 %v4264_v40, %s4309_s0  ;;  %v5387_v47 = vadd.f32 %v3598_v51, %v2464_v39 }
 0x290   :  { %v2673_v3 = vadd.f32 1.0, %v4266_v61  ;;  %v2003_v41 = vpop.f32.mrb[90].mxu1  ;;  %v2467_v6 = vpop.f32.mrb[90].mxu0 }
 0x291   :  { %v4268_v4 = vpop.eup %4267  ;;  %3034 = vst.msk [vmem:[%s5624_s3 + $0x40] sm:$0xff] %vm3025_vm2, %v2984_v1  ;;  %v3600_v10 = vadd.f32 %v5342_v9, %v2003_v41  ;;  %v3501_v17 = vpop.f32.mrb[91].mxu0  ;;  %v3374_v20 = vmul.f32 -1.442695, %v5387_v47 }
 0x292   :  { %v2848_v19 = vpop.permute.xlu1 %2847  ;;  %4277 = vrcp.f32 %v2673_v3  ;;  %v2674_v55 = vadd.f32 1.0, %v4268_v4  ;;  %v2005_v53 = vpop.f32.mrb[91].mxu1 }
 0x293   :  { %v2985_v24 = vmul.f32 %v5165_v63, %v2848_v19  ;;  %v4270_v29 = vpop.eup %4269  ;;  %v5396_v30 = vadd.f32 %v3600_v10, %v2467_v6 }
 0x294   :  { %4279 = vrcp.f32 %v2674_v55  ;;  %2905 = vrot.lane.b32.xlu0 %v4270_v29, %s4309_s0  ;;  %v2008_v32 = vpop.f32.mrb[92].mxu1 }
 0x295   :  { %3035 = vst.msk [vmem:[%s5624_s3 + $0x48] sm:$0xff] %vm3025_vm2, %v2985_v24  ;;  %4281 = vpow2.f32 %v3374_v20  ;;  %v3375_v33 = vmul.f32 -1.442695, %v5396_v30  ;;  %v3602_v38 = vadd.f32 %v5342_v9, %v2008_v32  ;;  %v2472_v63 = vpop.f32.mrb[92].mxu0  ;;  %v2010_v39 = vpop.f32.mrb[93].mxu1 }
 0x296   :  { %v4272_v34 = vpop.eup %4271  ;;  %v2850_v45 = vpop.permute.xlu0 %2849 }
 0x297   :  { %v4274_v15 = vpop.eup %4273  ;;  %4283 = vpow2.f32 %v3375_v33  ;;  %v3504_v40 = vpop.f32.mrb[93].mxu0  ;;  %v2986_v51 = vmul.f32 %v5170_v14, %v2850_v45  ;;  %2907 = vrot.lane.b32.xlu1 %v4272_v34, %s4309_s0  ;;  %v5407_v61 = vadd.f32 %v3602_v38, %v2472_v63 }
 0x298   :  { %v2675_v57 = vadd.f32 1.0, %v4274_v15  ;;  %v2011_v58 = vpop.f32.mrb[94].mxu1  ;;  %v2475_v1 = vpop.f32.mrb[94].mxu0 }
 0x299   :  { %v4276_v22 = vpop.eup %4275  ;;  %3036 = vst.msk [vmem:[%s5624_s3 + $0x50] sm:$0xff] %vm3025_vm2, %v2986_v51  ;;  %v3604_v3 = vadd.f32 %v5342_v9, %v2011_v58  ;;  %v3505_v41 = vpop.f32.mrb[95].mxu0  ;;  %v3376_v4 = vmul.f32 -1.442695, %v5407_v61 }
 0x29a   :  { %v2852_v6 = vpop.permute.xlu1 %2851  ;;  %4285 = vrcp.f32 %v2675_v57  ;;  %v2676_v14 = vadd.f32 1.0, %v4276_v22  ;;  %v2013_v17 = vpop.f32.mrb[95].mxu1 }
 0x29b   :  { %v2987_v10 = vmul.f32 %v5175_v23, %v2852_v6  ;;  %v5416_v19 = vadd.f32 %v3604_v3, %v2475_v1 }
 0x29c   :  { %v4278_v55 = vpop.eup %4277  ;;  %4287 = vrcp.f32 %v2676_v14  ;;  %v2016_v24 = vpop.f32.mrb[96].mxu1 }
 0x29d   :  { %3037 = vst.msk [vmem:[%s5624_s3 + $0x58] sm:$0xff] %vm3025_vm2, %v2987_v10  ;;  %4289 = vpow2.f32 %v3376_v4  ;;  %v3377_v20 = vmul.f32 -1.442695, %v5416_v19  ;;  %2909 = vrot.lane.b32.xlu0 %v4278_v55, %s4309_s0  ;;  %v3606_v29 = vadd.f32 %v5342_v9, %v2016_v24  ;;  %v2480_v23 = vpop.f32.mrb[96].mxu0  ;;  %v2018_v63 = vpop.f32.mrb[97].mxu1 }
 0x29e   :  { %v4280_v53 = vpop.eup %4279  ;;  %v2854_v33 = vpop.permute.xlu0 %2853 }
 0x29f   :  { %v4282_v32 = vpop.eup %4281  ;;  %4291 = vpow2.f32 %v3377_v20  ;;  %v3508_v34 = vpop.f32.mrb[97].mxu0  ;;  %v2988_v38 = vmul.f32 %v5181_v36, %v2854_v33  ;;  %2911 = vrot.lane.b32.xlu1 %v4280_v53, %s4309_s0  ;;  %v5427_v15 = vadd.f32 %v3606_v29, %v2480_v23 }
 0x2a0   :  { %v2677_v45 = vadd.f32 1.0, %v4282_v32  ;;  %v2019_v40 = vpop.f32.mrb[98].mxu1  ;;  %v2483_v51 = vpop.f32.mrb[98].mxu0 }
 0x2a1   :  { %v4284_v39 = vpop.eup %4283  ;;  %3038 = vst.msk [vmem:[%s5624_s3 + $0x60] sm:$0xff] %vm3025_vm2, %v2988_v38  ;;  %v3509_v9 = vpop.f32.mrb[99].mxu0  ;;  %v3378_v36 = vmul.f32 -1.442695, %v5427_v15 }
 0x2a2   :  { %v2856_v57 = vpop.permute.xlu1 %2855  ;;  %4293 = vrcp.f32 %v2677_v45  ;;  %v2678_v58 = vadd.f32 1.0, %v4284_v39  ;;  %v2020_v22 = vpop.f32.mrb[99].mxu1 }
 0x2a3   :  { %v2989_v1 = vmul.f32 %v5185_v46, %v2856_v57 }
 0x2a4   :  { %v4286_v3 = vpop.eup %4285  ;;  %4295 = vrcp.f32 %v2678_v58 }
 0x2a5   :  { %3039 = vst.msk [vmem:[%s5624_s3 + $0x68] sm:$0xff] %vm3025_vm2, %v2989_v1  ;;  %4297 = vpow2.f32 %v3378_v36  ;;  %2913 = vrot.lane.b32.xlu0 %v4286_v3, %s4309_s0 }
 0x2a6   :  { %v4288_v41 = vpop.eup %4287  ;;  %v2858_v6 = vpop.permute.xlu0 %2857 }
 0x2a7   :  { %v4290_v14 = vpop.eup %4289  ;;  %v2990_v4 = vmul.f32 %v5191_v62, %v2858_v6  ;;  %2915 = vrot.lane.b32.xlu1 %v4288_v41, %s4309_s0 }
 0x2a8   :  { %v2679_v10 = vadd.f32 1.0, %v4290_v14  ;;  %v2860_v46 = vpop.permute.xlu1 %2859 }
 0x2a9   :  { %v4292_v17 = vpop.eup %4291  ;;  %3040 = vst.msk [vmem:[%s5624_s3 + $0x70] sm:$0xff] %vm3025_vm2, %v2990_v4  ;;  %v2991_v55 = vmul.f32 %v5195_v8, %v2860_v46 }
 0x2aa   :  { %4299 = vrcp.f32 %v2679_v10  ;;  %v2680_v20 = vadd.f32 1.0, %v4292_v17 }
 0x2ab   :  { %3041 = vst.msk [vmem:[%s5624_s3 + $0x78] sm:$0xff] %vm3025_vm2, %v2991_v55 }
 0x2ac   :  { %v4294_v62 = vpop.eup %4293  ;;  %4301 = vrcp.f32 %v2680_v20 }
 0x2ad   :  { %2917 = vrot.lane.b32.xlu0 %v4294_v62, %s4309_s0 }
 0x2ae   :  { %v4296_v24 = vpop.eup %4295  ;;  %v2862_v53 = vpop.permute.xlu0 %2861 }
 0x2af   :  { %v4298_v29 = vpop.eup %4297  ;;  %v2992_v23 = vmul.f32 %v5201_v25, %v2862_v53  ;;  %2919 = vrot.lane.b32.xlu1 %v4296_v24, %s4309_s0 }
 0x2b0   :  { %v2681_v33 = vadd.f32 1.0, %v4298_v29  ;;  %v2864_v8 = vpop.permute.xlu1 %2863 }
 0x2b1   :  { %3042 = vst.msk [vmem:[%s5624_s3 + $0x80] sm:$0xff] %vm3025_vm2, %v2992_v23  ;;  %v2993_v32 = vmul.f32 %v5205_v31, %v2864_v8 }
 0x2b2   :  { %4303 = vrcp.f32 %v2681_v33 }
 0x2b3   :  { %3043 = vst.msk [vmem:[%s5624_s3 + $0x88] sm:$0xff] %vm3025_vm2, %v2993_v32 }
 0x2b4   :  { %v4300_v34 = vpop.eup %4299 }
 0x2b5   :  { %2921 = vrot.lane.b32.xlu0 %v4300_v34, %s4309_s0 }
 0x2b6   :  { %v4302_v25 = vpop.eup %4301  ;;  %v2866_v38 = vpop.permute.xlu0 %2865 }
 0x2b7   :  { %v2994_v63 = vmul.f32 %v5211_v50, %v2866_v38  ;;  %2923 = vrot.lane.b32.xlu1 %v4302_v25, %s4309_s0 }
 0x2b8   :  { %v2868_v45 = vpop.permute.xlu1 %2867 }
 0x2b9   :  { %3044 = vst.msk [vmem:[%s5624_s3 + $0x90] sm:$0xff] %vm3025_vm2, %v2994_v63  ;;  %v2995_v31 = vmul.f32 %v5215_v59, %v2868_v45 }
 0x2bb   :  { %3045 = vst.msk [vmem:[%s5624_s3 + $0x98] sm:$0xff] %vm3025_vm2, %v2995_v31 }
 0x2bc   :  { %v4304_v40 = vpop.eup %4303 }
 0x2bd   :  { %2925 = vrot.lane.b32.xlu0 %v4304_v40, %s4309_s0 }
 0x2be   :  { %v2870_v51 = vpop.permute.xlu0 %2869 }
 0x2bf   :  { %v2996_v50 = vmul.f32 %v5221_v16, %v2870_v51 }
 0x2c0   :  { %v2872_v39 = vpop.permute.xlu1 %2871 }
 0x2c1   :  { %3046 = vst.msk [vmem:[%s5624_s3 + $0xa0] sm:$0xff] %vm3025_vm2, %v2996_v50  ;;  %v2997_v9 = vmul.f32 %v5225_v26, %v2872_v39 }
 0x2c3   :  { %3047 = vst.msk [vmem:[%s5624_s3 + $0xa8] sm:$0xff] %vm3025_vm2, %v2997_v9 }
 0x2c6   :  { %v2874_v59 = vpop.permute.xlu0 %2873 }
 0x2c7   :  { %v2998_v57 = vmul.f32 %v5231_v44, %v2874_v59 }
 0x2c8   :  { %v2876_v58 = vpop.permute.xlu1 %2875 }
 0x2c9   :  { %3048 = vst.msk [vmem:[%s5624_s3 + $0xb0] sm:$0xff] %vm3025_vm2, %v2998_v57  ;;  %v2999_v16 = vmul.f32 %v5235_v54, %v2876_v58 }
 0x2cb   :  { %3049 = vst.msk [vmem:[%s5624_s3 + $0xb8] sm:$0xff] %vm3025_vm2, %v2999_v16 }
 0x2ce   :  { %v2878_v26 = vpop.permute.xlu0 %2877 }
 0x2cf   :  { %v3000_v36 = vmul.f32 %v5241_v11, %v2878_v26 }
 0x2d0   :  { %v2880_v1 = vpop.permute.xlu1 %2879 }
 0x2d1   :  { %3050 = vst.msk [vmem:[%s5624_s3 + $0xc0] sm:$0xff] %vm3025_vm2, %v3000_v36  ;;  %v3001_v44 = vmul.f32 %v5245_v21, %v2880_v1 }
 0x2d3   :  { %3051 = vst.msk [vmem:[%s5624_s3 + $0xc8] sm:$0xff] %vm3025_vm2, %v3001_v44 }
 0x2d6   :  { %v2882_v54 = vpop.permute.xlu0 %2881 }
 0x2d7   :  { %v3002_v22 = vmul.f32 %v5251_v43, %v2882_v54 }
 0x2d8   :  { %v2884_v3 = vpop.permute.xlu1 %2883 }
 0x2d9   :  { %3052 = vst.msk [vmem:[%s5624_s3 + $0xd0] sm:$0xff] %vm3025_vm2, %v3002_v22  ;;  %v3003_v11 = vmul.f32 %v5255_v56, %v2884_v3 }
 0x2db   :  { %3053 = vst.msk [vmem:[%s5624_s3 + $0xd8] sm:$0xff] %vm3025_vm2, %v3003_v11 }
 0x2de   :  { %v2886_v21 = vpop.permute.xlu0 %2885 }
 0x2df   :  { %v3004_v41 = vmul.f32 %v5261_v13, %v2886_v21 }
 0x2e0   :  { %v2888_v6 = vpop.permute.xlu1 %2887 }
 0x2e1   :  { %3054 = vst.msk [vmem:[%s5624_s3 + $0xe0] sm:$0xff] %vm3025_vm2, %v3004_v41  ;;  %v3005_v43 = vmul.f32 %v5265_v28, %v2888_v6 }
 0x2e3   :  { %3055 = vst.msk [vmem:[%s5624_s3 + $0xe8] sm:$0xff] %vm3025_vm2, %v3005_v43 }
 0x2e6   :  { %v2890_v56 = vpop.permute.xlu0 %2889 }
 0x2e7   :  { %v3006_v14 = vmul.f32 %v5271_v49, %v2890_v56 }
 0x2e8   :  { %v2892_v4 = vpop.permute.xlu1 %2891 }
 0x2e9   :  { %3056 = vst.msk [vmem:[%s5624_s3 + $0xf0] sm:$0xff] %vm3025_vm2, %v3006_v14  ;;  %v3007_v13 = vmul.f32 %v5275_v2, %v2892_v4 }
 0x2eb   :  { %3057 = vst.msk [vmem:[%s5624_s3 + $0xf8] sm:$0xff] %vm3025_vm2, %v3007_v13 }
 0x2ee   :  { %v2894_v28 = vpop.permute.xlu0 %2893 }
 0x2ef   :  { %v3008_v10 = vmul.f32 %v5281_v27, %v2894_v28 }
 0x2f0   :  { %v2896_v46 = vpop.permute.xlu1 %2895 }
 0x2f1   :  { %3058 = vst.msk [vmem:[%s5624_s3 + $0x100] sm:$0xff] %vm3025_vm2, %v3008_v10  ;;  %v3009_v49 = vmul.f32 %v5285_v37, %v2896_v46 }
 0x2f3   :  { %3059 = vst.msk [vmem:[%s5624_s3 + $0x108] sm:$0xff] %vm3025_vm2, %v3009_v49 }
 0x2f6   :  { %v2898_v2 = vpop.permute.xlu0 %2897 }
 0x2f7   :  { %v3010_v17 = vmul.f32 %v5291_v5, %v2898_v2 }
 0x2f8   :  { %v2900_v55 = vpop.permute.xlu1 %2899 }
 0x2f9   :  { %3060 = vst.msk [vmem:[%s5624_s3 + $0x110] sm:$0xff] %vm3025_vm2, %v3010_v17  ;;  %v3011_v27 = vmul.f32 %v5295_v18, %v2900_v55 }
 0x2fb   :  { %3061 = vst.msk [vmem:[%s5624_s3 + $0x118] sm:$0xff] %vm3025_vm2, %v3011_v27 }
 0x2fe   :  { %v2902_v37 = vpop.permute.xlu0 %2901 }
 0x2ff   :  { %v3012_v20 = vmul.f32 %v5302_v48, %v2902_v37 }
 0x301   :  { %3062 = vst.msk [vmem:[%s5624_s3 + $0x120] sm:$0xff] %vm3025_vm2, %v3012_v20  ;;  %v2904_v5 = vpop.permute.xlu1 %2903 }
 0x302   :  { %v3013_v62 = vmul.f32 %v5310_v7, %v2904_v5 }
 0x304   :  { %3063 = vst.msk [vmem:[%s5624_s3 + $0x128] sm:$0xff] %vm3025_vm2, %v3013_v62 }
 0x306   :  { %v2906_v18 = vpop.permute.xlu0 %2905 }
 0x307   :  { %v3014_v24 = vmul.f32 %v5322_v35, %v2906_v18 }
 0x309   :  { %3064 = vst.msk [vmem:[%s5624_s3 + $0x130] sm:$0xff] %vm3025_vm2, %v3014_v24  ;;  %v2908_v48 = vpop.permute.xlu1 %2907 }
 0x30a   :  { %v3015_v53 = vmul.f32 %v5330_v60, %v2908_v48 }
 0x30c   :  { %3065 = vst.msk [vmem:[%s5624_s3 + $0x138] sm:$0xff] %vm3025_vm2, %v3015_v53 }
 0x30f   :  { %v2910_v7 = vpop.permute.xlu0 %2909 }
 0x310   :  { %v3016_v29 = vmul.f32 %v5347_v0, %v2910_v7 }
 0x311   :  { %v2912_v23 = vpop.permute.xlu1 %2911 }
 0x312   :  { %3066 = vst.msk [vmem:[%s5624_s3 + $0x140] sm:$0xff] %vm3025_vm2, %v3016_v29  ;;  %v3017_v35 = vmul.f32 %v5356_v52, %v2912_v23 }
 0x314   :  { %3067 = vst.msk [vmem:[%s5624_s3 + $0x148] sm:$0xff] %vm3025_vm2, %v3017_v35 }
 0x317   :  { %v2914_v60 = vpop.permute.xlu0 %2913 }
 0x318   :  { %v3018_v33 = vmul.f32 %v5367_v12, %v2914_v60 }
 0x319   :  { %v2916_v8 = vpop.permute.xlu1 %2915 }
 0x31a   :  { %3068 = vst.msk [vmem:[%s5624_s3 + $0x150] sm:$0xff] %vm3025_vm2, %v3018_v33  ;;  %v3019_v0 = vmul.f32 %v5376_v42, %v2916_v8 }
 0x31c   :  { %3069 = vst.msk [vmem:[%s5624_s3 + $0x158] sm:$0xff] %vm3025_vm2, %v3019_v0 }
 0x31f   :  { %v2918_v52 = vpop.permute.xlu0 %2917 }
 0x320   :  { %v3020_v32 = vmul.f32 %v5387_v47, %v2918_v52 }
 0x321   :  { %v2920_v34 = vpop.permute.xlu1 %2919 }
 0x322   :  { %3070 = vst.msk [vmem:[%s5624_s3 + $0x160] sm:$0xff] %vm3025_vm2, %v3020_v32  ;;  %v3021_v12 = vmul.f32 %v5396_v30, %v2920_v34 }
 0x324   :  { %3071 = vst.msk [vmem:[%s5624_s3 + $0x168] sm:$0xff] %vm3025_vm2, %v3021_v12 }
 0x327   :  { %v2922_v42 = vpop.permute.xlu0 %2921 }
 0x328   :  { %v3022_v25 = vmul.f32 %v5407_v61, %v2922_v42 }
 0x329   :  { %v2924_v38 = vpop.permute.xlu1 %2923 }
 0x32a   :  { %3072 = vst.msk [vmem:[%s5624_s3 + $0x170] sm:$0xff] %vm3025_vm2, %v3022_v25  ;;  %v3023_v47 = vmul.f32 %v5416_v19, %v2924_v38 }
 0x32c   :  { %3073 = vst.msk [vmem:[%s5624_s3 + $0x178] sm:$0xff] %vm3025_vm2, %v3023_v47 }
 0x32f   :  { %v2926_v30 = vpop.permute.xlu0 %2925 }
 0x330   :  { %v3024_v63 = vmul.f32 %v5427_v15, %v2926_v30 }
 0x332   :  { %3074 = vst.msk [vmem:[%s5624_s3 + $0x180] sm:$0xff] %vm3025_vm2, %v3024_v63 }

// kernel: encoder_z_prior.9
= control target key start
LH: loop header
LB: loop body
LE: loop exit
PB: predicated region body
PF: predicated region fallthrough
CT: control target
= control target key end

     0   :  { %v1363_v34 = vmov 0.0   ;;  %vm1364_vm0 = vmmov 0   ;;  %vm516_vm1 = vcmask 523264   ;;  %s1781_s1 = inlined_call_operand.vmem [shape: bf16[576,128], index: 1, kind: input, shape index: {}]   ;;  %s1782_s0 = inlined_call_operand.vmem [shape: bf16[104,576], index: 0, kind: input, shape index: {}]   ;;  %s1783_s2 = inlined_call_operand.vmem [shape: f32[1,128], index: 2, kind: input, shape index: {}]   ;;  %s1784_s3 = inlined_call_operand.vmem [shape: f32[104,64], index: 3, kind: output, shape index: {}]  }
   0x1   :  { %v1228_v0 = vld [vmem:[%s1781_s1 + $0x40] sm:$0xff]   ;;  %v1232_v4 = vld [vmem:[%s1781_s1 + $0x48] sm:$0xff]   ;;  %v1236_v8 = vld [vmem:[%s1781_s1 + $0x50] sm:$0xff]  }
   0x2   :  { %v1229_v1 = vld [vmem:[%s1781_s1 + $0xc0] sm:$0xff]   ;;  %1054 = vmatprep.subr.bf16.mxu0 %v1228_v0  ;;  %v1233_v5 = vld [vmem:[%s1781_s1 + $0xc8] sm:$0xff]   ;;  %v1237_v9 = vld [vmem:[%s1781_s1 + $0xd0] sm:$0xff]  }
   0x3   :  { %v1230_v2 = vld [vmem:[%s1781_s1] sm:$0xff]   ;;  %1112 = vmatprep.subr.bf16.mxu1 %v1229_v1  ;;  %v1234_v6 = vld [vmem:[%s1781_s1 + $0x8] sm:$0xff]   ;;  %v1238_v10 = vld [vmem:[%s1781_s1 + $0x10] sm:$0xff]  }
   0x4   :  { %v1231_v3 = vld [vmem:[%s1781_s1 + $0x80] sm:$0xff]   ;;  %1055 = vmatpush3.bf16.msra.mxu0 %v1230_v2  ;;  %v1235_v7 = vld [vmem:[%s1781_s1 + $0x88] sm:$0xff]   ;;  %v1239_v11 = vld [vmem:[%s1781_s1 + $0x90] sm:$0xff]  }
   0x5   :  { %1113 = vmatpush3.bf16.msra.mxu1 %v1231_v3  ;;  %1056 = vmatprep.subr.bf16.mxu0 %v1232_v4  ;;  %v1240_v12 = vld [vmem:[%s1781_s1 + $0x58] sm:$0xff]   ;;  %v1244_v16 = vld [vmem:[%s1781_s1 + $0x60] sm:$0xff]   ;;  %v1248_v20 = vld [vmem:[%s1781_s1 + $0x68] sm:$0xff]  }
   0x6   :  { %1114 = vmatprep.subr.bf16.mxu1 %v1233_v5  ;;  %v1241_v13 = vld [vmem:[%s1781_s1 + $0xd8] sm:$0xff]   ;;  %v1245_v17 = vld [vmem:[%s1781_s1 + $0xe0] sm:$0xff]   ;;  %v1249_v21 = vld [vmem:[%s1781_s1 + $0xe8] sm:$0xff]  }
   0x7   :  { %v1242_v14 = vld [vmem:[%s1781_s1 + $0x18] sm:$0xff]   ;;  %v1246_v18 = vld [vmem:[%s1781_s1 + $0x20] sm:$0xff]   ;;  %v1250_v22 = vld [vmem:[%s1781_s1 + $0x28] sm:$0xff]  }
   0x8   :  { %1057 = vmatpush3.bf16.msra.mxu0 %v1234_v6  ;;  %v1243_v15 = vld [vmem:[%s1781_s1 + $0x98] sm:$0xff]   ;;  %v1247_v19 = vld [vmem:[%s1781_s1 + $0xa0] sm:$0xff]   ;;  %v1251_v23 = vld [vmem:[%s1781_s1 + $0xa8] sm:$0xff]  }
   0x9   :  { %1115 = vmatpush3.bf16.msra.mxu1 %v1235_v7  ;;  %1058 = vmatprep.subr.bf16.mxu0 %v1236_v8  ;;  %v1252_v24 = vld [vmem:[%s1781_s1 + $0x70] sm:$0xff]   ;;  %v1256_v28 = vld [vmem:[%s1781_s1 + $0x78] sm:$0xff]   ;;  %v1265_v36 = vld [vmem:[%s1782_s0 + $0xc] ss:$20 sps:$4 sm:$0xff]  }
   0xa   :  { %1116 = vmatprep.subr.bf16.mxu1 %v1237_v9  ;;  %v1253_v25 = vld [vmem:[%s1781_s1 + $0xf0] sm:$0xff]   ;;  %v1257_v29 = vld [vmem:[%s1781_s1 + $0xf8] sm:$0xff]   ;;  %v1266_v37 = vld [vmem:[%s1781_s1 + $0x100] sm:$0xff]   ;;  %658 = vmatprep.mubr.bf16.mxu1 %v1265_v36 }
   0xb   :  { %v1254_v26 = vld [vmem:[%s1781_s1 + $0x30] sm:$0xff]   ;;  %v1258_v30 = vld [vmem:[%s1781_s1 + $0x38] sm:$0xff]   ;;  %v1267_v38 = vld [vmem:[%s1782_s0 + $0x2c] ss:$20 sps:$4 sm:$0xff]  }
   0xc   :  { %1059 = vmatpush3.bf16.msra.mxu0 %v1238_v10  ;;  %v1255_v27 = vld [vmem:[%s1781_s1 + $0xb0] sm:$0xff]   ;;  %v1259_v31 = vld [vmem:[%s1781_s1 + $0xb8] sm:$0xff]   ;;  %v1277_v43 = vld [vmem:[%s1781_s1 + $0x108] sm:$0xff]  }
   0xd   :  { %1117 = vmatpush3.bf16.msra.mxu1 %v1239_v11  ;;  %1060 = vmatprep.subr.bf16.mxu0 %v1240_v12  ;;  %v1260_v32 = vld [vmem:[%s1782_s0] ss:$20 sps:$4 sm:$0xff]   ;;  %v1262_v33 = vld [vmem:[%s1782_s0 + $0x4] ss:$20 sps:$4 sm:$0xff]   ;;  %v1263_v35 = vld [vmem:[%s1782_s0 + $0x8] ss:$20 sps:$4 sm:$0xff]  }
   0xe   :  { %1118 = vmatprep.subr.bf16.mxu1 %v1241_v13  ;;  %570 = vmatprep.mubr.bf16.mxu0 %v1262_v33  ;;  %v1269_v39 = vld [vmem:[%s1782_s0 + $0x34] ss:$20 sps:$4 sm:$0xff]   ;;  %v1272_v41 = vld [vmem:[%s1782_s0 + $0x30] ss:$20 sps:$4 sm:$0xff]   ;;  %v1279_v47 = vld [vmem:[%s1782_s0 + $0x58] ss:$20 sps:$4 sm:$0xff]  }
   0xf   :  { %v1271_v40 = vld [vmem:[%s1782_s0 + $0x28] ss:$20 sps:$4 sm:$0xff]   ;;  %v1286_v45 = vld [vmem:[%s1781_s1 + $0x110] sm:$0xff]   ;;  %v1282_v49 = vld [vmem:[%s1782_s0 + $0x84] ss:$20 sps:$4 sm:$0xff]  }
  0x10   :  { %1061 = vmatpush3.bf16.msra.mxu0 %v1242_v14  ;;  %v1273_v42 = vld [vmem:[%s1782_s0 + $0x54] ss:$20 sps:$4 sm:$0xff]   ;;  %v1275_v44 = vld [vmem:[%s1782_s0 + $0x5c] ss:$20 sps:$4 sm:$0xff]   ;;  %v1284_v51 = vld [vmem:[%s1782_s0 + $0x78] ss:$20 sps:$4 sm:$0xff]  }
  0x11   :  { %1119 = vmatpush3.bf16.msra.mxu1 %v1243_v15  ;;  %1062 = vmatprep.subr.bf16.mxu0 %v1244_v16  ;;  %v1278_v46 = vld [vmem:[%s1782_s0 + $0x50] ss:$20 sps:$4 sm:$0xff]   ;;  %v1299_v50 = vld [vmem:[%s1781_s1 + $0x118] sm:$0xff]   ;;  %v1285_v52 = vld [vmem:[%s1782_s0 + $0x80] ss:$20 sps:$4 sm:$0xff]  }
  0x12   :  { %1120 = vmatprep.subr.bf16.mxu1 %v1245_v17  ;;  %v1280_v48 = vld [vmem:[%s1782_s0 + $0x7c] ss:$20 sps:$4 sm:$0xff]   ;;  %v1287_v53 = vld [vmem:[%s1782_s0 + $0xa4] ss:$20 sps:$4 sm:$0xff]   ;;  %v1289_v54 = vld [vmem:[%s1782_s0 + $0xac] ss:$20 sps:$4 sm:$0xff]  }
  0x13   :  { %v1291_v55 = vld [vmem:[%s1782_s0 + $0xa0] ss:$20 sps:$4 sm:$0xff]   ;;  %v1292_v56 = vld [vmem:[%s1782_s0 + $0xa8] ss:$20 sps:$4 sm:$0xff]   ;;  %v1298_v62 = vld [vmem:[%s1782_s0 + $0xd0] ss:$20 sps:$4 sm:$0xff]  }
  0x14   :  { %1063 = vmatpush3.bf16.msra.mxu0 %v1246_v18  ;;  %v1293_v57 = vld [vmem:[%s1782_s0 + $0xcc] ss:$20 sps:$4 sm:$0xff]   ;;  %v1295_v58 = vld [vmem:[%s1782_s0 + $0xd4] ss:$20 sps:$4 sm:$0xff]   ;;  %v52_v60 = vld [vmem:[%s1782_s0 + $0xf8] sm:$0xff] }
  0x15   :  { %1121 = vmatpush3.bf16.msra.mxu1 %v1247_v19  ;;  %1064 = vmatprep.subr.bf16.mxu0 %v1248_v20  ;;  %v51_v59 = vld [vmem:[%s1782_s0 + $0xf0] sm:$0xff]  ;;  %v1297_v61 = vld [vmem:[%s1782_s0 + $0xc8] ss:$20 sps:$4 sm:$0xff]   ;;  %v996_v0 = vcombine.high %v52_v60, %v52_v60  ;;  %v995_v2 = vcombine.low %v52_v60, %v52_v60  ;;  %v1306_v5 = vld [vmem:[%s1782_s0 + $0x38] ss:$20 sps:$4 sm:$0xff]  }
  0x16   :  { %1122 = vmatprep.subr.bf16.mxu1 %v1249_v21  ;;  %v994_v63 = vcombine.high %v51_v59, %v51_v59  ;;  %v993_v1 = vcombine.low %v51_v59, %v51_v59  ;;  %v1304_v3 = vld [vmem:[%s1782_s0 + $0x10] ss:$20 sps:$4 sm:$0xff]   ;;  %v1307_v6 = vld [vmem:[%s1782_s0 + $0xd8] ss:$20 sps:$4 sm:$0xff]   ;;  %v1308_v7 = vld [vmem:[%s1782_s0 + $0x60] ss:$20 sps:$4 sm:$0xff]  }
  0x17   :  { %v1305_v4 = vld [vmem:[%s1782_s0 + $0xb0] ss:$20 sps:$4 sm:$0xff]   ;;  %v1309_v8 = vld [vmem:[%s1782_s0 + $0x100] ss:$0 sps:$4 sm:$0xff]   ;;  %v1310_v9 = vld [vmem:[%s1782_s0 + $0x88] ss:$20 sps:$4 sm:$0xff]  }
  0x18   :  { %1065 = vmatpush3.bf16.msra.mxu0 %v1250_v22  ;;  %v1625_v11 = vld [vmem:[%s1783_s2] ss:$0 sm:$0xff]  ;;  %s1365_s0 = smov 64  }
  0x19   :  { %1123 = vmatpush3.bf16.msra.mxu1 %v1251_v23  ;;  %1066 = vmatprep.subr.bf16.mxu0 %v1252_v24 }
  0x1a   :  { %1124 = vmatprep.subr.bf16.mxu1 %v1253_v25 }
  0x1c   :  { %1067 = vmatpush3.bf16.msra.mxu0 %v1254_v26 }
  0x1d   :  { %1125 = vmatpush3.bf16.msra.mxu1 %v1255_v27  ;;  %1068 = vmatprep.subr.bf16.mxu0 %v1256_v28 }
  0x1e   :  { %1126 = vmatprep.subr.bf16.mxu1 %v1257_v29 }
  0x20   :  { %1069 = vmatpush3.bf16.msra.mxu0 %v1258_v30 }
  0x21   :  { %1127 = vmatpush3.bf16.msra.mxu1 %v1259_v31  ;;  %1181 = vmatprep.subr.bf16.mxu0 %v1363_v34 }
  0x22   :  { %1217 = vmatprep.subr.bf16.mxu1 %v1363_v34 }
  0x23   :  { %571 = vmatmul.mubr.bf16.vlgmr.msra.gmra.mrb[0].mxu0 %v1260_v32 }
  0x24   :  { %659 = vmatmul.mubr.bf16.vlgmr.msra.gmra.mrb[0].mxu1 %v1263_v35  ;;  %1182 = vmatpush3.bf16.msra.mxu0 %v1266_v37 }
  0x25   :  { %578 = vmatprep.mubr.bf16.mxu0 %v1267_v38  ;;  %1221 = vmatpush3.bf16.msra.mxu1 %v1266_v37 }
  0x26   :  { %666 = vmatprep.mubr.bf16.mxu1 %v1269_v39  ;;  %1183 = vmatprep.subr.bf16.mxu0 %v1363_v34 }
  0x27   :  { %1218 = vmatprep.subr.bf16.mxu1 %v1363_v34 }
  0x28   :  { %1184 = vmatpush3.bf16.msra.mxu0 %v1277_v43 }
  0x29   :  { %1222 = vmatpush3.bf16.msra.mxu1 %v1277_v43  ;;  %1185 = vmatprep.subr.bf16.mxu0 %v1363_v34 }
  0x2a   :  { %1219 = vmatprep.subr.bf16.mxu1 %v1363_v34 }
  0x2b   :  { %579 = vmatmul.mubr.bf16.gmra.mrb[4].mxu0 %v1271_v40 }
  0x2c   :  { %667 = vmatmul.mubr.bf16.gmra.mrb[4].mxu1 %v1272_v41  ;;  %586 = vmatprep.mubr.bf16.mxu0 %v1273_v42 }
  0x2d   :  { %674 = vmatprep.mubr.bf16.mxu1 %v1275_v44  ;;  %1186 = vmatpush3.bf16.msra.mxu0 %v1286_v45 }
  0x2e   :  { %1223 = vmatpush3.bf16.msra.mxu1 %v1286_v45  ;;  %1187 = vmatprep.subr.bf16.mxu0 %v1363_v34 }
  0x2f   :  { %1220 = vmatprep.subr.bf16.mxu1 %v1363_v34 }
  0x31   :  { %1188 = vmatpush3.bf16.msra.mxu0 %v1299_v50 }
  0x32   :  { %1224 = vmatpush3.bf16.msra.mxu1 %v1299_v50 }
  0x33   :  { %587 = vmatmul.mubr.bf16.gmra.mrb[8].mxu0 %v1278_v46 }
  0x34   :  { %675 = vmatmul.mubr.bf16.gmra.mrb[8].mxu1 %v1279_v47  ;;  %594 = vmatprep.mubr.bf16.mxu0 %v1280_v48 }
  0x35   :  { %682 = vmatprep.mubr.bf16.mxu1 %v1282_v49 }
  0x3b   :  { %595 = vmatmul.mubr.bf16.gmra.mrb[12].mxu0 %v1284_v51 }
  0x3c   :  { %683 = vmatmul.mubr.bf16.gmra.mrb[12].mxu1 %v1285_v52  ;;  %602 = vmatprep.mubr.bf16.mxu0 %v1287_v53 }
  0x3d   :  { %690 = vmatprep.mubr.bf16.mxu1 %v1289_v54 }
  0x43   :  { %603 = vmatmul.mubr.bf16.gmra.mrb[16].mxu0 %v1291_v55 }
  0x44   :  { %691 = vmatmul.mubr.bf16.gmra.mrb[16].mxu1 %v1292_v56  ;;  %610 = vmatprep.mubr.bf16.mxu0 %v1293_v57 }
  0x45   :  { %698 = vmatprep.mubr.bf16.mxu1 %v1295_v58 }
  0x4b   :  { %611 = vmatmul.mubr.bf16.gmra.mrb[20].mxu0 %v1297_v61 }
  0x4c   :  { %699 = vmatmul.mubr.bf16.gmra.mrb[20].mxu1 %v1298_v62  ;;  %618 = vmatprep.mubr.bf16.mxu0 %v994_v63 }
  0x4d   :  { %706 = vmatprep.mubr.bf16.mxu1 %v996_v0 }
  0x53   :  { %619 = vmatmul.mubr.bf16.gmra.mrb[24].mxu0 %v993_v1 }
  0x54   :  { %707 = vmatmul.mubr.bf16.gmra.mrb[24].mxu1 %v995_v2  ;;  %1189 = vmatprep.mubr.msk.bf16.mxu0 %vm1364_vm0, %v1363_v34 }
  0x55   :  { %1205 = vmatprep.mubr.msk.bf16.mxu1 %vm1364_vm0, %v1363_v34 }
  0x5b   :  { %1190 = vmatmul.mubr.msk.bf16.vlgmr.msra.gmra.mrb[28].mxu0 %vm516_vm1, %v1304_v3 }
  0x5c   :  { %1206 = vmatmul.mubr.msk.bf16.vlgmr.msra.gmra.mrb[28].mxu1 %vm516_vm1, %v1305_v4  ;;  %1193 = vmatprep.mubr.msk.bf16.mxu0 %vm1364_vm0, %v1363_v34 }
  0x5d   :  { %1209 = vmatprep.mubr.msk.bf16.mxu1 %vm1364_vm0, %v1363_v34 }
  0x63   :  { %1194 = vmatmul.mubr.msk.bf16.gmra.mrb[32].mxu0 %vm516_vm1, %v1306_v5 }
  0x64   :  { %1210 = vmatmul.mubr.msk.bf16.gmra.mrb[32].mxu1 %vm516_vm1, %v1307_v6  ;;  %1197 = vmatprep.mubr.msk.bf16.mxu0 %vm1364_vm0, %v1363_v34 }
  0x65   :  { %1213 = vmatprep.mubr.msk.bf16.mxu1 %vm1364_vm0, %v1363_v34 }
  0x6b   :  { %1198 = vmatmul.mubr.msk.bf16.gmra.mrb[36].mxu0 %vm516_vm1, %v1308_v7 }
  0x6c   :  { %1214 = vmatmul.mubr.msk.bf16.gmra.mrb[36].mxu1 %vm516_vm1, %v1309_v8  ;;  %1201 = vmatprep.mubr.msk.bf16.mxu0 %vm1364_vm0, %v1363_v34 }
  0x73   :  { %1202 = vmatmul.mubr.msk.bf16.gmra.mrb[40].mxu0 %vm516_vm1, %v1310_v9 }
  0xf6   :  { %v1070_v10 = vpop.f32.mrb[0].mxu0 }
  0xf7   :  { %v1071_v12 = vpop.f32.mrb[1].mxu0  ;;  %v1128_v13 = vpop.f32.mrb[0].mxu1 }
  0xf8   :  { %v1072_v14 = vadd.f32 %v1071_v12, %v1070_v10  ;;  %v1073_v15 = vpop.f32.mrb[2].mxu0  ;;  %v1129_v16 = vpop.f32.mrb[1].mxu1 }
  0xf9   :  { %v1074_v17 = vpop.f32.mrb[3].mxu0  ;;  %v1130_v18 = vadd.f32 %v1129_v16, %v1128_v13  ;;  %v1131_v19 = vpop.f32.mrb[2].mxu1 }
  0xfa   :  { %v573_v20 = vadd.f32 %v1072_v14, %v1625_v11  ;;  %v1075_v21 = vadd.f32 %v1074_v17, %v1073_v15  ;;  %v1132_v22 = vpop.f32.mrb[3].mxu1 }
  0xfb   :  { %v1133_v23 = vadd.f32 %v1132_v22, %v1131_v19 }
  0xfc   :  { %v576_v24 = vadd.f32 %v1075_v21, %v1625_v11  ;;  %v1629_v25 = vadd.f32 %v1130_v18, %v573_v20 }
  0xfe   :  { %v1076_v26 = vpop.f32.mrb[4].mxu0  ;;  %v1631_v27 = vadd.f32 %v1133_v23, %v576_v24 }
  0xff   :  { %v1077_v28 = vpop.f32.mrb[5].mxu0  ;;  %v1134_v29 = vpop.f32.mrb[4].mxu1 }
 0x100   :  { %v1078_v30 = vadd.f32 %v1077_v28, %v1076_v26  ;;  %v1079_v31 = vpop.f32.mrb[6].mxu0  ;;  %v1135_v32 = vpop.f32.mrb[5].mxu1 }
 0x101   :  { %v1080_v33 = vpop.f32.mrb[7].mxu0  ;;  %v1136_v34 = vadd.f32 %v1135_v32, %v1134_v29  ;;  %v1137_v35 = vpop.f32.mrb[6].mxu1 }
 0x102   :  { %v581_v36 = vadd.f32 %v1078_v30, %v1625_v11  ;;  %v1081_v37 = vadd.f32 %v1080_v33, %v1079_v31  ;;  %v1138_v38 = vpop.f32.mrb[7].mxu1 }
 0x103   :  { %v1139_v39 = vadd.f32 %v1138_v38, %v1137_v35 }
 0x104   :  { %v584_v40 = vadd.f32 %v1081_v37, %v1625_v11  ;;  %v1635_v41 = vadd.f32 %v1136_v34, %v581_v36 }
 0x106   :  { %v1082_v42 = vpop.f32.mrb[8].mxu0  ;;  %v1637_v43 = vadd.f32 %v1139_v39, %v584_v40 }
 0x107   :  { %v1083_v44 = vpop.f32.mrb[9].mxu0  ;;  %v1140_v45 = vpop.f32.mrb[8].mxu1 }
 0x108   :  { %v1084_v46 = vadd.f32 %v1083_v44, %v1082_v42  ;;  %v1085_v47 = vpop.f32.mrb[10].mxu0  ;;  %v1141_v48 = vpop.f32.mrb[9].mxu1 }
 0x109   :  { %v1086_v49 = vpop.f32.mrb[11].mxu0  ;;  %v1142_v50 = vadd.f32 %v1141_v48, %v1140_v45  ;;  %v1143_v51 = vpop.f32.mrb[10].mxu1 }
 0x10a   :  { %v589_v52 = vadd.f32 %v1084_v46, %v1625_v11  ;;  %v1087_v53 = vadd.f32 %v1086_v49, %v1085_v47  ;;  %v1144_v54 = vpop.f32.mrb[11].mxu1 }
 0x10b   :  { %v1145_v55 = vadd.f32 %v1144_v54, %v1143_v51 }
 0x10c   :  { %v592_v56 = vadd.f32 %v1087_v53, %v1625_v11  ;;  %v1641_v57 = vadd.f32 %v1142_v50, %v589_v52 }
 0x10e   :  { %v1088_v58 = vpop.f32.mrb[12].mxu0  ;;  %v1643_v59 = vadd.f32 %v1145_v55, %v592_v56 }
 0x10f   :  { %v1089_v60 = vpop.f32.mrb[13].mxu0  ;;  %v1146_v61 = vpop.f32.mrb[12].mxu1 }
 0x110   :  { %v1090_v62 = vadd.f32 %v1089_v60, %v1088_v58  ;;  %v1091_v63 = vpop.f32.mrb[14].mxu0  ;;  %v1147_v0 = vpop.f32.mrb[13].mxu1 }
 0x111   :  { %v1092_v1 = vpop.f32.mrb[15].mxu0  ;;  %v1148_v2 = vadd.f32 %v1147_v0, %v1146_v61  ;;  %v1149_v3 = vpop.f32.mrb[14].mxu1 }
 0x112   :  { %v597_v4 = vadd.f32 %v1090_v62, %v1625_v11  ;;  %v1093_v5 = vadd.f32 %v1092_v1, %v1091_v63  ;;  %v1150_v6 = vpop.f32.mrb[15].mxu1 }
 0x113   :  { %v1151_v7 = vadd.f32 %v1150_v6, %v1149_v3 }
 0x114   :  { %v600_v8 = vadd.f32 %v1093_v5, %v1625_v11  ;;  %v1647_v9 = vadd.f32 %v1148_v2, %v597_v4 }
 0x116   :  { %v1094_v10 = vpop.f32.mrb[16].mxu0  ;;  %v1649_v12 = vadd.f32 %v1151_v7, %v600_v8 }
 0x117   :  { %v1095_v13 = vpop.f32.mrb[17].mxu0  ;;  %v1152_v14 = vpop.f32.mrb[16].mxu1 }
 0x118   :  { %v1096_v15 = vadd.f32 %v1095_v13, %v1094_v10  ;;  %v1097_v16 = vpop.f32.mrb[18].mxu0  ;;  %v1153_v17 = vpop.f32.mrb[17].mxu1 }
 0x119   :  { %v1098_v18 = vpop.f32.mrb[19].mxu0  ;;  %v1154_v19 = vadd.f32 %v1153_v17, %v1152_v14  ;;  %v1155_v20 = vpop.f32.mrb[18].mxu1 }
 0x11a   :  { %v605_v21 = vadd.f32 %v1096_v15, %v1625_v11  ;;  %v1099_v22 = vadd.f32 %v1098_v18, %v1097_v16  ;;  %v1156_v23 = vpop.f32.mrb[19].mxu1 }
 0x11b   :  { %v1157_v24 = vadd.f32 %v1156_v23, %v1155_v20 }
 0x11c   :  { %v608_v26 = vadd.f32 %v1099_v22, %v1625_v11  ;;  %v693_v28 = vadd.f32 %v1154_v19, %v605_v21 }
 0x11e   :  { %v1100_v29 = vpop.f32.mrb[20].mxu0  ;;  %v696_v30 = vadd.f32 %v1157_v24, %v608_v26 }
 0x11f   :  { %v1101_v31 = vpop.f32.mrb[21].mxu0  ;;  %v1158_v32 = vpop.f32.mrb[20].mxu1 }
 0x120   :  { %v1102_v33 = vadd.f32 %v1101_v31, %v1100_v29  ;;  %v1103_v34 = vpop.f32.mrb[22].mxu0  ;;  %v1159_v35 = vpop.f32.mrb[21].mxu1 }
 0x121   :  { %v1104_v36 = vpop.f32.mrb[23].mxu0  ;;  %v1160_v37 = vadd.f32 %v1159_v35, %v1158_v32  ;;  %v1161_v38 = vpop.f32.mrb[22].mxu1 }
 0x122   :  { %v613_v39 = vadd.f32 %v1102_v33, %v1625_v11  ;;  %v1105_v40 = vadd.f32 %v1104_v36, %v1103_v34  ;;  %v1162_v42 = vpop.f32.mrb[23].mxu1 }
 0x123   :  { %v1163_v44 = vadd.f32 %v1162_v42, %v1161_v38 }
 0x124   :  { %v616_v45 = vadd.f32 %v1105_v40, %v1625_v11  ;;  %v701_v46 = vadd.f32 %v1160_v37, %v613_v39 }
 0x126   :  { %v1106_v47 = vpop.f32.mrb[24].mxu0  ;;  %v704_v48 = vadd.f32 %v1163_v44, %v616_v45 }
 0x127   :  { %v1107_v49 = vpop.f32.mrb[25].mxu0  ;;  %v1164_v50 = vpop.f32.mrb[24].mxu1 }
 0x128   :  { %v1108_v51 = vadd.f32 %v1107_v49, %v1106_v47  ;;  %v1109_v52 = vpop.f32.mrb[26].mxu0  ;;  %v1165_v53 = vpop.f32.mrb[25].mxu1 }
 0x129   :  { %v1110_v54 = vpop.f32.mrb[27].mxu0  ;;  %v1166_v55 = vadd.f32 %v1165_v53, %v1164_v50  ;;  %v1167_v56 = vpop.f32.mrb[26].mxu1 }
 0x12a   :  { %v621_v58 = vadd.f32 %v1108_v51, %v1625_v11  ;;  %v1168_v60 = vpop.f32.mrb[27].mxu1 }
 0x12c   :  { %v709_v61 = vadd.f32 %v1166_v55, %v621_v58 }
 0x12e   :  { %v748_v62 = vpop.f32.mrb[28].mxu0 }
 0x12f   :  { %v1657_v63 = vadd.f32 %v748_v62, %v1629_v25  ;;  %v780_v0 = vpop.f32.mrb[28].mxu1  ;;  %v1191_v1 = vpop.f32.mrb[29].mxu0 }
 0x130   :  { %v1659_v2 = vadd.f32 %v780_v0, %v693_v28  ;;  %v1207_v3 = vpop.f32.mrb[29].mxu1  ;;  %v751_v4 = vpop.f32.mrb[30].mxu0 }
 0x131   :  { %v1041_v5 = vmul.f32 -1.442695, %v1657_v63  ;;  %v1663_v6 = vadd.f32 %v751_v4, %v1631_v27  ;;  %v783_v7 = vpop.f32.mrb[30].mxu1  ;;  %v1192_v8 = vpop.f32.mrb[31].mxu0 }
 0x132   :  { %v1049_v11 = vmul.f32 -1.442695, %v1659_v2  ;;  %v1666_v10 = vadd.f32 %v783_v7, %v696_v30  ;;  %v1208_v13 = vpop.f32.mrb[31].mxu1 }
 0x133   :  { %1311 = vpow2.f32 %v1041_v5  ;;  %v1042_v25 = vmul.f32 -1.442695, %v1663_v6 }
 0x134   :  { %1313 = vpow2.f32 %v1049_v11  ;;  %v1050_v14 = vmul.f32 -1.442695, %v1666_v10 }
 0x135   :  { %1315 = vpow2.f32 %v1042_v25 }
 0x136   :  { %1317 = vpow2.f32 %v1050_v14  ;;  %v756_v15 = vpop.f32.mrb[32].mxu0 }
 0x137   :  { %v1671_v16 = vadd.f32 %v756_v15, %v1635_v41  ;;  %v788_v27 = vpop.f32.mrb[32].mxu1  ;;  %v1195_v17 = vpop.f32.mrb[33].mxu0 }
 0x138   :  { %v1673_v18 = vadd.f32 %v788_v27, %v701_v46  ;;  %v1211_v19 = vpop.f32.mrb[33].mxu1  ;;  %v759_v20 = vpop.f32.mrb[34].mxu0 }
 0x139   :  { %v1043_v21 = vmul.f32 -1.442695, %v1671_v16  ;;  %v1677_v22 = vadd.f32 %v759_v20, %v1637_v43  ;;  %v791_v23 = vpop.f32.mrb[34].mxu1  ;;  %v1196_v24 = vpop.f32.mrb[35].mxu0 }
 0x13a   :  { %v1051_v26 = vmul.f32 -1.442695, %v1673_v18  ;;  %v1680_v28 = vadd.f32 %v791_v23, %v704_v48  ;;  %v1212_v29 = vpop.f32.mrb[35].mxu1 }
 0x13b   :  { %1319 = vpow2.f32 %v1043_v21  ;;  %v1044_v41 = vmul.f32 -1.442695, %v1677_v22 }
 0x13c   :  { %1321 = vpow2.f32 %v1051_v26  ;;  %v1052_v39 = vmul.f32 -1.442695, %v1680_v28 }
 0x13d   :  { %v1312_v30 = vpop.eup %1311  ;;  %1323 = vpow2.f32 %v1044_v41 }
 0x13e   :  { %v1314_v31 = vpop.eup %1313  ;;  %v841_v32 = vadd.f32 1.0, %v1312_v30  ;;  %v764_v33 = vpop.f32.mrb[36].mxu0 }
 0x13f   :  { %v1316_v34 = vpop.eup %1315  ;;  %v849_v35 = vadd.f32 1.0, %v1314_v31  ;;  %v1684_v43 = vadd.f32 %v764_v33, %v1641_v57  ;;  %v796_v36 = vpop.f32.mrb[36].mxu1 }
 0x140   :  { %v1199_v37 = vpop.f32.mrb[37].mxu0  ;;  %v1318_v38 = vpop.eup %1317  ;;  %1325 = vrcp.f32 %v841_v32  ;;  %v1687_v40 = vadd.f32 %v796_v36, %v709_v61  ;;  %v842_v50 = vadd.f32 1.0, %v1316_v34 }
 0x141   :  { %v767_v42 = vpop.f32.mrb[38].mxu0  ;;  %v1215_v44 = vpop.f32.mrb[37].mxu1  ;;  %v850_v45 = vadd.f32 1.0, %v1318_v38  ;;  %v1045_v46 = vmul.f32 -1.442695, %v1684_v43  ;;  %1327 = vrcp.f32 %v849_v35 }
 0x142   :  { %v1691_v47 = vadd.f32 %v767_v42, %v1643_v59  ;;  %v1200_v48 = vpop.f32.mrb[39].mxu0  ;;  %v799_v49 = vpop.f32.mrb[38].mxu1  ;;  %v1053_v53 = vmul.f32 -1.442695, %v1687_v40 }
 0x143   :  { %v1216_v57 = vpop.f32.mrb[39].mxu1  ;;  %1329 = vrcp.f32 %v850_v45 }
 0x144   :  { %v1046_v51 = vmul.f32 -1.442695, %v1691_v47  ;;  %1331 = vpow2.f32 %v1045_v46 }
 0x145   :  { %v1320_v52 = vpop.eup %1319  ;;  %1333 = vpow2.f32 %v1052_v39 }
 0x146   :  { %v1322_v54 = vpop.eup %1321  ;;  %v843_v55 = vadd.f32 1.0, %v1320_v52  ;;  %1335 = vpow2.f32 %v1046_v51  ;;  %v772_v56 = vpop.f32.mrb[40].mxu0 }
 0x147   :  { %v1324_v58 = vpop.eup %1323  ;;  %1337 = vrcp.f32 %v842_v50  ;;  %v851_v59 = vadd.f32 1.0, %v1322_v54  ;;  %v1696_v60 = vadd.f32 %v772_v56, %v1647_v9  ;;  %v1203_v61 = vpop.f32.mrb[41].mxu0 }
 0x148   :  { %1339 = vrcp.f32 %v843_v55  ;;  %v844_v62 = vadd.f32 1.0, %v1324_v58  ;;  %v775_v0 = vpop.f32.mrb[42].mxu0 }
 0x149   :  { %1341 = vpow2.f32 %v1053_v53  ;;  %v1047_v1 = vmul.f32 -1.442695, %v1696_v60  ;;  %v1700_v3 = vadd.f32 %v775_v0, %v1649_v12  ;;  %v1204_v4 = vpop.f32.mrb[43].mxu0 }
 0x14a   :  { %v1326_v5 = vpop.eup %1325  ;;  %1343 = vrcp.f32 %v851_v59 }
 0x14b   :  { %1345 = vrcp.f32 %v844_v62  ;;  %v1048_v7 = vmul.f32 -1.442695, %v1700_v3  ;;  %893 = vrot.lane.b32.xlu0 %v1326_v5, %s1365_s0  ;;  %v1328_v9 = vpop.eup %1327 }
 0x14c   :  { %1347 = vpow2.f32 %v1047_v1 }
 0x14d   :  { %v1330_v8 = vpop.eup %1329  ;;  %1349 = vpow2.f32 %v1048_v7 }
 0x14e   :  { %v1332_v11 = vpop.eup %1331  ;;  %911 = vrot.lane.b32.xlu1 %v1330_v8, %s1365_s0 }
 0x14f   :  { %v1334_v13 = vpop.eup %1333  ;;  %v845_v25 = vadd.f32 1.0, %v1332_v11  ;;  %909 = vrot.lane.b32.xlu0 %v1328_v9, %s1365_s0 }
 0x150   :  { %v1336_v12 = vpop.eup %1335  ;;  %v852_v41 = vadd.f32 1.0, %v1334_v13 }
 0x151   :  { %v1338_v14 = vpop.eup %1337  ;;  %1351 = vrcp.f32 %v845_v25  ;;  %v846_v15 = vadd.f32 1.0, %v1336_v12 }
 0x152   :  { %v1340_v27 = vpop.eup %1339 }
 0x153   :  { %v1342_v17 = vpop.eup %1341  ;;  %1353 = vrcp.f32 %v846_v15  ;;  %897 = vrot.lane.b32.xlu1 %v1340_v27, %s1365_s0  ;;  %895 = vrot.lane.b32.xlu0 %v1338_v14, %s1365_s0 }
 0x154   :  { %v1344_v19 = vpop.eup %1343  ;;  %v853_v29 = vadd.f32 1.0, %v1342_v17 }
 0x155   :  { %v1346_v20 = vpop.eup %1345 }
 0x156   :  { %v1348_v21 = vpop.eup %1347 }
 0x157   :  { %v1350_v23 = vpop.eup %1349  ;;  %v847_v24 = vadd.f32 1.0, %v1348_v21  ;;  %899 = vrot.lane.b32.xlu1 %v1346_v20, %s1365_s0  ;;  %913 = vrot.lane.b32.xlu0 %v1344_v19, %s1365_s0 }
 0x158   :  { %v848_v26 = vadd.f32 1.0, %v1350_v23 }
 0x159   :  { %1355 = vrcp.f32 %v847_v24 }
 0x15a   :  { %1357 = vrcp.f32 %v848_v26 }
 0x15b   :  { %v1352_v30 = vpop.eup %1351  ;;  %1359 = vrcp.f32 %v853_v29 }
 0x15c   :  { %901 = vrot.lane.b32.xlu0 %v1352_v30, %s1365_s0  ;;  %1361 = vrcp.f32 %v852_v41 }
 0x15d   :  { %v1354_v31 = vpop.eup %1353 }
 0x15e   :  { %903 = vrot.lane.b32.xlu1 %v1354_v31, %s1365_s0 }
 0x163   :  { %v1356_v32 = vpop.eup %1355 }
 0x164   :  { %v1358_v33 = vpop.eup %1357  ;;  %905 = vrot.lane.b32.xlu0 %v1356_v32, %s1365_s0 }
 0x165   :  { %907 = vrot.lane.b32.xlu1 %v1358_v33, %s1365_s0  ;;  %v1360_v34 = vpop.eup %1359 }
 0x166   :  { %v1362_v35 = vpop.eup %1361 }
 0x168   :  { %917 = vrot.lane.b32.xlu0 %v1360_v34, %s1365_s0 }
 0x169   :  { %915 = vrot.lane.b32.xlu1 %v1362_v35, %s1365_s0 }
 0x1bd   :  { %v894_v36 = vpop.permute.xlu0 %893 }
 0x1be   :  { %v932_v37 = vmul.f32 %v894_v36, %v1657_v63 }
 0x1c0   :  { %945 = vst.msk [vmem:[%s1784_s3] sm:$0xff] %vm516_vm1, %v932_v37  ;;  %v912_v38 = vpop.permute.xlu1 %911 }
 0x1c1   :  { %v941_v39 = vmul.f32 %v912_v38, %v1666_v10  ;;  %v910_v42 = vpop.permute.xlu0 %909 }
 0x1c2   :  { %v940_v44 = vmul.f32 %v910_v42, %v1659_v2 }
 0x1c3   :  { %954 = vst.msk [vmem:[%s1784_s3 + $0x48] sm:$0xff] %vm516_vm1, %v941_v39 }
 0x1c4   :  { %953 = vst.msk [vmem:[%s1784_s3 + $0x40] sm:$0xff] %vm516_vm1, %v940_v44 }
 0x1c5   :  { %v898_v63 = vpop.permute.xlu1 %897  ;;  %v896_v45 = vpop.permute.xlu0 %895 }
 0x1c6   :  { %v934_v46 = vmul.f32 %v898_v63, %v1671_v16  ;;  %v933_v48 = vmul.f32 %v896_v45, %v1663_v6 }
 0x1c8   :  { %947 = vst.msk [vmem:[%s1784_s3 + $0x10] sm:$0xff] %vm516_vm1, %v934_v46  ;;  %946 = vst.msk [vmem:[%s1784_s3 + $0x8] sm:$0xff] %vm516_vm1, %v933_v48 }
 0x1c9   :  { %v900_v2 = vpop.permute.xlu1 %899  ;;  %v914_v10 = vpop.permute.xlu0 %913 }
 0x1ca   :  { %v935_v49 = vmul.f32 %v900_v2, %v1677_v22  ;;  %v942_v57 = vmul.f32 %v914_v10, %v1673_v18 }
 0x1cc   :  { %948 = vst.msk [vmem:[%s1784_s3 + $0x18] sm:$0xff] %vm516_vm1, %v935_v49  ;;  %955 = vst.msk [vmem:[%s1784_s3 + $0x50] sm:$0xff] %vm516_vm1, %v942_v57 }
 0x1ce   :  { %v902_v6 = vpop.permute.xlu0 %901 }
 0x1cf   :  { %v936_v16 = vmul.f32 %v902_v6, %v1684_v43 }
 0x1d0   :  { %v904_v50 = vpop.permute.xlu1 %903 }
 0x1d1   :  { %949 = vst.msk [vmem:[%s1784_s3 + $0x20] sm:$0xff] %vm516_vm1, %v936_v16  ;;  %v937_v18 = vmul.f32 %v904_v50, %v1691_v47 }
 0x1d3   :  { %950 = vst.msk [vmem:[%s1784_s3 + $0x28] sm:$0xff] %vm516_vm1, %v937_v18 }
 0x1d6   :  { %v906_v22 = vpop.permute.xlu0 %905 }
 0x1d7   :  { %v938_v51 = vmul.f32 %v906_v22, %v1696_v60  ;;  %v908_v52 = vpop.permute.xlu1 %907 }
 0x1d8   :  { %v939_v53 = vmul.f32 %v908_v52, %v1700_v3 }
 0x1d9   :  { %951 = vst.msk [vmem:[%s1784_s3 + $0x30] sm:$0xff] %vm516_vm1, %v938_v51 }
 0x1da   :  { %952 = vst.msk [vmem:[%s1784_s3 + $0x38] sm:$0xff] %vm516_vm1, %v939_v53  ;;  %v918_v43 = vpop.permute.xlu0 %917 }
 0x1db   :  { %v944_v47 = vmul.f32 %v918_v43, %v1687_v40  ;;  %v916_v54 = vpop.permute.xlu1 %915 }
 0x1dc   :  { %v943_v55 = vmul.f32 %v916_v54, %v1680_v28 }
 0x1dd   :  { %957 = vst.msk [vmem:[%s1784_s3 + $0x60] sm:$0xff] %vm516_vm1, %v944_v47 }
 0x1de   :  { %956 = vst.msk [vmem:[%s1784_s3 + $0x58] sm:$0xff] %vm516_vm1, %v943_v55 }

// kernel: encoder_z_prior.10
= control target key start
LH: loop header
LB: loop body
LE: loop exit
PB: predicated region body
PF: predicated region fallthrough
CT: control target
= control target key end

     0   :  { %v1364_v34 = vmov 0.0   ;;  %vm1365_vm0 = vmmov 0   ;;  %vm516_vm1 = vcmask 523264   ;;  %vm945_vm2 = vcmask 48128   ;;  %s1782_s1 = inlined_call_operand.vmem [shape: bf16[576,12], index: 1, kind: input, shape index: {}]   ;;  %s1783_s0 = inlined_call_operand.vmem [shape: bf16[104,576], index: 0, kind: input, shape index: {}]   ;;  %s1784_s2 = inlined_call_operand.vmem [shape: f32[1,12], index: 2, kind: input, shape index: {}]   ;;  %s1785_s3 = inlined_call_operand.vmem [shape: f32[104,6], index: 3, kind: output, shape index: {}]  }
   0x1   :  { %v1229_v0 = vld [vmem:[%s1782_s1 + $0x40] sm:$0xff]   ;;  %v1233_v4 = vld [vmem:[%s1782_s1 + $0x48] sm:$0xff]   ;;  %v1237_v8 = vld [vmem:[%s1782_s1 + $0x50] sm:$0xff]  }
   0x2   :  { %v1230_v1 = vld [vmem:[%s1782_s1 + $0xc0] sm:$0xff]   ;;  %1055 = vmatprep.subr.bf16.mxu0 %v1229_v0  ;;  %v1234_v5 = vld [vmem:[%s1782_s1 + $0xc8] sm:$0xff]   ;;  %v1238_v9 = vld [vmem:[%s1782_s1 + $0xd0] sm:$0xff]  }
   0x3   :  { %v1231_v2 = vld [vmem:[%s1782_s1] sm:$0xff]   ;;  %1113 = vmatprep.subr.bf16.mxu1 %v1230_v1  ;;  %v1235_v6 = vld [vmem:[%s1782_s1 + $0x8] sm:$0xff]   ;;  %v1239_v10 = vld [vmem:[%s1782_s1 + $0x10] sm:$0xff]  }
   0x4   :  { %v1232_v3 = vld [vmem:[%s1782_s1 + $0x80] sm:$0xff]   ;;  %1056 = vmatpush3.bf16.msra.mxu0 %v1231_v2  ;;  %v1236_v7 = vld [vmem:[%s1782_s1 + $0x88] sm:$0xff]   ;;  %v1240_v11 = vld [vmem:[%s1782_s1 + $0x90] sm:$0xff]  }
   0x5   :  { %1114 = vmatpush3.bf16.msra.mxu1 %v1232_v3  ;;  %1057 = vmatprep.subr.bf16.mxu0 %v1233_v4  ;;  %v1241_v12 = vld [vmem:[%s1782_s1 + $0x58] sm:$0xff]   ;;  %v1245_v16 = vld [vmem:[%s1782_s1 + $0x60] sm:$0xff]   ;;  %v1249_v20 = vld [vmem:[%s1782_s1 + $0x68] sm:$0xff]  }
   0x6   :  { %1115 = vmatprep.subr.bf16.mxu1 %v1234_v5  ;;  %v1242_v13 = vld [vmem:[%s1782_s1 + $0xd8] sm:$0xff]   ;;  %v1246_v17 = vld [vmem:[%s1782_s1 + $0xe0] sm:$0xff]   ;;  %v1250_v21 = vld [vmem:[%s1782_s1 + $0xe8] sm:$0xff]  }
   0x7   :  { %v1243_v14 = vld [vmem:[%s1782_s1 + $0x18] sm:$0xff]   ;;  %v1247_v18 = vld [vmem:[%s1782_s1 + $0x20] sm:$0xff]   ;;  %v1251_v22 = vld [vmem:[%s1782_s1 + $0x28] sm:$0xff]  }
   0x8   :  { %1058 = vmatpush3.bf16.msra.mxu0 %v1235_v6  ;;  %v1244_v15 = vld [vmem:[%s1782_s1 + $0x98] sm:$0xff]   ;;  %v1248_v19 = vld [vmem:[%s1782_s1 + $0xa0] sm:$0xff]   ;;  %v1252_v23 = vld [vmem:[%s1782_s1 + $0xa8] sm:$0xff]  }
   0x9   :  { %1116 = vmatpush3.bf16.msra.mxu1 %v1236_v7  ;;  %1059 = vmatprep.subr.bf16.mxu0 %v1237_v8  ;;  %v1253_v24 = vld [vmem:[%s1782_s1 + $0x70] sm:$0xff]   ;;  %v1257_v28 = vld [vmem:[%s1782_s1 + $0x78] sm:$0xff]   ;;  %v1266_v36 = vld [vmem:[%s1783_s0 + $0xc] ss:$20 sps:$4 sm:$0xff]  }
   0xa   :  { %1117 = vmatprep.subr.bf16.mxu1 %v1238_v9  ;;  %v1254_v25 = vld [vmem:[%s1782_s1 + $0xf0] sm:$0xff]   ;;  %v1258_v29 = vld [vmem:[%s1782_s1 + $0xf8] sm:$0xff]   ;;  %v1267_v37 = vld [vmem:[%s1782_s1 + $0x100] sm:$0xff]   ;;  %658 = vmatprep.mubr.bf16.mxu1 %v1266_v36 }
   0xb   :  { %v1255_v26 = vld [vmem:[%s1782_s1 + $0x30] sm:$0xff]   ;;  %v1259_v30 = vld [vmem:[%s1782_s1 + $0x38] sm:$0xff]   ;;  %v1268_v38 = vld [vmem:[%s1783_s0 + $0x2c] ss:$20 sps:$4 sm:$0xff]  }
   0xc   :  { %1060 = vmatpush3.bf16.msra.mxu0 %v1239_v10  ;;  %v1256_v27 = vld [vmem:[%s1782_s1 + $0xb0] sm:$0xff]   ;;  %v1260_v31 = vld [vmem:[%s1782_s1 + $0xb8] sm:$0xff]   ;;  %v1278_v43 = vld [vmem:[%s1782_s1 + $0x108] sm:$0xff]  }
   0xd   :  { %1118 = vmatpush3.bf16.msra.mxu1 %v1240_v11  ;;  %1061 = vmatprep.subr.bf16.mxu0 %v1241_v12  ;;  %v1261_v32 = vld [vmem:[%s1783_s0] ss:$20 sps:$4 sm:$0xff]   ;;  %v1263_v33 = vld [vmem:[%s1783_s0 + $0x4] ss:$20 sps:$4 sm:$0xff]   ;;  %v1264_v35 = vld [vmem:[%s1783_s0 + $0x8] ss:$20 sps:$4 sm:$0xff]  }
   0xe   :  { %1119 = vmatprep.subr.bf16.mxu1 %v1242_v13  ;;  %570 = vmatprep.mubr.bf16.mxu0 %v1263_v33  ;;  %v1270_v39 = vld [vmem:[%s1783_s0 + $0x34] ss:$20 sps:$4 sm:$0xff]   ;;  %v1273_v41 = vld [vmem:[%s1783_s0 + $0x30] ss:$20 sps:$4 sm:$0xff]   ;;  %v1280_v47 = vld [vmem:[%s1783_s0 + $0x58] ss:$20 sps:$4 sm:$0xff]  }
   0xf   :  { %v1272_v40 = vld [vmem:[%s1783_s0 + $0x28] ss:$20 sps:$4 sm:$0xff]   ;;  %v1287_v45 = vld [vmem:[%s1782_s1 + $0x110] sm:$0xff]   ;;  %v1283_v49 = vld [vmem:[%s1783_s0 + $0x84] ss:$20 sps:$4 sm:$0xff]  }
  0x10   :  { %1062 = vmatpush3.bf16.msra.mxu0 %v1243_v14  ;;  %v1274_v42 = vld [vmem:[%s1783_s0 + $0x54] ss:$20 sps:$4 sm:$0xff]   ;;  %v1276_v44 = vld [vmem:[%s1783_s0 + $0x5c] ss:$20 sps:$4 sm:$0xff]   ;;  %v1285_v51 = vld [vmem:[%s1783_s0 + $0x78] ss:$20 sps:$4 sm:$0xff]  }
  0x11   :  { %1120 = vmatpush3.bf16.msra.mxu1 %v1244_v15  ;;  %1063 = vmatprep.subr.bf16.mxu0 %v1245_v16  ;;  %v1279_v46 = vld [vmem:[%s1783_s0 + $0x50] ss:$20 sps:$4 sm:$0xff]   ;;  %v1300_v50 = vld [vmem:[%s1782_s1 + $0x118] sm:$0xff]   ;;  %v1286_v52 = vld [vmem:[%s1783_s0 + $0x80] ss:$20 sps:$4 sm:$0xff]  }
  0x12   :  { %1121 = vmatprep.subr.bf16.mxu1 %v1246_v17  ;;  %v1281_v48 = vld [vmem:[%s1783_s0 + $0x7c] ss:$20 sps:$4 sm:$0xff]   ;;  %v1288_v53 = vld [vmem:[%s1783_s0 + $0xa4] ss:$20 sps:$4 sm:$0xff]   ;;  %v1290_v54 = vld [vmem:[%s1783_s0 + $0xac] ss:$20 sps:$4 sm:$0xff]  }
  0x13   :  { %v1292_v55 = vld [vmem:[%s1783_s0 + $0xa0] ss:$20 sps:$4 sm:$0xff]   ;;  %v1293_v56 = vld [vmem:[%s1783_s0 + $0xa8] ss:$20 sps:$4 sm:$0xff]   ;;  %v1299_v62 = vld [vmem:[%s1783_s0 + $0xd0] ss:$20 sps:$4 sm:$0xff]  }
  0x14   :  { %1064 = vmatpush3.bf16.msra.mxu0 %v1247_v18  ;;  %v1294_v57 = vld [vmem:[%s1783_s0 + $0xcc] ss:$20 sps:$4 sm:$0xff]   ;;  %v1296_v58 = vld [vmem:[%s1783_s0 + $0xd4] ss:$20 sps:$4 sm:$0xff]   ;;  %v52_v60 = vld [vmem:[%s1783_s0 + $0xf8] sm:$0xff] }
  0x15   :  { %1122 = vmatpush3.bf16.msra.mxu1 %v1248_v19  ;;  %1065 = vmatprep.subr.bf16.mxu0 %v1249_v20  ;;  %v51_v59 = vld [vmem:[%s1783_s0 + $0xf0] sm:$0xff]  ;;  %v1298_v61 = vld [vmem:[%s1783_s0 + $0xc8] ss:$20 sps:$4 sm:$0xff]   ;;  %v997_v0 = vcombine.high %v52_v60, %v52_v60  ;;  %v996_v2 = vcombine.low %v52_v60, %v52_v60  ;;  %v1307_v5 = vld [vmem:[%s1783_s0 + $0x38] ss:$20 sps:$4 sm:$0xff]  }
  0x16   :  { %1123 = vmatprep.subr.bf16.mxu1 %v1250_v21  ;;  %v995_v63 = vcombine.high %v51_v59, %v51_v59  ;;  %v994_v1 = vcombine.low %v51_v59, %v51_v59  ;;  %v1305_v3 = vld [vmem:[%s1783_s0 + $0x10] ss:$20 sps:$4 sm:$0xff]   ;;  %v1308_v6 = vld [vmem:[%s1783_s0 + $0xd8] ss:$20 sps:$4 sm:$0xff]   ;;  %v1309_v7 = vld [vmem:[%s1783_s0 + $0x60] ss:$20 sps:$4 sm:$0xff]  }
  0x17   :  { %v1306_v4 = vld [vmem:[%s1783_s0 + $0xb0] ss:$20 sps:$4 sm:$0xff]   ;;  %v1310_v8 = vld [vmem:[%s1783_s0 + $0x100] ss:$0 sps:$4 sm:$0xff]   ;;  %v1311_v9 = vld [vmem:[%s1783_s0 + $0x88] ss:$20 sps:$4 sm:$0xff]  }
  0x18   :  { %1066 = vmatpush3.bf16.msra.mxu0 %v1251_v22  ;;  %v1626_v11 = vld [vmem:[%s1784_s2] ss:$0 sm:$0xff]  ;;  %s1366_s0 = smov 122  }
  0x19   :  { %1124 = vmatpush3.bf16.msra.mxu1 %v1252_v23  ;;  %1067 = vmatprep.subr.bf16.mxu0 %v1253_v24 }
  0x1a   :  { %1125 = vmatprep.subr.bf16.mxu1 %v1254_v25 }
  0x1c   :  { %1068 = vmatpush3.bf16.msra.mxu0 %v1255_v26 }
  0x1d   :  { %1126 = vmatpush3.bf16.msra.mxu1 %v1256_v27  ;;  %1069 = vmatprep.subr.bf16.mxu0 %v1257_v28 }
  0x1e   :  { %1127 = vmatprep.subr.bf16.mxu1 %v1258_v29 }
  0x20   :  { %1070 = vmatpush3.bf16.msra.mxu0 %v1259_v30 }
  0x21   :  { %1128 = vmatpush3.bf16.msra.mxu1 %v1260_v31  ;;  %1182 = vmatprep.subr.bf16.mxu0 %v1364_v34 }
  0x22   :  { %1218 = vmatprep.subr.bf16.mxu1 %v1364_v34 }
  0x23   :  { %571 = vmatmul.mubr.bf16.vlgmr.msra.gmra.mrb[0].mxu0 %v1261_v32 }
  0x24   :  { %659 = vmatmul.mubr.bf16.vlgmr.msra.gmra.mrb[0].mxu1 %v1264_v35  ;;  %1183 = vmatpush3.bf16.msra.mxu0 %v1267_v37 }
  0x25   :  { %578 = vmatprep.mubr.bf16.mxu0 %v1268_v38  ;;  %1222 = vmatpush3.bf16.msra.mxu1 %v1267_v37 }
  0x26   :  { %666 = vmatprep.mubr.bf16.mxu1 %v1270_v39  ;;  %1184 = vmatprep.subr.bf16.mxu0 %v1364_v34 }
  0x27   :  { %1219 = vmatprep.subr.bf16.mxu1 %v1364_v34 }
  0x28   :  { %1185 = vmatpush3.bf16.msra.mxu0 %v1278_v43 }
  0x29   :  { %1223 = vmatpush3.bf16.msra.mxu1 %v1278_v43  ;;  %1186 = vmatprep.subr.bf16.mxu0 %v1364_v34 }
  0x2a   :  { %1220 = vmatprep.subr.bf16.mxu1 %v1364_v34 }
  0x2b   :  { %579 = vmatmul.mubr.bf16.gmra.mrb[4].mxu0 %v1272_v40 }
  0x2c   :  { %667 = vmatmul.mubr.bf16.gmra.mrb[4].mxu1 %v1273_v41  ;;  %586 = vmatprep.mubr.bf16.mxu0 %v1274_v42 }
  0x2d   :  { %674 = vmatprep.mubr.bf16.mxu1 %v1276_v44  ;;  %1187 = vmatpush3.bf16.msra.mxu0 %v1287_v45 }
  0x2e   :  { %1224 = vmatpush3.bf16.msra.mxu1 %v1287_v45  ;;  %1188 = vmatprep.subr.bf16.mxu0 %v1364_v34 }
  0x2f   :  { %1221 = vmatprep.subr.bf16.mxu1 %v1364_v34 }
  0x31   :  { %1189 = vmatpush3.bf16.msra.mxu0 %v1300_v50 }
  0x32   :  { %1225 = vmatpush3.bf16.msra.mxu1 %v1300_v50 }
  0x33   :  { %587 = vmatmul.mubr.bf16.gmra.mrb[8].mxu0 %v1279_v46 }
  0x34   :  { %675 = vmatmul.mubr.bf16.gmra.mrb[8].mxu1 %v1280_v47  ;;  %594 = vmatprep.mubr.bf16.mxu0 %v1281_v48 }
  0x35   :  { %682 = vmatprep.mubr.bf16.mxu1 %v1283_v49 }
  0x3b   :  { %595 = vmatmul.mubr.bf16.gmra.mrb[12].mxu0 %v1285_v51 }
  0x3c   :  { %683 = vmatmul.mubr.bf16.gmra.mrb[12].mxu1 %v1286_v52  ;;  %602 = vmatprep.mubr.bf16.mxu0 %v1288_v53 }
  0x3d   :  { %690 = vmatprep.mubr.bf16.mxu1 %v1290_v54 }
  0x43   :  { %603 = vmatmul.mubr.bf16.gmra.mrb[16].mxu0 %v1292_v55 }
  0x44   :  { %691 = vmatmul.mubr.bf16.gmra.mrb[16].mxu1 %v1293_v56  ;;  %610 = vmatprep.mubr.bf16.mxu0 %v1294_v57 }
  0x45   :  { %698 = vmatprep.mubr.bf16.mxu1 %v1296_v58 }
  0x4b   :  { %611 = vmatmul.mubr.bf16.gmra.mrb[20].mxu0 %v1298_v61 }
  0x4c   :  { %699 = vmatmul.mubr.bf16.gmra.mrb[20].mxu1 %v1299_v62  ;;  %618 = vmatprep.mubr.bf16.mxu0 %v995_v63 }
  0x4d   :  { %706 = vmatprep.mubr.bf16.mxu1 %v997_v0 }
  0x53   :  { %619 = vmatmul.mubr.bf16.gmra.mrb[24].mxu0 %v994_v1 }
  0x54   :  { %707 = vmatmul.mubr.bf16.gmra.mrb[24].mxu1 %v996_v2  ;;  %1190 = vmatprep.mubr.msk.bf16.mxu0 %vm1365_vm0, %v1364_v34 }
  0x55   :  { %1206 = vmatprep.mubr.msk.bf16.mxu1 %vm1365_vm0, %v1364_v34 }
  0x5b   :  { %1191 = vmatmul.mubr.msk.bf16.vlgmr.msra.gmra.mrb[28].mxu0 %vm516_vm1, %v1305_v3 }
  0x5c   :  { %1207 = vmatmul.mubr.msk.bf16.vlgmr.msra.gmra.mrb[28].mxu1 %vm516_vm1, %v1306_v4  ;;  %1194 = vmatprep.mubr.msk.bf16.mxu0 %vm1365_vm0, %v1364_v34 }
  0x5d   :  { %1210 = vmatprep.mubr.msk.bf16.mxu1 %vm1365_vm0, %v1364_v34 }
  0x63   :  { %1195 = vmatmul.mubr.msk.bf16.gmra.mrb[32].mxu0 %vm516_vm1, %v1307_v5 }
  0x64   :  { %1211 = vmatmul.mubr.msk.bf16.gmra.mrb[32].mxu1 %vm516_vm1, %v1308_v6  ;;  %1198 = vmatprep.mubr.msk.bf16.mxu0 %vm1365_vm0, %v1364_v34 }
  0x65   :  { %1214 = vmatprep.mubr.msk.bf16.mxu1 %vm1365_vm0, %v1364_v34 }
  0x6b   :  { %1199 = vmatmul.mubr.msk.bf16.gmra.mrb[36].mxu0 %vm516_vm1, %v1309_v7 }
  0x6c   :  { %1215 = vmatmul.mubr.msk.bf16.gmra.mrb[36].mxu1 %vm516_vm1, %v1310_v8  ;;  %1202 = vmatprep.mubr.msk.bf16.mxu0 %vm1365_vm0, %v1364_v34 }
  0x73   :  { %1203 = vmatmul.mubr.msk.bf16.gmra.mrb[40].mxu0 %vm516_vm1, %v1311_v9 }
  0xf6   :  { %v1071_v10 = vpop.f32.mrb[0].mxu0 }
  0xf7   :  { %v1072_v12 = vpop.f32.mrb[1].mxu0  ;;  %v1129_v13 = vpop.f32.mrb[0].mxu1 }
  0xf8   :  { %v1073_v14 = vadd.f32 %v1072_v12, %v1071_v10  ;;  %v1074_v15 = vpop.f32.mrb[2].mxu0  ;;  %v1130_v16 = vpop.f32.mrb[1].mxu1 }
  0xf9   :  { %v1075_v17 = vpop.f32.mrb[3].mxu0  ;;  %v1131_v18 = vadd.f32 %v1130_v16, %v1129_v13  ;;  %v1132_v19 = vpop.f32.mrb[2].mxu1 }
  0xfa   :  { %v573_v20 = vadd.f32 %v1073_v14, %v1626_v11  ;;  %v1076_v21 = vadd.f32 %v1075_v17, %v1074_v15  ;;  %v1133_v22 = vpop.f32.mrb[3].mxu1 }
  0xfb   :  { %v1134_v23 = vadd.f32 %v1133_v22, %v1132_v19 }
  0xfc   :  { %v576_v24 = vadd.f32 %v1076_v21, %v1626_v11  ;;  %v1630_v25 = vadd.f32 %v1131_v18, %v573_v20 }
  0xfe   :  { %v1077_v26 = vpop.f32.mrb[4].mxu0  ;;  %v1632_v27 = vadd.f32 %v1134_v23, %v576_v24 }
  0xff   :  { %v1078_v28 = vpop.f32.mrb[5].mxu0  ;;  %v1135_v29 = vpop.f32.mrb[4].mxu1 }
 0x100   :  { %v1079_v30 = vadd.f32 %v1078_v28, %v1077_v26  ;;  %v1080_v31 = vpop.f32.mrb[6].mxu0  ;;  %v1136_v32 = vpop.f32.mrb[5].mxu1 }
 0x101   :  { %v1081_v33 = vpop.f32.mrb[7].mxu0  ;;  %v1137_v34 = vadd.f32 %v1136_v32, %v1135_v29  ;;  %v1138_v35 = vpop.f32.mrb[6].mxu1 }
 0x102   :  { %v581_v36 = vadd.f32 %v1079_v30, %v1626_v11  ;;  %v1082_v37 = vadd.f32 %v1081_v33, %v1080_v31  ;;  %v1139_v38 = vpop.f32.mrb[7].mxu1 }
 0x103   :  { %v1140_v39 = vadd.f32 %v1139_v38, %v1138_v35 }
 0x104   :  { %v584_v40 = vadd.f32 %v1082_v37, %v1626_v11  ;;  %v1636_v41 = vadd.f32 %v1137_v34, %v581_v36 }
 0x106   :  { %v1083_v42 = vpop.f32.mrb[8].mxu0  ;;  %v1638_v43 = vadd.f32 %v1140_v39, %v584_v40 }
 0x107   :  { %v1084_v44 = vpop.f32.mrb[9].mxu0  ;;  %v1141_v45 = vpop.f32.mrb[8].mxu1 }
 0x108   :  { %v1085_v46 = vadd.f32 %v1084_v44, %v1083_v42  ;;  %v1086_v47 = vpop.f32.mrb[10].mxu0  ;;  %v1142_v48 = vpop.f32.mrb[9].mxu1 }
 0x109   :  { %v1087_v49 = vpop.f32.mrb[11].mxu0  ;;  %v1143_v50 = vadd.f32 %v1142_v48, %v1141_v45  ;;  %v1144_v51 = vpop.f32.mrb[10].mxu1 }
 0x10a   :  { %v589_v52 = vadd.f32 %v1085_v46, %v1626_v11  ;;  %v1088_v53 = vadd.f32 %v1087_v49, %v1086_v47  ;;  %v1145_v54 = vpop.f32.mrb[11].mxu1 }
 0x10b   :  { %v1146_v55 = vadd.f32 %v1145_v54, %v1144_v51 }
 0x10c   :  { %v592_v56 = vadd.f32 %v1088_v53, %v1626_v11  ;;  %v1642_v57 = vadd.f32 %v1143_v50, %v589_v52 }
 0x10e   :  { %v1089_v58 = vpop.f32.mrb[12].mxu0  ;;  %v1644_v59 = vadd.f32 %v1146_v55, %v592_v56 }
 0x10f   :  { %v1090_v60 = vpop.f32.mrb[13].mxu0  ;;  %v1147_v61 = vpop.f32.mrb[12].mxu1 }
 0x110   :  { %v1091_v62 = vadd.f32 %v1090_v60, %v1089_v58  ;;  %v1092_v63 = vpop.f32.mrb[14].mxu0  ;;  %v1148_v0 = vpop.f32.mrb[13].mxu1 }
 0x111   :  { %v1093_v1 = vpop.f32.mrb[15].mxu0  ;;  %v1149_v2 = vadd.f32 %v1148_v0, %v1147_v61  ;;  %v1150_v3 = vpop.f32.mrb[14].mxu1 }
 0x112   :  { %v597_v4 = vadd.f32 %v1091_v62, %v1626_v11  ;;  %v1094_v5 = vadd.f32 %v1093_v1, %v1092_v63  ;;  %v1151_v6 = vpop.f32.mrb[15].mxu1 }
 0x113   :  { %v1152_v7 = vadd.f32 %v1151_v6, %v1150_v3 }
 0x114   :  { %v600_v8 = vadd.f32 %v1094_v5, %v1626_v11  ;;  %v1648_v9 = vadd.f32 %v1149_v2, %v597_v4 }
 0x116   :  { %v1095_v10 = vpop.f32.mrb[16].mxu0  ;;  %v1650_v12 = vadd.f32 %v1152_v7, %v600_v8 }
 0x117   :  { %v1096_v13 = vpop.f32.mrb[17].mxu0  ;;  %v1153_v14 = vpop.f32.mrb[16].mxu1 }
 0x118   :  { %v1097_v15 = vadd.f32 %v1096_v13, %v1095_v10  ;;  %v1098_v16 = vpop.f32.mrb[18].mxu0  ;;  %v1154_v17 = vpop.f32.mrb[17].mxu1 }
 0x119   :  { %v1099_v18 = vpop.f32.mrb[19].mxu0  ;;  %v1155_v19 = vadd.f32 %v1154_v17, %v1153_v14  ;;  %v1156_v20 = vpop.f32.mrb[18].mxu1 }
 0x11a   :  { %v605_v21 = vadd.f32 %v1097_v15, %v1626_v11  ;;  %v1100_v22 = vadd.f32 %v1099_v18, %v1098_v16  ;;  %v1157_v23 = vpop.f32.mrb[19].mxu1 }
 0x11b   :  { %v1158_v24 = vadd.f32 %v1157_v23, %v1156_v20 }
 0x11c   :  { %v608_v26 = vadd.f32 %v1100_v22, %v1626_v11  ;;  %v693_v28 = vadd.f32 %v1155_v19, %v605_v21 }
 0x11e   :  { %v1101_v29 = vpop.f32.mrb[20].mxu0  ;;  %v696_v30 = vadd.f32 %v1158_v24, %v608_v26 }
 0x11f   :  { %v1102_v31 = vpop.f32.mrb[21].mxu0  ;;  %v1159_v32 = vpop.f32.mrb[20].mxu1 }
 0x120   :  { %v1103_v33 = vadd.f32 %v1102_v31, %v1101_v29  ;;  %v1104_v34 = vpop.f32.mrb[22].mxu0  ;;  %v1160_v35 = vpop.f32.mrb[21].mxu1 }
 0x121   :  { %v1105_v36 = vpop.f32.mrb[23].mxu0  ;;  %v1161_v37 = vadd.f32 %v1160_v35, %v1159_v32  ;;  %v1162_v38 = vpop.f32.mrb[22].mxu1 }
 0x122   :  { %v613_v39 = vadd.f32 %v1103_v33, %v1626_v11  ;;  %v1106_v40 = vadd.f32 %v1105_v36, %v1104_v34  ;;  %v1163_v42 = vpop.f32.mrb[23].mxu1 }
 0x123   :  { %v1164_v44 = vadd.f32 %v1163_v42, %v1162_v38 }
 0x124   :  { %v616_v45 = vadd.f32 %v1106_v40, %v1626_v11  ;;  %v701_v46 = vadd.f32 %v1161_v37, %v613_v39 }
 0x126   :  { %v1107_v47 = vpop.f32.mrb[24].mxu0  ;;  %v704_v48 = vadd.f32 %v1164_v44, %v616_v45 }
 0x127   :  { %v1108_v49 = vpop.f32.mrb[25].mxu0  ;;  %v1165_v50 = vpop.f32.mrb[24].mxu1 }
 0x128   :  { %v1109_v51 = vadd.f32 %v1108_v49, %v1107_v47  ;;  %v1110_v52 = vpop.f32.mrb[26].mxu0  ;;  %v1166_v53 = vpop.f32.mrb[25].mxu1 }
 0x129   :  { %v1111_v54 = vpop.f32.mrb[27].mxu0  ;;  %v1167_v55 = vadd.f32 %v1166_v53, %v1165_v50  ;;  %v1168_v56 = vpop.f32.mrb[26].mxu1 }
 0x12a   :  { %v621_v58 = vadd.f32 %v1109_v51, %v1626_v11  ;;  %v1169_v60 = vpop.f32.mrb[27].mxu1 }
 0x12c   :  { %v709_v61 = vadd.f32 %v1167_v55, %v621_v58 }
 0x12e   :  { %v748_v62 = vpop.f32.mrb[28].mxu0 }
 0x12f   :  { %v1658_v63 = vadd.f32 %v748_v62, %v1630_v25  ;;  %v780_v0 = vpop.f32.mrb[28].mxu1  ;;  %v1192_v1 = vpop.f32.mrb[29].mxu0 }
 0x130   :  { %v1660_v2 = vadd.f32 %v780_v0, %v693_v28  ;;  %v1208_v3 = vpop.f32.mrb[29].mxu1  ;;  %v751_v4 = vpop.f32.mrb[30].mxu0 }
 0x131   :  { %v1042_v5 = vmul.f32 -1.442695, %v1658_v63  ;;  %v1664_v6 = vadd.f32 %v751_v4, %v1632_v27  ;;  %v783_v7 = vpop.f32.mrb[30].mxu1  ;;  %v1193_v8 = vpop.f32.mrb[31].mxu0 }
 0x132   :  { %v1050_v11 = vmul.f32 -1.442695, %v1660_v2  ;;  %v1667_v10 = vadd.f32 %v783_v7, %v696_v30  ;;  %v1209_v13 = vpop.f32.mrb[31].mxu1 }
 0x133   :  { %1312 = vpow2.f32 %v1042_v5  ;;  %v1043_v25 = vmul.f32 -1.442695, %v1664_v6 }
 0x134   :  { %1314 = vpow2.f32 %v1050_v11  ;;  %v1051_v14 = vmul.f32 -1.442695, %v1667_v10 }
 0x135   :  { %1316 = vpow2.f32 %v1043_v25 }
 0x136   :  { %1318 = vpow2.f32 %v1051_v14  ;;  %v756_v15 = vpop.f32.mrb[32].mxu0 }
 0x137   :  { %v1672_v16 = vadd.f32 %v756_v15, %v1636_v41  ;;  %v788_v27 = vpop.f32.mrb[32].mxu1  ;;  %v1196_v17 = vpop.f32.mrb[33].mxu0 }
 0x138   :  { %v1674_v18 = vadd.f32 %v788_v27, %v701_v46  ;;  %v1212_v19 = vpop.f32.mrb[33].mxu1  ;;  %v759_v20 = vpop.f32.mrb[34].mxu0 }
 0x139   :  { %v1044_v21 = vmul.f32 -1.442695, %v1672_v16  ;;  %v1678_v22 = vadd.f32 %v759_v20, %v1638_v43  ;;  %v791_v23 = vpop.f32.mrb[34].mxu1  ;;  %v1197_v24 = vpop.f32.mrb[35].mxu0 }
 0x13a   :  { %v1052_v26 = vmul.f32 -1.442695, %v1674_v18  ;;  %v1681_v28 = vadd.f32 %v791_v23, %v704_v48  ;;  %v1213_v29 = vpop.f32.mrb[35].mxu1 }
 0x13b   :  { %1320 = vpow2.f32 %v1044_v21  ;;  %v1045_v41 = vmul.f32 -1.442695, %v1678_v22 }
 0x13c   :  { %1322 = vpow2.f32 %v1052_v26  ;;  %v1053_v39 = vmul.f32 -1.442695, %v1681_v28 }
 0x13d   :  { %v1313_v30 = vpop.eup %1312  ;;  %1324 = vpow2.f32 %v1045_v41 }
 0x13e   :  { %v1315_v31 = vpop.eup %1314  ;;  %v841_v32 = vadd.f32 1.0, %v1313_v30  ;;  %v764_v33 = vpop.f32.mrb[36].mxu0 }
 0x13f   :  { %v1317_v34 = vpop.eup %1316  ;;  %v849_v35 = vadd.f32 1.0, %v1315_v31  ;;  %v1685_v43 = vadd.f32 %v764_v33, %v1642_v57  ;;  %v796_v36 = vpop.f32.mrb[36].mxu1 }
 0x140   :  { %v1200_v37 = vpop.f32.mrb[37].mxu0  ;;  %v1319_v38 = vpop.eup %1318  ;;  %1326 = vrcp.f32 %v841_v32  ;;  %v1688_v40 = vadd.f32 %v796_v36, %v709_v61  ;;  %v842_v50 = vadd.f32 1.0, %v1317_v34 }
 0x141   :  { %v767_v42 = vpop.f32.mrb[38].mxu0  ;;  %v1216_v44 = vpop.f32.mrb[37].mxu1  ;;  %v850_v45 = vadd.f32 1.0, %v1319_v38  ;;  %v1046_v46 = vmul.f32 -1.442695, %v1685_v43  ;;  %1328 = vrcp.f32 %v849_v35 }
 0x142   :  { %v1692_v47 = vadd.f32 %v767_v42, %v1644_v59  ;;  %v1201_v48 = vpop.f32.mrb[39].mxu0  ;;  %v799_v49 = vpop.f32.mrb[38].mxu1  ;;  %v1054_v53 = vmul.f32 -1.442695, %v1688_v40 }
 0x143   :  { %v1217_v57 = vpop.f32.mrb[39].mxu1  ;;  %1330 = vrcp.f32 %v850_v45 }
 0x144   :  { %v1047_v51 = vmul.f32 -1.442695, %v1692_v47  ;;  %1332 = vpow2.f32 %v1046_v46 }
 0x145   :  { %v1321_v52 = vpop.eup %1320  ;;  %1334 = vpow2.f32 %v1053_v39 }
 0x146   :  { %v1323_v54 = vpop.eup %1322  ;;  %v843_v55 = vadd.f32 1.0, %v1321_v52  ;;  %1336 = vpow2.f32 %v1047_v51  ;;  %v772_v56 = vpop.f32.mrb[40].mxu0 }
 0x147   :  { %v1325_v58 = vpop.eup %1324  ;;  %1338 = vrcp.f32 %v842_v50  ;;  %v851_v59 = vadd.f32 1.0, %v1323_v54  ;;  %v1697_v60 = vadd.f32 %v772_v56, %v1648_v9  ;;  %v1204_v61 = vpop.f32.mrb[41].mxu0 }
 0x148   :  { %1340 = vrcp.f32 %v843_v55  ;;  %v844_v62 = vadd.f32 1.0, %v1325_v58  ;;  %v775_v0 = vpop.f32.mrb[42].mxu0 }
 0x149   :  { %1342 = vpow2.f32 %v1054_v53  ;;  %v1048_v1 = vmul.f32 -1.442695, %v1697_v60  ;;  %v1701_v3 = vadd.f32 %v775_v0, %v1650_v12  ;;  %v1205_v4 = vpop.f32.mrb[43].mxu0 }
 0x14a   :  { %v1327_v5 = vpop.eup %1326  ;;  %1344 = vrcp.f32 %v851_v59 }
 0x14b   :  { %1346 = vrcp.f32 %v844_v62  ;;  %v1049_v7 = vmul.f32 -1.442695, %v1701_v3  ;;  %893 = vrot.lane.b32.xlu0 %v1327_v5, %s1366_s0  ;;  %v1329_v9 = vpop.eup %1328 }
 0x14c   :  { %1348 = vpow2.f32 %v1048_v1 }
 0x14d   :  { %v1331_v8 = vpop.eup %1330  ;;  %1350 = vpow2.f32 %v1049_v7 }
 0x14e   :  { %v1333_v11 = vpop.eup %1332  ;;  %911 = vrot.lane.b32.xlu1 %v1331_v8, %s1366_s0 }
 0x14f   :  { %v1335_v13 = vpop.eup %1334  ;;  %v845_v25 = vadd.f32 1.0, %v1333_v11  ;;  %909 = vrot.lane.b32.xlu0 %v1329_v9, %s1366_s0 }
 0x150   :  { %v1337_v12 = vpop.eup %1336  ;;  %v852_v41 = vadd.f32 1.0, %v1335_v13 }
 0x151   :  { %v1339_v14 = vpop.eup %1338  ;;  %1352 = vrcp.f32 %v845_v25  ;;  %v846_v15 = vadd.f32 1.0, %v1337_v12 }
 0x152   :  { %v1341_v27 = vpop.eup %1340 }
 0x153   :  { %v1343_v17 = vpop.eup %1342  ;;  %1354 = vrcp.f32 %v846_v15  ;;  %897 = vrot.lane.b32.xlu1 %v1341_v27, %s1366_s0  ;;  %895 = vrot.lane.b32.xlu0 %v1339_v14, %s1366_s0 }
 0x154   :  { %v1345_v19 = vpop.eup %1344  ;;  %v853_v29 = vadd.f32 1.0, %v1343_v17 }
 0x155   :  { %v1347_v20 = vpop.eup %1346 }
 0x156   :  { %v1349_v21 = vpop.eup %1348 }
 0x157   :  { %v1351_v23 = vpop.eup %1350  ;;  %v847_v24 = vadd.f32 1.0, %v1349_v21  ;;  %899 = vrot.lane.b32.xlu1 %v1347_v20, %s1366_s0  ;;  %913 = vrot.lane.b32.xlu0 %v1345_v19, %s1366_s0 }
 0x158   :  { %v848_v26 = vadd.f32 1.0, %v1351_v23 }
 0x159   :  { %1356 = vrcp.f32 %v847_v24 }
 0x15a   :  { %1358 = vrcp.f32 %v848_v26 }
 0x15b   :  { %v1353_v30 = vpop.eup %1352  ;;  %1360 = vrcp.f32 %v853_v29 }
 0x15c   :  { %901 = vrot.lane.b32.xlu0 %v1353_v30, %s1366_s0  ;;  %1362 = vrcp.f32 %v852_v41 }
 0x15d   :  { %v1355_v31 = vpop.eup %1354 }
 0x15e   :  { %903 = vrot.lane.b32.xlu1 %v1355_v31, %s1366_s0 }
 0x163   :  { %v1357_v32 = vpop.eup %1356 }
 0x164   :  { %v1359_v33 = vpop.eup %1358  ;;  %905 = vrot.lane.b32.xlu0 %v1357_v32, %s1366_s0 }
 0x165   :  { %907 = vrot.lane.b32.xlu1 %v1359_v33, %s1366_s0  ;;  %v1361_v34 = vpop.eup %1360 }
 0x166   :  { %v1363_v35 = vpop.eup %1362 }
 0x168   :  { %917 = vrot.lane.b32.xlu0 %v1361_v34, %s1366_s0 }
 0x169   :  { %915 = vrot.lane.b32.xlu1 %v1363_v35, %s1366_s0 }
 0x1bd   :  { %v894_v36 = vpop.permute.xlu0 %893 }
 0x1be   :  { %v932_v37 = vmul.f32 %v894_v36, %v1658_v63 }
 0x1c0   :  { %946 = vst.msk [vmem:[%s1785_s3] sm:$0xff] %vm945_vm2, %v932_v37  ;;  %v912_v38 = vpop.permute.xlu1 %911 }
 0x1c1   :  { %v941_v39 = vmul.f32 %v912_v38, %v1667_v10  ;;  %v910_v42 = vpop.permute.xlu0 %909 }
 0x1c2   :  { %v940_v44 = vmul.f32 %v910_v42, %v1660_v2 }
 0x1c3   :  { %955 = vst.msk [vmem:[%s1785_s3 + $0x48] sm:$0xff] %vm945_vm2, %v941_v39 }
 0x1c4   :  { %954 = vst.msk [vmem:[%s1785_s3 + $0x40] sm:$0xff] %vm945_vm2, %v940_v44 }
 0x1c5   :  { %v898_v63 = vpop.permute.xlu1 %897  ;;  %v896_v45 = vpop.permute.xlu0 %895 }
 0x1c6   :  { %v934_v46 = vmul.f32 %v898_v63, %v1672_v16  ;;  %v933_v48 = vmul.f32 %v896_v45, %v1664_v6 }
 0x1c8   :  { %948 = vst.msk [vmem:[%s1785_s3 + $0x10] sm:$0xff] %vm945_vm2, %v934_v46  ;;  %947 = vst.msk [vmem:[%s1785_s3 + $0x8] sm:$0xff] %vm945_vm2, %v933_v48 }
 0x1c9   :  { %v900_v2 = vpop.permute.xlu1 %899  ;;  %v914_v10 = vpop.permute.xlu0 %913 }
 0x1ca   :  { %v935_v49 = vmul.f32 %v900_v2, %v1678_v22  ;;  %v942_v57 = vmul.f32 %v914_v10, %v1674_v18 }
 0x1cc   :  { %949 = vst.msk [vmem:[%s1785_s3 + $0x18] sm:$0xff] %vm945_vm2, %v935_v49  ;;  %956 = vst.msk [vmem:[%s1785_s3 + $0x50] sm:$0xff] %vm945_vm2, %v942_v57 }
 0x1ce   :  { %v902_v6 = vpop.permute.xlu0 %901 }
 0x1cf   :  { %v936_v16 = vmul.f32 %v902_v6, %v1685_v43 }
 0x1d0   :  { %v904_v50 = vpop.permute.xlu1 %903 }
 0x1d1   :  { %950 = vst.msk [vmem:[%s1785_s3 + $0x20] sm:$0xff] %vm945_vm2, %v936_v16  ;;  %v937_v18 = vmul.f32 %v904_v50, %v1692_v47 }
 0x1d3   :  { %951 = vst.msk [vmem:[%s1785_s3 + $0x28] sm:$0xff] %vm945_vm2, %v937_v18 }
 0x1d6   :  { %v906_v22 = vpop.permute.xlu0 %905 }
 0x1d7   :  { %v938_v51 = vmul.f32 %v906_v22, %v1697_v60  ;;  %v908_v52 = vpop.permute.xlu1 %907 }
 0x1d8   :  { %v939_v53 = vmul.f32 %v908_v52, %v1701_v3 }
 0x1d9   :  { %952 = vst.msk [vmem:[%s1785_s3 + $0x30] sm:$0xff] %vm945_vm2, %v938_v51 }
 0x1da   :  { %953 = vst.msk [vmem:[%s1785_s3 + $0x38] sm:$0xff] %vm945_vm2, %v939_v53  ;;  %v918_v43 = vpop.permute.xlu0 %917 }
 0x1db   :  { %v944_v47 = vmul.f32 %v918_v43, %v1688_v40  ;;  %v916_v54 = vpop.permute.xlu1 %915 }
 0x1dc   :  { %v943_v55 = vmul.f32 %v916_v54, %v1681_v28 }
 0x1dd   :  { %958 = vst.msk [vmem:[%s1785_s3 + $0x60] sm:$0xff] %vm945_vm2, %v944_v47 }
 0x1de   :  { %957 = vst.msk [vmem:[%s1785_s3 + $0x58] sm:$0xff] %vm945_vm2, %v943_v55 }

// kernel: encoder_z_prior.11
= control target key start
LH: loop header
LB: loop body
LE: loop exit
PB: predicated region body
PF: predicated region fallthrough
CT: control target
= control target key end

     0   :  { %v364_v1 = vmov 0.0   ;;  %vm365_vm0 = vmmov 0   ;;  %vm186_vm1 = vcmask 1042432   ;;  %vm182_vm2 = vcmask 310272   ;;  %s455_s1 = inlined_call_operand.vmem [shape: bf16[294,16], index: 1, kind: input, shape index: {}]   ;;  %s456_s0 = inlined_call_operand.vmem [shape: bf16[8,294], index: 0, kind: input, shape index: {}]   ;;  %s457_s2 = inlined_call_operand.vmem [shape: f32[1,16], index: 2, kind: input, shape index: {}]   ;;  %s458_s3 = inlined_call_operand.vmem [shape: f32[8,16], index: 3, kind: output, shape index: {}]  }
   0x1   :  { %v342_v0 = vld [vmem:[%s455_s1 + $0x40] sm:$0xff]   ;;  %330 = vmatprep.subr.bf16.mxu1 %v364_v1  ;;  %336 = vmatprep.mubr.msk.bf16.mxu1 %vm365_vm0, %v364_v1  ;;  %v344_v3 = vld [vmem:[%s455_s1 + $0x48] sm:$0xff]   ;;  %v346_v5 = vld [vmem:[%s455_s1 + $0x50] sm:$0xff]   ;;  %vm272_vm3 = vcmask 64512   ;;  %vm274_vm4 = vcmask 130048  }
   0x2   :  { %v343_v2 = vld [vmem:[%s455_s1] sm:$0xff]   ;;  %304 = vmatprep.subr.bf16.mxu0 %v342_v0  ;;  %v345_v4 = vld [vmem:[%s455_s1 + $0x8] sm:$0xff]   ;;  %v347_v6 = vld [vmem:[%s455_s1 + $0x10] sm:$0xff]  }
   0x3   :  { %305 = vmatpush3.bf16.msra.mxu0 %v343_v2  ;;  %v348_v7 = vld [vmem:[%s455_s1 + $0x58] sm:$0xff]   ;;  %v350_v9 = vld [vmem:[%s455_s1 + $0x60] sm:$0xff]   ;;  %v357_v12 = vld [vmem:[%s455_s1 + $0x88] sm:$0xff]  }
   0x4   :  { %306 = vmatprep.subr.bf16.mxu0 %v344_v3  ;;  %v349_v8 = vld [vmem:[%s455_s1 + $0x18] sm:$0xff]   ;;  %v354_v10 = vld [vmem:[%s455_s1 + $0x80] sm:$0xff]   ;;  %v352_v13 = vld [vmem:[%s455_s1 + $0x68] sm:$0xff]  }
   0x5   :  { %v351_v11 = vld [vmem:[%s455_s1 + $0x20] sm:$0xff]   ;;  %331 = vmatpush3.bf16.msra.mxu1 %v354_v10  ;;  %v353_v15 = vld [vmem:[%s455_s1 + $0x28] sm:$0xff]   ;;  %v363_v17 = vld [vmem:[%s455_s1 + $0x90] ss:$0 sps:$4 sm:$0x77]  }
   0x6   :  { %332 = vmatprep.subr.bf16.mxu1 %v364_v1  ;;  %v15_v14 = vld [vmem:[%s456_s0] sm:$0xff]  ;;  %v355_v18 = vld [vmem:[%s455_s1 + $0x70] sm:$0xff]   ;;  %v362_v19 = vld [vmem:[%s456_s0 + $0x8] ss:$0 sps:$4 sm:$0xff]   ;;  %v188_v20 = vsel %vm186_vm1, %v363_v17, 0 }
   0x7   :  { %307 = vmatpush3.bf16.msra.mxu0 %v345_v4  ;;  %v282_v16 = vcombine.high %v15_v14, %v15_v14  ;;  %v356_v21 = vld [vmem:[%s455_s1 + $0x30] sm:$0xff]   ;;  %v358_v22 = vld [vmem:[%s455_s1 + $0x78] sm:$0xff]   ;;  %v281_v24 = vcombine.low %v15_v14, %v15_v14  ;;  %v280_v31 = vld [vmem:[%s457_s2] ss:$0 sm:$0xff] }
   0x8   :  { %308 = vmatprep.subr.bf16.mxu0 %v346_v5  ;;  %v359_v23 = vld [vmem:[%s455_s1 + $0x38] sm:$0xff]  }
   0x9   :  { %333 = vmatpush3.bf16.msra.mxu1 %v357_v12  ;;  %222 = vmatprep.mubr.bf16.mxu0 %v282_v16 }
   0xa   :  { %334 = vmatprep.subr.bf16.mxu1 %v364_v1 }
   0xb   :  { %309 = vmatpush3.bf16.msra.mxu0 %v347_v6 }
   0xc   :  { %310 = vmatprep.subr.bf16.mxu0 %v348_v7 }
   0xd   :  { %335 = vmatpush3.bf16.msra.mxu1 %v188_v20 }
   0xf   :  { %311 = vmatpush3.bf16.msra.mxu0 %v349_v8 }
  0x10   :  { %312 = vmatprep.subr.bf16.mxu0 %v350_v9  ;;  %337 = vmatmul.mubr.msk.bf16.vlgmr.msra.gmra.mrb[0].mxu1 %vm182_vm2, %v362_v19 }
  0x13   :  { %313 = vmatpush3.bf16.msra.mxu0 %v351_v11 }
  0x14   :  { %314 = vmatprep.subr.bf16.mxu0 %v352_v13 }
  0x17   :  { %315 = vmatpush3.bf16.msra.mxu0 %v353_v15 }
  0x18   :  { %316 = vmatprep.subr.bf16.mxu0 %v355_v18 }
  0x1b   :  { %317 = vmatpush3.bf16.msra.mxu0 %v356_v21 }
  0x1c   :  { %318 = vmatprep.subr.bf16.mxu0 %v358_v22 }
  0x1f   :  { %319 = vmatpush3.bf16.msra.mxu0 %v359_v23 }
  0x22   :  { %223 = vmatmul.mubr.bf16.vlgmr.msra.gmra.mrb[0].mxu0 %v281_v24 }
  0xe3   :  { %v264_v25 = vpop.f32.mrb[0].mxu1 }
  0xe4   :  { %v338_v26 = vpop.f32.mrb[1].mxu1 }
  0xe5   :  { %v267_v27 = vpop.f32.mrb[2].mxu1 }
  0xe6   :  { %v339_v28 = vpop.f32.mrb[3].mxu1 }
  0xf5   :  { %v320_v29 = vpop.f32.mrb[0].mxu0 }
  0xf6   :  { %v321_v30 = vpop.f32.mrb[1].mxu0 }
  0xf7   :  { %v322_v32 = vadd.f32 %v321_v30, %v320_v29  ;;  %v323_v33 = vpop.f32.mrb[2].mxu0 }
  0xf8   :  { %v324_v34 = vpop.f32.mrb[3].mxu0 }
  0xf9   :  { %v225_v35 = vadd.f32 %v322_v32, %v280_v31 }
  0xfb   :  { %v265_v36 = vadd.f32 %v264_v25, %v225_v35 }
  0xfd   :  { %v270_v37 = vmax.f32 %v265_v36, -6.0 }
  0xff   :  { %v271_v38 = vmin.f32 %v270_v37, 2.0 }
 0x101   :  { %v273_v39 = vsel %vm272_vm3, %v265_v36, %v271_v38 }
 0x102   :  { %275 = vst.msk [vmem:[%s458_s3] sm:$0xff] %vm274_vm4, %v273_v39 }

</bundles_post_ra>
